<compile_context>
chip_gen: v6e
topology: v6e:2x2x1
jax: 0.10.0
libtpu: 0.0.40
codegen_flags: <defaults>
</compile_context>

<pallas_src>
import numpy as np
import jax
import jax.numpy as jnp
from jax.experimental import pallas as pl
from jax.experimental.pallas import tpu as pltpu


# Model dimensions (fixed by the synthetic module definition)
C_IN, H, W = 4, 16, 16            # observation (NCHW)
C1 = 8                            # conv1 out channels (3x3, stride 1, pad 1)
C2, H2, W2 = 8, 8, 8              # conv2 out (3x3, stride 2, pad 1)
N_FC, N_A1, N_ACT = 32, 64, 6     # fc -> actor hidden -> action logits
HW = H * W                        # 256 spatial positions (conv1)
Q = H2 * W2                       # 64 spatial positions (conv2)


def _relu(v):
    return jnp.maximum(v, 0.0)


def _mm(a, b):
    # bf16 operands (MXU native), f32 accumulation.
    return jnp.dot(a.astype(jnp.bfloat16), b.astype(jnp.bfloat16),
                   preferred_element_type=jnp.float32)


# ----------------------------------------------------------------------------
# Fused kernel: one grid step == one image; everything stays in VMEM.
# ----------------------------------------------------------------------------
def fused_agent_kernel(x_ref, s1_ref, w1_ref, b1_ref,
                       s2_ref, w2_ref, b2_ref,
                       e_ref, fcw_ref, r_ref, bfc_ref,
                       wa1_ref, ba1_ref, wa2_ref, ba2_ref,
                       o_ref):
    x = x_ref[0]                                        # (HW, C_IN) f32, flat NHWC

    # conv1 as implicit GEMM: per 3x3 tap, neighbor gather (masked selection
    # matmul, zero-padding folded into S1) then a tiny weight matmul.
    acc1 = jnp.zeros((HW, C1), jnp.float32)
    for t in range(9):
        xt = _mm(s1_ref[t], x)                          # (HW, C_IN)
        acc1 = acc1 + _mm(xt, w1_ref[t])                # (HW, C1)
    a1 = _relu(acc1 + b1_ref[...])                      # (HW, C1)

    # conv2 (stride 2): selection matrices also fold in the stride-2 subsampling.
    acc2 = jnp.zeros((Q, C2), jnp.float32)
    for t in range(9):
        at = _mm(s2_ref[t], a1)                         # (Q, C1)
        acc2 = acc2 + _mm(at, w2_ref[t])                # (Q, C2)
    a2 = _relu(acc2 + b2_ref[...])                      # (Q, C2)

    # fc over the NCHW-flattened features of this image:
    #   fc[j] = sum_{q,c} a2[q, c] * fc_w[c*Q + q, j]
    # implemented as expand (matmul) * re-laid-out fc weight, reduce over q (sum),
    # reduce over c (matmul) -- no in-kernel transposes / relayout reshapes.
    y = _mm(a2, e_ref[...])                             # (Q, C2*N_FC); y[q, c*32+j] = a2[q, c]
    y = y * fcw_ref[...].astype(jnp.float32)            # * fc_w[c*Q+q, j]
    z = jnp.sum(y, axis=0, keepdims=True)               # (1, C2*N_FC)
    hfc = _relu(_mm(z, r_ref[...]) + bfc_ref[...])      # (1, N_FC)

    # actor head
    h1 = _relu(_mm(hfc, wa1_ref[...]) + ba1_ref[...])   # (1, N_A1)
    logits = _mm(h1, wa2_ref[...]) + ba2_ref[...]       # (1, N_ACT)
    o_ref[...] = logits.reshape(o_ref.shape)


# ----------------------------------------------------------------------------
# Parameters: raw (PyTorch-style) init + one-time kernel-ready re-layout.
# ----------------------------------------------------------------------------
def init_params(key):
    ks = jax.random.split(key, 10)
    s = 0.1
    return {
        "conv1_w": s * jax.random.normal(ks[0], (C1, C_IN, 3, 3), jnp.float32),
        "conv1_b": s * jax.random.normal(ks[1], (C1,), jnp.float32),
        "conv2_w": s * jax.random.normal(ks[2], (C2, C1, 3, 3), jnp.float32),
        "conv2_b": s * jax.random.normal(ks[3], (C2,), jnp.float32),
        "fc_w":    s * jax.random.normal(ks[4], (C2 * H2 * W2, N_FC), jnp.float32),
        "fc_b":    s * jax.random.normal(ks[5], (N_FC,), jnp.float32),
        "act1_w":  s * jax.random.normal(ks[6], (N_FC, N_A1), jnp.float32),
        "act1_b":  s * jax.random.normal(ks[7], (N_A1,), jnp.float32),
        "act2_w":  s * jax.random.normal(ks[8], (N_A1, N_ACT), jnp.float32),
        "act2_b":  s * jax.random.normal(ks[9], (N_ACT,), jnp.float32),
    }


def _selection_matrices(h, w, ho, wo, stride):
    """S[t, out, in] = 1 iff 3x3 tap t at output position `out` reads input `in`;
    zero-padding(=1) is handled by leaving out-of-image rows all zero."""
    S = np.zeros((9, ho * wo, h * w), np.float32)
    for ky in range(3):
        for kx in range(3):
            t = ky * 3 + kx
            for yo in range(ho):
                for xo in range(wo):
                    yy = stride * yo + ky - 1
                    xx = stride * xo + kx - 1
                    if 0 <= yy < h and 0 <= xx < w:
                        S[t, yo * wo + xo, yy * w + xx] = 1.0
    return S


def prepare_params(raw, compute_dtype=jnp.bfloat16):
    """One-time re-layout of raw weights into kernel-ready constants (done at init,
    NOT per forward call)."""
    w1 = np.asarray(raw["conv1_w"], np.float32)
    w2 = np.asarray(raw["conv2_w"], np.float32)
    fc_w = np.asarray(raw["fc_w"], np.float32)

    w1_taps = np.transpose(w1, (2, 3, 1, 0)).reshape(9, C_IN, C1)   # [tap, cin, cout]
    w2_taps = np.transpose(w2, (2, 3, 1, 0)).reshape(9, C1, C2)
    s1 = _selection_matrices(H, W, H, W, 1)          # (9, 256, 256)
    s2 = _selection_matrices(H, W, H2, W2, 2)        # (9, 64, 256)

    # fc_w rows follow the PyTorch NCHW flatten (c*Q + q); re-lay so the kernel,
    # which holds features as a2[q, c], can contract them with structural matmuls.
    fcw_flat = fc_w.reshape(C2, Q, N_FC).transpose(1, 0, 2).reshape(Q, C2 * N_FC)
    expand = np.zeros((C2, C2 * N_FC), np.float32)   # expand[c, c*32+j] = 1
    for c in range(C2):
        expand[c, c * N_FC:(c + 1) * N_FC] = 1.0
    reduce_c = np.tile(np.eye(N_FC, dtype=np.float32), (C2, 1))     # (C2*N_FC, N_FC)

    cd, f32 = compute_dtype, jnp.float32
    return {
        "s1": jnp.asarray(s1, cd), "w1": jnp.asarray(w1_taps, cd),
        "b1": jnp.asarray(raw["conv1_b"], f32).reshape(1, C1),
        "s2": jnp.asarray(s2, cd), "w2": jnp.asarray(w2_taps, cd),
        "b2": jnp.asarray(raw["conv2_b"], f32).reshape(1, C2),
        "e": jnp.asarray(expand, cd), "fcw": jnp.asarray(fcw_flat, cd),
        "r": jnp.asarray(reduce_c, cd),
        "bfc": jnp.asarray(raw["fc_b"], f32).reshape(1, N_FC),
        "wa1": jnp.asarray(raw["act1_w"], cd),
        "ba1": jnp.asarray(raw["act1_b"], f32).reshape(1, N_A1),
        "wa2": jnp.asarray(raw["act2_w"], cd),
        "ba2": jnp.asarray(raw["act2_b"], f32).reshape(1, N_ACT),
    }


# ----------------------------------------------------------------------------
# Agent.forward(state) = actor(feature_extractor(state)) -- single pallas_call.
# ----------------------------------------------------------------------------
def agent_forward(params, state_nchw):
    n = state_nchw.shape[0]
    # Single cheap layout op on the tiny observation: NCHW -> flat (spatial, channel).
    x = state_nchw.astype(jnp.float32).transpose(0, 2, 3, 1).reshape(n, HW, C_IN)

    consts = (params["s1"], params["w1"], params["b1"],
              params["s2"], params["w2"], params["b2"],
              params["e"], params["fcw"], params["r"], params["bfc"],
              params["wa1"], params["ba1"], params["wa2"], params["ba2"])

    def const_spec(a):
        nd = a.ndim
        return pl.BlockSpec(a.shape, lambda i, _nd=nd: (0,) * _nd)

    in_specs = [pl.BlockSpec((1, HW, C_IN), lambda i: (i, 0, 0))]
    in_specs += [const_spec(a) for a in consts]

    flops_per_img = 2 * (9 * (HW * HW * C_IN + HW * C_IN * C1)
                         + 9 * (Q * HW * C1 + Q * C1 * C2)
                         + Q * C2 * C2 * N_FC + C2 * N_FC * N_FC
                         + N_FC * N_A1 + N_A1 * N_ACT)
    bytes_accessed = int(x.size * 4 + n * N_ACT * 4
                         + sum(a.size * a.dtype.itemsize for a in consts))

    out = pl.pallas_call(
        fused_agent_kernel,
        out_shape=jax.ShapeDtypeStruct((n, 1, N_ACT), jnp.float32),
        grid=(n,),
        in_specs=in_specs,
        out_specs=pl.BlockSpec((1, 1, N_ACT), lambda i: (i, 0, 0)),
        compiler_params=pltpu.CompilerParams(
            dimension_semantics=("parallel",)),
        cost_estimate=pl.CostEstimate(flops=n * flops_per_img,
                                      transcendentals=0,
                                      bytes_accessed=bytes_accessed),
    )(x, *consts)
    return out.reshape(n, N_ACT)


# ----------------------------------------------------------------------------
# Pure-JAX (XLA) f32 reference for correctness checking.
# ----------------------------------------------------------------------------
def reference_forward(raw, state_nchw):
    dn = ("NCHW", "OIHW", "NCHW")
    x = jax.lax.conv_general_dilated(state_nchw, raw["conv1_w"], (1, 1),
                                     [(1, 1), (1, 1)], dimension_numbers=dn)
    x = jax.nn.relu(x + raw["conv1_b"][None, :, None, None])
    x = jax.lax.conv_general_dilated(x, raw["conv2_w"], (2, 2),
                                     [(1, 1), (1, 1)], dimension_numbers=dn)
    x = jax.nn.relu(x + raw["conv2_b"][None, :, None, None])
    x = x.reshape(x.shape[0], -1)                       # NCHW flatten
    x = jax.nn.relu(x @ raw["fc_w"] + raw["fc_b"])
    x = jax.nn.relu(x @ raw["act1_w"] + raw["act1_b"])
    return x @ raw["act2_w"] + raw["act2_b"]


if __name__ == "__main__":
    key = jax.random.PRNGKey(0)
    pkey, xkey = jax.random.split(key)
    raw = init_params(pkey)
    params = prepare_params(raw)
    state = jax.random.normal(xkey, (2, C_IN, H, W), jnp.float32)   # NCHW observations

    logits = jax.jit(agent_forward)(params, state)
    jax.block_until_ready(logits)
    assert logits.shape == (2, N_ACT) and logits.dtype == jnp.float32

    ref = reference_forward(raw, state)
    assert float(jnp.max(jnp.abs(logits - ref))) < 5e-2   # bf16-operand tolerance
    print("KERNEL_OK")
</pallas_src>

<mosaic_0001>
module attributes {stable_mosaic.version = 11 : i64} {
  func.func @fused_agent_kernel(%arg0: i32, %arg1: memref<1x256x4xf32, #tpu.memory_space<vmem>>, %arg2: memref<9x256x256xbf16, #tpu.memory_space<vmem>>, %arg3: memref<9x4x8xbf16, #tpu.memory_space<vmem>>, %arg4: memref<1x8xf32, #tpu.memory_space<vmem>>, %arg5: memref<9x64x256xbf16, #tpu.memory_space<vmem>>, %arg6: memref<9x8x8xbf16, #tpu.memory_space<vmem>>, %arg7: memref<1x8xf32, #tpu.memory_space<vmem>>, %arg8: memref<8x256xbf16, #tpu.memory_space<vmem>>, %arg9: memref<64x256xbf16, #tpu.memory_space<vmem>>, %arg10: memref<256x32xbf16, #tpu.memory_space<vmem>>, %arg11: memref<1x32xf32, #tpu.memory_space<vmem>>, %arg12: memref<32x64xbf16, #tpu.memory_space<vmem>>, %arg13: memref<1x64xf32, #tpu.memory_space<vmem>>, %arg14: memref<64x6xbf16, #tpu.memory_space<vmem>>, %arg15: memref<1x6xf32, #tpu.memory_space<vmem>>, %arg16: memref<1x1x6xf32, #tpu.memory_space<vmem>>) attributes {dimension_semantics = [#tpu.dimension_semantics<parallel>], iteration_bounds = array<i64: 2>, scalar_prefetch = 0 : i64, scratch_operands = 0 : i64, tpu.core_type = #tpu.core_type<tc>, window_params = [{transform_indices = @transform_0, window_bounds = array<i64: 1, 256, 4>}, {pipeline_mode = #tpu.pipeline_mode<synchronous>, transform_indices = @transform_1, window_bounds = array<i64: 9, 256, 256>}, {pipeline_mode = #tpu.pipeline_mode<synchronous>, transform_indices = @transform_2, window_bounds = array<i64: 9, 4, 8>}, {pipeline_mode = #tpu.pipeline_mode<synchronous>, transform_indices = @transform_3, window_bounds = array<i64: 1, 8>}, {pipeline_mode = #tpu.pipeline_mode<synchronous>, transform_indices = @transform_4, window_bounds = array<i64: 9, 64, 256>}, {pipeline_mode = #tpu.pipeline_mode<synchronous>, transform_indices = @transform_5, window_bounds = array<i64: 9, 8, 8>}, {pipeline_mode = #tpu.pipeline_mode<synchronous>, transform_indices = @transform_6, window_bounds = array<i64: 1, 8>}, {pipeline_mode = #tpu.pipeline_mode<synchronous>, transform_indices = @transform_7, window_bounds = array<i64: 8, 256>}, {pipeline_mode = #tpu.pipeline_mode<synchronous>, transform_indices = @transform_8, window_bounds = array<i64: 64, 256>}, {pipeline_mode = #tpu.pipeline_mode<synchronous>, transform_indices = @transform_9, window_bounds = array<i64: 256, 32>}, {pipeline_mode = #tpu.pipeline_mode<synchronous>, transform_indices = @transform_10, window_bounds = array<i64: 1, 32>}, {pipeline_mode = #tpu.pipeline_mode<synchronous>, transform_indices = @transform_11, window_bounds = array<i64: 32, 64>}, {pipeline_mode = #tpu.pipeline_mode<synchronous>, transform_indices = @transform_12, window_bounds = array<i64: 1, 64>}, {pipeline_mode = #tpu.pipeline_mode<synchronous>, transform_indices = @transform_13, window_bounds = array<i64: 64, 6>}, {pipeline_mode = #tpu.pipeline_mode<synchronous>, transform_indices = @transform_14, window_bounds = array<i64: 1, 6>}, {transform_indices = @transform_15, window_bounds = array<i64: 1, 1, 6>}]} {
    %c0 = arith.constant 0 : index
    %c0_0 = arith.constant 0 : index
    %c0_1 = arith.constant 0 : index
    %0 = vector.load %arg1[%c0, %c0_0, %c0_1] : memref<1x256x4xf32, #tpu.memory_space<vmem>>, vector<1x256x4xf32>
    %1 = vector.shape_cast %0 : vector<1x256x4xf32> to vector<256x4xf32>
    %cst = arith.constant 0.000000e+00 : f32
    %2 = vector.broadcast %cst : f32 to vector<256x8xf32>
    %c0_2 = arith.constant 0 : index
    %c0_3 = arith.constant 0 : index
    %c0_4 = arith.constant 0 : index
    %3 = vector.load %arg2[%c0_2, %c0_3, %c0_4] : memref<9x256x256xbf16, #tpu.memory_space<vmem>>, vector<1x256x256xbf16>
    %4 = vector.shape_cast %3 : vector<1x256x256xbf16> to vector<256x256xbf16>
    %5 = arith.truncf %1 : vector<256x4xf32> to vector<256x4xbf16>
    %cst_5 = arith.constant dense<0.000000e+00> : vector<256x4xf32>
    %6 = tpu.matmul %4, %5, %cst_5 {dimension_numbers = #tpu.dot_dimension_numbers<[1], [0], [0], [1], [0, 0, 1, 1], [], []>} : vector<256x256xbf16>, vector<256x4xbf16>, vector<256x4xf32> -> vector<256x4xf32>
    %c0_6 = arith.constant 0 : index
    %c0_7 = arith.constant 0 : index
    %c0_8 = arith.constant 0 : index
    %7 = vector.load %arg3[%c0_6, %c0_7, %c0_8] : memref<9x4x8xbf16, #tpu.memory_space<vmem>>, vector<1x4x8xbf16>
    %8 = vector.shape_cast %7 : vector<1x4x8xbf16> to vector<4x8xbf16>
    %9 = arith.truncf %6 : vector<256x4xf32> to vector<256x4xbf16>
    %cst_9 = arith.constant dense<0.000000e+00> : vector<256x8xf32>
    %10 = tpu.matmul %9, %8, %cst_9 {dimension_numbers = #tpu.dot_dimension_numbers<[1], [0], [0], [1], [0, 0, 1, 1], [], []>} : vector<256x4xbf16>, vector<4x8xbf16>, vector<256x8xf32> -> vector<256x8xf32>
    %11 = arith.addf %2, %10 : vector<256x8xf32>
    %c1 = arith.constant 1 : index
    %c0_10 = arith.constant 0 : index
    %c0_11 = arith.constant 0 : index
    %12 = vector.load %arg2[%c1, %c0_10, %c0_11] : memref<9x256x256xbf16, #tpu.memory_space<vmem>>, vector<1x256x256xbf16>
    %13 = vector.shape_cast %12 : vector<1x256x256xbf16> to vector<256x256xbf16>
    %14 = arith.truncf %1 : vector<256x4xf32> to vector<256x4xbf16>
    %cst_12 = arith.constant dense<0.000000e+00> : vector<256x4xf32>
    %15 = tpu.matmul %13, %14, %cst_12 {dimension_numbers = #tpu.dot_dimension_numbers<[1], [0], [0], [1], [0, 0, 1, 1], [], []>} : vector<256x256xbf16>, vector<256x4xbf16>, vector<256x4xf32> -> vector<256x4xf32>
    %c1_13 = arith.constant 1 : index
    %c0_14 = arith.constant 0 : index
    %c0_15 = arith.constant 0 : index
    %16 = vector.load %arg3[%c1_13, %c0_14, %c0_15] : memref<9x4x8xbf16, #tpu.memory_space<vmem>>, vector<1x4x8xbf16>
    %17 = vector.shape_cast %16 : vector<1x4x8xbf16> to vector<4x8xbf16>
    %18 = arith.truncf %15 : vector<256x4xf32> to vector<256x4xbf16>
    %cst_16 = arith.constant dense<0.000000e+00> : vector<256x8xf32>
    %19 = tpu.matmul %18, %17, %cst_16 {dimension_numbers = #tpu.dot_dimension_numbers<[1], [0], [0], [1], [0, 0, 1, 1], [], []>} : vector<256x4xbf16>, vector<4x8xbf16>, vector<256x8xf32> -> vector<256x8xf32>
    %20 = arith.addf %11, %19 : vector<256x8xf32>
    %c2 = arith.constant 2 : index
    %c0_17 = arith.constant 0 : index
    %c0_18 = arith.constant 0 : index
    %21 = vector.load %arg2[%c2, %c0_17, %c0_18] : memref<9x256x256xbf16, #tpu.memory_space<vmem>>, vector<1x256x256xbf16>
    %22 = vector.shape_cast %21 : vector<1x256x256xbf16> to vector<256x256xbf16>
    %23 = arith.truncf %1 : vector<256x4xf32> to vector<256x4xbf16>
    %cst_19 = arith.constant dense<0.000000e+00> : vector<256x4xf32>
    %24 = tpu.matmul %22, %23, %cst_19 {dimension_numbers = #tpu.dot_dimension_numbers<[1], [0], [0], [1], [0, 0, 1, 1], [], []>} : vector<256x256xbf16>, vector<256x4xbf16>, vector<256x4xf32> -> vector<256x4xf32>
    %c2_20 = arith.constant 2 : index
    %c0_21 = arith.constant 0 : index
    %c0_22 = arith.constant 0 : index
    %25 = vector.load %arg3[%c2_20, %c0_21, %c0_22] : memref<9x4x8xbf16, #tpu.memory_space<vmem>>, vector<1x4x8xbf16>
    %26 = vector.shape_cast %25 : vector<1x4x8xbf16> to vector<4x8xbf16>
    %27 = arith.truncf %24 : vector<256x4xf32> to vector<256x4xbf16>
    %cst_23 = arith.constant dense<0.000000e+00> : vector<256x8xf32>
    %28 = tpu.matmul %27, %26, %cst_23 {dimension_numbers = #tpu.dot_dimension_numbers<[1], [0], [0], [1], [0, 0, 1, 1], [], []>} : vector<256x4xbf16>, vector<4x8xbf16>, vector<256x8xf32> -> vector<256x8xf32>
    %29 = arith.addf %20, %28 : vector<256x8xf32>
    %c3 = arith.constant 3 : index
    %c0_24 = arith.constant 0 : index
    %c0_25 = arith.constant 0 : index
    %30 = vector.load %arg2[%c3, %c0_24, %c0_25] : memref<9x256x256xbf16, #tpu.memory_space<vmem>>, vector<1x256x256xbf16>
    %31 = vector.shape_cast %30 : vector<1x256x256xbf16> to vector<256x256xbf16>
    %32 = arith.truncf %1 : vector<256x4xf32> to vector<256x4xbf16>
    %cst_26 = arith.constant dense<0.000000e+00> : vector<256x4xf32>
    %33 = tpu.matmul %31, %32, %cst_26 {dimension_numbers = #tpu.dot_dimension_numbers<[1], [0], [0], [1], [0, 0, 1, 1], [], []>} : vector<256x256xbf16>, vector<256x4xbf16>, vector<256x4xf32> -> vector<256x4xf32>
    %c3_27 = arith.constant 3 : index
    %c0_28 = arith.constant 0 : index
    %c0_29 = arith.constant 0 : index
    %34 = vector.load %arg3[%c3_27, %c0_28, %c0_29] : memref<9x4x8xbf16, #tpu.memory_space<vmem>>, vector<1x4x8xbf16>
    %35 = vector.shape_cast %34 : vector<1x4x8xbf16> to vector<4x8xbf16>
    %36 = arith.truncf %33 : vector<256x4xf32> to vector<256x4xbf16>
    %cst_30 = arith.constant dense<0.000000e+00> : vector<256x8xf32>
    %37 = tpu.matmul %36, %35, %cst_30 {dimension_numbers = #tpu.dot_dimension_numbers<[1], [0], [0], [1], [0, 0, 1, 1], [], []>} : vector<256x4xbf16>, vector<4x8xbf16>, vector<256x8xf32> -> vector<256x8xf32>
    %38 = arith.addf %29, %37 : vector<256x8xf32>
    %c4 = arith.constant 4 : index
    %c0_31 = arith.constant 0 : index
    %c0_32 = arith.constant 0 : index
    %39 = vector.load %arg2[%c4, %c0_31, %c0_32] : memref<9x256x256xbf16, #tpu.memory_space<vmem>>, vector<1x256x256xbf16>
    %40 = vector.shape_cast %39 : vector<1x256x256xbf16> to vector<256x256xbf16>
    %41 = arith.truncf %1 : vector<256x4xf32> to vector<256x4xbf16>
    %cst_33 = arith.constant dense<0.000000e+00> : vector<256x4xf32>
    %42 = tpu.matmul %40, %41, %cst_33 {dimension_numbers = #tpu.dot_dimension_numbers<[1], [0], [0], [1], [0, 0, 1, 1], [], []>} : vector<256x256xbf16>, vector<256x4xbf16>, vector<256x4xf32> -> vector<256x4xf32>
    %c4_34 = arith.constant 4 : index
    %c0_35 = arith.constant 0 : index
    %c0_36 = arith.constant 0 : index
    %43 = vector.load %arg3[%c4_34, %c0_35, %c0_36] : memref<9x4x8xbf16, #tpu.memory_space<vmem>>, vector<1x4x8xbf16>
    %44 = vector.shape_cast %43 : vector<1x4x8xbf16> to vector<4x8xbf16>
    %45 = arith.truncf %42 : vector<256x4xf32> to vector<256x4xbf16>
    %cst_37 = arith.constant dense<0.000000e+00> : vector<256x8xf32>
    %46 = tpu.matmul %45, %44, %cst_37 {dimension_numbers = #tpu.dot_dimension_numbers<[1], [0], [0], [1], [0, 0, 1, 1], [], []>} : vector<256x4xbf16>, vector<4x8xbf16>, vector<256x8xf32> -> vector<256x8xf32>
    %47 = arith.addf %38, %46 : vector<256x8xf32>
    %c5 = arith.constant 5 : index
    %c0_38 = arith.constant 0 : index
    %c0_39 = arith.constant 0 : index
    %48 = vector.load %arg2[%c5, %c0_38, %c0_39] : memref<9x256x256xbf16, #tpu.memory_space<vmem>>, vector<1x256x256xbf16>
    %49 = vector.shape_cast %48 : vector<1x256x256xbf16> to vector<256x256xbf16>
    %50 = arith.truncf %1 : vector<256x4xf32> to vector<256x4xbf16>
    %cst_40 = arith.constant dense<0.000000e+00> : vector<256x4xf32>
    %51 = tpu.matmul %49, %50, %cst_40 {dimension_numbers = #tpu.dot_dimension_numbers<[1], [0], [0], [1], [0, 0, 1, 1], [], []>} : vector<256x256xbf16>, vector<256x4xbf16>, vector<256x4xf32> -> vector<256x4xf32>
    %c5_41 = arith.constant 5 : index
    %c0_42 = arith.constant 0 : index
    %c0_43 = arith.constant 0 : index
    %52 = vector.load %arg3[%c5_41, %c0_42, %c0_43] : memref<9x4x8xbf16, #tpu.memory_space<vmem>>, vector<1x4x8xbf16>
    %53 = vector.shape_cast %52 : vector<1x4x8xbf16> to vector<4x8xbf16>
    %54 = arith.truncf %51 : vector<256x4xf32> to vector<256x4xbf16>
    %cst_44 = arith.constant dense<0.000000e+00> : vector<256x8xf32>
    %55 = tpu.matmul %54, %53, %cst_44 {dimension_numbers = #tpu.dot_dimension_numbers<[1], [0], [0], [1], [0, 0, 1, 1], [], []>} : vector<256x4xbf16>, vector<4x8xbf16>, vector<256x8xf32> -> vector<256x8xf32>
    %56 = arith.addf %47, %55 : vector<256x8xf32>
    %c6 = arith.constant 6 : index
    %c0_45 = arith.constant 0 : index
    %c0_46 = arith.constant 0 : index
    %57 = vector.load %arg2[%c6, %c0_45, %c0_46] : memref<9x256x256xbf16, #tpu.memory_space<vmem>>, vector<1x256x256xbf16>
    %58 = vector.shape_cast %57 : vector<1x256x256xbf16> to vector<256x256xbf16>
    %59 = arith.truncf %1 : vector<256x4xf32> to vector<256x4xbf16>
    %cst_47 = arith.constant dense<0.000000e+00> : vector<256x4xf32>
    %60 = tpu.matmul %58, %59, %cst_47 {dimension_numbers = #tpu.dot_dimension_numbers<[1], [0], [0], [1], [0, 0, 1, 1], [], []>} : vector<256x256xbf16>, vector<256x4xbf16>, vector<256x4xf32> -> vector<256x4xf32>
    %c6_48 = arith.constant 6 : index
    %c0_49 = arith.constant 0 : index
    %c0_50 = arith.constant 0 : index
    %61 = vector.load %arg3[%c6_48, %c0_49, %c0_50] : memref<9x4x8xbf16, #tpu.memory_space<vmem>>, vector<1x4x8xbf16>
    %62 = vector.shape_cast %61 : vector<1x4x8xbf16> to vector<4x8xbf16>
    %63 = arith.truncf %60 : vector<256x4xf32> to vector<256x4xbf16>
    %cst_51 = arith.constant dense<0.000000e+00> : vector<256x8xf32>
    %64 = tpu.matmul %63, %62, %cst_51 {dimension_numbers = #tpu.dot_dimension_numbers<[1], [0], [0], [1], [0, 0, 1, 1], [], []>} : vector<256x4xbf16>, vector<4x8xbf16>, vector<256x8xf32> -> vector<256x8xf32>
    %65 = arith.addf %56, %64 : vector<256x8xf32>
    %c7 = arith.constant 7 : index
    %c0_52 = arith.constant 0 : index
    %c0_53 = arith.constant 0 : index
    %66 = vector.load %arg2[%c7, %c0_52, %c0_53] : memref<9x256x256xbf16, #tpu.memory_space<vmem>>, vector<1x256x256xbf16>
    %67 = vector.shape_cast %66 : vector<1x256x256xbf16> to vector<256x256xbf16>
    %68 = arith.truncf %1 : vector<256x4xf32> to vector<256x4xbf16>
    %cst_54 = arith.constant dense<0.000000e+00> : vector<256x4xf32>
    %69 = tpu.matmul %67, %68, %cst_54 {dimension_numbers = #tpu.dot_dimension_numbers<[1], [0], [0], [1], [0, 0, 1, 1], [], []>} : vector<256x256xbf16>, vector<256x4xbf16>, vector<256x4xf32> -> vector<256x4xf32>
    %c7_55 = arith.constant 7 : index
    %c0_56 = arith.constant 0 : index
    %c0_57 = arith.constant 0 : index
    %70 = vector.load %arg3[%c7_55, %c0_56, %c0_57] : memref<9x4x8xbf16, #tpu.memory_space<vmem>>, vector<1x4x8xbf16>
    %71 = vector.shape_cast %70 : vector<1x4x8xbf16> to vector<4x8xbf16>
    %72 = arith.truncf %69 : vector<256x4xf32> to vector<256x4xbf16>
    %cst_58 = arith.constant dense<0.000000e+00> : vector<256x8xf32>
    %73 = tpu.matmul %72, %71, %cst_58 {dimension_numbers = #tpu.dot_dimension_numbers<[1], [0], [0], [1], [0, 0, 1, 1], [], []>} : vector<256x4xbf16>, vector<4x8xbf16>, vector<256x8xf32> -> vector<256x8xf32>
    %74 = arith.addf %65, %73 : vector<256x8xf32>
    %c8 = arith.constant 8 : index
    %c0_59 = arith.constant 0 : index
    %c0_60 = arith.constant 0 : index
    %75 = vector.load %arg2[%c8, %c0_59, %c0_60] : memref<9x256x256xbf16, #tpu.memory_space<vmem>>, vector<1x256x256xbf16>
    %76 = vector.shape_cast %75 : vector<1x256x256xbf16> to vector<256x256xbf16>
    %77 = arith.truncf %1 : vector<256x4xf32> to vector<256x4xbf16>
    %cst_61 = arith.constant dense<0.000000e+00> : vector<256x4xf32>
    %78 = tpu.matmul %76, %77, %cst_61 {dimension_numbers = #tpu.dot_dimension_numbers<[1], [0], [0], [1], [0, 0, 1, 1], [], []>} : vector<256x256xbf16>, vector<256x4xbf16>, vector<256x4xf32> -> vector<256x4xf32>
    %c8_62 = arith.constant 8 : index
    %c0_63 = arith.constant 0 : index
    %c0_64 = arith.constant 0 : index
    %79 = vector.load %arg3[%c8_62, %c0_63, %c0_64] : memref<9x4x8xbf16, #tpu.memory_space<vmem>>, vector<1x4x8xbf16>
    %80 = vector.shape_cast %79 : vector<1x4x8xbf16> to vector<4x8xbf16>
    %81 = arith.truncf %78 : vector<256x4xf32> to vector<256x4xbf16>
    %cst_65 = arith.constant dense<0.000000e+00> : vector<256x8xf32>
    %82 = tpu.matmul %81, %80, %cst_65 {dimension_numbers = #tpu.dot_dimension_numbers<[1], [0], [0], [1], [0, 0, 1, 1], [], []>} : vector<256x4xbf16>, vector<4x8xbf16>, vector<256x8xf32> -> vector<256x8xf32>
    %83 = arith.addf %74, %82 : vector<256x8xf32>
    %c0_66 = arith.constant 0 : index
    %c0_67 = arith.constant 0 : index
    %84 = vector.load %arg4[%c0_66, %c0_67] : memref<1x8xf32, #tpu.memory_space<vmem>>, vector<1x8xf32>
    %85 = vector.broadcast %84 : vector<1x8xf32> to vector<256x8xf32>
    %86 = arith.addf %83, %85 : vector<256x8xf32>
    %cst_68 = arith.constant 0.000000e+00 : f32
    %87 = vector.broadcast %cst_68 : f32 to vector<256x8xf32>
    %88 = arith.maximumf %86, %87 : vector<256x8xf32>
    %cst_69 = arith.constant 0.000000e+00 : f32
    %89 = vector.broadcast %cst_69 : f32 to vector<64x8xf32>
    %c0_70 = arith.constant 0 : index
    %c0_71 = arith.constant 0 : index
    %c0_72 = arith.constant 0 : index
    %90 = vector.load %arg5[%c0_70, %c0_71, %c0_72] : memref<9x64x256xbf16, #tpu.memory_space<vmem>>, vector<1x64x256xbf16>
    %91 = vector.shape_cast %90 : vector<1x64x256xbf16> to vector<64x256xbf16>
    %92 = arith.truncf %88 : vector<256x8xf32> to vector<256x8xbf16>
    %cst_73 = arith.constant dense<0.000000e+00> : vector<64x8xf32>
    %93 = tpu.matmul %91, %92, %cst_73 {dimension_numbers = #tpu.dot_dimension_numbers<[1], [0], [0], [1], [0, 0, 1, 1], [], []>} : vector<64x256xbf16>, vector<256x8xbf16>, vector<64x8xf32> -> vector<64x8xf32>
    %c0_74 = arith.constant 0 : index
    %c0_75 = arith.constant 0 : index
    %c0_76 = arith.constant 0 : index
    %94 = vector.load %arg6[%c0_74, %c0_75, %c0_76] : memref<9x8x8xbf16, #tpu.memory_space<vmem>>, vector<1x8x8xbf16>
    %95 = vector.shape_cast %94 : vector<1x8x8xbf16> to vector<8x8xbf16>
    %96 = arith.truncf %93 : vector<64x8xf32> to vector<64x8xbf16>
    %cst_77 = arith.constant dense<0.000000e+00> : vector<64x8xf32>
    %97 = tpu.matmul %96, %95, %cst_77 {dimension_numbers = #tpu.dot_dimension_numbers<[1], [0], [0], [1], [0, 0, 1, 1], [], []>} : vector<64x8xbf16>, vector<8x8xbf16>, vector<64x8xf32> -> vector<64x8xf32>
    %98 = arith.addf %89, %97 : vector<64x8xf32>
    %c1_78 = arith.constant 1 : index
    %c0_79 = arith.constant 0 : index
    %c0_80 = arith.constant 0 : index
    %99 = vector.load %arg5[%c1_78, %c0_79, %c0_80] : memref<9x64x256xbf16, #tpu.memory_space<vmem>>, vector<1x64x256xbf16>
    %100 = vector.shape_cast %99 : vector<1x64x256xbf16> to vector<64x256xbf16>
    %101 = arith.truncf %88 : vector<256x8xf32> to vector<256x8xbf16>
    %cst_81 = arith.constant dense<0.000000e+00> : vector<64x8xf32>
    %102 = tpu.matmul %100, %101, %cst_81 {dimension_numbers = #tpu.dot_dimension_numbers<[1], [0], [0], [1], [0, 0, 1, 1], [], []>} : vector<64x256xbf16>, vector<256x8xbf16>, vector<64x8xf32> -> vector<64x8xf32>
    %c1_82 = arith.constant 1 : index
    %c0_83 = arith.constant 0 : index
    %c0_84 = arith.constant 0 : index
    %103 = vector.load %arg6[%c1_82, %c0_83, %c0_84] : memref<9x8x8xbf16, #tpu.memory_space<vmem>>, vector<1x8x8xbf16>
    %104 = vector.shape_cast %103 : vector<1x8x8xbf16> to vector<8x8xbf16>
    %105 = arith.truncf %102 : vector<64x8xf32> to vector<64x8xbf16>
    %cst_85 = arith.constant dense<0.000000e+00> : vector<64x8xf32>
    %106 = tpu.matmul %105, %104, %cst_85 {dimension_numbers = #tpu.dot_dimension_numbers<[1], [0], [0], [1], [0, 0, 1, 1], [], []>} : vector<64x8xbf16>, vector<8x8xbf16>, vector<64x8xf32> -> vector<64x8xf32>
    %107 = arith.addf %98, %106 : vector<64x8xf32>
    %c2_86 = arith.constant 2 : index
    %c0_87 = arith.constant 0 : index
    %c0_88 = arith.constant 0 : index
    %108 = vector.load %arg5[%c2_86, %c0_87, %c0_88] : memref<9x64x256xbf16, #tpu.memory_space<vmem>>, vector<1x64x256xbf16>
    %109 = vector.shape_cast %108 : vector<1x64x256xbf16> to vector<64x256xbf16>
    %110 = arith.truncf %88 : vector<256x8xf32> to vector<256x8xbf16>
    %cst_89 = arith.constant dense<0.000000e+00> : vector<64x8xf32>
    %111 = tpu.matmul %109, %110, %cst_89 {dimension_numbers = #tpu.dot_dimension_numbers<[1], [0], [0], [1], [0, 0, 1, 1], [], []>} : vector<64x256xbf16>, vector<256x8xbf16>, vector<64x8xf32> -> vector<64x8xf32>
    %c2_90 = arith.constant 2 : index
    %c0_91 = arith.constant 0 : index
    %c0_92 = arith.constant 0 : index
    %112 = vector.load %arg6[%c2_90, %c0_91, %c0_92] : memref<9x8x8xbf16, #tpu.memory_space<vmem>>, vector<1x8x8xbf16>
    %113 = vector.shape_cast %112 : vector<1x8x8xbf16> to vector<8x8xbf16>
    %114 = arith.truncf %111 : vector<64x8xf32> to vector<64x8xbf16>
    %cst_93 = arith.constant dense<0.000000e+00> : vector<64x8xf32>
    %115 = tpu.matmul %114, %113, %cst_93 {dimension_numbers = #tpu.dot_dimension_numbers<[1], [0], [0], [1], [0, 0, 1, 1], [], []>} : vector<64x8xbf16>, vector<8x8xbf16>, vector<64x8xf32> -> vector<64x8xf32>
    %116 = arith.addf %107, %115 : vector<64x8xf32>
    %c3_94 = arith.constant 3 : index
    %c0_95 = arith.constant 0 : index
    %c0_96 = arith.constant 0 : index
    %117 = vector.load %arg5[%c3_94, %c0_95, %c0_96] : memref<9x64x256xbf16, #tpu.memory_space<vmem>>, vector<1x64x256xbf16>
    %118 = vector.shape_cast %117 : vector<1x64x256xbf16> to vector<64x256xbf16>
    %119 = arith.truncf %88 : vector<256x8xf32> to vector<256x8xbf16>
    %cst_97 = arith.constant dense<0.000000e+00> : vector<64x8xf32>
    %120 = tpu.matmul %118, %119, %cst_97 {dimension_numbers = #tpu.dot_dimension_numbers<[1], [0], [0], [1], [0, 0, 1, 1], [], []>} : vector<64x256xbf16>, vector<256x8xbf16>, vector<64x8xf32> -> vector<64x8xf32>
    %c3_98 = arith.constant 3 : index
    %c0_99 = arith.constant 0 : index
    %c0_100 = arith.constant 0 : index
    %121 = vector.load %arg6[%c3_98, %c0_99, %c0_100] : memref<9x8x8xbf16, #tpu.memory_space<vmem>>, vector<1x8x8xbf16>
    %122 = vector.shape_cast %121 : vector<1x8x8xbf16> to vector<8x8xbf16>
    %123 = arith.truncf %120 : vector<64x8xf32> to vector<64x8xbf16>
    %cst_101 = arith.constant dense<0.000000e+00> : vector<64x8xf32>
    %124 = tpu.matmul %123, %122, %cst_101 {dimension_numbers = #tpu.dot_dimension_numbers<[1], [0], [0], [1], [0, 0, 1, 1], [], []>} : vector<64x8xbf16>, vector<8x8xbf16>, vector<64x8xf32> -> vector<64x8xf32>
    %125 = arith.addf %116, %124 : vector<64x8xf32>
    %c4_102 = arith.constant 4 : index
    %c0_103 = arith.constant 0 : index
    %c0_104 = arith.constant 0 : index
    %126 = vector.load %arg5[%c4_102, %c0_103, %c0_104] : memref<9x64x256xbf16, #tpu.memory_space<vmem>>, vector<1x64x256xbf16>
    %127 = vector.shape_cast %126 : vector<1x64x256xbf16> to vector<64x256xbf16>
    %128 = arith.truncf %88 : vector<256x8xf32> to vector<256x8xbf16>
    %cst_105 = arith.constant dense<0.000000e+00> : vector<64x8xf32>
    %129 = tpu.matmul %127, %128, %cst_105 {dimension_numbers = #tpu.dot_dimension_numbers<[1], [0], [0], [1], [0, 0, 1, 1], [], []>} : vector<64x256xbf16>, vector<256x8xbf16>, vector<64x8xf32> -> vector<64x8xf32>
    %c4_106 = arith.constant 4 : index
    %c0_107 = arith.constant 0 : index
    %c0_108 = arith.constant 0 : index
    %130 = vector.load %arg6[%c4_106, %c0_107, %c0_108] : memref<9x8x8xbf16, #tpu.memory_space<vmem>>, vector<1x8x8xbf16>
    %131 = vector.shape_cast %130 : vector<1x8x8xbf16> to vector<8x8xbf16>
    %132 = arith.truncf %129 : vector<64x8xf32> to vector<64x8xbf16>
    %cst_109 = arith.constant dense<0.000000e+00> : vector<64x8xf32>
    %133 = tpu.matmul %132, %131, %cst_109 {dimension_numbers = #tpu.dot_dimension_numbers<[1], [0], [0], [1], [0, 0, 1, 1], [], []>} : vector<64x8xbf16>, vector<8x8xbf16>, vector<64x8xf32> -> vector<64x8xf32>
    %134 = arith.addf %125, %133 : vector<64x8xf32>
    %c5_110 = arith.constant 5 : index
    %c0_111 = arith.constant 0 : index
    %c0_112 = arith.constant 0 : index
    %135 = vector.load %arg5[%c5_110, %c0_111, %c0_112] : memref<9x64x256xbf16, #tpu.memory_space<vmem>>, vector<1x64x256xbf16>
    %136 = vector.shape_cast %135 : vector<1x64x256xbf16> to vector<64x256xbf16>
    %137 = arith.truncf %88 : vector<256x8xf32> to vector<256x8xbf16>
    %cst_113 = arith.constant dense<0.000000e+00> : vector<64x8xf32>
    %138 = tpu.matmul %136, %137, %cst_113 {dimension_numbers = #tpu.dot_dimension_numbers<[1], [0], [0], [1], [0, 0, 1, 1], [], []>} : vector<64x256xbf16>, vector<256x8xbf16>, vector<64x8xf32> -> vector<64x8xf32>
    %c5_114 = arith.constant 5 : index
    %c0_115 = arith.constant 0 : index
    %c0_116 = arith.constant 0 : index
    %139 = vector.load %arg6[%c5_114, %c0_115, %c0_116] : memref<9x8x8xbf16, #tpu.memory_space<vmem>>, vector<1x8x8xbf16>
    %140 = vector.shape_cast %139 : vector<1x8x8xbf16> to vector<8x8xbf16>
    %141 = arith.truncf %138 : vector<64x8xf32> to vector<64x8xbf16>
    %cst_117 = arith.constant dense<0.000000e+00> : vector<64x8xf32>
    %142 = tpu.matmul %141, %140, %cst_117 {dimension_numbers = #tpu.dot_dimension_numbers<[1], [0], [0], [1], [0, 0, 1, 1], [], []>} : vector<64x8xbf16>, vector<8x8xbf16>, vector<64x8xf32> -> vector<64x8xf32>
    %143 = arith.addf %134, %142 : vector<64x8xf32>
    %c6_118 = arith.constant 6 : index
    %c0_119 = arith.constant 0 : index
    %c0_120 = arith.constant 0 : index
    %144 = vector.load %arg5[%c6_118, %c0_119, %c0_120] : memref<9x64x256xbf16, #tpu.memory_space<vmem>>, vector<1x64x256xbf16>
    %145 = vector.shape_cast %144 : vector<1x64x256xbf16> to vector<64x256xbf16>
    %146 = arith.truncf %88 : vector<256x8xf32> to vector<256x8xbf16>
    %cst_121 = arith.constant dense<0.000000e+00> : vector<64x8xf32>
    %147 = tpu.matmul %145, %146, %cst_121 {dimension_numbers = #tpu.dot_dimension_numbers<[1], [0], [0], [1], [0, 0, 1, 1], [], []>} : vector<64x256xbf16>, vector<256x8xbf16>, vector<64x8xf32> -> vector<64x8xf32>
    %c6_122 = arith.constant 6 : index
    %c0_123 = arith.constant 0 : index
    %c0_124 = arith.constant 0 : index
    %148 = vector.load %arg6[%c6_122, %c0_123, %c0_124] : memref<9x8x8xbf16, #tpu.memory_space<vmem>>, vector<1x8x8xbf16>
    %149 = vector.shape_cast %148 : vector<1x8x8xbf16> to vector<8x8xbf16>
    %150 = arith.truncf %147 : vector<64x8xf32> to vector<64x8xbf16>
    %cst_125 = arith.constant dense<0.000000e+00> : vector<64x8xf32>
    %151 = tpu.matmul %150, %149, %cst_125 {dimension_numbers = #tpu.dot_dimension_numbers<[1], [0], [0], [1], [0, 0, 1, 1], [], []>} : vector<64x8xbf16>, vector<8x8xbf16>, vector<64x8xf32> -> vector<64x8xf32>
    %152 = arith.addf %143, %151 : vector<64x8xf32>
    %c7_126 = arith.constant 7 : index
    %c0_127 = arith.constant 0 : index
    %c0_128 = arith.constant 0 : index
    %153 = vector.load %arg5[%c7_126, %c0_127, %c0_128] : memref<9x64x256xbf16, #tpu.memory_space<vmem>>, vector<1x64x256xbf16>
    %154 = vector.shape_cast %153 : vector<1x64x256xbf16> to vector<64x256xbf16>
    %155 = arith.truncf %88 : vector<256x8xf32> to vector<256x8xbf16>
    %cst_129 = arith.constant dense<0.000000e+00> : vector<64x8xf32>
    %156 = tpu.matmul %154, %155, %cst_129 {dimension_numbers = #tpu.dot_dimension_numbers<[1], [0], [0], [1], [0, 0, 1, 1], [], []>} : vector<64x256xbf16>, vector<256x8xbf16>, vector<64x8xf32> -> vector<64x8xf32>
    %c7_130 = arith.constant 7 : index
    %c0_131 = arith.constant 0 : index
    %c0_132 = arith.constant 0 : index
    %157 = vector.load %arg6[%c7_130, %c0_131, %c0_132] : memref<9x8x8xbf16, #tpu.memory_space<vmem>>, vector<1x8x8xbf16>
    %158 = vector.shape_cast %157 : vector<1x8x8xbf16> to vector<8x8xbf16>
    %159 = arith.truncf %156 : vector<64x8xf32> to vector<64x8xbf16>
    %cst_133 = arith.constant dense<0.000000e+00> : vector<64x8xf32>
    %160 = tpu.matmul %159, %158, %cst_133 {dimension_numbers = #tpu.dot_dimension_numbers<[1], [0], [0], [1], [0, 0, 1, 1], [], []>} : vector<64x8xbf16>, vector<8x8xbf16>, vector<64x8xf32> -> vector<64x8xf32>
    %161 = arith.addf %152, %160 : vector<64x8xf32>
    %c8_134 = arith.constant 8 : index
    %c0_135 = arith.constant 0 : index
    %c0_136 = arith.constant 0 : index
    %162 = vector.load %arg5[%c8_134, %c0_135, %c0_136] : memref<9x64x256xbf16, #tpu.memory_space<vmem>>, vector<1x64x256xbf16>
    %163 = vector.shape_cast %162 : vector<1x64x256xbf16> to vector<64x256xbf16>
    %164 = arith.truncf %88 : vector<256x8xf32> to vector<256x8xbf16>
    %cst_137 = arith.constant dense<0.000000e+00> : vector<64x8xf32>
    %165 = tpu.matmul %163, %164, %cst_137 {dimension_numbers = #tpu.dot_dimension_numbers<[1], [0], [0], [1], [0, 0, 1, 1], [], []>} : vector<64x256xbf16>, vector<256x8xbf16>, vector<64x8xf32> -> vector<64x8xf32>
    %c8_138 = arith.constant 8 : index
    %c0_139 = arith.constant 0 : index
    %c0_140 = arith.constant 0 : index
    %166 = vector.load %arg6[%c8_138, %c0_139, %c0_140] : memref<9x8x8xbf16, #tpu.memory_space<vmem>>, vector<1x8x8xbf16>
    %167 = vector.shape_cast %166 : vector<1x8x8xbf16> to vector<8x8xbf16>
    %168 = arith.truncf %165 : vector<64x8xf32> to vector<64x8xbf16>
    %cst_141 = arith.constant dense<0.000000e+00> : vector<64x8xf32>
    %169 = tpu.matmul %168, %167, %cst_141 {dimension_numbers = #tpu.dot_dimension_numbers<[1], [0], [0], [1], [0, 0, 1, 1], [], []>} : vector<64x8xbf16>, vector<8x8xbf16>, vector<64x8xf32> -> vector<64x8xf32>
    %170 = arith.addf %161, %169 : vector<64x8xf32>
    %c0_142 = arith.constant 0 : index
    %c0_143 = arith.constant 0 : index
    %171 = vector.load %arg7[%c0_142, %c0_143] : memref<1x8xf32, #tpu.memory_space<vmem>>, vector<1x8xf32>
    %172 = vector.broadcast %171 : vector<1x8xf32> to vector<64x8xf32>
    %173 = arith.addf %170, %172 : vector<64x8xf32>
    %cst_144 = arith.constant 0.000000e+00 : f32
    %174 = vector.broadcast %cst_144 : f32 to vector<64x8xf32>
    %175 = arith.maximumf %173, %174 : vector<64x8xf32>
    %c0_145 = arith.constant 0 : index
    %c0_146 = arith.constant 0 : index
    %176 = vector.load %arg8[%c0_145, %c0_146] : memref<8x256xbf16, #tpu.memory_space<vmem>>, vector<8x256xbf16>
    %177 = arith.truncf %175 : vector<64x8xf32> to vector<64x8xbf16>
    %cst_147 = arith.constant dense<0.000000e+00> : vector<64x256xf32>
    %178 = tpu.matmul %177, %176, %cst_147 {dimension_numbers = #tpu.dot_dimension_numbers<[1], [0], [0], [1], [0, 0, 1, 1], [], []>} : vector<64x8xbf16>, vector<8x256xbf16>, vector<64x256xf32> -> vector<64x256xf32>
    %c0_148 = arith.constant 0 : index
    %c0_149 = arith.constant 0 : index
    %179 = vector.load %arg9[%c0_148, %c0_149] : memref<64x256xbf16, #tpu.memory_space<vmem>>, vector<64x256xbf16>
    %180 = arith.extf %179 : vector<64x256xbf16> to vector<64x256xf32>
    %181 = arith.mulf %178, %180 : vector<64x256xf32>
    %cst_150 = arith.constant dense<0.000000e+00> : vector<256xf32>
    %182 = vector.multi_reduction <add>, %181, %cst_150 [0] : vector<64x256xf32> to vector<256xf32>
    %183 = vector.shape_cast %182 : vector<256xf32> to vector<1x256xf32>
    %c0_151 = arith.constant 0 : index
    %c0_152 = arith.constant 0 : index
    %184 = vector.load %arg10[%c0_151, %c0_152] : memref<256x32xbf16, #tpu.memory_space<vmem>>, vector<256x32xbf16>
    %185 = arith.truncf %183 : vector<1x256xf32> to vector<1x256xbf16>
    %cst_153 = arith.constant dense<0.000000e+00> : vector<1x32xf32>
    %186 = tpu.matmul %185, %184, %cst_153 {dimension_numbers = #tpu.dot_dimension_numbers<[1], [0], [0], [1], [0, 0, 1, 1], [], []>} : vector<1x256xbf16>, vector<256x32xbf16>, vector<1x32xf32> -> vector<1x32xf32>
    %c0_154 = arith.constant 0 : index
    %c0_155 = arith.constant 0 : index
    %187 = vector.load %arg11[%c0_154, %c0_155] : memref<1x32xf32, #tpu.memory_space<vmem>>, vector<1x32xf32>
    %188 = arith.addf %186, %187 : vector<1x32xf32>
    %cst_156 = arith.constant 0.000000e+00 : f32
    %189 = vector.broadcast %cst_156 : f32 to vector<1x32xf32>
    %190 = arith.maximumf %188, %189 : vector<1x32xf32>
    %c0_157 = arith.constant 0 : index
    %c0_158 = arith.constant 0 : index
    %191 = vector.load %arg12[%c0_157, %c0_158] : memref<32x64xbf16, #tpu.memory_space<vmem>>, vector<32x64xbf16>
    %192 = arith.truncf %190 : vector<1x32xf32> to vector<1x32xbf16>
    %cst_159 = arith.constant dense<0.000000e+00> : vector<1x64xf32>
    %193 = tpu.matmul %192, %191, %cst_159 {dimension_numbers = #tpu.dot_dimension_numbers<[1], [0], [0], [1], [0, 0, 1, 1], [], []>} : vector<1x32xbf16>, vector<32x64xbf16>, vector<1x64xf32> -> vector<1x64xf32>
    %c0_160 = arith.constant 0 : index
    %c0_161 = arith.constant 0 : index
    %194 = vector.load %arg13[%c0_160, %c0_161] : memref<1x64xf32, #tpu.memory_space<vmem>>, vector<1x64xf32>
    %195 = arith.addf %193, %194 : vector<1x64xf32>
    %cst_162 = arith.constant 0.000000e+00 : f32
    %196 = vector.broadcast %cst_162 : f32 to vector<1x64xf32>
    %197 = arith.maximumf %195, %196 : vector<1x64xf32>
    %c0_163 = arith.constant 0 : index
    %c0_164 = arith.constant 0 : index
    %198 = vector.load %arg14[%c0_163, %c0_164] : memref<64x6xbf16, #tpu.memory_space<vmem>>, vector<64x6xbf16>
    %199 = arith.truncf %197 : vector<1x64xf32> to vector<1x64xbf16>
    %cst_165 = arith.constant dense<0.000000e+00> : vector<1x6xf32>
    %200 = tpu.matmul %199, %198, %cst_165 {dimension_numbers = #tpu.dot_dimension_numbers<[1], [0], [0], [1], [0, 0, 1, 1], [], []>} : vector<1x64xbf16>, vector<64x6xbf16>, vector<1x6xf32> -> vector<1x6xf32>
    %c0_166 = arith.constant 0 : index
    %c0_167 = arith.constant 0 : index
    %201 = vector.load %arg15[%c0_166, %c0_167] : memref<1x6xf32, #tpu.memory_space<vmem>>, vector<1x6xf32>
    %202 = arith.addf %200, %201 : vector<1x6xf32>
    %203 = vector.shape_cast %202 : vector<1x6xf32> to vector<1x1x6xf32>
    %c0_168 = arith.constant 0 : index
    %c0_169 = arith.constant 0 : index
    %c0_170 = arith.constant 0 : index
    %204 = vector.load %arg16[%c0_168, %c0_169, %c0_170] : memref<1x1x6xf32, #tpu.memory_space<vmem>>, vector<1x1x6xf32>
    tpu.vector_store %arg16[%c0_168, %c0_169, %c0_170], %203 {strides = array<i32>} : memref<1x1x6xf32, #tpu.memory_space<vmem>>, vector<1x1x6xf32>,
    return
  }
  func.func @transform_0(%arg0: i32) -> (i32, i32, i32) {
    %c0_i32 = arith.constant 0 : i32
    %c0_i32_0 = arith.constant 0 : i32
    %c0_i32_1 = arith.constant 0 : i32
    return %arg0, %c0_i32, %c0_i32_0 : i32, i32, i32
  }
  func.func @transform_1(%arg0: i32) -> (i32, i32, i32) {
    %c0_i32 = arith.constant 0 : i32
    %c0_i32_0 = arith.constant 0 : i32
    %c0_i32_1 = arith.constant 0 : i32
    %c0_i32_2 = arith.constant 0 : i32
    return %c0_i32, %c0_i32_0, %c0_i32_1 : i32, i32, i32
  }
  func.func @transform_2(%arg0: i32) -> (i32, i32, i32) {
    %c0_i32 = arith.constant 0 : i32
    %c0_i32_0 = arith.constant 0 : i32
    %c0_i32_1 = arith.constant 0 : i32
    %c0_i32_2 = arith.constant 0 : i32
    return %c0_i32, %c0_i32_0, %c0_i32_1 : i32, i32, i32
  }
  func.func @transform_3(%arg0: i32) -> (i32, i32) {
    %c0_i32 = arith.constant 0 : i32
    %c0_i32_0 = arith.constant 0 : i32
    %c0_i32_1 = arith.constant 0 : i32
    return %c0_i32, %c0_i32_0 : i32, i32
  }
  func.func @transform_4(%arg0: i32) -> (i32, i32, i32) {
    %c0_i32 = arith.constant 0 : i32
    %c0_i32_0 = arith.constant 0 : i32
    %c0_i32_1 = arith.constant 0 : i32
    %c0_i32_2 = arith.constant 0 : i32
    return %c0_i32, %c0_i32_0, %c0_i32_1 : i32, i32, i32
  }
  func.func @transform_5(%arg0: i32) -> (i32, i32, i32) {
    %c0_i32 = arith.constant 0 : i32
    %c0_i32_0 = arith.constant 0 : i32
    %c0_i32_1 = arith.constant 0 : i32
    %c0_i32_2 = arith.constant 0 : i32
    return %c0_i32, %c0_i32_0, %c0_i32_1 : i32, i32, i32
  }
  func.func @transform_6(%arg0: i32) -> (i32, i32) {
    %c0_i32 = arith.constant 0 : i32
    %c0_i32_0 = arith.constant 0 : i32
    %c0_i32_1 = arith.constant 0 : i32
    return %c0_i32, %c0_i32_0 : i32, i32
  }
  func.func @transform_7(%arg0: i32) -> (i32, i32) {
    %c0_i32 = arith.constant 0 : i32
    %c0_i32_0 = arith.constant 0 : i32
    %c0_i32_1 = arith.constant 0 : i32
    return %c0_i32, %c0_i32_0 : i32, i32
  }
  func.func @transform_8(%arg0: i32) -> (i32, i32) {
    %c0_i32 = arith.constant 0 : i32
    %c0_i32_0 = arith.constant 0 : i32
    %c0_i32_1 = arith.constant 0 : i32
    return %c0_i32, %c0_i32_0 : i32, i32
  }
  func.func @transform_9(%arg0: i32) -> (i32, i32) {
    %c0_i32 = arith.constant 0 : i32
    %c0_i32_0 = arith.constant 0 : i32
    %c0_i32_1 = arith.constant 0 : i32
    return %c0_i32, %c0_i32_0 : i32, i32
  }
  func.func @transform_10(%arg0: i32) -> (i32, i32) {
    %c0_i32 = arith.constant 0 : i32
    %c0_i32_0 = arith.constant 0 : i32
    %c0_i32_1 = arith.constant 0 : i32
    return %c0_i32, %c0_i32_0 : i32, i32
  }
  func.func @transform_11(%arg0: i32) -> (i32, i32) {
    %c0_i32 = arith.constant 0 : i32
    %c0_i32_0 = arith.constant 0 : i32
    %c0_i32_1 = arith.constant 0 : i32
    return %c0_i32, %c0_i32_0 : i32, i32
  }
  func.func @transform_12(%arg0: i32) -> (i32, i32) {
    %c0_i32 = arith.constant 0 : i32
    %c0_i32_0 = arith.constant 0 : i32
    %c0_i32_1 = arith.constant 0 : i32
    return %c0_i32, %c0_i32_0 : i32, i32
  }
  func.func @transform_13(%arg0: i32) -> (i32, i32) {
    %c0_i32 = arith.constant 0 : i32
    %c0_i32_0 = arith.constant 0 : i32
    %c0_i32_1 = arith.constant 0 : i32
    return %c0_i32, %c0_i32_0 : i32, i32
  }
  func.func @transform_14(%arg0: i32) -> (i32, i32) {
    %c0_i32 = arith.constant 0 : i32
    %c0_i32_0 = arith.constant 0 : i32
    %c0_i32_1 = arith.constant 0 : i32
    return %c0_i32, %c0_i32_0 : i32, i32
  }
  func.func @transform_15(%arg0: i32) -> (i32, i32, i32) {
    %c0_i32 = arith.constant 0 : i32
    %c0_i32_0 = arith.constant 0 : i32
    %c0_i32_1 = arith.constant 0 : i32
    return %arg0, %c0_i32, %c0_i32_0 : i32, i32, i32
  }
}

</mosaic_0001>

<bundles_post_ra>
// kernel: agent_forward.1
= control target key start
LH: loop header
LB: loop body
LE: loop exit
PB: predicated region body
PF: predicated region fallthrough
CT: control target
= control target key end

     0   :  { %s14383_s0 = inlined_call_operand.vmem [shape: f32[2,256,4], index: 0, kind: input, shape index: {}]   ;;  %s14384_s1 = inlined_call_operand.hbm [shape: bf16[9,256,256], index: 1, kind: input, shape index: {}]   ;;  %s14385_s2 = inlined_call_operand.vmem [shape: bf16[9,4,8], index: 2, kind: input, shape index: {}]   ;;  %s14386_s3 = inlined_call_operand.hbm [shape: f32[1,8], index: 3, kind: input, shape index: {}]   ;;  %s14387_s4 = inlined_call_operand.hbm [shape: bf16[9,64,256], index: 4, kind: input, shape index: {}]   ;;  %s14388_s5 = inlined_call_operand.vmem [shape: bf16[9,8,8], index: 5, kind: input, shape index: {}]   ;;  %s14389_s6 = inlined_call_operand.hbm [shape: f32[1,8], index: 6, kind: input, shape index: {}]   ;;  %s14390_s7 = inlined_call_operand.hbm [shape: bf16[8,256], index: 7, kind: input, shape index: {}]   ;;  %s14391_s8 = inlined_call_operand.hbm [shape: bf16[64,256], index: 8, kind: input, shape index: {}]   ;;  %s14392_s9 = inlined_call_operand.vmem [shape: bf16[256,32], index: 9, kind: input, shape index: {}]   ;;  %s14393_s10 = inlined_call_operand.hbm [shape: f32[1,32], index: 10, kind: input, shape index: {}]   ;;  %s14394_s11 = inlined_call_operand.hbm [shape: bf16[32,64], index: 11, kind: input, shape index: {}]   ;;  %s14395_s12 = inlined_call_operand.hbm [shape: f32[1,64], index: 12, kind: input, shape index: {}]   ;;  %s14396_s13 = inlined_call_operand.vmem [shape: bf16[64,6], index: 13, kind: input, shape index: {}]   ;;  %s14397_s14 = inlined_call_operand.hbm [shape: f32[1,6], index: 14, kind: input, shape index: {}]   ;;  %s14398_s15 = inlined_call_operand.hbm [shape: f32[2,1,6], index: 15, kind: output, shape index: {}]  }
   0x1   :  { %14413 = sst [smem:[#allocation82_spill]] %s14386_s3 }
   0x2   :  { %14414 = sst [smem:[#allocation83_spill]] %s14389_s6 }
   0x3   :  { %20 = vsyncpa [#allocation3], 0 }
   0x4   :  { %21 = vsyncpa [#allocation6], 0 }
   0x5   :  { %22 = vsyncpa [#allocation9], 0 }
   0x6   :  { %23 = vsyncpa [#allocation12], 0 }
   0x7   :  { %24 = vsyncpa [#allocation15], 0 }
   0x8   :  { %25 = vsyncpa [#allocation18], 0 }
   0x9   :  { %26 = vsyncpa [#allocation4], 0 }
   0xa   :  { %28 = vsyncpa [#allocation4 + $0x1], 0  ;;  %s12573_s18 = smov 0   ;;  %s12575_s19 = smov 0  }
   0xb   :  { %s12577_s20 = smov 0   ;;  %s12579_s21 = smov 0  }
   0xc LB: > { %14415 = sst [smem:[#allocation27_spill]] %s12461_s18  ;;  %s12594_s22 = sadd.s32 4294967295, %s12473_s21   ;;  %s12473_s21 = sphi %s12579_s21, %s14546_s21   ;;  %s12469_s20 = sphi %s12577_s20, %s14548_s20   ;;  %s12465_s19 = sphi %s12575_s19, %s14550_s19   ;;  %s12461_s18 = sphi %s12573_s18, %s14549_s18  }
   0xd   : > { %14416 = sst [smem:[#allocation28_spill]] %s12469_s20  ;;  %s8769_s23 = sadd.s32 4294967294, %s12473_s21  }
   0xe   : > { %14417 = sst [smem:[#allocation29_spill]] %s12473_s21  ;;  %s12598_s24 = sadd.s32 1, %s12473_s21  }
   0xf   : > { %14418 = sst [smem:[#allocation30_spill]] %s12598_s24  ;;  %s361_s25 = sadd.s32 1, %s12469_s20 }
  0x10   : > { %s358_s26 = ssub.s32 %s12473_s21, %s12598_s24  ;;  %p371_p0 = scmp.ne.s32.totalorder %s12469_s20, %s12465_s19 }
  0x11   : > { %p359_p1 = scmp.eq.s32.totalorder %s358_s26, 0  ;;  %p372_p2 = scmp.eq.s32.totalorder %s12594_s22, 1 }
  0x12   : > { %p377_p3 = scmp.ne.s32.totalorder %s12465_s19, %s12461_s18  ;;  %p378_p4 = scmp.eq.s32.totalorder %s8769_s23, 1 }
  0x13   : > { %s12609_s27 = scalar_select %p359_p1, %s12469_s20, %s361_s25  }
  0x14   : > { %p12611_p5 = por %p372_p2, %p371_p0  ;;  %p12615_p6 = por %p378_p4, %p377_p3 }
  0x15   : > { %14419 = sst [smem:[#allocation31_spill]] %s12609_s27  ;;  %p8770_p7 = scmp.ge.s32.totalorder %s12473_s21, 1 }
  0x16   : > { %s14420_s28 = scalar_select %p12611_p5, 1, 0 }
  0x17   : > { %s14421_s29 = scalar_select %p12615_p6, 1, 0 }
  0x18   : > { %p385_p8 = scmp.lt.s32.totalorder %s12473_s21, 3  ;;  %p14404_p9 = scmp.eq.s32.totalorder %s12594_s22, 0 }
  0x19   : > { %14422 = sst [smem:[#allocation32_spill]] %s14421_s29  ;;  %s12475_s16 = smov [#allocation5]  }
  0x1a   : > { %p12622_p10 = pnand %p8770_p7, %p385_p8  ;;  %s414_s17 = sshll.u32 %s12475_s16, 4  ;;  %s415_s17 = int_to_ptr.vmem [resolvable:$true] %s414_s17 }
  0x1b   : > { %s12476_s23 = smov [#allocation8]   ;;  %s12477_s27 = smov [#allocation11]  }
  0x1c   : > { %s14423_s30 = scalar_select %p12622_p10, 1, 0 }
  0x1d   : > { %p11460_p11 = pneg %p12622_p10  ;;  %s441_s25 = sshll.u32 %s12476_s23, 4  ;;  %s442_s25 = int_to_ptr.vmem [resolvable:$true] %s441_s25 }
  0x1e   : > { %s462_s20 = sshll.u32 %s12477_s27, 4  ;;  %s12140_s16 = scalar_lea.vmem %s415_s17, 16  ;;  %s463_s20 = int_to_ptr.vmem [resolvable:$true] %s462_s20 }
  0x1f   : > { %p12630_p12 = pnand %p14404_p9, %p11460_p11  ;;  %p12141_p0 = scmp.ne.s32.totalorder %s415_s17, %s12140_s16 }
  0x20   : > { %s12147_s23 = scalar_lea.vmem %s415_s17, 32  ;;  %p12148_p3 = scmp.lt.s32.totalorder %s415_s17, %s415_s17 }
  0x21   : > { %p12636_p13 = pneg %p12630_p12  ;;  %p12149_p4 = scmp.lt.s32.totalorder %s12147_s23, %s12140_s16 }
  0x23   : > { %p12143_p1 = pnand %p12141_p0, %p12636_p13  ;;  %p12150_p7 = por %p12149_p4, %p12148_p3 }
  0x25   : > { %p12144_p2 = pneg %p12143_p1 }
  0x27   : > { %p12151_p8 = pnand %p12150_p7, %p12144_p2 }
  0x29   : > { %12154 = shalt.err (!%p12151_p8)
}
  0x2a   : > { %s14426_s3 = sld [smem:[#allocation82_spill]]  ;;  %s12166_s18 = scalar_lea.vmem %s442_s25, 16 }
  0x2b   : > { %p12167_p11 = scmp.ne.s32.totalorder %s442_s25, %s12166_s18  ;;  %s12173_s21 = scalar_lea.vmem %s442_s25, 32 }
  0x2c   : > { %p12174_p0 = scmp.lt.s32.totalorder %s442_s25, %s442_s25  ;;  %p12175_p1 = scmp.lt.s32.totalorder %s12173_s21, %s12166_s18 }
  0x2d   : > { %p12169_p9 = pnand %p12167_p11, %p12636_p13 }
  0x2e   : > { %p12176_p5 = por %p12175_p1, %p12174_p0 }
  0x2f   : > { %p12170_p6 = pneg %p12169_p9 }
  0x30   : > { %11466 = dma.hbm_to_vmem [thread:$0]  (!%p12630_p12), %s14426_s3, 16, %s415_s17, [#allocation6]  }
  0x31   : > { %p12177_p10 = pnand %p12176_p5, %p12170_p6 }
  0x33   : > { %12180 = shalt.err (!%p12177_p10)
}
  0x34   : > { %s14427_s6 = sld [smem:[#allocation83_spill]]  ;;  %s12192_s29 = scalar_lea.vmem %s463_s20, 1024 }
  0x35   : > { %p12193_p2 = scmp.ne.s32.totalorder %s463_s20, %s12192_s29  ;;  %p12200_p9 = scmp.lt.s32.totalorder %s463_s20, %s463_s20 }
  0x36   : > { %p12201_p7 = scmp.lt.s32.totalorder %s12192_s29, %s12192_s29 }
  0x37   : > { %p12195_p3 = pnand %p12193_p2, %p12636_p13 }
  0x38   : > { %p12202_p8 = por %p12201_p7, %p12200_p9 }
  0x39   : > { %p12196_p4 = pneg %p12195_p3 }
  0x3a   : > { %11472 = dma.hbm_to_vmem [thread:$0]  (!%p12630_p12), %s14427_s6, 16, %s442_s25, [#allocation9]  }
  0x3b   : > { %p12203_p11 = pnand %p12202_p8, %p12196_p4 }
  0x3d   : > { %12206 = shalt.err (!%p12203_p11)
}
  0x3e   : > { %s14408_s18 = smov 128   ;;  %s14410_s21 = smov 8  }
  0x3f   : > { %11478 = dma.hbm_to_vmem [thread:$0]  (!%p12630_p12), %s14391_s8, 1024, %s463_s20, [#allocation12], %s14408_s18, %s14408_s18, %s14410_s21  }
  0x40   : > { %s12480_s27 = smov [#allocation14]  }
  0x41   : > { %s489_s16 = sshll.u32 %s12480_s27, 4  ;;  %s490_s16 = int_to_ptr.vmem [resolvable:$true] %s489_s16 }
  0x42   : > { %s12218_s23 = scalar_lea.vmem %s490_s16, 256  ;;  %p12226_p0 = scmp.lt.s32.totalorder %s490_s16, %s490_s16 }
  0x43   : > { %p12219_p5 = scmp.ne.s32.totalorder %s490_s16, %s12218_s23  ;;  %p12227_p1 = scmp.lt.s32.totalorder %s12218_s23, %s12218_s23 }
  0x45   : > { %p12221_p6 = pnand %p12219_p5, %p12636_p13  ;;  %p12228_p2 = por %p12227_p1, %p12226_p0 }
  0x47   : > { %p12222_p10 = pneg %p12221_p6 }
  0x49   : > { %p12229_p3 = pnand %p12228_p2, %p12222_p10 }
  0x4b   : > { %12232 = shalt.err (!%p12229_p3)
}
  0x4c   : > { %s12481_s29 = smov 64   ;;  %s12482_s3 = smov 4  }
  0x4d   : > { %11484 = dma.hbm_to_vmem [thread:$0]  (!%p12630_p12), %s14394_s11, 256, %s490_s16, [#allocation15], %s12481_s29, %s12481_s29, %s12482_s3  }
  0x4e   : > { %s12483_s25 = smov [#allocation2]   ;;  %s12484_s18 = smov [#allocation7]  }
  0x4f   : > { %s397_s27 = sshll.u32 %s12483_s25, 4  ;;  %s424_s21 = sshll.u32 %s12484_s18, 4  ;;  %s398_s27 = int_to_ptr.vmem [resolvable:$true] %s397_s27  ;;  %s425_s21 = int_to_ptr.vmem [resolvable:$true] %s424_s21 }
  0x50   : > { %s12244_s6 = scalar_lea.vmem %s398_s27, 36864  ;;  %p12252_p8 = scmp.lt.s32.totalorder %s398_s27, %s398_s27 }
  0x51   : > { %p12245_p4 = scmp.ne.s32.totalorder %s398_s27, %s12244_s6  ;;  %p12253_p11 = scmp.lt.s32.totalorder %s12244_s6, %s12244_s6 }
  0x53   : > { %p12247_p9 = pnand %p12245_p4, %p12636_p13  ;;  %p12254_p5 = por %p12253_p11, %p12252_p8 }
  0x55   : > { %p12248_p7 = pneg %p12247_p9 }
  0x57   : > { %p12255_p6 = pnand %p12254_p5, %p12248_p7 }
  0x59   : > { %12258 = shalt.err (!%p12255_p6)
}
  0x5a   : > { %s14428_s23 = smov 8   ;;  %s14429_s3 = smov 128  }
  0x5b   : > { %11463 = dma.hbm_to_vmem [thread:$0]  (!%p12630_p12), %s14384_s1, 36864, %s398_s27, [#allocation3], %s14429_s3, %s14429_s3, %s14428_s23  }
  0x5c   : > { %s12270_s18 = scalar_lea.vmem %s425_s21, 9216  ;;  %p12278_p2 = scmp.lt.s32.totalorder %s425_s21, %s425_s21 }
  0x5d   : > { %p12271_p10 = scmp.ne.s32.totalorder %s425_s21, %s12270_s18  ;;  %p12279_p3 = scmp.lt.s32.totalorder %s12270_s18, %s12270_s18 }
  0x5f   : > { %p12273_p0 = pnand %p12271_p10, %p12636_p13  ;;  %p12280_p4 = por %p12279_p3, %p12278_p2 }
  0x61   : > { %p12274_p1 = pneg %p12273_p0 }
  0x63   : > { %p12281_p9 = pnand %p12280_p4, %p12274_p1 }
  0x65   : > { %12284 = shalt.err (!%p12281_p9)
}
  0x66   : > { %11469 = dma.hbm_to_vmem [thread:$0]  (!%p12630_p12), %s14387_s4, 9216, %s425_s21, [#allocation6], %s14429_s3, %s14429_s3, %s14428_s23  }
  0x67   : > { %s12485_s20 = smov [#allocation10]   ;;  %s12486_s27 = smov [#allocation13]  }
  0x68   : > { %s452_s25 = sshll.u32 %s12485_s20, 4  ;;  %s479_s16 = sshll.u32 %s12486_s27, 4  ;;  %s453_s25 = int_to_ptr.vmem [resolvable:$true] %s452_s25  ;;  %s480_s16 = int_to_ptr.vmem [resolvable:$true] %s479_s16 }
  0x69   : > { %s12296_s29 = scalar_lea.vmem %s453_s25, 128  ;;  %p12304_p5 = scmp.lt.s32.totalorder %s453_s25, %s453_s25 }
  0x6a   : > { %p12297_p7 = scmp.ne.s32.totalorder %s453_s25, %s12296_s29  ;;  %p12305_p6 = scmp.lt.s32.totalorder %s12296_s29, %s12296_s29 }
  0x6c   : > { %p12299_p8 = pnand %p12297_p7, %p12636_p13  ;;  %p12306_p10 = por %p12305_p6, %p12304_p5 }
  0x6e   : > { %p12300_p11 = pneg %p12299_p8 }
  0x70   : > { %p12307_p0 = pnand %p12306_p10, %p12300_p11 }
  0x72   : > { %12310 = shalt.err (!%p12307_p0)
}
  0x73   : > { %11475 = dma.hbm_to_vmem [thread:$0]  (!%p12630_p12), %s14390_s7, 128, %s453_s25, [#allocation9]  }
  0x74   : > { %s12322_s23 = scalar_lea.vmem %s480_s16, 16  ;;  %s12329_s3 = scalar_lea.vmem %s480_s16, 32 }
  0x75   : > { %p12323_p1 = scmp.ne.s32.totalorder %s480_s16, %s12322_s23  ;;  %p12330_p4 = scmp.lt.s32.totalorder %s480_s16, %s480_s16 }
  0x76   : > { %p12331_p9 = scmp.lt.s32.totalorder %s12329_s3, %s12322_s23 }
  0x77   : > { %p12325_p2 = pnand %p12323_p1, %p12636_p13 }
  0x78   : > { %p12332_p7 = por %p12331_p9, %p12330_p4 }
  0x79   : > { %p12326_p3 = pneg %p12325_p2 }
  0x7b   : > { %p12333_p8 = pnand %p12332_p7, %p12326_p3 }
  0x7d   : > { %12336 = shalt.err (!%p12333_p8)
}
  0x7e   : > { %11481 = dma.hbm_to_vmem [thread:$0]  (!%p12630_p12), %s14393_s10, 16, %s480_s16, [#allocation12]  }
  0x7f   : > { %s12487_s20 = smov [#allocation16]   ;;  %s12488_s27 = smov [#allocation17]  }
  0x80   : > { %s503_s25 = sshll.u32 %s12487_s20, 4  ;;  %s517_s29 = sshll.u32 %s12488_s27, 4  ;;  %s504_s25 = int_to_ptr.vmem [resolvable:$true] %s503_s25  ;;  %s518_s29 = int_to_ptr.vmem [resolvable:$true] %s517_s29 }
  0x81   : > { %s12348_s18 = scalar_lea.vmem %s504_s25, 16  ;;  %s12355_s21 = scalar_lea.vmem %s504_s25, 32 }
  0x82   : > { %p12349_p11 = scmp.ne.s32.totalorder %s504_s25, %s12348_s18  ;;  %p12356_p10 = scmp.lt.s32.totalorder %s504_s25, %s504_s25 }
  0x83   : > { %p12357_p0 = scmp.lt.s32.totalorder %s12355_s21, %s12348_s18 }
  0x84   : > { %p12351_p5 = pnand %p12349_p11, %p12636_p13 }
  0x85   : > { %p12358_p1 = por %p12357_p0, %p12356_p10 }
  0x86   : > { %p12352_p6 = pneg %p12351_p5 }
  0x88   : > { %p12359_p2 = pnand %p12358_p1, %p12352_p6 }
  0x8a   : > { %12362 = shalt.err (!%p12359_p2)
}
  0x8b   : > { %11487 = dma.hbm_to_vmem [thread:$0]  (!%p12630_p12), %s14395_s12, 16, %s504_s25, [#allocation15]  }
  0x8c   : > { %s12374_s3 = scalar_lea.vmem %s518_s29, 16  ;;  %s12381_s6 = scalar_lea.vmem %s518_s29, 32 }
  0x8d   : > { %p12375_p3 = scmp.ne.s32.totalorder %s518_s29, %s12374_s3  ;;  %p12382_p7 = scmp.lt.s32.totalorder %s518_s29, %s518_s29 }
  0x8e   : > { %p12383_p8 = scmp.lt.s32.totalorder %s12381_s6, %s12374_s3 }
  0x8f   : > { %p12377_p4 = pnand %p12375_p3, %p12636_p13 }
  0x90   : > { %p12384_p11 = por %p12383_p8, %p12382_p7 }
  0x91   : > { %p12378_p9 = pneg %p12377_p4 }
  0x93   : > { %p12385_p5 = pnand %p12384_p11, %p12378_p9 }
  0x95   : > { %12388 = shalt.err (!%p12385_p5)
}
  0x96   : > { %11490 = dma.hbm_to_vmem [thread:$0]  (!%p12630_p12), %s14397_s14, 16, %s518_s29, [#allocation18]  }
  0x97   : > { %p14430_p6 = scmp.ne.s32.totalorder %s14423_s30, 0 }
  0x99   : > { %538 = sbr.rel (%p14430_p6) target bundleno = 5465 (0x1559), region = 80 }
  0x9e   : > { %p14431_p10 = scmp.eq.s32.totalorder %s12594_s22, 0 }
  0xa0   : > { %12432 = dma.done.wait (%p14431_p10), [#allocation3], 36864   ;;  %p14432_p13 = pmov %p14431_p10 }
  0xa1   : > { %p14433_p0 = pmov %p14431_p10 }
  0xa2   : > { %12434 = vsyncadd (%p14432_p13), [#allocation3], 4294930432 }
  0xa3   : > { %12436 = dma.done.wait (%p14433_p0), [#allocation6], 9232   ;;  %p14434_p1 = pmov %p14433_p0 }
  0xa4   : > { %p14435_p2 = pmov %p14433_p0 }
  0xa5   : > { %12438 = vsyncadd (%p14434_p1), [#allocation6], 4294958064 }
  0xa6   : > { %12440 = dma.done.wait (%p14435_p2), [#allocation9], 144   ;;  %p14436_p12 = pmov %p14433_p0 }
  0xa7   : > { %p14437_p3 = pmov %p14433_p0 }
  0xa8   : > { %12442 = vsyncadd (%p14436_p12), [#allocation9], 4294967152 }
  0xa9   : > { %12444 = dma.done.wait (%p14437_p3), [#allocation12], 1040   ;;  %p14438_p4 = pmov %p14433_p0 }
  0xaa   : > { %p14439_p9 = pmov %p14433_p0 }
  0xab   : > { %12446 = vsyncadd (%p14438_p4), [#allocation12], 4294966256 }
  0xac   : > { %12448 = dma.done.wait (%p14439_p9), [#allocation15], 272   ;;  %p14440_p7 = pmov %p14433_p0 }
  0xad   : > { %p14441_p8 = pmov %p14433_p0 }
  0xae   : > { %12450 = vsyncadd (%p14440_p7), [#allocation15], 4294967024 }
  0xaf   : > { %12452 = dma.done.wait (%p14441_p8), [#allocation18], 16   ;;  %p14442_p11 = pmov %p14433_p0 }
  0xb0   : > { %p621_p5 = scmp.lt.s32.totalorder %s12594_s22, 1  ;;  %v11567_v27 = vld [vmem:[#allocation2 + $0x4] ss:$8 sps:$4 sm:$0xff]   ;;  %v11565_v50 = vld [vmem:[#allocation2] ss:$8 sps:$4 sm:$0xff]   ;;  %vm1466_vm0 = vcmask 1041408  }
  0xb1   : > { %12454 = vsyncadd (%p14442_p11), [#allocation18], 4294967280  ;;  %v11570_v31 = vld [vmem:[#allocation2 + $0x104] ss:$8 sps:$4 sm:$0xff]   ;;  %899 = vmatprep.mubr.bf16.mxu0 %v11567_v27  ;;  %v11568_v51 = vld [vmem:[#allocation2 + $0x100] ss:$8 sps:$4 sm:$0xff]  }
  0xb2   : > { %s622_s24 = scalar_select %p621_p5, %s12594_s22, 1  ;;  %1270 = vmatprep.mubr.bf16.mxu1 %v11570_v31  ;;  %v11571_v52 = vld [vmem:[#allocation2 + $0x14] ss:$8 sps:$4 sm:$0xff]   ;;  %v11575_v54 = vld [vmem:[#allocation2 + $0x10] ss:$8 sps:$4 sm:$0xff]   ;;  %vm1417_vm1 = vcmask 31744  }
  0xb3   : > { %v11573_v53 = vld [vmem:[#allocation2 + $0x114] ss:$8 sps:$4 sm:$0xff]   ;;  %v11576_v55 = vld [vmem:[#allocation2 + $0x110] ss:$8 sps:$4 sm:$0xff]   ;;  %v11577_v56 = vld [vmem:[#allocation2 + $0x24] ss:$8 sps:$4 sm:$0xff]  }
  0xb4   : > { %s9387_s30 = sshll.u32 %s622_s24, 8  ;;  %v11579_v57 = vld [vmem:[#allocation2 + $0x124] ss:$8 sps:$4 sm:$0xff]   ;;  %v11581_v58 = vld [vmem:[#allocation2 + $0x20] ss:$8 sps:$4 sm:$0xff]   ;;  %vm6493_vm2 = vcmask 1043456  }
  0xb5   : > { %s12750_s27 = scalar_lea.vmem %s14383_s0, %s9387_s30  ;;  %v11582_v59 = vld [vmem:[#allocation2 + $0x120] ss:$8 sps:$4 sm:$0xff]   ;;  %v11583_v60 = vld [vmem:[#allocation2 + $0x34] ss:$8 sps:$4 sm:$0xff]   ;;  %v11587_v62 = vld [vmem:[#allocation2 + $0x30] ss:$8 sps:$4 sm:$0xff]  }
  0xb6   : > { %v657_v0 = vld [vmem:[%s12750_s27 + $0xf0] sm:$0xff]  ;;  %v658_v1 = vld [vmem:[%s12750_s27 + $0xf8] sm:$0xff]  ;;  %v655_v5 = vld [vmem:[%s12750_s27 + $0xe0] sm:$0xff]  ;;  %vm6480_vm3 = vcmask 64512   ;;  %vm12491_vm4 = vmmov 0   ;;  %vm8478_vm5 = vcmask 261120  }
  0xb7   : > { %v641_v2 = vld [vmem:[%s12750_s27 + $0x70] sm:$0xff]  ;;  %v12755_v3 = vpack.c.bf16 %v658_v1, %v657_v0  ;;  %v642_v4 = vld [vmem:[%s12750_s27 + $0x78] sm:$0xff]  ;;  %v656_v6 = vld [vmem:[%s12750_s27 + $0xe8] sm:$0xff]  ;;  %vm8557_vm6 = vcmask 523264   ;;  %s619_s6 = sand.u32 1, %s12465_s19   ;;  %s9384_s17 = sshll.u32 %s12594_s22, 4 }
  0xb8   : > { %v12760_v7 = vpack.c.bf16 %v642_v4, %v641_v2  ;;  %v12762_v8 = vpack.c.bf16 %v656_v6, %v655_v5  ;;  %v639_v9 = vld [vmem:[%s12750_s27 + $0x60] sm:$0xff]  ;;  %v640_v10 = vld [vmem:[%s12750_s27 + $0x68] sm:$0xff]  ;;  %v653_v11 = vld [vmem:[%s12750_s27 + $0xd0] sm:$0xff]  ;;  %s620_s20 = scalar_lea.vmem [#allocation19], %s619_s6  ;;  %vm8601_vm7 = vcmask 40960   ;;  %s14342_s25 = scalar_lea.hbm %s14398_s15, %s9384_s17 }
  0xb9   : > { %9388 = vmatprep.subr.bf16.mxu0 %v12755_v3  ;;  %9500 = vmatprep.subr.bf16.mxu1 %v12755_v3  ;;  %v654_v12 = vld [vmem:[%s12750_s27 + $0xd8] sm:$0xff]  ;;  %v12772_v13 = vpack.c.bf16 %v640_v10, %v639_v9  ;;  %v637_v15 = vld [vmem:[%s12750_s27 + $0x50] sm:$0xff]  ;;  %v651_v17 = vld [vmem:[%s12750_s27 + $0xc0] sm:$0xff]  ;;  %s8616_s24 = sshll.u32 %s620_s20, 4  ;;  %p14541_p10 = scmp.ne.s32.totalorder %s14420_s28, 0  ;;  %s14344_s24 = int_to_ptr.vmem [resolvable:$true] %s8616_s24 }
  0xba   : > { %9389 = vmatpush3.bf16.msra.mxu0 %v12760_v7  ;;  %9501 = vmatpush3.bf16.msra.mxu1 %v12760_v7  ;;  %v12776_v14 = vpack.c.bf16 %v654_v12, %v653_v11  ;;  %v638_v16 = vld [vmem:[%s12750_s27 + $0x58] sm:$0xff]  ;;  %v652_v18 = vld [vmem:[%s12750_s27 + $0xc8] sm:$0xff]  ;;  %v635_v21 = vld [vmem:[%s12750_s27 + $0x40] sm:$0xff]  ;;  %s12389_s22 = scalar_lea.vmem %s14344_s24, 16  ;;  %s12492_s29 = smov [#allocation19]  }
  0xbb   : > { %9390 = vmatprep.subr.bf16.mxu0 %v12762_v8  ;;  %9502 = vmatprep.subr.bf16.mxu1 %v12762_v8  ;;  %v12784_v19 = vpack.c.bf16 %v638_v16, %v637_v15  ;;  %v12788_v20 = vpack.c.bf16 %v652_v18, %v651_v17  ;;  %v636_v22 = vld [vmem:[%s12750_s27 + $0x48] sm:$0xff]  ;;  %v649_v23 = vld [vmem:[%s12750_s27 + $0xb0] sm:$0xff]  ;;  %v650_v24 = vld [vmem:[%s12750_s27 + $0xb8] sm:$0xff]  ;;  %p12390_p6 = scmp.ne.s32.totalorder %s14344_s24, %s12389_s22  ;;  %s12393_s18 = sshll.u32 %s12492_s29, 4  ;;  %s12394_s18 = int_to_ptr.vmem [resolvable:$false] %s12393_s18 }
  0xbc   : > { %v633_v25 = vld [vmem:[%s12750_s27 + $0x30] sm:$0xff]  ;;  %v634_v26 = vld [vmem:[%s12750_s27 + $0x38] sm:$0xff]  ;;  %v12798_v28 = vpack.c.bf16 %v636_v22, %v635_v21  ;;  %v647_v29 = vld [vmem:[%s12750_s27 + $0xa0] sm:$0xff]  ;;  %v12803_v30 = vpack.c.bf16 %v650_v24, %v649_v23  ;;  %s12395_s21 = scalar_lea.vmem %s12394_s18, 32  ;;  %p12396_p1 = scmp.lt.s32.totalorder %s14344_s24, %s12394_s18 }
  0xbd   : > { %v648_v32 = vld [vmem:[%s12750_s27 + $0xa8] sm:$0xff]  ;;  %v12808_v33 = vpack.c.bf16 %v634_v26, %v633_v25  ;;  %v631_v34 = vld [vmem:[%s12750_s27 + $0x20] sm:$0xff]  ;;  %v645_v37 = vld [vmem:[%s12750_s27 + $0x90] sm:$0xff]  ;;  %p12391_p13 = pnand %p12390_p6, %p14541_p10  ;;  %p12397_p2 = scmp.lt.s32.totalorder %s12395_s21, %s12389_s22 }
  0xbe   : > { %9391 = vmatpush3.bf16.msra.mxu0 %v12772_v13  ;;  %9503 = vmatpush3.bf16.msra.mxu1 %v12772_v13  ;;  %v12813_v35 = vpack.c.bf16 %v648_v32, %v647_v29  ;;  %v632_v36 = vld [vmem:[%s12750_s27 + $0x28] sm:$0xff]  ;;  %v646_v38 = vld [vmem:[%s12750_s27 + $0x98] sm:$0xff]  ;;  %v629_v40 = vld [vmem:[%s12750_s27 + $0x10] sm:$0xff] }
  0xbf   : > { %9392 = vmatprep.subr.bf16.mxu0 %v12776_v14  ;;  %9504 = vmatprep.subr.bf16.mxu1 %v12776_v14  ;;  %v12820_v39 = vpack.c.bf16 %v632_v36, %v631_v34  ;;  %v630_v41 = vld [vmem:[%s12750_s27 + $0x18] sm:$0xff]  ;;  %v12826_v42 = vpack.c.bf16 %v646_v38, %v645_v37  ;;  %v643_v43 = vld [vmem:[%s12750_s27 + $0x80] sm:$0xff]  ;;  %v644_v44 = vld [vmem:[%s12750_s27 + $0x88] sm:$0xff]  ;;  %p12392_p0 = pneg %p12391_p13  ;;  %p12398_p12 = por %p12397_p2, %p12396_p1 }
  0xc0   : > { %v12832_v45 = vpack.c.bf16 %v630_v41, %v629_v40  ;;  %v627_v46 = vld [vmem:[%s12750_s27] sm:$0xff]  ;;  %v12837_v47 = vpack.c.bf16 %v644_v44, %v643_v43  ;;  %v628_v48 = vld [vmem:[%s12750_s27 + $0x8] sm:$0xff]  ;;  %v11585_v61 = vld [vmem:[#allocation2 + $0x134] ss:$8 sps:$4 sm:$0xff]   ;;  %s8604_s27 = scalar_lea.sflag [#allocation4], %s619_s6 }
  0xc1   : > { %v12842_v49 = vpack.c.bf16 %v628_v48, %v627_v46  ;;  %v11588_v63 = vld [vmem:[#allocation2 + $0x130] ss:$8 sps:$4 sm:$0xff]   ;;  %v8859_v0 = vld [vmem:[%s14385_s2 + $0x2] sm:$0x3]  ;;  %v11589_v1 = vld [vmem:[#allocation2 + $0x44] ss:$8 sps:$4 sm:$0xff]   ;;  %p12399_p3 = pnand %p12398_p12, %p12392_p0 }
  0xc2   : > { %9393 = vmatpush3.bf16.msra.mxu0 %v12784_v19  ;;  %9505 = vmatpush3.bf16.msra.mxu1 %v12784_v19  ;;  %v11591_v2 = vld [vmem:[#allocation2 + $0x144] ss:$8 sps:$4 sm:$0xff]   ;;  %v1468_v4 = vsel %vm1466_vm0, %v8859_v0, 0  ;;  %v11593_v5 = vld [vmem:[#allocation2 + $0x40] ss:$8 sps:$4 sm:$0xff]  }
  0xc3   : > { %9394 = vmatprep.subr.bf16.mxu0 %v12788_v20  ;;  %9506 = vmatprep.subr.bf16.mxu1 %v12788_v20  ;;  %v11594_v6 = vld [vmem:[#allocation2 + $0x140] ss:$8 sps:$4 sm:$0xff]   ;;  %v11595_v9 = vld [vmem:[#allocation2 + $0x54] ss:$8 sps:$4 sm:$0xff]   ;;  %v11599_v11 = vld [vmem:[#allocation2 + $0x50] ss:$8 sps:$4 sm:$0xff]  }
  0xc4   : > { %v11597_v10 = vld [vmem:[#allocation2 + $0x154] ss:$8 sps:$4 sm:$0xff]   ;;  %v11600_v12 = vld [vmem:[#allocation2 + $0x150] ss:$8 sps:$4 sm:$0xff]   ;;  %v11601_v15 = vld [vmem:[#allocation2 + $0x64] ss:$8 sps:$4 sm:$0xff]  }
  0xc5   : > { %v11603_v16 = vld [vmem:[#allocation2 + $0x164] ss:$8 sps:$4 sm:$0xff]   ;;  %v11605_v17 = vld [vmem:[#allocation2 + $0x60] ss:$8 sps:$4 sm:$0xff]   ;;  %v11607_v21 = vld [vmem:[#allocation2 + $0x74] ss:$8 sps:$4 sm:$0xff]  }
  0xc6   : > { %9395 = vmatpush3.bf16.msra.mxu0 %v12798_v28  ;;  %9507 = vmatpush3.bf16.msra.mxu1 %v12798_v28  ;;  %v11606_v18 = vld [vmem:[#allocation2 + $0x160] ss:$8 sps:$4 sm:$0xff]   ;;  %v11609_v22 = vld [vmem:[#allocation2 + $0x174] ss:$8 sps:$4 sm:$0xff]   ;;  %v11611_v23 = vld [vmem:[#allocation2 + $0x70] ss:$8 sps:$4 sm:$0xff]  }
  0xc7   : > { %9396 = vmatprep.subr.bf16.mxu0 %v12803_v30  ;;  %9508 = vmatprep.subr.bf16.mxu1 %v12803_v30  ;;  %v11612_v24 = vld [vmem:[#allocation2 + $0x170] ss:$8 sps:$4 sm:$0xff]   ;;  %v11613_v25 = vld [vmem:[#allocation2 + $0x84] ss:$8 sps:$4 sm:$0xff]   ;;  %v11617_v27 = vld [vmem:[#allocation2 + $0x80] ss:$8 sps:$4 sm:$0xff]  }
  0xc8   : > { %v11615_v26 = vld [vmem:[#allocation2 + $0x184] ss:$8 sps:$4 sm:$0xff]   ;;  %v11618_v29 = vld [vmem:[#allocation2 + $0x180] ss:$8 sps:$4 sm:$0xff]   ;;  %v11619_v31 = vld [vmem:[#allocation2 + $0x94] ss:$8 sps:$4 sm:$0xff]  }
  0xc9   : > { %v11621_v32 = vld [vmem:[#allocation2 + $0x194] ss:$8 sps:$4 sm:$0xff]   ;;  %v11623_v34 = vld [vmem:[#allocation2 + $0x90] ss:$8 sps:$4 sm:$0xff]   ;;  %v11625_v37 = vld [vmem:[#allocation2 + $0xa4] ss:$8 sps:$4 sm:$0xff]  }
  0xca   : > { %9397 = vmatpush3.bf16.msra.mxu0 %v12808_v33  ;;  %9509 = vmatpush3.bf16.msra.mxu1 %v12808_v33  ;;  %v11624_v36 = vld [vmem:[#allocation2 + $0x190] ss:$8 sps:$4 sm:$0xff]   ;;  %v11627_v38 = vld [vmem:[#allocation2 + $0x1a4] ss:$8 sps:$4 sm:$0xff]   ;;  %v11629_v40 = vld [vmem:[#allocation2 + $0xa0] ss:$8 sps:$4 sm:$0xff]  }
  0xcb   : > { %9398 = vmatprep.subr.bf16.mxu0 %v12813_v35  ;;  %9510 = vmatprep.subr.bf16.mxu1 %v12813_v35  ;;  %v11630_v41 = vld [vmem:[#allocation2 + $0x1a0] ss:$8 sps:$4 sm:$0xff]   ;;  %v11631_v43 = vld [vmem:[#allocation2 + $0xb4] ss:$8 sps:$4 sm:$0xff]  }
  0xcc   : > { %v11633_v44 = vld [vmem:[#allocation2 + $0x1b4] ss:$8 sps:$4 sm:$0xff]   ;;  %v1028_v46 = vld [vmem:[%s14385_s2] sm:$0x3] }
  0xcd   : > { %v1680_v48 = vsel %vm1466_vm0, %v1028_v46, 0 }
  0xce   : > { %9399 = vmatpush3.bf16.msra.mxu0 %v12820_v39  ;;  %9511 = vmatpush3.bf16.msra.mxu1 %v12820_v39 }
  0xcf   : > { %9400 = vmatprep.subr.bf16.mxu0 %v12826_v42  ;;  %9512 = vmatprep.subr.bf16.mxu1 %v12826_v42 }
  0xd2   : > { %9401 = vmatpush3.bf16.msra.mxu0 %v12832_v45  ;;  %9513 = vmatpush3.bf16.msra.mxu1 %v12832_v45 }
  0xd3   : > { %9402 = vmatprep.subr.bf16.mxu0 %v12837_v47  ;;  %9514 = vmatprep.subr.bf16.mxu1 %v12837_v47 }
  0xd6   : > { %9403 = vmatpush3.bf16.msra.mxu0 %v12842_v49  ;;  %9515 = vmatpush3.bf16.msra.mxu1 %v12842_v49 }
  0xd7   : > { %11400 = vmatprep.subr.msk.bf16.mxu0 %vm1466_vm0, %v8859_v0  ;;  %11401 = vmatprep.subr.msk.bf16.mxu1 %vm1466_vm0, %v1028_v46  ;;  %v11655_v0 = vld [vmem:[#allocation2 + $0xf4] ss:$8 sps:$4 sm:$0xff]  }
  0xd9   : > { %900 = vmatmul.mubr.bf16.vlgmr.msra.gmra.mxu0 %v11565_v50  ;;  %1271 = vmatmul.mubr.bf16.vlgmr.msra.gmra.mxu1 %v11568_v51  ;;  %v11635_v50 = vld [vmem:[#allocation2 + $0xb0] ss:$8 sps:$4 sm:$0xff]  }
  0xda   : > { %907 = vmatprep.mubr.bf16.mxu0 %v11571_v52  ;;  %1278 = vmatprep.mubr.bf16.mxu1 %v11573_v53  ;;  %v11636_v51 = vld [vmem:[#allocation2 + $0x1b0] ss:$8 sps:$4 sm:$0xff]   ;;  %v11637_v52 = vld [vmem:[#allocation2 + $0xc4] ss:$8 sps:$4 sm:$0xff]  }
  0xdb   : > { %10985 = vmatpush3.bf16.msra.mxu0 %v1468_v4  ;;  %11019 = vmatpush3.bf16.msra.mxu1 %v1680_v48  ;;  %v11639_v53 = vld [vmem:[#allocation2 + $0x1c4] ss:$8 sps:$4 sm:$0xff]   ;;  %v11660_v4 = vld [vmem:[#allocation2 + $0x1f0] ss:$8 sps:$4 sm:$0xff]  }
  0xdc   : > { %9646 = vmatprep.subr.bf16.mxu0 %v12755_v3 }
  0xe1   : > { %908 = vmatmul.mubr.bf16.gmra.mxu0 %v11575_v54  ;;  %1279 = vmatmul.mubr.bf16.gmra.mxu1 %v11576_v55  ;;  %v11641_v54 = vld [vmem:[#allocation2 + $0xc0] ss:$8 sps:$4 sm:$0xff]  }
  0xe2   : > { %915 = vmatprep.mubr.bf16.mxu0 %v11577_v56  ;;  %1286 = vmatprep.mubr.bf16.mxu1 %v11579_v57  ;;  %v11642_v55 = vld [vmem:[#allocation2 + $0x1c0] ss:$8 sps:$4 sm:$0xff]   ;;  %v11643_v56 = vld [vmem:[#allocation2 + $0xd4] ss:$8 sps:$4 sm:$0xff]  }
  0xe3   : > { %v11645_v57 = vld [vmem:[#allocation2 + $0x1d4] ss:$8 sps:$4 sm:$0xff]  }
  0xe9   : > { %916 = vmatmul.mubr.bf16.gmra.mxu0 %v11581_v58  ;;  %1287 = vmatmul.mubr.bf16.gmra.mxu1 %v11582_v59  ;;  %v11647_v58 = vld [vmem:[#allocation2 + $0xd0] ss:$8 sps:$4 sm:$0xff]  }
  0xea   : > { %923 = vmatprep.mubr.bf16.mxu0 %v11583_v60  ;;  %1294 = vmatprep.mubr.bf16.mxu1 %v11585_v61  ;;  %v11648_v59 = vld [vmem:[#allocation2 + $0x1d0] ss:$8 sps:$4 sm:$0xff]   ;;  %v11649_v60 = vld [vmem:[#allocation2 + $0xe4] ss:$8 sps:$4 sm:$0xff]  }
  0xeb   : > { %v11651_v61 = vld [vmem:[#allocation2 + $0x1e4] ss:$8 sps:$4 sm:$0xff]  }
  0xf1   : > { %924 = vmatmul.mubr.bf16.gmra.mxu0 %v11587_v62  ;;  %1295 = vmatmul.mubr.bf16.gmra.mxu1 %v11588_v63  ;;  %v11653_v62 = vld [vmem:[#allocation2 + $0xe0] ss:$8 sps:$4 sm:$0xff]  }
  0xf2   : > { %931 = vmatprep.mubr.bf16.mxu0 %v11589_v1  ;;  %1302 = vmatprep.mubr.bf16.mxu1 %v11591_v2  ;;  %v11654_v63 = vld [vmem:[#allocation2 + $0x1e0] ss:$8 sps:$4 sm:$0xff]   ;;  %v11657_v1 = vld [vmem:[#allocation2 + $0x1f4] ss:$8 sps:$4 sm:$0xff]   ;;  %v11659_v2 = vld [vmem:[#allocation2 + $0xf0] ss:$8 sps:$4 sm:$0xff]  }
  0xf9   : > { %932 = vmatmul.mubr.bf16.gmra.mxu0 %v11593_v5  ;;  %1303 = vmatmul.mubr.bf16.gmra.mxu1 %v11594_v6 }
  0xfa   : > { %939 = vmatprep.mubr.bf16.mxu0 %v11595_v9  ;;  %1310 = vmatprep.mubr.bf16.mxu1 %v11597_v10 }
 0x101   : > { %940 = vmatmul.mubr.bf16.gmra.mxu0 %v11599_v11  ;;  %1311 = vmatmul.mubr.bf16.gmra.mxu1 %v11600_v12 }
 0x102   : > { %947 = vmatprep.mubr.bf16.mxu0 %v11601_v15  ;;  %1318 = vmatprep.mubr.bf16.mxu1 %v11603_v16 }
 0x109   : > { %948 = vmatmul.mubr.bf16.gmra.mxu0 %v11605_v17  ;;  %1319 = vmatmul.mubr.bf16.gmra.mxu1 %v11606_v18 }
 0x10a   : > { %955 = vmatprep.mubr.bf16.mxu0 %v11607_v21  ;;  %1326 = vmatprep.mubr.bf16.mxu1 %v11609_v22 }
 0x111   : > { %956 = vmatmul.mubr.bf16.gmra.mxu0 %v11611_v23  ;;  %1327 = vmatmul.mubr.bf16.gmra.mxu1 %v11612_v24 }
 0x112   : > { %963 = vmatprep.mubr.bf16.mxu0 %v11613_v25  ;;  %1334 = vmatprep.mubr.bf16.mxu1 %v11615_v26 }
 0x119   : > { %964 = vmatmul.mubr.bf16.gmra.mxu0 %v11617_v27  ;;  %1335 = vmatmul.mubr.bf16.gmra.mxu1 %v11618_v29 }
 0x11a   : > { %971 = vmatprep.mubr.bf16.mxu0 %v11619_v31  ;;  %1342 = vmatprep.mubr.bf16.mxu1 %v11621_v32 }
 0x121   : > { %972 = vmatmul.mubr.bf16.gmra.mxu0 %v11623_v34  ;;  %1343 = vmatmul.mubr.bf16.gmra.mxu1 %v11624_v36 }
 0x122   : > { %979 = vmatprep.mubr.bf16.mxu0 %v11625_v37  ;;  %1350 = vmatprep.mubr.bf16.mxu1 %v11627_v38 }
 0x129   : > { %980 = vmatmul.mubr.bf16.gmra.mxu0 %v11629_v40  ;;  %1351 = vmatmul.mubr.bf16.gmra.mxu1 %v11630_v41 }
 0x12a   : > { %987 = vmatprep.mubr.bf16.mxu0 %v11631_v43  ;;  %1358 = vmatprep.mubr.bf16.mxu1 %v11633_v44 }
 0x131   : > { %988 = vmatmul.mubr.bf16.gmra.mxu0 %v11635_v50  ;;  %1359 = vmatmul.mubr.bf16.gmra.mxu1 %v11636_v51 }
 0x132   : > { %995 = vmatprep.mubr.bf16.mxu0 %v11637_v52  ;;  %1366 = vmatprep.mubr.bf16.mxu1 %v11639_v53 }
 0x139   : > { %996 = vmatmul.mubr.bf16.gmra.mxu0 %v11641_v54  ;;  %1367 = vmatmul.mubr.bf16.gmra.mxu1 %v11642_v55 }
 0x13a   : > { %1003 = vmatprep.mubr.bf16.mxu0 %v11643_v56  ;;  %1374 = vmatprep.mubr.bf16.mxu1 %v11645_v57 }
 0x141   : > { %1004 = vmatmul.mubr.bf16.gmra.mxu0 %v11647_v58  ;;  %1375 = vmatmul.mubr.bf16.gmra.mxu1 %v11648_v59 }
 0x142   : > { %1011 = vmatprep.mubr.bf16.mxu0 %v11649_v60  ;;  %1382 = vmatprep.mubr.bf16.mxu1 %v11651_v61 }
 0x149   : > { %1012 = vmatmul.mubr.bf16.gmra.mxu0 %v11653_v62  ;;  %1383 = vmatmul.mubr.bf16.gmra.mxu1 %v11654_v63 }
 0x14a   : > { %1019 = vmatprep.mubr.bf16.mxu0 %v11655_v0  ;;  %1390 = vmatprep.mubr.bf16.mxu1 %v11657_v1 }
 0x151   : > { %1020 = vmatmul.mubr.bf16.gmra.mxu0 %v11659_v2  ;;  %1391 = vmatmul.mubr.bf16.gmra.mxu1 %v11660_v4 }
 0x199   : > { %v9404_v5 = vpop.f32.mrf.mxu0  ;;  %v9516_v6 = vpop.f32.mrf.mxu1 }
 0x19b   : > { %v9405_v9 = vpop.f32.mrf.mxu0  ;;  %v9517_v10 = vpop.f32.mrf.mxu1 }
 0x19c   : > { %v9406_v15 = vadd.f32 %v9405_v9, %v9404_v5  ;;  %v9518_v18 = vadd.f32 %v9517_v10, %v9516_v6 }
 0x19d   : > { %v9407_v11 = vpop.f32.mrf.mxu0  ;;  %v9519_v12 = vpop.f32.mrf.mxu1 }
 0x19f   : > { %v9408_v16 = vpop.f32.mrf.mxu0  ;;  %v9520_v17 = vpop.f32.mrf.mxu1 }
 0x1a0   : > { %v9409_v21 = vadd.f32 %v9408_v16, %v9407_v11  ;;  %v9521_v22 = vadd.f32 %v9520_v17, %v9519_v12 }
 0x1a1   : > { %v9410_v23 = vpop.f32.mrf.mxu0  ;;  %v9522_v24 = vpop.f32.mrf.mxu1 }
 0x1a2   : > { %v1029_v25 = vpack.c.bf16 %v9409_v21, %v9406_v15  ;;  %v1401_v26 = vpack.c.bf16 %v9521_v22, %v9518_v18 }
 0x1a3   : > { %v9411_v27 = vpop.f32.mrf.mxu0  ;;  %v9523_v29 = vpop.f32.mrf.mxu1 }
 0x1a4   : > { %10986 = vmatprep.mubr.msk.bf16.mxu0 %vm1417_vm1, %v1401_v26  ;;  %11020 = vmatprep.mubr.msk.bf16.mxu1 %vm1417_vm1, %v1029_v25  ;;  %v9412_v34 = vadd.f32 %v9411_v27, %v9410_v23  ;;  %v9524_v38 = vadd.f32 %v9523_v29, %v9522_v24 }
 0x1a5   : > { %v9413_v31 = vpop.f32.mrf.mxu0  ;;  %v9525_v32 = vpop.f32.mrf.mxu1 }
 0x1a7   : > { %v9414_v36 = vpop.f32.mrf.mxu0  ;;  %v9526_v37 = vpop.f32.mrf.mxu1 }
 0x1a8   : > { %v9415_v40 = vadd.f32 %v9414_v36, %v9413_v31  ;;  %v9527_v41 = vadd.f32 %v9526_v37, %v9525_v32 }
 0x1a9   : > { %v9416_v43 = vpop.f32.mrf.mxu0  ;;  %v9528_v44 = vpop.f32.mrf.mxu1 }
 0x1aa   : > { %v1030_v46 = vpack.c.bf16 %v9415_v40, %v9412_v34  ;;  %v1402_v48 = vpack.c.bf16 %v9527_v41, %v9524_v38 }
 0x1ab   : > { %v9417_v50 = vpop.f32.mrf.mxu0  ;;  %v9529_v51 = vpop.f32.mrf.mxu1 }
 0x1ac   : > { %10987 = vmatmul.mubr.msk.bf16.vlgmr.msra.gmra.mxu0 %vm1417_vm1, %v1402_v48  ;;  %11021 = vmatmul.mubr.msk.bf16.vlgmr.msra.gmra.mxu1 %vm1417_vm1, %v1030_v46  ;;  %v9418_v54 = vadd.f32 %v9417_v50, %v9416_v43  ;;  %v9530_v57 = vadd.f32 %v9529_v51, %v9528_v44 }
 0x1ad   : > { %v9419_v52 = vpop.f32.mrf.mxu0  ;;  %v9531_v53 = vpop.f32.mrf.mxu1  ;;  %9647 = vmatpush3.bf16.msra.mxu0 %v12760_v7 }
 0x1ae   : > { %9648 = vmatprep.subr.bf16.mxu0 %v12762_v8 }
 0x1af   : > { %v9420_v55 = vpop.f32.mrf.mxu0  ;;  %v9532_v56 = vpop.f32.mrf.mxu1 }
 0x1b0   : > { %v9421_v58 = vadd.f32 %v9420_v55, %v9419_v52  ;;  %v9533_v59 = vadd.f32 %v9532_v56, %v9531_v53 }
 0x1b1   : > { %v9422_v60 = vpop.f32.mrf.mxu0  ;;  %v9534_v61 = vpop.f32.mrf.mxu1  ;;  %9649 = vmatpush3.bf16.msra.mxu0 %v12772_v13 }
 0x1b2   : > { %v1031_v62 = vpack.c.bf16 %v9421_v58, %v9418_v54  ;;  %v1403_v63 = vpack.c.bf16 %v9533_v59, %v9530_v57  ;;  %9650 = vmatprep.subr.bf16.mxu0 %v12776_v14 }
 0x1b3   : > { %v9423_v0 = vpop.f32.mrf.mxu0  ;;  %v9535_v1 = vpop.f32.mrf.mxu1 }
 0x1b4   : > { %10990 = vmatprep.mubr.msk.bf16.mxu0 %vm1417_vm1, %v1403_v63  ;;  %11024 = vmatprep.mubr.msk.bf16.mxu1 %vm1417_vm1, %v1031_v62  ;;  %v9424_v5 = vadd.f32 %v9423_v0, %v9422_v60  ;;  %v9536_v10 = vadd.f32 %v9535_v1, %v9534_v61 }
 0x1b5   : > { %v9425_v2 = vpop.f32.mrf.mxu0  ;;  %v9537_v4 = vpop.f32.mrf.mxu1  ;;  %9651 = vmatpush3.bf16.msra.mxu0 %v12784_v19 }
 0x1b6   : > { %9652 = vmatprep.subr.bf16.mxu0 %v12788_v20 }
 0x1b7   : > { %v9426_v6 = vpop.f32.mrf.mxu0  ;;  %v9538_v9 = vpop.f32.mrf.mxu1 }
 0x1b8   : > { %v9427_v11 = vadd.f32 %v9426_v6, %v9425_v2  ;;  %v9539_v12 = vadd.f32 %v9538_v9, %v9537_v4 }
 0x1b9   : > { %v9428_v15 = vpop.f32.mrf.mxu0  ;;  %v9540_v16 = vpop.f32.mrf.mxu1  ;;  %9653 = vmatpush3.bf16.msra.mxu0 %v12798_v28 }
 0x1ba   : > { %v1032_v17 = vpack.c.bf16 %v9427_v11, %v9424_v5  ;;  %v1404_v18 = vpack.c.bf16 %v9539_v12, %v9536_v10  ;;  %9654 = vmatprep.subr.bf16.mxu0 %v12803_v30 }
 0x1bb   : > { %v9429_v21 = vpop.f32.mrf.mxu0  ;;  %v9541_v22 = vpop.f32.mrf.mxu1 }
 0x1bc   : > { %10991 = vmatmul.mubr.msk.bf16.gmra.mxu0 %vm1417_vm1, %v1404_v18  ;;  %11025 = vmatmul.mubr.msk.bf16.gmra.mxu1 %vm1417_vm1, %v1032_v17  ;;  %v9430_v25 = vadd.f32 %v9429_v21, %v9428_v15  ;;  %v9542_v29 = vadd.f32 %v9541_v22, %v9540_v16 }
 0x1bd   : > { %v9431_v23 = vpop.f32.mrf.mxu0  ;;  %v9543_v24 = vpop.f32.mrf.mxu1  ;;  %9655 = vmatpush3.bf16.msra.mxu0 %v12808_v33 }
 0x1be   : > { %9656 = vmatprep.subr.bf16.mxu0 %v12813_v35 }
 0x1bf   : > { %v9432_v26 = vpop.f32.mrf.mxu0  ;;  %v9544_v27 = vpop.f32.mrf.mxu1 }
 0x1c0   : > { %v9433_v31 = vadd.f32 %v9432_v26, %v9431_v23  ;;  %v9545_v32 = vadd.f32 %v9544_v27, %v9543_v24 }
 0x1c1   : > { %v9434_v34 = vpop.f32.mrf.mxu0  ;;  %v9546_v36 = vpop.f32.mrf.mxu1  ;;  %9657 = vmatpush3.bf16.msra.mxu0 %v12820_v39 }
 0x1c2   : > { %v1033_v37 = vpack.c.bf16 %v9433_v31, %v9430_v25  ;;  %v1405_v38 = vpack.c.bf16 %v9545_v32, %v9542_v29  ;;  %9658 = vmatprep.subr.bf16.mxu0 %v12826_v42 }
 0x1c3   : > { %v9435_v40 = vpop.f32.mrf.mxu0  ;;  %v9547_v41 = vpop.f32.mrf.mxu1 }
 0x1c4   : > { %10994 = vmatprep.mubr.msk.bf16.mxu0 %vm1417_vm1, %v1405_v38  ;;  %11028 = vmatprep.mubr.msk.bf16.mxu1 %vm1417_vm1, %v1033_v37  ;;  %v9436_v46 = vadd.f32 %v9435_v40, %v9434_v34  ;;  %v9548_v51 = vadd.f32 %v9547_v41, %v9546_v36 }
 0x1c5   : > { %v9437_v43 = vpop.f32.mrf.mxu0  ;;  %v9549_v44 = vpop.f32.mrf.mxu1  ;;  %9659 = vmatpush3.bf16.msra.mxu0 %v12832_v45 }
 0x1c6   : > { %9660 = vmatprep.subr.bf16.mxu0 %v12837_v47 }
 0x1c7   : > { %v9438_v48 = vpop.f32.mrf.mxu0  ;;  %v9550_v50 = vpop.f32.mrf.mxu1 }
 0x1c8   : > { %v9439_v52 = vadd.f32 %v9438_v48, %v9437_v43  ;;  %v9551_v53 = vadd.f32 %v9550_v50, %v9549_v44 }
 0x1c9   : > { %v9440_v54 = vpop.f32.mrf.mxu0  ;;  %v9552_v55 = vpop.f32.mrf.mxu1  ;;  %9661 = vmatpush3.bf16.msra.mxu0 %v12842_v49 }
 0x1ca   : > { %v1034_v56 = vpack.c.bf16 %v9439_v52, %v9436_v46  ;;  %v1406_v57 = vpack.c.bf16 %v9551_v53, %v9548_v51 }
 0x1cb   : > { %v9441_v58 = vpop.f32.mrf.mxu0  ;;  %v9553_v59 = vpop.f32.mrf.mxu1 }
 0x1cc   : > { %10995 = vmatmul.mubr.msk.bf16.gmra.mxu0 %vm1417_vm1, %v1406_v57  ;;  %11029 = vmatmul.mubr.msk.bf16.gmra.mxu1 %vm1417_vm1, %v1034_v56  ;;  %v9442_v62 = vadd.f32 %v9441_v58, %v9440_v54  ;;  %v9554_v1 = vadd.f32 %v9553_v59, %v9552_v55 }
 0x1cd   : > { %v9443_v60 = vpop.f32.mrf.mxu0  ;;  %v9555_v61 = vpop.f32.mrf.mxu1 }
 0x1cf   : > { %v9444_v63 = vpop.f32.mrf.mxu0  ;;  %v9556_v0 = vpop.f32.mrf.mxu1 }
 0x1d0   : > { %v9445_v2 = vadd.f32 %v9444_v63, %v9443_v60  ;;  %v9557_v4 = vadd.f32 %v9556_v0, %v9555_v61 }
 0x1d1   : > { %v9446_v5 = vpop.f32.mrf.mxu0  ;;  %v9558_v6 = vpop.f32.mrf.mxu1 }
 0x1d2   : > { %v1035_v9 = vpack.c.bf16 %v9445_v2, %v9442_v62  ;;  %v1407_v10 = vpack.c.bf16 %v9557_v4, %v9554_v1 }
 0x1d3   : > { %v9447_v11 = vpop.f32.mrf.mxu0  ;;  %v9559_v12 = vpop.f32.mrf.mxu1 }
 0x1d4   : > { %10998 = vmatprep.mubr.msk.bf16.mxu0 %vm1417_vm1, %v1407_v10  ;;  %11032 = vmatprep.mubr.msk.bf16.mxu1 %vm1417_vm1, %v1035_v9  ;;  %v9448_v17 = vadd.f32 %v9447_v11, %v9446_v5  ;;  %v9560_v22 = vadd.f32 %v9559_v12, %v9558_v6 }
 0x1d5   : > { %v9449_v15 = vpop.f32.mrf.mxu0  ;;  %v9561_v16 = vpop.f32.mrf.mxu1 }
 0x1d7   : > { %v9450_v18 = vpop.f32.mrf.mxu0  ;;  %v9562_v21 = vpop.f32.mrf.mxu1 }
 0x1d8   : > { %v9451_v23 = vadd.f32 %v9450_v18, %v9449_v15  ;;  %v9563_v24 = vadd.f32 %v9562_v21, %v9561_v16 }
 0x1d9   : > { %v9452_v25 = vpop.f32.mrf.mxu0  ;;  %v9564_v26 = vpop.f32.mrf.mxu1 }
 0x1da   : > { %v1036_v27 = vpack.c.bf16 %v9451_v23, %v9448_v17  ;;  %v1408_v29 = vpack.c.bf16 %v9563_v24, %v9560_v22 }
 0x1db   : > { %v9453_v31 = vpop.f32.mrf.mxu0  ;;  %v9565_v32 = vpop.f32.mrf.mxu1 }
 0x1dc   : > { %10999 = vmatmul.mubr.msk.bf16.gmra.mxu0 %vm1417_vm1, %v1408_v29  ;;  %11033 = vmatmul.mubr.msk.bf16.gmra.mxu1 %vm1417_vm1, %v1036_v27  ;;  %v9454_v37 = vadd.f32 %v9453_v31, %v9452_v25  ;;  %v9566_v41 = vadd.f32 %v9565_v32, %v9564_v26 }
 0x1dd   : > { %v9455_v34 = vpop.f32.mrf.mxu0  ;;  %v9567_v36 = vpop.f32.mrf.mxu1 }
 0x1df   : > { %v9456_v38 = vpop.f32.mrf.mxu0  ;;  %v9568_v40 = vpop.f32.mrf.mxu1 }
 0x1e0   : > { %v9457_v43 = vadd.f32 %v9456_v38, %v9455_v34  ;;  %v9569_v44 = vadd.f32 %v9568_v40, %v9567_v36 }
 0x1e1   : > { %v9458_v46 = vpop.f32.mrf.mxu0  ;;  %v9570_v48 = vpop.f32.mrf.mxu1 }
 0x1e2   : > { %v1037_v50 = vpack.c.bf16 %v9457_v43, %v9454_v37  ;;  %v1409_v51 = vpack.c.bf16 %v9569_v44, %v9566_v41 }
 0x1e3   : > { %v9459_v52 = vpop.f32.mrf.mxu0  ;;  %v9571_v53 = vpop.f32.mrf.mxu1 }
 0x1e4   : > { %11002 = vmatprep.mubr.msk.bf16.mxu0 %vm1417_vm1, %v1409_v51  ;;  %11036 = vmatprep.mubr.msk.bf16.mxu1 %vm1417_vm1, %v1037_v50  ;;  %v9460_v56 = vadd.f32 %v9459_v52, %v9458_v46  ;;  %v9572_v59 = vadd.f32 %v9571_v53, %v9570_v48 }
 0x1e5   : > { %v9461_v54 = vpop.f32.mrf.mxu0  ;;  %v9573_v55 = vpop.f32.mrf.mxu1 }
 0x1e7   : > { %v9462_v57 = vpop.f32.mrf.mxu0  ;;  %v9574_v58 = vpop.f32.mrf.mxu1 }
 0x1e8   : > { %v9463_v60 = vadd.f32 %v9462_v57, %v9461_v54  ;;  %v9575_v61 = vadd.f32 %v9574_v58, %v9573_v55 }
 0x1e9   : > { %v9464_v62 = vpop.f32.mrf.mxu0  ;;  %v9576_v63 = vpop.f32.mrf.mxu1 }
 0x1ea   : > { %v1038_v0 = vpack.c.bf16 %v9463_v60, %v9460_v56  ;;  %v1410_v1 = vpack.c.bf16 %v9575_v61, %v9572_v59 }
 0x1eb   : > { %v9465_v2 = vpop.f32.mrf.mxu0  ;;  %v9577_v4 = vpop.f32.mrf.mxu1 }
 0x1ec   : > { %11003 = vmatmul.mubr.msk.bf16.gmra.mxu0 %vm1417_vm1, %v1410_v1  ;;  %11037 = vmatmul.mubr.msk.bf16.gmra.mxu1 %vm1417_vm1, %v1038_v0  ;;  %v9466_v9 = vadd.f32 %v9465_v2, %v9464_v62  ;;  %v9578_v12 = vadd.f32 %v9577_v4, %v9576_v63 }
 0x1ed   : > { %v9467_v5 = vpop.f32.mrf.mxu0  ;;  %v9579_v6 = vpop.f32.mrf.mxu1 }
 0x1ef   : > { %v9468_v10 = vpop.f32.mrf.mxu0  ;;  %v9580_v11 = vpop.f32.mrf.mxu1 }
 0x1f0   : > { %v9469_v15 = vadd.f32 %v9468_v10, %v9467_v5  ;;  %v9581_v16 = vadd.f32 %v9580_v11, %v9579_v6 }
 0x1f1   : > { %v9470_v17 = vpop.f32.mrf.mxu0  ;;  %v9582_v18 = vpop.f32.mrf.mxu1 }
 0x1f2   : > { %v1039_v21 = vpack.c.bf16 %v9469_v15, %v9466_v9  ;;  %v1411_v22 = vpack.c.bf16 %v9581_v16, %v9578_v12 }
 0x1f3   : > { %v9471_v23 = vpop.f32.mrf.mxu0  ;;  %v9583_v24 = vpop.f32.mrf.mxu1 }
 0x1f4   : > { %11006 = vmatprep.mubr.msk.bf16.mxu0 %vm1417_vm1, %v1411_v22  ;;  %11040 = vmatprep.mubr.msk.bf16.mxu1 %vm1417_vm1, %v1039_v21  ;;  %v9472_v27 = vadd.f32 %v9471_v23, %v9470_v17  ;;  %v9584_v32 = vadd.f32 %v9583_v24, %v9582_v18 }
 0x1f5   : > { %v9473_v25 = vpop.f32.mrf.mxu0  ;;  %v9585_v26 = vpop.f32.mrf.mxu1 }
 0x1f7   : > { %v9474_v29 = vpop.f32.mrf.mxu0  ;;  %v9586_v31 = vpop.f32.mrf.mxu1 }
 0x1f8   : > { %v9475_v34 = vadd.f32 %v9474_v29, %v9473_v25  ;;  %v9587_v36 = vadd.f32 %v9586_v31, %v9585_v26 }
 0x1f9   : > { %v9476_v37 = vpop.f32.mrf.mxu0  ;;  %v9588_v38 = vpop.f32.mrf.mxu1 }
 0x1fa   : > { %v1040_v40 = vpack.c.bf16 %v9475_v34, %v9472_v27  ;;  %v1412_v41 = vpack.c.bf16 %v9587_v36, %v9584_v32 }
 0x1fb   : > { %v9477_v43 = vpop.f32.mrf.mxu0  ;;  %v9589_v44 = vpop.f32.mrf.mxu1 }
 0x1fc   : > { %11007 = vmatmul.mubr.msk.bf16.gmra.mxu0 %vm1417_vm1, %v1412_v41  ;;  %11041 = vmatmul.mubr.msk.bf16.gmra.mxu1 %vm1417_vm1, %v1040_v40  ;;  %v9478_v50 = vadd.f32 %v9477_v43, %v9476_v37  ;;  %v9590_v53 = vadd.f32 %v9589_v44, %v9588_v38 }
 0x1fd   : > { %v9479_v46 = vpop.f32.mrf.mxu0  ;;  %v9591_v48 = vpop.f32.mrf.mxu1 }
 0x1ff   : > { %v9480_v51 = vpop.f32.mrf.mxu0  ;;  %v9592_v52 = vpop.f32.mrf.mxu1 }
 0x200   : > { %v9481_v54 = vadd.f32 %v9480_v51, %v9479_v46  ;;  %v9593_v55 = vadd.f32 %v9592_v52, %v9591_v48 }
 0x201   : > { %v9482_v56 = vpop.f32.mrf.mxu0  ;;  %v9594_v57 = vpop.f32.mrf.mxu1 }
 0x202   : > { %v1041_v58 = vpack.c.bf16 %v9481_v54, %v9478_v50  ;;  %v1413_v59 = vpack.c.bf16 %v9593_v55, %v9590_v53  ;;  %v11663_v50 = vld [vmem:[#allocation2 + $0x204] ss:$8 sps:$4 sm:$0xff]   ;;  %v11661_v53 = vld [vmem:[#allocation2 + $0x200] ss:$8 sps:$4 sm:$0xff]   ;;  %v11664_v54 = vld [vmem:[#allocation2 + $0x214] ss:$8 sps:$4 sm:$0xff]  }
 0x203   : > { %v9483_v60 = vpop.f32.mrf.mxu0  ;;  %v9595_v61 = vpop.f32.mrf.mxu1  ;;  %v11666_v55 = vld [vmem:[#allocation2 + $0x210] ss:$8 sps:$4 sm:$0xff]  }
 0x204   : > { %11010 = vmatprep.mubr.msk.bf16.mxu0 %vm1417_vm1, %v1413_v59  ;;  %11044 = vmatprep.mubr.msk.bf16.mxu1 %vm1417_vm1, %v1041_v58  ;;  %v9484_v0 = vadd.f32 %v9483_v60, %v9482_v56  ;;  %v9596_v4 = vadd.f32 %v9595_v61, %v9594_v57  ;;  %v11667_v56 = vld [vmem:[#allocation2 + $0x224] ss:$8 sps:$4 sm:$0xff]   ;;  %v11669_v57 = vld [vmem:[#allocation2 + $0x220] ss:$8 sps:$4 sm:$0xff]   ;;  %v11670_v58 = vld [vmem:[#allocation2 + $0x234] ss:$8 sps:$4 sm:$0xff]  }
 0x205   : > { %v9485_v62 = vpop.f32.mrf.mxu0  ;;  %v9597_v63 = vpop.f32.mrf.mxu1  ;;  %v11672_v59 = vld [vmem:[#allocation2 + $0x230] ss:$8 sps:$4 sm:$0xff]   ;;  %v11675_v60 = vld [vmem:[#allocation2 + $0x244] ss:$8 sps:$4 sm:$0xff]   ;;  %v11673_v61 = vld [vmem:[#allocation2 + $0x240] ss:$8 sps:$4 sm:$0xff]  }
 0x207   : > { %v9486_v1 = vpop.f32.mrf.mxu0  ;;  %v9598_v2 = vpop.f32.mrf.mxu1 }
 0x208   : > { %v9487_v5 = vadd.f32 %v9486_v1, %v9485_v62  ;;  %v9599_v6 = vadd.f32 %v9598_v2, %v9597_v63  ;;  %v11678_v62 = vld [vmem:[#allocation2 + $0x254] ss:$8 sps:$4 sm:$0xff]   ;;  %v11676_v63 = vld [vmem:[#allocation2 + $0x250] ss:$8 sps:$4 sm:$0xff]   ;;  %v11679_v1 = vld [vmem:[#allocation2 + $0x260] ss:$8 sps:$4 sm:$0xff]  }
 0x209   : > { %v9488_v9 = vpop.f32.mrf.mxu0  ;;  %v9600_v10 = vpop.f32.mrf.mxu1  ;;  %v11684_v2 = vld [vmem:[#allocation2 + $0x274] ss:$8 sps:$4 sm:$0xff]  }
 0x20a   : > { %v1042_v11 = vpack.c.bf16 %v9487_v5, %v9484_v0  ;;  %v1414_v12 = vpack.c.bf16 %v9599_v6, %v9596_v4  ;;  %v11681_v0 = vld [vmem:[#allocation2 + $0x264] ss:$8 sps:$4 sm:$0xff]   ;;  %v11682_v4 = vld [vmem:[#allocation2 + $0x270] ss:$8 sps:$4 sm:$0xff]   ;;  %v11685_v6 = vld [vmem:[#allocation2 + $0x280] ss:$8 sps:$4 sm:$0xff]  }
 0x20b   : > { %v9489_v15 = vpop.f32.mrf.mxu0  ;;  %v9601_v16 = vpop.f32.mrf.mxu1  ;;  %v11687_v5 = vld [vmem:[#allocation2 + $0x284] ss:$8 sps:$4 sm:$0xff]  }
 0x20c   : > { %11011 = vmatmul.mubr.msk.bf16.gmra.mxu0 %vm1417_vm1, %v1414_v12  ;;  %11045 = vmatmul.mubr.msk.bf16.gmra.mxu1 %vm1417_vm1, %v1042_v11  ;;  %v9490_v21 = vadd.f32 %v9489_v15, %v9488_v9  ;;  %v9602_v24 = vadd.f32 %v9601_v16, %v9600_v10  ;;  %v11690_v9 = vld [vmem:[#allocation2 + $0x294] ss:$8 sps:$4 sm:$0xff]   ;;  %v11688_v10 = vld [vmem:[#allocation2 + $0x290] ss:$8 sps:$4 sm:$0xff]   ;;  %v11693_v11 = vld [vmem:[#allocation2 + $0x2a4] ss:$8 sps:$4 sm:$0xff]  }
 0x20d   : > { %v9491_v17 = vpop.f32.mrf.mxu0  ;;  %v9603_v18 = vpop.f32.mrf.mxu1 }
 0x20f   : > { %v9492_v22 = vpop.f32.mrf.mxu0  ;;  %v9604_v23 = vpop.f32.mrf.mxu1 }
 0x210   : > { %v9493_v25 = vadd.f32 %v9492_v22, %v9491_v17  ;;  %v9605_v26 = vadd.f32 %v9604_v23, %v9603_v18 }
 0x211   : > { %v9494_v27 = vpop.f32.mrf.mxu0  ;;  %v9606_v29 = vpop.f32.mrf.mxu1 }
 0x212   : > { %v1043_v31 = vpack.c.bf16 %v9493_v25, %v9490_v21  ;;  %v1415_v32 = vpack.c.bf16 %v9605_v26, %v9602_v24  ;;  %v11691_v24 = vld [vmem:[#allocation2 + $0x2a0] ss:$8 sps:$4 sm:$0xff]   ;;  %v11696_v26 = vld [vmem:[#allocation2 + $0x2b4] ss:$8 sps:$4 sm:$0xff]  }
 0x213   : > { %v9495_v34 = vpop.f32.mrf.mxu0  ;;  %v9607_v36 = vpop.f32.mrf.mxu1 }
 0x214   : > { %11014 = vmatprep.mubr.msk.bf16.mxu0 %vm1417_vm1, %v1415_v32  ;;  %11048 = vmatprep.mubr.msk.bf16.mxu1 %vm1417_vm1, %v1043_v31  ;;  %v9496_v40 = vadd.f32 %v9495_v34, %v9494_v27  ;;  %v9608_v44 = vadd.f32 %v9607_v36, %v9606_v29  ;;  %v8924_v27 = vld [vmem:[%s14385_s2 + $0x4] sm:$0x3]  ;;  %v11694_v31 = vld [vmem:[#allocation2 + $0x2b0] ss:$8 sps:$4 sm:$0xff]  }
 0x215   : > { %v9497_v37 = vpop.f32.mrf.mxu0  ;;  %v9609_v38 = vpop.f32.mrf.mxu1  ;;  %11402 = vmatprep.subr.msk.bf16.mxu1 %vm1466_vm0, %v8924_v27  ;;  %v2264_v29 = vsel %vm1466_vm0, %v8924_v27, 0  ;;  %v11699_v32 = vld [vmem:[#allocation2 + $0x2c4] ss:$8 sps:$4 sm:$0xff]  }
 0x216   : > { %11053 = vmatpush3.bf16.msra.mxu1 %v2264_v29 }
 0x217   : > { %v9498_v41 = vpop.f32.mrf.mxu0  ;;  %v9610_v43 = vpop.f32.mrf.mxu1  ;;  %9775 = vmatprep.subr.bf16.mxu1 %v12755_v3 }
 0x218   : > { %v9499_v46 = vadd.f32 %v9498_v41, %v9497_v37  ;;  %v9611_v48 = vadd.f32 %v9610_v43, %v9609_v38 }
 0x21a   : > { %v1044_v51 = vpack.c.bf16 %v9499_v46, %v9496_v40  ;;  %v1416_v52 = vpack.c.bf16 %v9611_v48, %v9608_v44 }
 0x21c   : > { %11015 = vmatmul.mubr.msk.bf16.gmra.mxu0 %vm1417_vm1, %v1416_v52  ;;  %11049 = vmatmul.mubr.msk.bf16.gmra.mxu1 %vm1417_vm1, %v1044_v51  ;;  %v11702_v52 = vld [vmem:[#allocation2 + $0x2d4] ss:$8 sps:$4 sm:$0xff]  }
 0x21d   : > { %2068 = vmatprep.mubr.bf16.mxu0 %v11663_v50  ;;  %v11697_v50 = vld [vmem:[#allocation2 + $0x2c0] ss:$8 sps:$4 sm:$0xff]  }
 0x224   : > { %2069 = vmatmul.mubr.bf16.vlgmr.msra.gmra.mxu0 %v11661_v53  ;;  %v11700_v53 = vld [vmem:[#allocation2 + $0x2d0] ss:$8 sps:$4 sm:$0xff]  }
 0x225   : > { %2076 = vmatprep.mubr.bf16.mxu0 %v11664_v54  ;;  %v11705_v54 = vld [vmem:[#allocation2 + $0x2e4] ss:$8 sps:$4 sm:$0xff]  }
 0x22c   : > { %2077 = vmatmul.mubr.bf16.gmra.mxu0 %v11666_v55 }
 0x22d   : > { %2084 = vmatprep.mubr.bf16.mxu0 %v11667_v56 }
 0x234   : > { %2085 = vmatmul.mubr.bf16.gmra.mxu0 %v11669_v57 }
 0x235   : > { %2092 = vmatprep.mubr.bf16.mxu0 %v11670_v58 }
 0x23c   : > { %2093 = vmatmul.mubr.bf16.gmra.mxu0 %v11672_v59 }
 0x23d   : > { %2100 = vmatprep.mubr.bf16.mxu0 %v11675_v60 }
 0x244   : > { %2101 = vmatmul.mubr.bf16.gmra.mxu0 %v11673_v61 }
 0x245   : > { %2108 = vmatprep.mubr.bf16.mxu0 %v11678_v62 }
 0x24c   : > { %2109 = vmatmul.mubr.bf16.gmra.mxu0 %v11676_v63 }
 0x24d   : > { %2116 = vmatprep.mubr.bf16.mxu0 %v11681_v0 }
 0x254   : > { %2117 = vmatmul.mubr.bf16.gmra.mxu0 %v11679_v1  ;;  %v11703_v1 = vld [vmem:[#allocation2 + $0x2e0] ss:$8 sps:$4 sm:$0xff]  }
 0x255   : > { %2124 = vmatprep.mubr.bf16.mxu0 %v11684_v2 }
 0x25c   : > { %2125 = vmatmul.mubr.bf16.gmra.mxu0 %v11682_v4  ;;  %v11708_v4 = vld [vmem:[#allocation2 + $0x2f4] ss:$8 sps:$4 sm:$0xff]  }
 0x25d   : > { %2132 = vmatprep.mubr.bf16.mxu0 %v11687_v5  ;;  %v11706_v5 = vld [vmem:[#allocation2 + $0x2f0] ss:$8 sps:$4 sm:$0xff]  }
 0x264   : > { %2133 = vmatmul.mubr.bf16.gmra.mxu0 %v11685_v6 }
 0x265   : > { %2140 = vmatprep.mubr.bf16.mxu0 %v11690_v9 }
 0x26c   : > { %v10988_v12 = vpop.f32.mrf.mxu0  ;;  %v11022_v15 = vpop.f32.mrf.mxu1  ;;  %2141 = vmatmul.mubr.bf16.gmra.mxu0 %v11688_v10 }
 0x26d   : > { %v12906_v16 = vadd.f32 %v11022_v15, %v10988_v12  ;;  %2148 = vmatprep.mubr.bf16.mxu0 %v11693_v11 }
 0x26e   : > { %v1504_v17 = vpop.f32.mrf.mxu0  ;;  %v1716_v18 = vpop.f32.mrf.mxu1 }
 0x26f   : > { %v12908_v21 = vadd.f32 %v1716_v18, %v1504_v17 }
 0x270   : > { %v10989_v22 = vpop.f32.mrf.mxu0  ;;  %v11023_v23 = vpop.f32.mrf.mxu1 }
 0x271   : > { %v12910_v25 = vadd.f32 %v11023_v23, %v10989_v22 }
 0x272   : > { %v12918_v34 = vpop.f32.mrf.mxu0  ;;  %v12920_v36 = vpop.f32.mrf.mxu1 }
 0x273   : > { %14443 = vst [vmem:[#allocation33_spill] sm:$0xff] %v12918_v34  ;;  %14444 = vst [vmem:[#allocation34_spill] sm:$0xff] %v12920_v36 }
 0x274   : > { %2149 = vmatmul.mubr.bf16.gmra.mxu0 %v11691_v24 }
 0x275   : > { %2156 = vmatprep.mubr.bf16.mxu0 %v11696_v26 }
 0x27c   : > { %v10992_v37 = vpop.f32.mrf.mxu0  ;;  %v11026_v38 = vpop.f32.mrf.mxu1  ;;  %2157 = vmatmul.mubr.bf16.gmra.mxu0 %v11694_v31 }
 0x27d   : > { %v12922_v40 = vadd.f32 %v11026_v38, %v10992_v37  ;;  %2164 = vmatprep.mubr.bf16.mxu0 %v11699_v32 }
 0x27e   : > { %v1520_v41 = vpop.f32.mrf.mxu0  ;;  %v1732_v43 = vpop.f32.mrf.mxu1 }
 0x27f   : > { %v12924_v44 = vadd.f32 %v1732_v43, %v1520_v41 }
 0x280   : > { %v10993_v46 = vpop.f32.mrf.mxu0  ;;  %v11027_v48 = vpop.f32.mrf.mxu1 }
 0x281   : > { %v12926_v51 = vadd.f32 %v11027_v48, %v10993_v46 }
 0x282   : > { %v12928_v55 = vpop.f32.mrf.mxu0  ;;  %v12930_v56 = vpop.f32.mrf.mxu1 }
 0x283   : > { %14445 = vst [vmem:[#allocation35_spill] sm:$0xff] %v12928_v55  ;;  %14446 = vst [vmem:[#allocation36_spill] sm:$0xff] %v12930_v56 }
 0x284   : > { %2165 = vmatmul.mubr.bf16.gmra.mxu0 %v11697_v50 }
 0x285   : > { %2172 = vmatprep.mubr.bf16.mxu0 %v11702_v52 }
 0x28c   : > { %v10996_v57 = vpop.f32.mrf.mxu0  ;;  %v11030_v58 = vpop.f32.mrf.mxu1  ;;  %2173 = vmatmul.mubr.bf16.gmra.mxu0 %v11700_v53 }
 0x28d   : > { %v12932_v59 = vadd.f32 %v11030_v58, %v10996_v57  ;;  %2180 = vmatprep.mubr.bf16.mxu0 %v11705_v54 }
 0x28e   : > { %v1536_v60 = vpop.f32.mrf.mxu0  ;;  %v1748_v61 = vpop.f32.mrf.mxu1 }
 0x28f   : > { %v12934_v62 = vadd.f32 %v1748_v61, %v1536_v60 }
 0x290   : > { %v10997_v63 = vpop.f32.mrf.mxu0  ;;  %v11031_v0 = vpop.f32.mrf.mxu1 }
 0x291   : > { %v12936_v2 = vadd.f32 %v11031_v0, %v10997_v63 }
 0x292   : > { %v12938_v6 = vpop.f32.mrf.mxu0  ;;  %v12940_v9 = vpop.f32.mrf.mxu1 }
 0x293   : > { %14447 = vst [vmem:[#allocation37_spill] sm:$0xff] %v12938_v6  ;;  %14448 = vst [vmem:[#allocation38_spill] sm:$0xff] %v12940_v9 }
 0x294   : > { %2181 = vmatmul.mubr.bf16.gmra.mxu0 %v11703_v1 }
 0x295   : > { %2188 = vmatprep.mubr.bf16.mxu0 %v11708_v4 }
 0x29c   : > { %v11000_v10 = vpop.f32.mrf.mxu0  ;;  %v11034_v11 = vpop.f32.mrf.mxu1  ;;  %2189 = vmatmul.mubr.bf16.gmra.mxu0 %v11706_v5 }
 0x29d   : > { %v12942_v12 = vadd.f32 %v11034_v11, %v11000_v10 }
 0x29e   : > { %v1552_v15 = vpop.f32.mrf.mxu0  ;;  %v1764_v17 = vpop.f32.mrf.mxu1 }
 0x29f   : > { %v12944_v18 = vadd.f32 %v1764_v17, %v1552_v15 }
 0x2a0   : > { %v11001_v22 = vpop.f32.mrf.mxu0  ;;  %v11035_v23 = vpop.f32.mrf.mxu1 }
 0x2a1   : > { %v12946_v24 = vadd.f32 %v11035_v23, %v11001_v22 }
 0x2a2   : > { %v12948_v26 = vpop.f32.mrf.mxu0  ;;  %v12950_v27 = vpop.f32.mrf.mxu1 }
 0x2ac   : > { %v11004_v29 = vpop.f32.mrf.mxu0  ;;  %v11038_v31 = vpop.f32.mrf.mxu1 }
 0x2ad   : > { %v12952_v32 = vadd.f32 %v11038_v31, %v11004_v29 }
 0x2ae   : > { %v1568_v37 = vpop.f32.mrf.mxu0  ;;  %v1780_v38 = vpop.f32.mrf.mxu1 }
 0x2af   : > { %v12954_v41 = vadd.f32 %v1780_v38, %v1568_v37 }
 0x2b0   : > { %v11005_v43 = vpop.f32.mrf.mxu0  ;;  %v11039_v46 = vpop.f32.mrf.mxu1 }
 0x2b1   : > { %v12956_v48 = vadd.f32 %v11039_v46, %v11005_v43 }
 0x2b2   : > { %v12958_v50 = vpop.f32.mrf.mxu0  ;;  %v12960_v52 = vpop.f32.mrf.mxu1 }
 0x2b3   : > { %14449 = vst [vmem:[#allocation39_spill] sm:$0xff] %v12958_v50  ;;  %14450 = vst [vmem:[#allocation40_spill] sm:$0xff] %v12960_v52 }
 0x2bc   : > { %v11008_v53 = vpop.f32.mrf.mxu0  ;;  %v11042_v54 = vpop.f32.mrf.mxu1 }
 0x2bd   : > { %v12962_v57 = vadd.f32 %v11042_v54, %v11008_v53 }
 0x2be   : > { %v1584_v58 = vpop.f32.mrf.mxu0  ;;  %v1796_v60 = vpop.f32.mrf.mxu1 }
 0x2bf   : > { %v12964_v61 = vadd.f32 %v1796_v60, %v1584_v58 }
 0x2c0   : > { %v11009_v63 = vpop.f32.mrf.mxu0  ;;  %v11043_v0 = vpop.f32.mrf.mxu1 }
 0x2c1   : > { %v12966_v1 = vadd.f32 %v11043_v0, %v11009_v63 }
 0x2c2   : > { %v12968_v4 = vpop.f32.mrf.mxu0  ;;  %v12970_v5 = vpop.f32.mrf.mxu1 }
 0x2c3   : > { %14451 = vst [vmem:[#allocation41_spill] sm:$0xff] %v12968_v4  ;;  %14452 = vst [vmem:[#allocation42_spill] sm:$0xff] %v12970_v5 }
 0x2cc   : > { %v11012_v10 = vpop.f32.mrf.mxu0  ;;  %v11046_v11 = vpop.f32.mrf.mxu1 }
 0x2cd   : > { %v12972_v15 = vadd.f32 %v11046_v11, %v11012_v10 }
 0x2ce   : > { %v1600_v17 = vpop.f32.mrf.mxu0  ;;  %v1812_v22 = vpop.f32.mrf.mxu1 }
 0x2cf   : > { %v12974_v23 = vadd.f32 %v1812_v22, %v1600_v17 }
 0x2d0   : > { %v11013_v29 = vpop.f32.mrf.mxu0  ;;  %v11047_v31 = vpop.f32.mrf.mxu1 }
 0x2d1   : > { %v12976_v37 = vadd.f32 %v11047_v31, %v11013_v29 }
 0x2d2   : > { %v12978_v38 = vpop.f32.mrf.mxu0  ;;  %v12980_v43 = vpop.f32.mrf.mxu1 }
 0x2d3   : > { %14453 = vst [vmem:[#allocation43_spill] sm:$0xff] %v12978_v38  ;;  %14454 = vst [vmem:[#allocation44_spill] sm:$0xff] %v12980_v43 }
 0x2dc   : > { %v11016_v46 = vpop.f32.mrf.mxu0  ;;  %v11050_v53 = vpop.f32.mrf.mxu1 }
 0x2dd   : > { %v12982_v54 = vadd.f32 %v11050_v53, %v11016_v46 }
 0x2de   : > { %v1616_v58 = vpop.f32.mrf.mxu0  ;;  %v1828_v60 = vpop.f32.mrf.mxu1 }
 0x2df   : > { %v12984_v63 = vadd.f32 %v1828_v60, %v1616_v58 }
 0x2e0   : > { %v11017_v0 = vpop.f32.mrf.mxu0  ;;  %v11051_v10 = vpop.f32.mrf.mxu1 }
 0x2e1   : > { %v12986_v11 = vadd.f32 %v11051_v10, %v11017_v0 }
 0x2e2   : > { %v12988_v17 = vpop.f32.mrf.mxu0 }
 0x2e4   : > { %v9662_v22 = vpop.f32.mrf.mxu0 }
 0x2e6   : > { %v9663_v29 = vpop.f32.mrf.mxu0 }
 0x2e7   : > { %v9664_v34 = vadd.f32 %v9663_v29, %v9662_v22 }
 0x2e8   : > { %v9665_v31 = vpop.f32.mrf.mxu0 }
 0x2ea   : > { %v9666_v36 = vpop.f32.mrf.mxu0 }
 0x2eb   : > { %v9667_v52 = vadd.f32 %v9666_v36, %v9665_v31 }
 0x2ec   : > { %v9668_v50 = vpop.f32.mrf.mxu0 }
 0x2ed   : > { %v2199_v56 = vpack.c.bf16 %v9667_v52, %v9664_v34 }
 0x2ee   : > { %v9669_v46 = vpop.f32.mrf.mxu0 }
 0x2ef   : > { %11054 = vmatprep.mubr.msk.bf16.mxu1 %vm1417_vm1, %v2199_v56  ;;  %v9670_v60 = vadd.f32 %v9669_v46, %v9668_v50 }
 0x2f0   : > { %v9671_v53 = vpop.f32.mrf.mxu0 }
 0x2f2   : > { %v9672_v58 = vpop.f32.mrf.mxu0 }
 0x2f3   : > { %v9673_v55 = vadd.f32 %v9672_v58, %v9671_v53 }
 0x2f4   : > { %v9674_v5 = vpop.f32.mrf.mxu0 }
 0x2f5   : > { %v2200_v0 = vpack.c.bf16 %v9673_v55, %v9670_v60 }
 0x2f6   : > { %v9675_v10 = vpop.f32.mrf.mxu0 }
 0x2f7   : > { %11055 = vmatmul.mubr.msk.bf16.vlgmr.msra.gmra.mxu1 %vm1417_vm1, %v2200_v0  ;;  %v9676_v22 = vadd.f32 %v9675_v10, %v9674_v5 }
 0x2f8   : > { %v9677_v4 = vpop.f32.mrf.mxu0  ;;  %9776 = vmatpush3.bf16.msra.mxu1 %v12760_v7 }
 0x2f9   : > { %9777 = vmatprep.subr.bf16.mxu1 %v12762_v8 }
 0x2fa   : > { %v9678_v36 = vpop.f32.mrf.mxu0 }
 0x2fb   : > { %v9679_v34 = vadd.f32 %v9678_v36, %v9677_v4 }
 0x2fc   : > { %v9680_v52 = vpop.f32.mrf.mxu0  ;;  %9778 = vmatpush3.bf16.msra.mxu1 %v12772_v13 }
 0x2fd   : > { %v2201_v56 = vpack.c.bf16 %v9679_v34, %v9676_v22  ;;  %9779 = vmatprep.subr.bf16.mxu1 %v12776_v14 }
 0x2fe   : > { %v9681_v50 = vpop.f32.mrf.mxu0 }
 0x2ff   : > { %11058 = vmatprep.mubr.msk.bf16.mxu1 %vm1417_vm1, %v2201_v56  ;;  %v9682_v31 = vadd.f32 %v9681_v50, %v9680_v52 }
 0x300   : > { %v9683_v55 = vpop.f32.mrf.mxu0  ;;  %9780 = vmatpush3.bf16.msra.mxu1 %v12784_v19 }
 0x301   : > { %9781 = vmatprep.subr.bf16.mxu1 %v12788_v20 }
 0x302   : > { %v9684_v29 = vpop.f32.mrf.mxu0 }
 0x303   : > { %v9685_v46 = vadd.f32 %v9684_v29, %v9683_v55 }
 0x304   : > { %v9686_v53 = vpop.f32.mrf.mxu0  ;;  %9782 = vmatpush3.bf16.msra.mxu1 %v12798_v28 }
 0x305   : > { %v2202_v4 = vpack.c.bf16 %v9685_v46, %v9682_v31  ;;  %9783 = vmatprep.subr.bf16.mxu1 %v12803_v30 }
 0x306   : > { %v9687_v5 = vpop.f32.mrf.mxu0 }
 0x307   : > { %11059 = vmatmul.mubr.msk.bf16.gmra.mxu1 %vm1417_vm1, %v2202_v4  ;;  %v9688_v0 = vadd.f32 %v9687_v5, %v9686_v53 }
 0x308   : > { %v9689_v58 = vpop.f32.mrf.mxu0  ;;  %9784 = vmatpush3.bf16.msra.mxu1 %v12808_v33 }
 0x309   : > { %9785 = vmatprep.subr.bf16.mxu1 %v12813_v35 }
 0x30a   : > { %v9690_v60 = vpop.f32.mrf.mxu0 }
 0x30b   : > { %v9691_v10 = vadd.f32 %v9690_v60, %v9689_v58 }
 0x30c   : > { %v9692_v36 = vpop.f32.mrf.mxu0  ;;  %9786 = vmatpush3.bf16.msra.mxu1 %v12820_v39 }
 0x30d   : > { %v2203_v22 = vpack.c.bf16 %v9691_v10, %v9688_v0  ;;  %9787 = vmatprep.subr.bf16.mxu1 %v12826_v42 }
 0x30e   : > { %v9693_v34 = vpop.f32.mrf.mxu0 }
 0x30f   : > { %11062 = vmatprep.mubr.msk.bf16.mxu1 %vm1417_vm1, %v2203_v22  ;;  %v9694_v50 = vadd.f32 %v9693_v34, %v9692_v36 }
 0x310   : > { %v9695_v52 = vpop.f32.mrf.mxu0  ;;  %9788 = vmatpush3.bf16.msra.mxu1 %v12832_v45 }
 0x311   : > { %9789 = vmatprep.subr.bf16.mxu1 %v12837_v47 }
 0x312   : > { %v9696_v56 = vpop.f32.mrf.mxu0 }
 0x313   : > { %v9697_v55 = vadd.f32 %v9696_v56, %v9695_v52 }
 0x314   : > { %v9698_v29 = vpop.f32.mrf.mxu0  ;;  %9790 = vmatpush3.bf16.msra.mxu1 %v12842_v49 }
 0x315   : > { %v2204_v31 = vpack.c.bf16 %v9697_v55, %v9694_v50 }
 0x316   : > { %v9699_v46 = vpop.f32.mrf.mxu0 }
 0x317   : > { %11063 = vmatmul.mubr.msk.bf16.gmra.mxu1 %vm1417_vm1, %v2204_v31  ;;  %v9700_v5 = vadd.f32 %v9699_v46, %v9698_v29 }
 0x318   : > { %v9701_v53 = vpop.f32.mrf.mxu0 }
 0x31a   : > { %v9702_v4 = vpop.f32.mrf.mxu0 }
 0x31b   : > { %v9703_v58 = vadd.f32 %v9702_v4, %v9701_v53 }
 0x31c   : > { %v9704_v60 = vpop.f32.mrf.mxu0 }
 0x31d   : > { %v2205_v0 = vpack.c.bf16 %v9703_v58, %v9700_v5 }
 0x31e   : > { %v9705_v10 = vpop.f32.mrf.mxu0 }
 0x31f   : > { %11066 = vmatprep.mubr.msk.bf16.mxu1 %vm1417_vm1, %v2205_v0  ;;  %v9706_v36 = vadd.f32 %v9705_v10, %v9704_v60 }
 0x320   : > { %v9707_v22 = vpop.f32.mrf.mxu0 }
 0x322   : > { %v9708_v9 = vpop.f32.mrf.mxu0 }
 0x323   : > { %v9709_v34 = vadd.f32 %v9708_v9, %v9707_v22 }
 0x324   : > { %v9710_v52 = vpop.f32.mrf.mxu0 }
 0x325   : > { %v2206_v56 = vpack.c.bf16 %v9709_v34, %v9706_v36 }
 0x326   : > { %v9711_v6 = vpop.f32.mrf.mxu0 }
 0x327   : > { %11067 = vmatmul.mubr.msk.bf16.gmra.mxu1 %vm1417_vm1, %v2206_v56  ;;  %v9712_v31 = vadd.f32 %v9711_v6, %v9710_v52 }
 0x328   : > { %v9713_v50 = vpop.f32.mrf.mxu0 }
 0x32a   : > { %v9714_v55 = vpop.f32.mrf.mxu0 }
 0x32b   : > { %v9715_v43 = vadd.f32 %v9714_v55, %v9713_v50 }
 0x32c   : > { %v9716_v29 = vpop.f32.mrf.mxu0 }
 0x32d   : > { %v2207_v46 = vpack.c.bf16 %v9715_v43, %v9712_v31 }
 0x32e   : > { %v9717_v53 = vpop.f32.mrf.mxu0 }
 0x32f   : > { %11070 = vmatprep.mubr.msk.bf16.mxu1 %vm1417_vm1, %v2207_v46  ;;  %v9718_v58 = vadd.f32 %v9717_v53, %v9716_v29 }
 0x330   : > { %v9719_v4 = vpop.f32.mrf.mxu0 }
 0x332   : > { %v9720_v5 = vpop.f32.mrf.mxu0 }
 0x333   : > { %v9721_v0 = vadd.f32 %v9720_v5, %v9719_v4 }
 0x334   : > { %v9722_v60 = vpop.f32.mrf.mxu0 }
 0x335   : > { %v2208_v9 = vpack.c.bf16 %v9721_v0, %v9718_v58 }
 0x336   : > { %v9723_v10 = vpop.f32.mrf.mxu0 }
 0x337   : > { %11071 = vmatmul.mubr.msk.bf16.gmra.mxu1 %vm1417_vm1, %v2208_v9  ;;  %v9724_v34 = vadd.f32 %v9723_v10, %v9722_v60 }
 0x338   : > { %v9725_v22 = vpop.f32.mrf.mxu0 }
 0x33a   : > { %v9726_v36 = vpop.f32.mrf.mxu0 }
 0x33b   : > { %v9727_v56 = vadd.f32 %v9726_v36, %v9725_v22 }
 0x33c   : > { %v9728_v6 = vpop.f32.mrf.mxu0 }
 0x33d   : > { %v2209_v52 = vpack.c.bf16 %v9727_v56, %v9724_v34 }
 0x33e   : > { %v9729_v50 = vpop.f32.mrf.mxu0 }
 0x33f   : > { %11074 = vmatprep.mubr.msk.bf16.mxu1 %vm1417_vm1, %v2209_v52  ;;  %v9730_v31 = vadd.f32 %v9729_v50, %v9728_v6 }
 0x340   : > { %v9731_v43 = vpop.f32.mrf.mxu0 }
 0x342   : > { %v9732_v55 = vpop.f32.mrf.mxu0 }
 0x343   : > { %v9733_v46 = vadd.f32 %v9732_v55, %v9731_v43 }
 0x344   : > { %v9734_v29 = vpop.f32.mrf.mxu0 }
 0x345   : > { %v2210_v53 = vpack.c.bf16 %v9733_v46, %v9730_v31 }
 0x346   : > { %v9735_v4 = vpop.f32.mrf.mxu0 }
 0x347   : > { %11075 = vmatmul.mubr.msk.bf16.gmra.mxu1 %vm1417_vm1, %v2210_v53  ;;  %v9736_v0 = vadd.f32 %v9735_v4, %v9734_v29 }
 0x348   : > { %v9737_v5 = vpop.f32.mrf.mxu0 }
 0x34a   : > { %v9738_v58 = vpop.f32.mrf.mxu0 }
 0x34b   : > { %v9739_v9 = vadd.f32 %v9738_v58, %v9737_v5 }
 0x34c   : > { %v9740_v60 = vpop.f32.mrf.mxu0 }
 0x34d   : > { %v2211_v10 = vpack.c.bf16 %v9739_v9, %v9736_v0 }
 0x34e   : > { %v9741_v22 = vpop.f32.mrf.mxu0 }
 0x34f   : > { %11078 = vmatprep.mubr.msk.bf16.mxu1 %vm1417_vm1, %v2211_v10  ;;  %v9742_v56 = vadd.f32 %v9741_v22, %v9740_v60  ;;  %v11711_v60 = vld [vmem:[#allocation2 + $0x304] ss:$8 sps:$4 sm:$0xff]  }
 0x350   : > { %v9743_v36 = vpop.f32.mrf.mxu0 }
 0x352   : > { %v9744_v34 = vpop.f32.mrf.mxu0 }
 0x353   : > { %v9745_v52 = vadd.f32 %v9744_v34, %v9743_v36  ;;  %v11709_v36 = vld [vmem:[#allocation2 + $0x300] ss:$8 sps:$4 sm:$0xff]   ;;  %v11714_v34 = vld [vmem:[#allocation2 + $0x314] ss:$8 sps:$4 sm:$0xff]  }
 0x354   : > { %v9746_v6 = vpop.f32.mrf.mxu0 }
 0x355   : > { %v2212_v50 = vpack.c.bf16 %v9745_v52, %v9742_v56  ;;  %v11712_v56 = vld [vmem:[#allocation2 + $0x310] ss:$8 sps:$4 sm:$0xff]   ;;  %v11717_v52 = vld [vmem:[#allocation2 + $0x324] ss:$8 sps:$4 sm:$0xff]  }
 0x356   : > { %v9747_v43 = vpop.f32.mrf.mxu0 }
 0x357   : > { %11079 = vmatmul.mubr.msk.bf16.gmra.mxu1 %vm1417_vm1, %v2212_v50  ;;  %v9748_v46 = vadd.f32 %v9747_v43, %v9746_v6  ;;  %v11715_v6 = vld [vmem:[#allocation2 + $0x320] ss:$8 sps:$4 sm:$0xff]   ;;  %v11720_v50 = vld [vmem:[#allocation2 + $0x334] ss:$8 sps:$4 sm:$0xff]   ;;  %v11718_v43 = vld [vmem:[#allocation2 + $0x330] ss:$8 sps:$4 sm:$0xff]  }
 0x358   : > { %v9749_v55 = vpop.f32.mrf.mxu0 }
 0x35a   : > { %v9750_v31 = vpop.f32.mrf.mxu0 }
 0x35b   : > { %v9751_v53 = vadd.f32 %v9750_v31, %v9749_v55  ;;  %v11723_v55 = vld [vmem:[#allocation2 + $0x344] ss:$8 sps:$4 sm:$0xff]   ;;  %v11721_v31 = vld [vmem:[#allocation2 + $0x340] ss:$8 sps:$4 sm:$0xff]  }
 0x35c   : > { %v9752_v29 = vpop.f32.mrf.mxu0 }
 0x35d   : > { %v2213_v4 = vpack.c.bf16 %v9751_v53, %v9748_v46  ;;  %v11726_v46 = vld [vmem:[#allocation2 + $0x354] ss:$8 sps:$4 sm:$0xff]   ;;  %v11724_v53 = vld [vmem:[#allocation2 + $0x350] ss:$8 sps:$4 sm:$0xff]  }
 0x35e   : > { %v9753_v5 = vpop.f32.mrf.mxu0 }
 0x35f   : > { %11082 = vmatprep.mubr.msk.bf16.mxu1 %vm1417_vm1, %v2213_v4  ;;  %v9754_v9 = vadd.f32 %v9753_v5, %v9752_v29  ;;  %v11729_v29 = vld [vmem:[#allocation2 + $0x364] ss:$8 sps:$4 sm:$0xff]   ;;  %v11727_v5 = vld [vmem:[#allocation2 + $0x360] ss:$8 sps:$4 sm:$0xff]  }
 0x360   : > { %v9755_v58 = vpop.f32.mrf.mxu0  ;;  %v8973_v4 = vld [vmem:[%s14385_s2 + $0x6] sm:$0x3] }
 0x361   : > { %11403 = vmatprep.subr.msk.bf16.mxu0 %vm1466_vm0, %v8973_v4 }
 0x362   : > { %v9756_v0 = vpop.f32.mrf.mxu0 }
 0x363   : > { %v9757_v10 = vadd.f32 %v9756_v0, %v9755_v58  ;;  %v11732_v58 = vld [vmem:[#allocation2 + $0x374] ss:$8 sps:$4 sm:$0xff]   ;;  %v2880_v0 = vsel %vm1466_vm0, %v8973_v4, 0  ;;  %v11747_v4 = vld [vmem:[#allocation2 + $0x3c4] ss:$8 sps:$4 sm:$0xff]  }
 0x364   : > { %11087 = vmatpush3.bf16.msra.mxu0 %v2880_v0 }
 0x365   : > { %v2214_v22 = vpack.c.bf16 %v9757_v10, %v9754_v9  ;;  %9904 = vmatprep.subr.bf16.mxu0 %v12755_v3  ;;  %v11730_v9 = vld [vmem:[#allocation2 + $0x370] ss:$8 sps:$4 sm:$0xff]   ;;  %v11735_v10 = vld [vmem:[#allocation2 + $0x384] ss:$8 sps:$4 sm:$0xff]  }
 0x367   : > { %11083 = vmatmul.mubr.msk.bf16.gmra.mxu1 %vm1417_vm1, %v2214_v22  ;;  %v11738_v22 = vld [vmem:[#allocation2 + $0x394] ss:$8 sps:$4 sm:$0xff]  }
 0x368   : > { %2684 = vmatprep.mubr.bf16.mxu1 %v11711_v60  ;;  %v11733_v60 = vld [vmem:[#allocation2 + $0x380] ss:$8 sps:$4 sm:$0xff]  }
 0x36f   : > { %2685 = vmatmul.mubr.bf16.vlgmr.msra.gmra.mxu1 %v11709_v36  ;;  %v11736_v36 = vld [vmem:[#allocation2 + $0x390] ss:$8 sps:$4 sm:$0xff]  }
 0x370   : > { %2692 = vmatprep.mubr.bf16.mxu1 %v11714_v34  ;;  %v11741_v34 = vld [vmem:[#allocation2 + $0x3a4] ss:$8 sps:$4 sm:$0xff]  }
 0x377   : > { %2693 = vmatmul.mubr.bf16.gmra.mxu1 %v11712_v56  ;;  %v13027_v56 = vpop.f32.mrf.mxu1 }
 0x378   : > { %2700 = vmatprep.mubr.bf16.mxu1 %v11717_v52  ;;  %14455 = vst [vmem:[#allocation45_spill] sm:$0xff] %v13027_v56 }
 0x37f   : > { %2701 = vmatmul.mubr.bf16.gmra.mxu1 %v11715_v6 }
 0x380   : > { %2708 = vmatprep.mubr.bf16.mxu1 %v11720_v50 }
 0x387   : > { %2709 = vmatmul.mubr.bf16.gmra.mxu1 %v11718_v43 }
 0x388   : > { %2716 = vmatprep.mubr.bf16.mxu1 %v11723_v55 }
 0x38f   : > { %2717 = vmatmul.mubr.bf16.gmra.mxu1 %v11721_v31  ;;  %v11739_v31 = vld [vmem:[#allocation2 + $0x3a0] ss:$8 sps:$4 sm:$0xff]  }
 0x390   : > { %2724 = vmatprep.mubr.bf16.mxu1 %v11726_v46 }
 0x397   : > { %2725 = vmatmul.mubr.bf16.gmra.mxu1 %v11724_v53  ;;  %v11744_v53 = vld [vmem:[#allocation2 + $0x3b4] ss:$8 sps:$4 sm:$0xff]  }
 0x398   : > { %2732 = vmatprep.mubr.bf16.mxu1 %v11729_v29  ;;  %v11742_v29 = vld [vmem:[#allocation2 + $0x3b0] ss:$8 sps:$4 sm:$0xff]  }
 0x39f   : > { %2733 = vmatmul.mubr.bf16.gmra.mxu1 %v11727_v5 }
 0x3a0   : > { %2740 = vmatprep.mubr.bf16.mxu1 %v11732_v58 }
 0x3a7   : > { %2741 = vmatmul.mubr.bf16.gmra.mxu1 %v11730_v9 }
 0x3a8   : > { %2748 = vmatprep.mubr.bf16.mxu1 %v11735_v10 }
 0x3af   : > { %2749 = vmatmul.mubr.bf16.gmra.mxu1 %v11733_v60  ;;  %v11750_v60 = vld [vmem:[#allocation2 + $0x3d4] ss:$8 sps:$4 sm:$0xff]  }
 0x3b0   : > { %2756 = vmatprep.mubr.bf16.mxu1 %v11738_v22  ;;  %v11748_v22 = vld [vmem:[#allocation2 + $0x3d0] ss:$8 sps:$4 sm:$0xff]  }
 0x3b7   : > { %v11056_v52 = vpop.f32.mrf.mxu1  ;;  %2757 = vmatmul.mubr.bf16.gmra.mxu1 %v11736_v36  ;;  %v11753_v36 = vld [vmem:[#allocation2 + $0x3e4] ss:$8 sps:$4 sm:$0xff]  }
 0x3b8   : > { %v13030_v6 = vadd.f32 %v11056_v52, %v12906_v16  ;;  %2764 = vmatprep.mubr.bf16.mxu1 %v11741_v34 }
 0x3b9   : > { %v2300_v50 = vpop.f32.mrf.mxu1 }
 0x3ba   : > { %v13033_v43 = vadd.f32 %v2300_v50, %v12908_v21 }
 0x3bb   : > { %v11057_v55 = vpop.f32.mrf.mxu1 }
 0x3bc   : > { %v13036_v46 = vadd.f32 %v11057_v55, %v12910_v25  ;;  %v11745_v25 = vld [vmem:[#allocation2 + $0x3c0] ss:$8 sps:$4 sm:$0xff]  }
 0x3bd   : > { %v13038_v5 = vpop.f32.mrf.mxu1 }
 0x3be   : > { %14456 = vst [vmem:[#allocation46_spill] sm:$0xff] %v13038_v5 }
 0x3bf   : > { %2765 = vmatmul.mubr.bf16.gmra.mxu1 %v11739_v31 }
 0x3c0   : > { %2772 = vmatprep.mubr.bf16.mxu1 %v11744_v53  ;;  %v11756_v53 = vld [vmem:[#allocation2 + $0x3f4] ss:$8 sps:$4 sm:$0xff]  }
 0x3c7   : > { %v11060_v58 = vpop.f32.mrf.mxu1  ;;  %2773 = vmatmul.mubr.bf16.gmra.mxu1 %v11742_v29  ;;  %v11754_v29 = vld [vmem:[#allocation2 + $0x3f0] ss:$8 sps:$4 sm:$0xff]  }
 0x3c8   : > { %v13041_v16 = vadd.f32 %v11060_v58, %v12922_v40  ;;  %2780 = vmatprep.mubr.bf16.mxu1 %v11747_v4 }
 0x3c9   : > { %v2316_v21 = vpop.f32.mrf.mxu1 }
 0x3ca   : > { %v13044_v0 = vadd.f32 %v2316_v21, %v12924_v44 }
 0x3cb   : > { %v11061_v9 = vpop.f32.mrf.mxu1 }
 0x3cc   : > { %v13047_v10 = vadd.f32 %v11061_v9, %v12926_v51  ;;  %v11751_v51 = vld [vmem:[#allocation2 + $0x3e0] ss:$8 sps:$4 sm:$0xff]  }
 0x3cd   : > { %v13049_v34 = vpop.f32.mrf.mxu1 }
 0x3ce   : > { %14457 = vst [vmem:[#allocation47_spill] sm:$0xff] %v13049_v34 }
 0x3cf   : > { %2781 = vmatmul.mubr.bf16.gmra.mxu1 %v11745_v25 }
 0x3d0   : > { %2788 = vmatprep.mubr.bf16.mxu1 %v11750_v60 }
 0x3d7   : > { %v11064_v52 = vpop.f32.mrf.mxu1  ;;  %2789 = vmatmul.mubr.bf16.gmra.mxu1 %v11748_v22 }
 0x3d8   : > { %v13052_v40 = vadd.f32 %v11064_v52, %v12932_v59  ;;  %2796 = vmatprep.mubr.bf16.mxu1 %v11753_v36 }
 0x3d9   : > { %v2332_v44 = vpop.f32.mrf.mxu1 }
 0x3da   : > { %v13055_v50 = vadd.f32 %v2332_v44, %v12934_v62 }
 0x3db   : > { %v11065_v55 = vpop.f32.mrf.mxu1 }
 0x3dc   : > { %v13058_v31 = vadd.f32 %v11065_v55, %v12936_v2 }
 0x3dd   : > { %v13060_v4 = vpop.f32.mrf.mxu1 }
 0x3de   : > { %14458 = vst [vmem:[#allocation48_spill] sm:$0xff] %v13060_v4 }
 0x3df   : > { %2797 = vmatmul.mubr.bf16.gmra.mxu1 %v11751_v51 }
 0x3e0   : > { %2804 = vmatprep.mubr.bf16.mxu1 %v11756_v53 }
 0x3e7   : > { %v11068_v58 = vpop.f32.mrf.mxu1  ;;  %2805 = vmatmul.mubr.bf16.gmra.mxu1 %v11754_v29 }
 0x3e8   : > { %v13063_v59 = vadd.f32 %v11068_v58, %v12942_v12 }
 0x3e9   : > { %v2348_v21 = vpop.f32.mrf.mxu1 }
 0x3ea   : > { %v13066_v62 = vadd.f32 %v2348_v21, %v12944_v18 }
 0x3eb   : > { %v11069_v9 = vpop.f32.mrf.mxu1 }
 0x3ec   : > { %v13069_v25 = vadd.f32 %v11069_v9, %v12946_v24 }
 0x3ed   : > { %v13071_v2 = vpop.f32.mrf.mxu1 }
 0x3f7   : > { %v11072_v60 = vpop.f32.mrf.mxu1 }
 0x3f8   : > { %v13074_v22 = vadd.f32 %v11072_v60, %v12952_v32 }
 0x3f9   : > { %v2364_v36 = vpop.f32.mrf.mxu1 }
 0x3fa   : > { %v13077_v52 = vadd.f32 %v2364_v36, %v12954_v41 }
 0x3fb   : > { %v11073_v12 = vpop.f32.mrf.mxu1 }
 0x3fc   : > { %v13080_v44 = vadd.f32 %v11073_v12, %v12956_v48 }
 0x3fd   : > { %v13082_v18 = vpop.f32.mrf.mxu1 }
 0x3fe   : > { %14459 = vst [vmem:[#allocation49_spill] sm:$0xff] %v13082_v18 }
 0x407   : > { %v11076_v55 = vpop.f32.mrf.mxu1 }
 0x408   : > { %v13085_v24 = vadd.f32 %v11076_v55, %v12962_v57 }
 0x409   : > { %v2380_v51 = vpop.f32.mrf.mxu1 }
 0x40a   : > { %v13088_v53 = vadd.f32 %v2380_v51, %v12964_v61 }
 0x40b   : > { %v11077_v32 = vpop.f32.mrf.mxu1 }
 0x40c   : > { %v13091_v29 = vadd.f32 %v11077_v32, %v12966_v1 }
 0x40d   : > { %v13093_v41 = vpop.f32.mrf.mxu1 }
 0x40e   : > { %14460 = vst [vmem:[#allocation50_spill] sm:$0xff] %v13093_v41 }
 0x417   : > { %v11080_v58 = vpop.f32.mrf.mxu1 }
 0x418   : > { %v13096_v48 = vadd.f32 %v11080_v58, %v12972_v15 }
 0x419   : > { %v2396_v21 = vpop.f32.mrf.mxu1 }
 0x41a   : > { %v13099_v9 = vadd.f32 %v2396_v21, %v12974_v23 }
 0x41b   : > { %v11081_v57 = vpop.f32.mrf.mxu1 }
 0x41c   : > { %v13102_v60 = vadd.f32 %v11081_v57, %v12976_v37 }
 0x41d   : > { %v13104_v61 = vpop.f32.mrf.mxu1 }
 0x41e   : > { %14461 = vst [vmem:[#allocation51_spill] sm:$0xff] %v13104_v61 }
 0x427   : > { %v11084_v36 = vpop.f32.mrf.mxu1 }
 0x428   : > { %v13107_v1 = vadd.f32 %v11084_v36, %v12982_v54 }
 0x429   : > { %v2412_v12 = vpop.f32.mrf.mxu1 }
 0x42a   : > { %v13110_v55 = vadd.f32 %v2412_v12, %v12984_v63 }
 0x42b   : > { %v11085_v15 = vpop.f32.mrf.mxu1 }
 0x42c   : > { %v13113_v51 = vadd.f32 %v11085_v15, %v12986_v11 }
 0x42d   : > { %v13115_v23 = vpop.f32.mrf.mxu1 }
 0x42e   : > { %14462 = vst [vmem:[#allocation52_spill] sm:$0xff] %v13115_v23 }
 0x42f   : > { %v9791_v32 = vpop.f32.mrf.mxu1 }
 0x431   : > { %v9792_v58 = vpop.f32.mrf.mxu1 }
 0x432   : > { %v9793_v57 = vadd.f32 %v9792_v58, %v9791_v32 }
 0x433   : > { %v9794_v37 = vpop.f32.mrf.mxu1 }
 0x435   : > { %v9795_v21 = vpop.f32.mrf.mxu1 }
 0x436   : > { %v9796_v5 = vadd.f32 %v9795_v21, %v9794_v37 }
 0x437   : > { %v9797_v18 = vpop.f32.mrf.mxu1 }
 0x438   : > { %v2815_v34 = vpack.c.bf16 %v9796_v5, %v9793_v57 }
 0x439   : > { %v9798_v54 = vpop.f32.mrf.mxu1 }
 0x43a   : > { %11088 = vmatprep.mubr.msk.bf16.mxu0 %vm1417_vm1, %v2815_v34  ;;  %v9799_v12 = vadd.f32 %v9798_v54, %v9797_v18 }
 0x43b   : > { %v9800_v36 = vpop.f32.mrf.mxu1 }
 0x43d   : > { %v9801_v63 = vpop.f32.mrf.mxu1 }
 0x43e   : > { %v9802_v41 = vadd.f32 %v9801_v63, %v9800_v36 }
 0x43f   : > { %v9803_v4 = vpop.f32.mrf.mxu1 }
 0x440   : > { %v2816_v11 = vpack.c.bf16 %v9802_v41, %v9799_v12 }
 0x441   : > { %v9804_v15 = vpop.f32.mrf.mxu1 }
 0x442   : > { %11089 = vmatmul.mubr.msk.bf16.vlgmr.msra.gmra.mxu0 %vm1417_vm1, %v2816_v11  ;;  %v9805_v58 = vadd.f32 %v9804_v15, %v9803_v4 }
 0x443   : > { %v9806_v61 = vpop.f32.mrf.mxu1  ;;  %9905 = vmatpush3.bf16.msra.mxu0 %v12760_v7 }
 0x444   : > { %9906 = vmatprep.subr.bf16.mxu0 %v12762_v8 }
 0x445   : > { %v9807_v32 = vpop.f32.mrf.mxu1 }
 0x446   : > { %v9808_v5 = vadd.f32 %v9807_v32, %v9806_v61 }
 0x447   : > { %v9809_v37 = vpop.f32.mrf.mxu1  ;;  %9907 = vmatpush3.bf16.msra.mxu0 %v12772_v13 }
 0x448   : > { %v2817_v34 = vpack.c.bf16 %v9808_v5, %v9805_v58  ;;  %9908 = vmatprep.subr.bf16.mxu0 %v12776_v14 }
 0x449   : > { %v9810_v18 = vpop.f32.mrf.mxu1 }
 0x44a   : > { %11092 = vmatprep.mubr.msk.bf16.mxu0 %vm1417_vm1, %v2817_v34  ;;  %v9811_v57 = vadd.f32 %v9810_v18, %v9809_v37 }
 0x44b   : > { %v9812_v41 = vpop.f32.mrf.mxu1  ;;  %9909 = vmatpush3.bf16.msra.mxu0 %v12784_v19 }
 0x44c   : > { %9910 = vmatprep.subr.bf16.mxu0 %v12788_v20 }
 0x44d   : > { %v9813_v21 = vpop.f32.mrf.mxu1 }
 0x44e   : > { %v9814_v54 = vadd.f32 %v9813_v21, %v9812_v41 }
 0x44f   : > { %v9815_v36 = vpop.f32.mrf.mxu1  ;;  %9911 = vmatpush3.bf16.msra.mxu0 %v12798_v28 }
 0x450   : > { %v2818_v4 = vpack.c.bf16 %v9814_v54, %v9811_v57  ;;  %9912 = vmatprep.subr.bf16.mxu0 %v12803_v30 }
 0x451   : > { %v9816_v61 = vpop.f32.mrf.mxu1 }
 0x452   : > { %11093 = vmatmul.mubr.msk.bf16.gmra.mxu0 %vm1417_vm1, %v2818_v4  ;;  %v9817_v11 = vadd.f32 %v9816_v61, %v9815_v36 }
 0x453   : > { %v9818_v63 = vpop.f32.mrf.mxu1  ;;  %9913 = vmatpush3.bf16.msra.mxu0 %v12808_v33 }
 0x454   : > { %9914 = vmatprep.subr.bf16.mxu0 %v12813_v35 }
 0x455   : > { %v9819_v12 = vpop.f32.mrf.mxu1 }
 0x456   : > { %v9820_v15 = vadd.f32 %v9819_v12, %v9818_v63 }
 0x457   : > { %v9821_v32 = vpop.f32.mrf.mxu1  ;;  %9915 = vmatpush3.bf16.msra.mxu0 %v12820_v39 }
 0x458   : > { %v2819_v58 = vpack.c.bf16 %v9820_v15, %v9817_v11  ;;  %9916 = vmatprep.subr.bf16.mxu0 %v12826_v42 }
 0x459   : > { %v9822_v5 = vpop.f32.mrf.mxu1 }
 0x45a   : > { %11096 = vmatprep.mubr.msk.bf16.mxu0 %vm1417_vm1, %v2819_v58  ;;  %v9823_v18 = vadd.f32 %v9822_v5, %v9821_v32 }
 0x45b   : > { %v9824_v37 = vpop.f32.mrf.mxu1  ;;  %9917 = vmatpush3.bf16.msra.mxu0 %v12832_v45 }
 0x45c   : > { %9918 = vmatprep.subr.bf16.mxu0 %v12837_v47 }
 0x45d   : > { %v9825_v34 = vpop.f32.mrf.mxu1 }
 0x45e   : > { %v9826_v41 = vadd.f32 %v9825_v34, %v9824_v37 }
 0x45f   : > { %v9827_v21 = vpop.f32.mrf.mxu1  ;;  %9919 = vmatpush3.bf16.msra.mxu0 %v12842_v49 }
 0x460   : > { %v2820_v57 = vpack.c.bf16 %v9826_v41, %v9823_v18 }
 0x461   : > { %v9828_v54 = vpop.f32.mrf.mxu1 }
 0x462   : > { %11097 = vmatmul.mubr.msk.bf16.gmra.mxu0 %vm1417_vm1, %v2820_v57  ;;  %v9829_v61 = vadd.f32 %v9828_v54, %v9827_v21 }
 0x463   : > { %v9830_v36 = vpop.f32.mrf.mxu1 }
 0x465   : > { %v9831_v4 = vpop.f32.mrf.mxu1 }
 0x466   : > { %v9832_v63 = vadd.f32 %v9831_v4, %v9830_v36 }
 0x467   : > { %v9833_v12 = vpop.f32.mrf.mxu1 }
 0x468   : > { %v2821_v11 = vpack.c.bf16 %v9832_v63, %v9829_v61 }
 0x469   : > { %v9834_v15 = vpop.f32.mrf.mxu1 }
 0x46a   : > { %11100 = vmatprep.mubr.msk.bf16.mxu0 %vm1417_vm1, %v2821_v11  ;;  %v9835_v32 = vadd.f32 %v9834_v15, %v9833_v12 }
 0x46b   : > { %v9836_v58 = vpop.f32.mrf.mxu1 }
 0x46d   : > { %v9837_v23 = vpop.f32.mrf.mxu1 }
 0x46e   : > { %v9838_v5 = vadd.f32 %v9837_v23, %v9836_v58 }
 0x46f   : > { %v9839_v37 = vpop.f32.mrf.mxu1 }
 0x470   : > { %v2822_v34 = vpack.c.bf16 %v9838_v5, %v9835_v32 }
 0x471   : > { %v9840_v38 = vpop.f32.mrf.mxu1 }
 0x472   : > { %11101 = vmatmul.mubr.msk.bf16.gmra.mxu0 %vm1417_vm1, %v2822_v34  ;;  %v9841_v57 = vadd.f32 %v9840_v38, %v9839_v37 }
 0x473   : > { %v9842_v18 = vpop.f32.mrf.mxu1 }
 0x475   : > { %v9843_v41 = vpop.f32.mrf.mxu1 }
 0x476   : > { %v9844_v56 = vadd.f32 %v9843_v41, %v9842_v18 }
 0x477   : > { %v9845_v21 = vpop.f32.mrf.mxu1 }
 0x478   : > { %v2823_v54 = vpack.c.bf16 %v9844_v56, %v9841_v57 }
 0x479   : > { %v9846_v36 = vpop.f32.mrf.mxu1 }
 0x47a   : > { %11104 = vmatprep.mubr.msk.bf16.mxu0 %vm1417_vm1, %v2823_v54  ;;  %v9847_v63 = vadd.f32 %v9846_v36, %v9845_v21 }
 0x47b   : > { %v9848_v4 = vpop.f32.mrf.mxu1 }
 0x47d   : > { %v9849_v61 = vpop.f32.mrf.mxu1 }
 0x47e   : > { %v9850_v11 = vadd.f32 %v9849_v61, %v9848_v4 }
 0x47f   : > { %v9851_v12 = vpop.f32.mrf.mxu1 }
 0x480   : > { %v2824_v23 = vpack.c.bf16 %v9850_v11, %v9847_v63 }
 0x481   : > { %v9852_v15 = vpop.f32.mrf.mxu1 }
 0x482   : > { %11105 = vmatmul.mubr.msk.bf16.gmra.mxu0 %vm1417_vm1, %v2824_v23  ;;  %v9853_v5 = vadd.f32 %v9852_v15, %v9851_v12 }
 0x483   : > { %v9854_v58 = vpop.f32.mrf.mxu1 }
 0x485   : > { %v9855_v32 = vpop.f32.mrf.mxu1 }
 0x486   : > { %v9856_v34 = vadd.f32 %v9855_v32, %v9854_v58 }
 0x487   : > { %v9857_v38 = vpop.f32.mrf.mxu1 }
 0x488   : > { %v2825_v37 = vpack.c.bf16 %v9856_v34, %v9853_v5 }
 0x489   : > { %v9858_v18 = vpop.f32.mrf.mxu1 }
 0x48a   : > { %11108 = vmatprep.mubr.msk.bf16.mxu0 %vm1417_vm1, %v2825_v37  ;;  %v9859_v57 = vadd.f32 %v9858_v18, %v9857_v38 }
 0x48b   : > { %v9860_v56 = vpop.f32.mrf.mxu1 }
 0x48d   : > { %v9861_v41 = vpop.f32.mrf.mxu1 }
 0x48e   : > { %v9862_v54 = vadd.f32 %v9861_v41, %v9860_v56 }
 0x48f   : > { %v9863_v21 = vpop.f32.mrf.mxu1 }
 0x490   : > { %v2826_v36 = vpack.c.bf16 %v9862_v54, %v9859_v57 }
 0x491   : > { %v9864_v4 = vpop.f32.mrf.mxu1 }
 0x492   : > { %11109 = vmatmul.mubr.msk.bf16.gmra.mxu0 %vm1417_vm1, %v2826_v36  ;;  %v9865_v11 = vadd.f32 %v9864_v4, %v9863_v21 }
 0x493   : > { %v9866_v61 = vpop.f32.mrf.mxu1 }
 0x495   : > { %v9867_v63 = vpop.f32.mrf.mxu1 }
 0x496   : > { %v9868_v23 = vadd.f32 %v9867_v63, %v9866_v61 }
 0x497   : > { %v9869_v12 = vpop.f32.mrf.mxu1 }
 0x498   : > { %v2827_v15 = vpack.c.bf16 %v9868_v23, %v9865_v11 }
 0x499   : > { %v9870_v58 = vpop.f32.mrf.mxu1 }
 0x49a   : > { %11112 = vmatprep.mubr.msk.bf16.mxu0 %vm1417_vm1, %v2827_v15  ;;  %v9871_v34 = vadd.f32 %v9870_v58, %v9869_v12  ;;  %v11759_v12 = vld [vmem:[#allocation2 + $0x404] ss:$8 sps:$4 sm:$0xff]  }
 0x49b   : > { %v9872_v32 = vpop.f32.mrf.mxu1 }
 0x49d   : > { %v9873_v5 = vpop.f32.mrf.mxu1 }
 0x49e   : > { %v9874_v37 = vadd.f32 %v9873_v5, %v9872_v32  ;;  %v11757_v32 = vld [vmem:[#allocation2 + $0x400] ss:$8 sps:$4 sm:$0xff]   ;;  %v11762_v5 = vld [vmem:[#allocation2 + $0x414] ss:$8 sps:$4 sm:$0xff]  }
 0x49f   : > { %v9875_v38 = vpop.f32.mrf.mxu1 }
 0x4a0   : > { %v2828_v18 = vpack.c.bf16 %v9874_v37, %v9871_v34  ;;  %v11760_v34 = vld [vmem:[#allocation2 + $0x410] ss:$8 sps:$4 sm:$0xff]   ;;  %v11765_v37 = vld [vmem:[#allocation2 + $0x424] ss:$8 sps:$4 sm:$0xff]  }
 0x4a1   : > { %v9876_v56 = vpop.f32.mrf.mxu1 }
 0x4a2   : > { %11113 = vmatmul.mubr.msk.bf16.gmra.mxu0 %vm1417_vm1, %v2828_v18  ;;  %v9877_v54 = vadd.f32 %v9876_v56, %v9875_v38  ;;  %v11763_v38 = vld [vmem:[#allocation2 + $0x420] ss:$8 sps:$4 sm:$0xff]   ;;  %v11768_v18 = vld [vmem:[#allocation2 + $0x434] ss:$8 sps:$4 sm:$0xff]   ;;  %v11766_v56 = vld [vmem:[#allocation2 + $0x430] ss:$8 sps:$4 sm:$0xff]  }
 0x4a3   : > { %v9878_v41 = vpop.f32.mrf.mxu1 }
 0x4a5   : > { %v9879_v57 = vpop.f32.mrf.mxu1 }
 0x4a6   : > { %v9880_v36 = vadd.f32 %v9879_v57, %v9878_v41  ;;  %v11771_v41 = vld [vmem:[#allocation2 + $0x444] ss:$8 sps:$4 sm:$0xff]   ;;  %v11769_v57 = vld [vmem:[#allocation2 + $0x440] ss:$8 sps:$4 sm:$0xff]  }
 0x4a7   : > { %v9881_v21 = vpop.f32.mrf.mxu1 }
 0x4a8   : > { %v2829_v4 = vpack.c.bf16 %v9880_v36, %v9877_v54  ;;  %v11774_v54 = vld [vmem:[#allocation2 + $0x454] ss:$8 sps:$4 sm:$0xff]   ;;  %v11772_v36 = vld [vmem:[#allocation2 + $0x450] ss:$8 sps:$4 sm:$0xff]  }
 0x4a9   : > { %v9882_v61 = vpop.f32.mrf.mxu1 }
 0x4aa   : > { %11116 = vmatprep.mubr.msk.bf16.mxu0 %vm1417_vm1, %v2829_v4  ;;  %v9883_v23 = vadd.f32 %v9882_v61, %v9881_v21  ;;  %v11777_v21 = vld [vmem:[#allocation2 + $0x464] ss:$8 sps:$4 sm:$0xff]   ;;  %v9022_v4 = vld [vmem:[%s14385_s2 + $0x8] sm:$0x3] }
 0x4ab   : > { %v9884_v63 = vpop.f32.mrf.mxu1  ;;  %v11775_v61 = vld [vmem:[#allocation2 + $0x460] ss:$8 sps:$4 sm:$0xff]   ;;  %11404 = vmatprep.subr.msk.bf16.mxu1 %vm1466_vm0, %v9022_v4 }
 0x4ad   : > { %v9885_v11 = vpop.f32.mrf.mxu1 }
 0x4ae   : > { %v9886_v15 = vadd.f32 %v9885_v11, %v9884_v63  ;;  %v11780_v63 = vld [vmem:[#allocation2 + $0x474] ss:$8 sps:$4 sm:$0xff]   ;;  %v3496_v11 = vsel %vm1466_vm0, %v9022_v4, 0 }
 0x4af   : > { %11121 = vmatpush3.bf16.msra.mxu1 %v3496_v11 }
 0x4b0   : > { %v2830_v58 = vpack.c.bf16 %v9886_v15, %v9883_v23  ;;  %10033 = vmatprep.subr.bf16.mxu1 %v12755_v3  ;;  %v11778_v23 = vld [vmem:[#allocation2 + $0x470] ss:$8 sps:$4 sm:$0xff]   ;;  %v11783_v15 = vld [vmem:[#allocation2 + $0x484] ss:$8 sps:$4 sm:$0xff]  }
 0x4b2   : > { %11117 = vmatmul.mubr.msk.bf16.gmra.mxu0 %vm1417_vm1, %v2830_v58  ;;  %v11786_v58 = vld [vmem:[#allocation2 + $0x494] ss:$8 sps:$4 sm:$0xff]  }
 0x4b3   : > { %3300 = vmatprep.mubr.bf16.mxu0 %v11759_v12  ;;  %v11781_v12 = vld [vmem:[#allocation2 + $0x480] ss:$8 sps:$4 sm:$0xff]  }
 0x4ba   : > { %3301 = vmatmul.mubr.bf16.vlgmr.msra.gmra.mxu0 %v11757_v32  ;;  %v11784_v32 = vld [vmem:[#allocation2 + $0x490] ss:$8 sps:$4 sm:$0xff]  }
 0x4bb   : > { %3308 = vmatprep.mubr.bf16.mxu0 %v11762_v5  ;;  %v11789_v5 = vld [vmem:[#allocation2 + $0x4a4] ss:$8 sps:$4 sm:$0xff]  }
 0x4c2   : > { %3309 = vmatmul.mubr.bf16.gmra.mxu0 %v11760_v34 }
 0x4c3   : > { %3316 = vmatprep.mubr.bf16.mxu0 %v11765_v37 }
 0x4ca   : > { %3317 = vmatmul.mubr.bf16.gmra.mxu0 %v11763_v38 }
 0x4cb   : > { %3324 = vmatprep.mubr.bf16.mxu0 %v11768_v18 }
 0x4d2   : > { %3325 = vmatmul.mubr.bf16.gmra.mxu0 %v11766_v56 }
 0x4d3   : > { %3332 = vmatprep.mubr.bf16.mxu0 %v11771_v41  ;;  %v11787_v41 = vld [vmem:[#allocation2 + $0x4a0] ss:$8 sps:$4 sm:$0xff]  }
 0x4da   : > { %3333 = vmatmul.mubr.bf16.gmra.mxu0 %v11769_v57 }
 0x4db   : > { %3340 = vmatprep.mubr.bf16.mxu0 %v11774_v54  ;;  %v11792_v54 = vld [vmem:[#allocation2 + $0x4b4] ss:$8 sps:$4 sm:$0xff]  }
 0x4e2   : > { %3341 = vmatmul.mubr.bf16.gmra.mxu0 %v11772_v36  ;;  %v11790_v36 = vld [vmem:[#allocation2 + $0x4b0] ss:$8 sps:$4 sm:$0xff]  }
 0x4e3   : > { %3348 = vmatprep.mubr.bf16.mxu0 %v11777_v21  ;;  %v11795_v21 = vld [vmem:[#allocation2 + $0x4c4] ss:$8 sps:$4 sm:$0xff]  }
 0x4ea   : > { %3349 = vmatmul.mubr.bf16.gmra.mxu0 %v11775_v61 }
 0x4eb   : > { %3356 = vmatprep.mubr.bf16.mxu0 %v11780_v63 }
 0x4f2   : > { %3357 = vmatmul.mubr.bf16.gmra.mxu0 %v11778_v23 }
 0x4f3   : > { %3364 = vmatprep.mubr.bf16.mxu0 %v11783_v15  ;;  %v11798_v15 = vld [vmem:[#allocation2 + $0x4d4] ss:$8 sps:$4 sm:$0xff]  }
 0x4fa   : > { %3365 = vmatmul.mubr.bf16.gmra.mxu0 %v11781_v12  ;;  %v11796_v12 = vld [vmem:[#allocation2 + $0x4d0] ss:$8 sps:$4 sm:$0xff]  }
 0x4fb   : > { %3372 = vmatprep.mubr.bf16.mxu0 %v11786_v58  ;;  %v11801_v58 = vld [vmem:[#allocation2 + $0x4e4] ss:$8 sps:$4 sm:$0xff]  }
 0x502   : > { %v11090_v34 = vpop.f32.mrf.mxu0  ;;  %3373 = vmatmul.mubr.bf16.gmra.mxu0 %v11784_v32 }
 0x503   : > { %v13155_v37 = vadd.f32 %v11090_v34, %v13030_v6  ;;  %3380 = vmatprep.mubr.bf16.mxu0 %v11789_v5 }
 0x504   : > { %v2916_v38 = vpop.f32.mrf.mxu0 }
 0x505   : > { %v13158_v18 = vadd.f32 %v2916_v38, %v13033_v43 }
 0x506   : > { %v11091_v56 = vpop.f32.mrf.mxu0 }
 0x507   : > { %v13161_v57 = vadd.f32 %v11091_v56, %v13036_v46  ;;  %v11793_v46 = vld [vmem:[#allocation2 + $0x4c0] ss:$8 sps:$4 sm:$0xff]  }
 0x508   : > { %v13163_v4 = vpop.f32.mrf.mxu0 }
 0x509   : > { %14463 = vst [vmem:[#allocation53_spill] sm:$0xff] %v13163_v4 }
 0x50a   : > { %3381 = vmatmul.mubr.bf16.gmra.mxu0 %v11787_v41  ;;  %v11804_v41 = vld [vmem:[#allocation2 + $0x4f4] ss:$8 sps:$4 sm:$0xff]  }
 0x50b   : > { %3388 = vmatprep.mubr.bf16.mxu0 %v11792_v54  ;;  %v11802_v54 = vld [vmem:[#allocation2 + $0x4f0] ss:$8 sps:$4 sm:$0xff]  }
 0x512   : > { %v11094_v61 = vpop.f32.mrf.mxu0  ;;  %3389 = vmatmul.mubr.bf16.gmra.mxu0 %v11790_v36 }
 0x513   : > { %v13166_v6 = vadd.f32 %v11094_v61, %v13041_v16  ;;  %3396 = vmatprep.mubr.bf16.mxu0 %v11795_v21 }
 0x514   : > { %v2932_v43 = vpop.f32.mrf.mxu0 }
 0x515   : > { %v13169_v63 = vadd.f32 %v2932_v43, %v13044_v0 }
 0x516   : > { %v11095_v11 = vpop.f32.mrf.mxu0 }
 0x517   : > { %v13172_v23 = vadd.f32 %v11095_v11, %v13047_v10  ;;  %v11799_v10 = vld [vmem:[#allocation2 + $0x4e0] ss:$8 sps:$4 sm:$0xff]  }
 0x518   : > { %v13174_v32 = vpop.f32.mrf.mxu0 }
 0x519   : > { %14464 = vst [vmem:[#allocation54_spill] sm:$0xff] %v13174_v32 }
 0x51a   : > { %3397 = vmatmul.mubr.bf16.gmra.mxu0 %v11793_v46 }
 0x51b   : > { %3404 = vmatprep.mubr.bf16.mxu0 %v11798_v15 }
 0x522   : > { %v11098_v5 = vpop.f32.mrf.mxu0  ;;  %3405 = vmatmul.mubr.bf16.gmra.mxu0 %v11796_v12 }
 0x523   : > { %v13177_v16 = vadd.f32 %v11098_v5, %v13052_v40  ;;  %3412 = vmatprep.mubr.bf16.mxu0 %v11801_v58 }
 0x524   : > { %v2948_v0 = vpop.f32.mrf.mxu0 }
 0x525   : > { %v13180_v34 = vadd.f32 %v2948_v0, %v13055_v50 }
 0x526   : > { %v11099_v38 = vpop.f32.mrf.mxu0 }
 0x527   : > { %v13183_v56 = vadd.f32 %v11099_v38, %v13058_v31 }
 0x528   : > { %v13185_v36 = vpop.f32.mrf.mxu0 }
 0x529   : > { %14465 = vst [vmem:[#allocation55_spill] sm:$0xff] %v13185_v36 }
 0x52a   : > { %3413 = vmatmul.mubr.bf16.gmra.mxu0 %v11799_v10 }
 0x52b   : > { %3420 = vmatprep.mubr.bf16.mxu0 %v11804_v41 }
 0x532   : > { %v11102_v21 = vpop.f32.mrf.mxu0  ;;  %3421 = vmatmul.mubr.bf16.gmra.mxu0 %v11802_v54 }
 0x533   : > { %v13188_v40 = vadd.f32 %v11102_v21, %v13063_v59 }
 0x534   : > { %v2964_v61 = vpop.f32.mrf.mxu0 }
 0x535   : > { %v13191_v50 = vadd.f32 %v2964_v61, %v13066_v62 }
 0x536   : > { %v11103_v43 = vpop.f32.mrf.mxu0 }
 0x537   : > { %v13194_v11 = vadd.f32 %v11103_v43, %v13069_v25 }
 0x538   : > { %v13196_v31 = vpop.f32.mrf.mxu0 }
 0x539   : > { %14466 = vst [vmem:[#allocation56_spill] sm:$0xff] %v13196_v31 }
 0x542   : > { %v11106_v46 = vpop.f32.mrf.mxu0 }
 0x543   : > { %v13199_v15 = vadd.f32 %v11106_v46, %v13074_v22 }
 0x544   : > { %v2980_v12 = vpop.f32.mrf.mxu0 }
 0x545   : > { %v13202_v58 = vadd.f32 %v2980_v12, %v13077_v52 }
 0x546   : > { %v11107_v59 = vpop.f32.mrf.mxu0 }
 0x547   : > { %v13205_v5 = vadd.f32 %v11107_v59, %v13080_v44 }
 0x548   : > { %v13207_v62 = vpop.f32.mrf.mxu0 }
 0x549   : > { %14467 = vst [vmem:[#allocation57_spill] sm:$0xff] %v13207_v62 }
 0x552   : > { %v11110_v0 = vpop.f32.mrf.mxu0 }
 0x553   : > { %v13210_v25 = vadd.f32 %v11110_v0, %v13085_v24 }
 0x554   : > { %v2996_v38 = vpop.f32.mrf.mxu0 }
 0x555   : > { %v13213_v10 = vadd.f32 %v2996_v38, %v13088_v53 }
 0x556   : > { %v11111_v22 = vpop.f32.mrf.mxu0 }
 0x557   : > { %v13216_v41 = vadd.f32 %v11111_v22, %v13091_v29 }
 0x558   : > { %v13218_v52 = vpop.f32.mrf.mxu0 }
 0x559   : > { %14468 = vst [vmem:[#allocation58_spill] sm:$0xff] %v13218_v52 }
 0x562   : > { %v11114_v54 = vpop.f32.mrf.mxu0 }
 0x563   : > { %v13221_v44 = vadd.f32 %v11114_v54, %v13096_v48 }
 0x564   : > { %v3012_v21 = vpop.f32.mrf.mxu0 }
 0x565   : > { %v13224_v61 = vadd.f32 %v3012_v21, %v13099_v9 }
 0x566   : > { %v11115_v24 = vpop.f32.mrf.mxu0 }
 0x567   : > { %v13227_v43 = vadd.f32 %v11115_v24, %v13102_v60 }
 0x568   : > { %v13229_v53 = vpop.f32.mrf.mxu0 }
 0x569   : > { %14469 = vst [vmem:[#allocation59_spill] sm:$0xff] %v13229_v53 }
 0x572   : > { %v11118_v46 = vpop.f32.mrf.mxu0 }
 0x573   : > { %v13232_v29 = vadd.f32 %v11118_v46, %v13107_v1 }
 0x574   : > { %v3028_v12 = vpop.f32.mrf.mxu0 }
 0x575   : > { %v13235_v59 = vadd.f32 %v3028_v12, %v13110_v55 }
 0x576   : > { %v11119_v48 = vpop.f32.mrf.mxu0 }
 0x577   : > { %v13238_v0 = vadd.f32 %v11119_v48, %v13113_v51 }
 0x578   : > { %v13240_v9 = vpop.f32.mrf.mxu0 }
 0x579   : > { %14470 = vst [vmem:[#allocation60_spill] sm:$0xff] %v13240_v9 }
 0x57a   : > { %v9920_v38 = vpop.f32.mrf.mxu0 }
 0x57c   : > { %v9921_v22 = vpop.f32.mrf.mxu0 }
 0x57d   : > { %v9922_v21 = vadd.f32 %v9921_v22, %v9920_v38 }
 0x57e   : > { %v9923_v60 = vpop.f32.mrf.mxu0 }
 0x580   : > { %v9924_v54 = vpop.f32.mrf.mxu0 }
 0x581   : > { %v9925_v24 = vadd.f32 %v9924_v54, %v9923_v60 }
 0x582   : > { %v9926_v4 = vpop.f32.mrf.mxu0 }
 0x583   : > { %v3431_v62 = vpack.c.bf16 %v9925_v24, %v9922_v21 }
 0x584   : > { %v9927_v1 = vpop.f32.mrf.mxu0 }
 0x585   : > { %11122 = vmatprep.mubr.msk.bf16.mxu1 %vm1417_vm1, %v3431_v62  ;;  %v9928_v12 = vadd.f32 %v9927_v1, %v9926_v4 }
 0x586   : > { %v9929_v46 = vpop.f32.mrf.mxu0 }
 0x588   : > { %v9930_v55 = vpop.f32.mrf.mxu0 }
 0x589   : > { %v9931_v32 = vadd.f32 %v9930_v55, %v9929_v46 }
 0x58a   : > { %v9932_v52 = vpop.f32.mrf.mxu0 }
 0x58b   : > { %v3432_v51 = vpack.c.bf16 %v9931_v32, %v9928_v12 }
 0x58c   : > { %v9933_v48 = vpop.f32.mrf.mxu0 }
 0x58d   : > { %11123 = vmatmul.mubr.msk.bf16.vlgmr.msra.gmra.mxu1 %vm1417_vm1, %v3432_v51  ;;  %v9934_v22 = vadd.f32 %v9933_v48, %v9932_v52 }
 0x58e   : > { %v9935_v36 = vpop.f32.mrf.mxu0  ;;  %10034 = vmatpush3.bf16.msra.mxu1 %v12760_v7 }
 0x58f   : > { %10035 = vmatprep.subr.bf16.mxu1 %v12762_v8 }
 0x590   : > { %v9936_v38 = vpop.f32.mrf.mxu0 }
 0x591   : > { %v9937_v60 = vadd.f32 %v9936_v38, %v9935_v36 }
 0x592   : > { %v9938_v54 = vpop.f32.mrf.mxu0  ;;  %10036 = vmatpush3.bf16.msra.mxu1 %v12772_v13 }
 0x593   : > { %v3433_v62 = vpack.c.bf16 %v9937_v60, %v9934_v22  ;;  %10037 = vmatprep.subr.bf16.mxu1 %v12776_v14 }
 0x594   : > { %v9939_v4 = vpop.f32.mrf.mxu0 }
 0x595   : > { %11126 = vmatprep.mubr.msk.bf16.mxu1 %vm1417_vm1, %v3433_v62  ;;  %v9940_v24 = vadd.f32 %v9939_v4, %v9938_v54 }
 0x596   : > { %v9941_v32 = vpop.f32.mrf.mxu0  ;;  %10038 = vmatpush3.bf16.msra.mxu1 %v12784_v19 }
 0x597   : > { %10039 = vmatprep.subr.bf16.mxu1 %v12788_v20 }
 0x598   : > { %v9942_v21 = vpop.f32.mrf.mxu0 }
 0x599   : > { %v9943_v1 = vadd.f32 %v9942_v21, %v9941_v32 }
 0x59a   : > { %v9944_v46 = vpop.f32.mrf.mxu0  ;;  %10040 = vmatpush3.bf16.msra.mxu1 %v12798_v28 }
 0x59b   : > { %v3434_v36 = vpack.c.bf16 %v9943_v1, %v9940_v24  ;;  %10041 = vmatprep.subr.bf16.mxu1 %v12803_v30 }
 0x59c   : > { %v9945_v52 = vpop.f32.mrf.mxu0 }
 0x59d   : > { %11127 = vmatmul.mubr.msk.bf16.gmra.mxu1 %vm1417_vm1, %v3434_v36  ;;  %v9946_v51 = vadd.f32 %v9945_v52, %v9944_v46 }
 0x59e   : > { %v9947_v55 = vpop.f32.mrf.mxu0  ;;  %10042 = vmatpush3.bf16.msra.mxu1 %v12808_v33 }
 0x59f   : > { %10043 = vmatprep.subr.bf16.mxu1 %v12813_v35 }
 0x5a0   : > { %v9948_v12 = vpop.f32.mrf.mxu0 }
 0x5a1   : > { %v9949_v48 = vadd.f32 %v9948_v12, %v9947_v55 }
 0x5a2   : > { %v9950_v38 = vpop.f32.mrf.mxu0  ;;  %10044 = vmatpush3.bf16.msra.mxu1 %v12820_v39 }
 0x5a3   : > { %v3435_v22 = vpack.c.bf16 %v9949_v48, %v9946_v51  ;;  %10045 = vmatprep.subr.bf16.mxu1 %v12826_v42 }
 0x5a4   : > { %v9951_v60 = vpop.f32.mrf.mxu0 }
 0x5a5   : > { %11130 = vmatprep.mubr.msk.bf16.mxu1 %vm1417_vm1, %v3435_v22  ;;  %v9952_v4 = vadd.f32 %v9951_v60, %v9950_v38 }
 0x5a6   : > { %v9953_v54 = vpop.f32.mrf.mxu0  ;;  %10046 = vmatpush3.bf16.msra.mxu1 %v12832_v45 }
 0x5a7   : > { %10047 = vmatprep.subr.bf16.mxu1 %v12837_v47 }
 0x5a8   : > { %v9954_v62 = vpop.f32.mrf.mxu0 }
 0x5a9   : > { %v9955_v32 = vadd.f32 %v9954_v62, %v9953_v54 }
 0x5aa   : > { %v9956_v21 = vpop.f32.mrf.mxu0  ;;  %10048 = vmatpush3.bf16.msra.mxu1 %v12842_v49 }
 0x5ab   : > { %v3436_v24 = vpack.c.bf16 %v9955_v32, %v9952_v4 }
 0x5ac   : > { %v9957_v1 = vpop.f32.mrf.mxu0 }
 0x5ad   : > { %11131 = vmatmul.mubr.msk.bf16.gmra.mxu1 %vm1417_vm1, %v3436_v24  ;;  %v9958_v52 = vadd.f32 %v9957_v1, %v9956_v21 }
 0x5ae   : > { %v9959_v46 = vpop.f32.mrf.mxu0 }
 0x5b0   : > { %v9960_v36 = vpop.f32.mrf.mxu0 }
 0x5b1   : > { %v9961_v55 = vadd.f32 %v9960_v36, %v9959_v46 }
 0x5b2   : > { %v9962_v12 = vpop.f32.mrf.mxu0 }
 0x5b3   : > { %v3437_v51 = vpack.c.bf16 %v9961_v55, %v9958_v52 }
 0x5b4   : > { %v9963_v48 = vpop.f32.mrf.mxu0 }
 0x5b5   : > { %11134 = vmatprep.mubr.msk.bf16.mxu1 %vm1417_vm1, %v3437_v51  ;;  %v9964_v38 = vadd.f32 %v9963_v48, %v9962_v12 }
 0x5b6   : > { %v9965_v22 = vpop.f32.mrf.mxu0 }
 0x5b8   : > { %v9966_v53 = vpop.f32.mrf.mxu0 }
 0x5b9   : > { %v9967_v60 = vadd.f32 %v9966_v53, %v9965_v22 }
 0x5ba   : > { %v9968_v54 = vpop.f32.mrf.mxu0 }
 0x5bb   : > { %v3438_v62 = vpack.c.bf16 %v9967_v60, %v9964_v38 }
 0x5bc   : > { %v9969_v9 = vpop.f32.mrf.mxu0 }
 0x5bd   : > { %11135 = vmatmul.mubr.msk.bf16.gmra.mxu1 %vm1417_vm1, %v3438_v62  ;;  %v9970_v24 = vadd.f32 %v9969_v9, %v9968_v54 }
 0x5be   : > { %v9971_v4 = vpop.f32.mrf.mxu0 }
 0x5c0   : > { %v9972_v32 = vpop.f32.mrf.mxu0 }
 0x5c1   : > { %v9973_v31 = vadd.f32 %v9972_v32, %v9971_v4 }
 0x5c2   : > { %v9974_v21 = vpop.f32.mrf.mxu0 }
 0x5c3   : > { %v3439_v1 = vpack.c.bf16 %v9973_v31, %v9970_v24 }
 0x5c4   : > { %v9975_v46 = vpop.f32.mrf.mxu0 }
 0x5c5   : > { %11138 = vmatprep.mubr.msk.bf16.mxu1 %vm1417_vm1, %v3439_v1  ;;  %v9976_v55 = vadd.f32 %v9975_v46, %v9974_v21 }
 0x5c6   : > { %v9977_v36 = vpop.f32.mrf.mxu0 }
 0x5c8   : > { %v9978_v52 = vpop.f32.mrf.mxu0 }
 0x5c9   : > { %v9979_v51 = vadd.f32 %v9978_v52, %v9977_v36 }
 0x5ca   : > { %v9980_v12 = vpop.f32.mrf.mxu0 }
 0x5cb   : > { %v3440_v53 = vpack.c.bf16 %v9979_v51, %v9976_v55 }
 0x5cc   : > { %v9981_v48 = vpop.f32.mrf.mxu0 }
 0x5cd   : > { %11139 = vmatmul.mubr.msk.bf16.gmra.mxu1 %vm1417_vm1, %v3440_v53  ;;  %v9982_v60 = vadd.f32 %v9981_v48, %v9980_v12 }
 0x5ce   : > { %v9983_v22 = vpop.f32.mrf.mxu0 }
 0x5d0   : > { %v9984_v38 = vpop.f32.mrf.mxu0 }
 0x5d1   : > { %v9985_v62 = vadd.f32 %v9984_v38, %v9983_v22 }
 0x5d2   : > { %v9986_v9 = vpop.f32.mrf.mxu0 }
 0x5d3   : > { %v3441_v54 = vpack.c.bf16 %v9985_v62, %v9982_v60 }
 0x5d4   : > { %v9987_v4 = vpop.f32.mrf.mxu0 }
 0x5d5   : > { %11142 = vmatprep.mubr.msk.bf16.mxu1 %vm1417_vm1, %v3441_v54  ;;  %v9988_v24 = vadd.f32 %v9987_v4, %v9986_v9 }
 0x5d6   : > { %v9989_v31 = vpop.f32.mrf.mxu0 }
 0x5d8   : > { %v9990_v32 = vpop.f32.mrf.mxu0 }
 0x5d9   : > { %v9991_v1 = vadd.f32 %v9990_v32, %v9989_v31 }
 0x5da   : > { %v9992_v21 = vpop.f32.mrf.mxu0 }
 0x5db   : > { %v3442_v46 = vpack.c.bf16 %v9991_v1, %v9988_v24 }
 0x5dc   : > { %v9993_v36 = vpop.f32.mrf.mxu0 }
 0x5dd   : > { %11143 = vmatmul.mubr.msk.bf16.gmra.mxu1 %vm1417_vm1, %v3442_v46  ;;  %v9994_v51 = vadd.f32 %v9993_v36, %v9992_v21 }
 0x5de   : > { %v9995_v52 = vpop.f32.mrf.mxu0 }
 0x5e0   : > { %v9996_v55 = vpop.f32.mrf.mxu0 }
 0x5e1   : > { %v9997_v53 = vadd.f32 %v9996_v55, %v9995_v52 }
 0x5e2   : > { %v9998_v12 = vpop.f32.mrf.mxu0 }
 0x5e3   : > { %v3443_v48 = vpack.c.bf16 %v9997_v53, %v9994_v51 }
 0x5e4   : > { %v9999_v22 = vpop.f32.mrf.mxu0 }
 0x5e5   : > { %11146 = vmatprep.mubr.msk.bf16.mxu1 %vm1417_vm1, %v3443_v48  ;;  %v10000_v62 = vadd.f32 %v9999_v22, %v9998_v12  ;;  %v11807_v12 = vld [vmem:[#allocation2 + $0x504] ss:$8 sps:$4 sm:$0xff]  }
 0x5e6   : > { %v10001_v38 = vpop.f32.mrf.mxu0 }
 0x5e8   : > { %v10002_v60 = vpop.f32.mrf.mxu0 }
 0x5e9   : > { %v10003_v54 = vadd.f32 %v10002_v60, %v10001_v38  ;;  %v11805_v38 = vld [vmem:[#allocation2 + $0x500] ss:$8 sps:$4 sm:$0xff]   ;;  %v11810_v60 = vld [vmem:[#allocation2 + $0x514] ss:$8 sps:$4 sm:$0xff]  }
 0x5ea   : > { %v10004_v9 = vpop.f32.mrf.mxu0 }
 0x5eb   : > { %v3444_v4 = vpack.c.bf16 %v10003_v54, %v10000_v62  ;;  %v11808_v62 = vld [vmem:[#allocation2 + $0x510] ss:$8 sps:$4 sm:$0xff]   ;;  %v11813_v54 = vld [vmem:[#allocation2 + $0x524] ss:$8 sps:$4 sm:$0xff]  }
 0x5ec   : > { %v10005_v31 = vpop.f32.mrf.mxu0 }
 0x5ed   : > { %11147 = vmatmul.mubr.msk.bf16.gmra.mxu1 %vm1417_vm1, %v3444_v4  ;;  %v10006_v1 = vadd.f32 %v10005_v31, %v10004_v9  ;;  %v11811_v9 = vld [vmem:[#allocation2 + $0x520] ss:$8 sps:$4 sm:$0xff]   ;;  %v11816_v4 = vld [vmem:[#allocation2 + $0x534] ss:$8 sps:$4 sm:$0xff]   ;;  %v11814_v31 = vld [vmem:[#allocation2 + $0x530] ss:$8 sps:$4 sm:$0xff]  }
 0x5ee   : > { %v10007_v32 = vpop.f32.mrf.mxu0 }
 0x5f0   : > { %v10008_v24 = vpop.f32.mrf.mxu0 }
 0x5f1   : > { %v10009_v46 = vadd.f32 %v10008_v24, %v10007_v32  ;;  %v11819_v32 = vld [vmem:[#allocation2 + $0x544] ss:$8 sps:$4 sm:$0xff]   ;;  %v11817_v24 = vld [vmem:[#allocation2 + $0x540] ss:$8 sps:$4 sm:$0xff]  }
 0x5f2   : > { %v10010_v21 = vpop.f32.mrf.mxu0 }
 0x5f3   : > { %v3445_v36 = vpack.c.bf16 %v10009_v46, %v10006_v1  ;;  %v11822_v1 = vld [vmem:[#allocation2 + $0x554] ss:$8 sps:$4 sm:$0xff]   ;;  %v11820_v46 = vld [vmem:[#allocation2 + $0x550] ss:$8 sps:$4 sm:$0xff]  }
 0x5f4   : > { %v10011_v52 = vpop.f32.mrf.mxu0 }
 0x5f5   : > { %11150 = vmatprep.mubr.msk.bf16.mxu1 %vm1417_vm1, %v3445_v36  ;;  %v10012_v53 = vadd.f32 %v10011_v52, %v10010_v21  ;;  %v11825_v21 = vld [vmem:[#allocation2 + $0x564] ss:$8 sps:$4 sm:$0xff]   ;;  %v9071_v36 = vld [vmem:[%s14385_s2 + $0xa] sm:$0x3] }
 0x5f6   : > { %v10013_v55 = vpop.f32.mrf.mxu0  ;;  %v11823_v52 = vld [vmem:[#allocation2 + $0x560] ss:$8 sps:$4 sm:$0xff]   ;;  %11405 = vmatprep.subr.msk.bf16.mxu0 %vm1466_vm0, %v9071_v36 }
 0x5f8   : > { %v10014_v51 = vpop.f32.mrf.mxu0 }
 0x5f9   : > { %v10015_v48 = vadd.f32 %v10014_v51, %v10013_v55  ;;  %v11828_v55 = vld [vmem:[#allocation2 + $0x574] ss:$8 sps:$4 sm:$0xff]   ;;  %v4112_v51 = vsel %vm1466_vm0, %v9071_v36, 0 }
 0x5fa   : > { %11155 = vmatpush3.bf16.msra.mxu0 %v4112_v51 }
 0x5fb   : > { %v3446_v22 = vpack.c.bf16 %v10015_v48, %v10012_v53  ;;  %10162 = vmatprep.subr.bf16.mxu0 %v12755_v3  ;;  %v11826_v53 = vld [vmem:[#allocation2 + $0x570] ss:$8 sps:$4 sm:$0xff]   ;;  %v11831_v48 = vld [vmem:[#allocation2 + $0x584] ss:$8 sps:$4 sm:$0xff]  }
 0x5fd   : > { %11151 = vmatmul.mubr.msk.bf16.gmra.mxu1 %vm1417_vm1, %v3446_v22  ;;  %v11834_v22 = vld [vmem:[#allocation2 + $0x594] ss:$8 sps:$4 sm:$0xff]  }
 0x5fe   : > { %3916 = vmatprep.mubr.bf16.mxu1 %v11807_v12  ;;  %v11829_v12 = vld [vmem:[#allocation2 + $0x580] ss:$8 sps:$4 sm:$0xff]  }
 0x605   : > { %3917 = vmatmul.mubr.bf16.vlgmr.msra.gmra.mxu1 %v11805_v38  ;;  %v11832_v38 = vld [vmem:[#allocation2 + $0x590] ss:$8 sps:$4 sm:$0xff]  }
 0x606   : > { %3924 = vmatprep.mubr.bf16.mxu1 %v11810_v60  ;;  %v11837_v60 = vld [vmem:[#allocation2 + $0x5a4] ss:$8 sps:$4 sm:$0xff]  }
 0x60d   : > { %3925 = vmatmul.mubr.bf16.gmra.mxu1 %v11808_v62 }
 0x60e   : > { %3932 = vmatprep.mubr.bf16.mxu1 %v11813_v54 }
 0x615   : > { %3933 = vmatmul.mubr.bf16.gmra.mxu1 %v11811_v9 }
 0x616   : > { %3940 = vmatprep.mubr.bf16.mxu1 %v11816_v4 }
 0x61d   : > { %3941 = vmatmul.mubr.bf16.gmra.mxu1 %v11814_v31 }
 0x61e   : > { %3948 = vmatprep.mubr.bf16.mxu1 %v11819_v32  ;;  %v11835_v32 = vld [vmem:[#allocation2 + $0x5a0] ss:$8 sps:$4 sm:$0xff]  }
 0x625   : > { %3949 = vmatmul.mubr.bf16.gmra.mxu1 %v11817_v24 }
 0x626   : > { %3956 = vmatprep.mubr.bf16.mxu1 %v11822_v1  ;;  %v11840_v1 = vld [vmem:[#allocation2 + $0x5b4] ss:$8 sps:$4 sm:$0xff]  }
 0x62d   : > { %3957 = vmatmul.mubr.bf16.gmra.mxu1 %v11820_v46  ;;  %v11838_v46 = vld [vmem:[#allocation2 + $0x5b0] ss:$8 sps:$4 sm:$0xff]  }
 0x62e   : > { %3964 = vmatprep.mubr.bf16.mxu1 %v11825_v21  ;;  %v11843_v21 = vld [vmem:[#allocation2 + $0x5c4] ss:$8 sps:$4 sm:$0xff]  }
 0x635   : > { %3965 = vmatmul.mubr.bf16.gmra.mxu1 %v11823_v52 }
 0x636   : > { %3972 = vmatprep.mubr.bf16.mxu1 %v11828_v55 }
 0x63d   : > { %3973 = vmatmul.mubr.bf16.gmra.mxu1 %v11826_v53 }
 0x63e   : > { %3980 = vmatprep.mubr.bf16.mxu1 %v11831_v48  ;;  %v11846_v48 = vld [vmem:[#allocation2 + $0x5d4] ss:$8 sps:$4 sm:$0xff]  }
 0x645   : > { %3981 = vmatmul.mubr.bf16.gmra.mxu1 %v11829_v12  ;;  %v11844_v12 = vld [vmem:[#allocation2 + $0x5d0] ss:$8 sps:$4 sm:$0xff]  }
 0x646   : > { %3988 = vmatprep.mubr.bf16.mxu1 %v11834_v22  ;;  %v11849_v22 = vld [vmem:[#allocation2 + $0x5e4] ss:$8 sps:$4 sm:$0xff]  }
 0x64d   : > { %v11124_v62 = vpop.f32.mrf.mxu1  ;;  %3989 = vmatmul.mubr.bf16.gmra.mxu1 %v11832_v38 }
 0x64e   : > { %v13280_v54 = vadd.f32 %v11124_v62, %v13155_v37  ;;  %3996 = vmatprep.mubr.bf16.mxu1 %v11837_v60 }
 0x64f   : > { %v3532_v9 = vpop.f32.mrf.mxu1 }
 0x650   : > { %v13283_v4 = vadd.f32 %v3532_v9, %v13158_v18 }
 0x651   : > { %v11125_v31 = vpop.f32.mrf.mxu1 }
 0x652   : > { %v13286_v24 = vadd.f32 %v11125_v31, %v13161_v57  ;;  %v11841_v57 = vld [vmem:[#allocation2 + $0x5c0] ss:$8 sps:$4 sm:$0xff]  }
 0x653   : > { %v13288_v36 = vpop.f32.mrf.mxu1 }
 0x654   : > { %14471 = vst [vmem:[#allocation61_spill] sm:$0xff] %v13288_v36 }
 0x655   : > { %3997 = vmatmul.mubr.bf16.gmra.mxu1 %v11835_v32  ;;  %v11852_v32 = vld [vmem:[#allocation2 + $0x5f4] ss:$8 sps:$4 sm:$0xff]  }
 0x656   : > { %4004 = vmatprep.mubr.bf16.mxu1 %v11840_v1  ;;  %v11850_v1 = vld [vmem:[#allocation2 + $0x5f0] ss:$8 sps:$4 sm:$0xff]  }
 0x65d   : > { %v11128_v52 = vpop.f32.mrf.mxu1  ;;  %4005 = vmatmul.mubr.bf16.gmra.mxu1 %v11838_v46 }
 0x65e   : > { %v13291_v37 = vadd.f32 %v11128_v52, %v13166_v6  ;;  %4012 = vmatprep.mubr.bf16.mxu1 %v11843_v21 }
 0x65f   : > { %v3548_v18 = vpop.f32.mrf.mxu1 }
 0x660   : > { %v13294_v55 = vadd.f32 %v3548_v18, %v13169_v63 }
 0x661   : > { %v11129_v51 = vpop.f32.mrf.mxu1 }
 0x662   : > { %v13297_v53 = vadd.f32 %v11129_v51, %v13172_v23  ;;  %v11847_v23 = vld [vmem:[#allocation2 + $0x5e0] ss:$8 sps:$4 sm:$0xff]  }
 0x663   : > { %v13299_v38 = vpop.f32.mrf.mxu1 }
 0x664   : > { %14472 = vst [vmem:[#allocation62_spill] sm:$0xff] %v13299_v38 }
 0x665   : > { %4013 = vmatmul.mubr.bf16.gmra.mxu1 %v11841_v57 }
 0x666   : > { %4020 = vmatprep.mubr.bf16.mxu1 %v11846_v48 }
 0x66d   : > { %v11132_v60 = vpop.f32.mrf.mxu1  ;;  %4021 = vmatmul.mubr.bf16.gmra.mxu1 %v11844_v12 }
 0x66e   : > { %v13302_v6 = vadd.f32 %v11132_v60, %v13177_v16  ;;  %4028 = vmatprep.mubr.bf16.mxu1 %v11849_v22 }
 0x66f   : > { %v3564_v63 = vpop.f32.mrf.mxu1 }
 0x670   : > { %v13305_v62 = vadd.f32 %v3564_v63, %v13180_v34 }
 0x671   : > { %v11133_v9 = vpop.f32.mrf.mxu1 }
 0x672   : > { %v13308_v31 = vadd.f32 %v11133_v9, %v13183_v56 }
 0x673   : > { %v13310_v46 = vpop.f32.mrf.mxu1 }
 0x674   : > { %14473 = vst [vmem:[#allocation63_spill] sm:$0xff] %v13310_v46 }
 0x675   : > { %4029 = vmatmul.mubr.bf16.gmra.mxu1 %v11847_v23 }
 0x676   : > { %4036 = vmatprep.mubr.bf16.mxu1 %v11852_v32 }
 0x67d   : > { %v11136_v21 = vpop.f32.mrf.mxu1  ;;  %4037 = vmatmul.mubr.bf16.gmra.mxu1 %v11850_v1 }
 0x67e   : > { %v13313_v16 = vadd.f32 %v11136_v21, %v13188_v40 }
 0x67f   : > { %v3580_v52 = vpop.f32.mrf.mxu1 }
 0x680   : > { %v13316_v34 = vadd.f32 %v3580_v52, %v13191_v50 }
 0x681   : > { %v11137_v18 = vpop.f32.mrf.mxu1 }
 0x682   : > { %v13319_v51 = vadd.f32 %v11137_v18, %v13194_v11 }
 0x683   : > { %v13321_v56 = vpop.f32.mrf.mxu1 }
 0x684   : > { %14474 = vst [vmem:[#allocation64_spill] sm:$0xff] %v13321_v56 }
 0x68d   : > { %v11140_v57 = vpop.f32.mrf.mxu1 }
 0x68e   : > { %v13324_v48 = vadd.f32 %v11140_v57, %v13199_v15 }
 0x68f   : > { %v3596_v12 = vpop.f32.mrf.mxu1 }
 0x690   : > { %v13327_v22 = vadd.f32 %v3596_v12, %v13202_v58 }
 0x691   : > { %v11141_v40 = vpop.f32.mrf.mxu1 }
 0x692   : > { %v13330_v60 = vadd.f32 %v11141_v40, %v13205_v5 }
 0x693   : > { %v13332_v50 = vpop.f32.mrf.mxu1 }
 0x694   : > { %14475 = vst [vmem:[#allocation65_spill] sm:$0xff] %v13332_v50 }
 0x69d   : > { %v11144_v63 = vpop.f32.mrf.mxu1 }
 0x69e   : > { %v13335_v11 = vadd.f32 %v11144_v63, %v13210_v25 }
 0x69f   : > { %v3612_v9 = vpop.f32.mrf.mxu1 }
 0x6a0   : > { %v13338_v23 = vadd.f32 %v3612_v9, %v13213_v10 }
 0x6a1   : > { %v11145_v15 = vpop.f32.mrf.mxu1 }
 0x6a2   : > { %v13341_v32 = vadd.f32 %v11145_v15, %v13216_v41 }
 0x6a3   : > { %v13343_v58 = vpop.f32.mrf.mxu1 }
 0x6a4   : > { %14476 = vst [vmem:[#allocation66_spill] sm:$0xff] %v13343_v58 }
 0x6ad   : > { %v11148_v1 = vpop.f32.mrf.mxu1 }
 0x6ae   : > { %v13346_v5 = vadd.f32 %v11148_v1, %v13221_v44 }
 0x6af   : > { %v3628_v21 = vpop.f32.mrf.mxu1 }
 0x6b0   : > { %v13349_v52 = vadd.f32 %v3628_v21, %v13224_v61 }
 0x6b1   : > { %v11149_v25 = vpop.f32.mrf.mxu1 }
 0x6b2   : > { %v13352_v18 = vadd.f32 %v11149_v25, %v13227_v43 }
 0x6b3   : > { %v13354_v10 = vpop.f32.mrf.mxu1 }
 0x6b4   : > { %14477 = vst [vmem:[#allocation67_spill] sm:$0xff] %v13354_v10 }
 0x6bd   : > { %v11152_v57 = vpop.f32.mrf.mxu1 }
 0x6be   : > { %v13357_v41 = vadd.f32 %v11152_v57, %v13232_v29 }
 0x6bf   : > { %v3644_v12 = vpop.f32.mrf.mxu1 }
 0x6c0   : > { %v13360_v40 = vadd.f32 %v3644_v12, %v13235_v59 }
 0x6c1   : > { %v11153_v44 = vpop.f32.mrf.mxu1 }
 0x6c2   : > { %v13363_v63 = vadd.f32 %v11153_v44, %v13238_v0 }
 0x6c3   : > { %v13365_v61 = vpop.f32.mrf.mxu1 }
 0x6c4   : > { %14478 = vst [vmem:[#allocation68_spill] sm:$0xff] %v13365_v61 }
 0x6c5   : > { %v10049_v9 = vpop.f32.mrf.mxu1 }
 0x6c7   : > { %v10050_v15 = vpop.f32.mrf.mxu1 }
 0x6c8   : > { %v10051_v21 = vadd.f32 %v10050_v15, %v10049_v9 }
 0x6c9   : > { %v10052_v43 = vpop.f32.mrf.mxu1 }
 0x6cb   : > { %v10053_v1 = vpop.f32.mrf.mxu1 }
 0x6cc   : > { %v10054_v25 = vadd.f32 %v10053_v1, %v10052_v43 }
 0x6cd   : > { %v10055_v36 = vpop.f32.mrf.mxu1 }
 0x6ce   : > { %v4047_v50 = vpack.c.bf16 %v10054_v25, %v10051_v21 }
 0x6cf   : > { %v10056_v29 = vpop.f32.mrf.mxu1 }
 0x6d0   : > { %11156 = vmatprep.mubr.msk.bf16.mxu0 %vm1417_vm1, %v4047_v50  ;;  %v10057_v12 = vadd.f32 %v10056_v29, %v10055_v36 }
 0x6d1   : > { %v10058_v57 = vpop.f32.mrf.mxu1 }
 0x6d3   : > { %v10059_v59 = vpop.f32.mrf.mxu1 }
 0x6d4   : > { %v10060_v38 = vadd.f32 %v10059_v59, %v10058_v57 }
 0x6d5   : > { %v10061_v58 = vpop.f32.mrf.mxu1 }
 0x6d6   : > { %v4048_v0 = vpack.c.bf16 %v10060_v38, %v10057_v12 }
 0x6d7   : > { %v10062_v44 = vpop.f32.mrf.mxu1 }
 0x6d8   : > { %11157 = vmatmul.mubr.msk.bf16.vlgmr.msra.gmra.mxu0 %vm1417_vm1, %v4048_v0  ;;  %v10063_v15 = vadd.f32 %v10062_v44, %v10061_v58 }
 0x6d9   : > { %v10064_v46 = vpop.f32.mrf.mxu1  ;;  %10163 = vmatpush3.bf16.msra.mxu0 %v12760_v7 }
 0x6da   : > { %10164 = vmatprep.subr.bf16.mxu0 %v12762_v8 }
 0x6db   : > { %v10065_v9 = vpop.f32.mrf.mxu1 }
 0x6dc   : > { %v10066_v43 = vadd.f32 %v10065_v9, %v10064_v46 }
 0x6dd   : > { %v10067_v1 = vpop.f32.mrf.mxu1  ;;  %10165 = vmatpush3.bf16.msra.mxu0 %v12772_v13 }
 0x6de   : > { %v4049_v50 = vpack.c.bf16 %v10066_v43, %v10063_v15  ;;  %10166 = vmatprep.subr.bf16.mxu0 %v12776_v14 }
 0x6df   : > { %v10068_v36 = vpop.f32.mrf.mxu1 }
 0x6e0   : > { %11160 = vmatprep.mubr.msk.bf16.mxu0 %vm1417_vm1, %v4049_v50  ;;  %v10069_v25 = vadd.f32 %v10068_v36, %v10067_v1 }
 0x6e1   : > { %v10070_v38 = vpop.f32.mrf.mxu1  ;;  %10167 = vmatpush3.bf16.msra.mxu0 %v12784_v19 }
 0x6e2   : > { %10168 = vmatprep.subr.bf16.mxu0 %v12788_v20 }
 0x6e3   : > { %v10071_v21 = vpop.f32.mrf.mxu1 }
 0x6e4   : > { %v10072_v29 = vadd.f32 %v10071_v21, %v10070_v38 }
 0x6e5   : > { %v10073_v57 = vpop.f32.mrf.mxu1  ;;  %10169 = vmatpush3.bf16.msra.mxu0 %v12798_v28 }
 0x6e6   : > { %v4050_v46 = vpack.c.bf16 %v10072_v29, %v10069_v25  ;;  %10170 = vmatprep.subr.bf16.mxu0 %v12803_v30 }
 0x6e7   : > { %v10074_v58 = vpop.f32.mrf.mxu1 }
 0x6e8   : > { %11161 = vmatmul.mubr.msk.bf16.gmra.mxu0 %vm1417_vm1, %v4050_v46  ;;  %v10075_v0 = vadd.f32 %v10074_v58, %v10073_v57 }
 0x6e9   : > { %v10076_v59 = vpop.f32.mrf.mxu1  ;;  %10171 = vmatpush3.bf16.msra.mxu0 %v12808_v33 }
 0x6ea   : > { %10172 = vmatprep.subr.bf16.mxu0 %v12813_v35 }
 0x6eb   : > { %v10077_v12 = vpop.f32.mrf.mxu1 }
 0x6ec   : > { %v10078_v44 = vadd.f32 %v10077_v12, %v10076_v59 }
 0x6ed   : > { %v10079_v9 = vpop.f32.mrf.mxu1  ;;  %10173 = vmatpush3.bf16.msra.mxu0 %v12820_v39 }
 0x6ee   : > { %v4051_v15 = vpack.c.bf16 %v10078_v44, %v10075_v0  ;;  %10174 = vmatprep.subr.bf16.mxu0 %v12826_v42 }
 0x6ef   : > { %v10080_v43 = vpop.f32.mrf.mxu1 }
 0x6f0   : > { %11164 = vmatprep.mubr.msk.bf16.mxu0 %vm1417_vm1, %v4051_v15  ;;  %v10081_v36 = vadd.f32 %v10080_v43, %v10079_v9 }
 0x6f1   : > { %v10082_v1 = vpop.f32.mrf.mxu1  ;;  %10175 = vmatpush3.bf16.msra.mxu0 %v12832_v45 }
 0x6f2   : > { %10176 = vmatprep.subr.bf16.mxu0 %v12837_v47 }
 0x6f3   : > { %v10083_v50 = vpop.f32.mrf.mxu1 }
 0x6f4   : > { %v10084_v38 = vadd.f32 %v10083_v50, %v10082_v1 }
 0x6f5   : > { %v10085_v21 = vpop.f32.mrf.mxu1  ;;  %10177 = vmatpush3.bf16.msra.mxu0 %v12842_v49 }
 0x6f6   : > { %v4052_v25 = vpack.c.bf16 %v10084_v38, %v10081_v36 }
 0x6f7   : > { %v10086_v29 = vpop.f32.mrf.mxu1 }
 0x6f8   : > { %11165 = vmatmul.mubr.msk.bf16.gmra.mxu0 %vm1417_vm1, %v4052_v25  ;;  %v10087_v58 = vadd.f32 %v10086_v29, %v10085_v21 }
 0x6f9   : > { %v10088_v57 = vpop.f32.mrf.mxu1 }
 0x6fb   : > { %v10089_v46 = vpop.f32.mrf.mxu1 }
 0x6fc   : > { %v10090_v59 = vadd.f32 %v10089_v46, %v10088_v57 }
 0x6fd   : > { %v10091_v12 = vpop.f32.mrf.mxu1 }
 0x6fe   : > { %v4053_v0 = vpack.c.bf16 %v10090_v59, %v10087_v58 }
 0x6ff   : > { %v10092_v44 = vpop.f32.mrf.mxu1 }
 0x700   : > { %11168 = vmatprep.mubr.msk.bf16.mxu0 %vm1417_vm1, %v4053_v0  ;;  %v10093_v9 = vadd.f32 %v10092_v44, %v10091_v12 }
 0x701   : > { %v10094_v15 = vpop.f32.mrf.mxu1 }
 0x703   : > { %v10095_v10 = vpop.f32.mrf.mxu1 }
 0x704   : > { %v10096_v43 = vadd.f32 %v10095_v10, %v10094_v15 }
 0x705   : > { %v10097_v1 = vpop.f32.mrf.mxu1 }
 0x706   : > { %v4054_v50 = vpack.c.bf16 %v10096_v43, %v10093_v9 }
 0x707   : > { %v10098_v61 = vpop.f32.mrf.mxu1 }
 0x708   : > { %11169 = vmatmul.mubr.msk.bf16.gmra.mxu0 %vm1417_vm1, %v4054_v50  ;;  %v10099_v25 = vadd.f32 %v10098_v61, %v10097_v1 }
 0x709   : > { %v10100_v36 = vpop.f32.mrf.mxu1 }
 0x70b   : > { %v10101_v38 = vpop.f32.mrf.mxu1 }
 0x70c   : > { %v10102_v56 = vadd.f32 %v10101_v38, %v10100_v36 }
 0x70d   : > { %v10103_v21 = vpop.f32.mrf.mxu1 }
 0x70e   : > { %v4055_v29 = vpack.c.bf16 %v10102_v56, %v10099_v25 }
 0x70f   : > { %v10104_v57 = vpop.f32.mrf.mxu1 }
 0x710   : > { %11172 = vmatprep.mubr.msk.bf16.mxu0 %vm1417_vm1, %v4055_v29  ;;  %v10105_v59 = vadd.f32 %v10104_v57, %v10103_v21 }
 0x711   : > { %v10106_v46 = vpop.f32.mrf.mxu1 }
 0x713   : > { %v10107_v58 = vpop.f32.mrf.mxu1 }
 0x714   : > { %v10108_v0 = vadd.f32 %v10107_v58, %v10106_v46 }
 0x715   : > { %v10109_v12 = vpop.f32.mrf.mxu1 }
 0x716   : > { %v4056_v10 = vpack.c.bf16 %v10108_v0, %v10105_v59 }
 0x717   : > { %v10110_v44 = vpop.f32.mrf.mxu1 }
 0x718   : > { %11173 = vmatmul.mubr.msk.bf16.gmra.mxu0 %vm1417_vm1, %v4056_v10  ;;  %v10111_v43 = vadd.f32 %v10110_v44, %v10109_v12 }
 0x719   : > { %v10112_v15 = vpop.f32.mrf.mxu1 }
 0x71b   : > { %v10113_v9 = vpop.f32.mrf.mxu1 }
 0x71c   : > { %v10114_v50 = vadd.f32 %v10113_v9, %v10112_v15 }
 0x71d   : > { %v10115_v61 = vpop.f32.mrf.mxu1 }
 0x71e   : > { %v4057_v1 = vpack.c.bf16 %v10114_v50, %v10111_v43 }
 0x71f   : > { %v10116_v36 = vpop.f32.mrf.mxu1 }
 0x720   : > { %11176 = vmatprep.mubr.msk.bf16.mxu0 %vm1417_vm1, %v4057_v1  ;;  %v10117_v25 = vadd.f32 %v10116_v36, %v10115_v61 }
 0x721   : > { %v10118_v56 = vpop.f32.mrf.mxu1 }
 0x723   : > { %v10119_v38 = vpop.f32.mrf.mxu1 }
 0x724   : > { %v10120_v29 = vadd.f32 %v10119_v38, %v10118_v56 }
 0x725   : > { %v10121_v21 = vpop.f32.mrf.mxu1 }
 0x726   : > { %v4058_v57 = vpack.c.bf16 %v10120_v29, %v10117_v25 }
 0x727   : > { %v10122_v46 = vpop.f32.mrf.mxu1 }
 0x728   : > { %11177 = vmatmul.mubr.msk.bf16.gmra.mxu0 %vm1417_vm1, %v4058_v57  ;;  %v10123_v0 = vadd.f32 %v10122_v46, %v10121_v21 }
 0x729   : > { %v10124_v58 = vpop.f32.mrf.mxu1 }
 0x72b   : > { %v10125_v59 = vpop.f32.mrf.mxu1 }
 0x72c   : > { %v10126_v10 = vadd.f32 %v10125_v59, %v10124_v58 }
 0x72d   : > { %v10127_v12 = vpop.f32.mrf.mxu1 }
 0x72e   : > { %v4059_v44 = vpack.c.bf16 %v10126_v10, %v10123_v0 }
 0x72f   : > { %v10128_v15 = vpop.f32.mrf.mxu1 }
 0x730   : > { %11180 = vmatprep.mubr.msk.bf16.mxu0 %vm1417_vm1, %v4059_v44  ;;  %v10129_v50 = vadd.f32 %v10128_v15, %v10127_v12  ;;  %v11855_v12 = vld [vmem:[#allocation2 + $0x604] ss:$8 sps:$4 sm:$0xff]  }
 0x731   : > { %v10130_v9 = vpop.f32.mrf.mxu1 }
 0x733   : > { %v10131_v43 = vpop.f32.mrf.mxu1 }
 0x734   : > { %v10132_v1 = vadd.f32 %v10131_v43, %v10130_v9  ;;  %v11853_v9 = vld [vmem:[#allocation2 + $0x600] ss:$8 sps:$4 sm:$0xff]   ;;  %v11858_v43 = vld [vmem:[#allocation2 + $0x614] ss:$8 sps:$4 sm:$0xff]  }
 0x735   : > { %v10133_v61 = vpop.f32.mrf.mxu1 }
 0x736   : > { %v4060_v36 = vpack.c.bf16 %v10132_v1, %v10129_v50  ;;  %v11856_v50 = vld [vmem:[#allocation2 + $0x610] ss:$8 sps:$4 sm:$0xff]   ;;  %v11861_v1 = vld [vmem:[#allocation2 + $0x624] ss:$8 sps:$4 sm:$0xff]  }
 0x737   : > { %v10134_v56 = vpop.f32.mrf.mxu1 }
 0x738   : > { %11181 = vmatmul.mubr.msk.bf16.gmra.mxu0 %vm1417_vm1, %v4060_v36  ;;  %v10135_v29 = vadd.f32 %v10134_v56, %v10133_v61  ;;  %v11859_v61 = vld [vmem:[#allocation2 + $0x620] ss:$8 sps:$4 sm:$0xff]   ;;  %v11864_v36 = vld [vmem:[#allocation2 + $0x634] ss:$8 sps:$4 sm:$0xff]   ;;  %v11862_v56 = vld [vmem:[#allocation2 + $0x630] ss:$8 sps:$4 sm:$0xff]  }
 0x739   : > { %v10136_v38 = vpop.f32.mrf.mxu1 }
 0x73b   : > { %v10137_v25 = vpop.f32.mrf.mxu1 }
 0x73c   : > { %v10138_v57 = vadd.f32 %v10137_v25, %v10136_v38  ;;  %v11867_v38 = vld [vmem:[#allocation2 + $0x644] ss:$8 sps:$4 sm:$0xff]   ;;  %v11865_v25 = vld [vmem:[#allocation2 + $0x640] ss:$8 sps:$4 sm:$0xff]  }
 0x73d   : > { %v10139_v21 = vpop.f32.mrf.mxu1 }
 0x73e   : > { %v4061_v46 = vpack.c.bf16 %v10138_v57, %v10135_v29  ;;  %v11870_v29 = vld [vmem:[#allocation2 + $0x654] ss:$8 sps:$4 sm:$0xff]   ;;  %v11868_v57 = vld [vmem:[#allocation2 + $0x650] ss:$8 sps:$4 sm:$0xff]  }
 0x73f   : > { %v10140_v58 = vpop.f32.mrf.mxu1 }
 0x740   : > { %11184 = vmatprep.mubr.msk.bf16.mxu0 %vm1417_vm1, %v4061_v46  ;;  %v10141_v10 = vadd.f32 %v10140_v58, %v10139_v21  ;;  %v11873_v21 = vld [vmem:[#allocation2 + $0x664] ss:$8 sps:$4 sm:$0xff]   ;;  %v11871_v58 = vld [vmem:[#allocation2 + $0x660] ss:$8 sps:$4 sm:$0xff]  }
 0x741   : > { %v10142_v59 = vpop.f32.mrf.mxu1  ;;  %v9120_v46 = vld [vmem:[%s14385_s2 + $0xc] sm:$0x3] }
 0x742   : > { %11406 = vmatprep.subr.msk.bf16.mxu1 %vm1466_vm0, %v9120_v46 }
 0x743   : > { %v10143_v0 = vpop.f32.mrf.mxu1 }
 0x744   : > { %v10144_v44 = vadd.f32 %v10143_v0, %v10142_v59  ;;  %v11876_v59 = vld [vmem:[#allocation2 + $0x674] ss:$8 sps:$4 sm:$0xff]   ;;  %v4728_v0 = vsel %vm1466_vm0, %v9120_v46, 0 }
 0x745   : > { %11189 = vmatpush3.bf16.msra.mxu1 %v4728_v0 }
 0x746   : > { %v4062_v15 = vpack.c.bf16 %v10144_v44, %v10141_v10  ;;  %10291 = vmatprep.subr.bf16.mxu1 %v12755_v3  ;;  %v11874_v10 = vld [vmem:[#allocation2 + $0x670] ss:$8 sps:$4 sm:$0xff]   ;;  %v11879_v44 = vld [vmem:[#allocation2 + $0x684] ss:$8 sps:$4 sm:$0xff]  }
 0x748   : > { %11185 = vmatmul.mubr.msk.bf16.gmra.mxu0 %vm1417_vm1, %v4062_v15  ;;  %v11882_v15 = vld [vmem:[#allocation2 + $0x694] ss:$8 sps:$4 sm:$0xff]  }
 0x749   : > { %4532 = vmatprep.mubr.bf16.mxu0 %v11855_v12  ;;  %v11877_v12 = vld [vmem:[#allocation2 + $0x680] ss:$8 sps:$4 sm:$0xff]  }
 0x750   : > { %4533 = vmatmul.mubr.bf16.vlgmr.msra.gmra.mxu0 %v11853_v9  ;;  %v11880_v9 = vld [vmem:[#allocation2 + $0x690] ss:$8 sps:$4 sm:$0xff]  }
 0x751   : > { %4540 = vmatprep.mubr.bf16.mxu0 %v11858_v43  ;;  %v11885_v43 = vld [vmem:[#allocation2 + $0x6a4] ss:$8 sps:$4 sm:$0xff]  }
 0x758   : > { %4541 = vmatmul.mubr.bf16.gmra.mxu0 %v11856_v50 }
 0x759   : > { %4548 = vmatprep.mubr.bf16.mxu0 %v11861_v1 }
 0x760   : > { %4549 = vmatmul.mubr.bf16.gmra.mxu0 %v11859_v61 }
 0x761   : > { %4556 = vmatprep.mubr.bf16.mxu0 %v11864_v36 }
 0x768   : > { %4557 = vmatmul.mubr.bf16.gmra.mxu0 %v11862_v56 }
 0x769   : > { %4564 = vmatprep.mubr.bf16.mxu0 %v11867_v38  ;;  %v11883_v38 = vld [vmem:[#allocation2 + $0x6a0] ss:$8 sps:$4 sm:$0xff]  }
 0x770   : > { %4565 = vmatmul.mubr.bf16.gmra.mxu0 %v11865_v25 }
 0x771   : > { %4572 = vmatprep.mubr.bf16.mxu0 %v11870_v29  ;;  %v11888_v29 = vld [vmem:[#allocation2 + $0x6b4] ss:$8 sps:$4 sm:$0xff]  }
 0x778   : > { %4573 = vmatmul.mubr.bf16.gmra.mxu0 %v11868_v57  ;;  %v11886_v57 = vld [vmem:[#allocation2 + $0x6b0] ss:$8 sps:$4 sm:$0xff]  }
 0x779   : > { %4580 = vmatprep.mubr.bf16.mxu0 %v11873_v21  ;;  %v11891_v21 = vld [vmem:[#allocation2 + $0x6c4] ss:$8 sps:$4 sm:$0xff]  }
 0x780   : > { %4581 = vmatmul.mubr.bf16.gmra.mxu0 %v11871_v58 }
 0x781   : > { %4588 = vmatprep.mubr.bf16.mxu0 %v11876_v59 }
 0x788   : > { %4589 = vmatmul.mubr.bf16.gmra.mxu0 %v11874_v10 }
 0x789   : > { %4596 = vmatprep.mubr.bf16.mxu0 %v11879_v44  ;;  %v11894_v44 = vld [vmem:[#allocation2 + $0x6d4] ss:$8 sps:$4 sm:$0xff]  }
 0x790   : > { %4597 = vmatmul.mubr.bf16.gmra.mxu0 %v11877_v12  ;;  %v11892_v12 = vld [vmem:[#allocation2 + $0x6d0] ss:$8 sps:$4 sm:$0xff]  }
 0x791   : > { %4604 = vmatprep.mubr.bf16.mxu0 %v11882_v15  ;;  %v11897_v15 = vld [vmem:[#allocation2 + $0x6e4] ss:$8 sps:$4 sm:$0xff]  }
 0x798   : > { %v11158_v50 = vpop.f32.mrf.mxu0  ;;  %4605 = vmatmul.mubr.bf16.gmra.mxu0 %v11880_v9 }
 0x799   : > { %v13405_v1 = vadd.f32 %v11158_v50, %v13280_v54  ;;  %4612 = vmatprep.mubr.bf16.mxu0 %v11885_v43 }
 0x79a   : > { %v4148_v61 = vpop.f32.mrf.mxu0 }
 0x79b   : > { %v13408_v36 = vadd.f32 %v4148_v61, %v13283_v4 }
 0x79c   : > { %v11159_v56 = vpop.f32.mrf.mxu0 }
 0x79d   : > { %v13411_v25 = vadd.f32 %v11159_v56, %v13286_v24  ;;  %v11889_v24 = vld [vmem:[#allocation2 + $0x6c0] ss:$8 sps:$4 sm:$0xff]  }
 0x79e   : > { %v13413_v46 = vpop.f32.mrf.mxu0 }
 0x79f   : > { %14479 = vst [vmem:[#allocation69_spill] sm:$0xff] %v13413_v46 }
 0x7a0   : > { %4613 = vmatmul.mubr.bf16.gmra.mxu0 %v11883_v38  ;;  %v11900_v38 = vld [vmem:[#allocation2 + $0x6f4] ss:$8 sps:$4 sm:$0xff]  }
 0x7a1   : > { %4620 = vmatprep.mubr.bf16.mxu0 %v11888_v29  ;;  %v11898_v29 = vld [vmem:[#allocation2 + $0x6f0] ss:$8 sps:$4 sm:$0xff]  }
 0x7a8   : > { %v11162_v58 = vpop.f32.mrf.mxu0  ;;  %4621 = vmatmul.mubr.bf16.gmra.mxu0 %v11886_v57 }
 0x7a9   : > { %v13416_v54 = vadd.f32 %v11162_v58, %v13291_v37  ;;  %4628 = vmatprep.mubr.bf16.mxu0 %v11891_v21 }
 0x7aa   : > { %v4164_v4 = vpop.f32.mrf.mxu0 }
 0x7ab   : > { %v13419_v59 = vadd.f32 %v4164_v4, %v13294_v55 }
 0x7ac   : > { %v11163_v0 = vpop.f32.mrf.mxu0 }
 0x7ad   : > { %v13422_v10 = vadd.f32 %v11163_v0, %v13297_v53  ;;  %v11895_v53 = vld [vmem:[#allocation2 + $0x6e0] ss:$8 sps:$4 sm:$0xff]  }
 0x7ae   : > { %v13424_v9 = vpop.f32.mrf.mxu0 }
 0x7af   : > { %14480 = vst [vmem:[#allocation70_spill] sm:$0xff] %v13424_v9 }
 0x7b0   : > { %4629 = vmatmul.mubr.bf16.gmra.mxu0 %v11889_v24 }
 0x7b1   : > { %4636 = vmatprep.mubr.bf16.mxu0 %v11894_v44 }
 0x7b8   : > { %v11166_v43 = vpop.f32.mrf.mxu0  ;;  %4637 = vmatmul.mubr.bf16.gmra.mxu0 %v11892_v12 }
 0x7b9   : > { %v13427_v37 = vadd.f32 %v11166_v43, %v13302_v6  ;;  %4644 = vmatprep.mubr.bf16.mxu0 %v11897_v15 }
 0x7ba   : > { %v4180_v55 = vpop.f32.mrf.mxu0 }
 0x7bb   : > { %v13430_v50 = vadd.f32 %v4180_v55, %v13305_v62 }
 0x7bc   : > { %v11167_v61 = vpop.f32.mrf.mxu0 }
 0x7bd   : > { %v13433_v56 = vadd.f32 %v11167_v61, %v13308_v31 }
 0x7be   : > { %v13435_v57 = vpop.f32.mrf.mxu0 }
 0x7bf   : > { %14481 = vst [vmem:[#allocation71_spill] sm:$0xff] %v13435_v57 }
 0x7c0   : > { %4645 = vmatmul.mubr.bf16.gmra.mxu0 %v11895_v53 }
 0x7c1   : > { %4652 = vmatprep.mubr.bf16.mxu0 %v11900_v38 }
 0x7c8   : > { %v11170_v21 = vpop.f32.mrf.mxu0  ;;  %4653 = vmatmul.mubr.bf16.gmra.mxu0 %v11898_v29 }
 0x7c9   : > { %v13438_v6 = vadd.f32 %v11170_v21, %v13313_v16 }
 0x7ca   : > { %v4196_v58 = vpop.f32.mrf.mxu0 }
 0x7cb   : > { %v13441_v62 = vadd.f32 %v4196_v58, %v13316_v34 }
 0x7cc   : > { %v11171_v4 = vpop.f32.mrf.mxu0 }
 0x7cd   : > { %v13444_v0 = vadd.f32 %v11171_v4, %v13319_v51 }
 0x7ce   : > { %v13446_v31 = vpop.f32.mrf.mxu0 }
 0x7cf   : > { %14482 = vst [vmem:[#allocation72_spill] sm:$0xff] %v13446_v31 }
 0x7d8   : > { %v11174_v24 = vpop.f32.mrf.mxu0 }
 0x7d9   : > { %v13449_v44 = vadd.f32 %v11174_v24, %v13324_v48 }
 0x7da   : > { %v4212_v12 = vpop.f32.mrf.mxu0 }
 0x7db   : > { %v13452_v15 = vadd.f32 %v4212_v12, %v13327_v22 }
 0x7dc   : > { %v11175_v16 = vpop.f32.mrf.mxu0 }
 0x7dd   : > { %v13455_v43 = vadd.f32 %v11175_v16, %v13330_v60 }
 0x7de   : > { %v13457_v34 = vpop.f32.mrf.mxu0 }
 0x7df   : > { %14483 = vst [vmem:[#allocation73_spill] sm:$0xff] %v13457_v34 }
 0x7e8   : > { %v11178_v55 = vpop.f32.mrf.mxu0 }
 0x7e9   : > { %v13460_v51 = vadd.f32 %v11178_v55, %v13335_v11 }
 0x7ea   : > { %v4228_v61 = vpop.f32.mrf.mxu0 }
 0x7eb   : > { %v13463_v53 = vadd.f32 %v4228_v61, %v13338_v23 }
 0x7ec   : > { %v11179_v48 = vpop.f32.mrf.mxu0 }
 0x7ed   : > { %v13466_v38 = vadd.f32 %v11179_v48, %v13341_v32 }
 0x7ee   : > { %v13468_v22 = vpop.f32.mrf.mxu0 }
 0x7ef   : > { %14484 = vst [vmem:[#allocation74_spill] sm:$0xff] %v13468_v22 }
 0x7f8   : > { %v11182_v29 = vpop.f32.mrf.mxu0 }
 0x7f9   : > { %v13471_v60 = vadd.f32 %v11182_v29, %v13346_v5 }
 0x7fa   : > { %v4244_v21 = vpop.f32.mrf.mxu0 }
 0x7fb   : > { %v13474_v58 = vadd.f32 %v4244_v21, %v13349_v52 }
 0x7fc   : > { %v11183_v11 = vpop.f32.mrf.mxu0 }
 0x7fd   : > { %v13477_v4 = vadd.f32 %v11183_v11, %v13352_v18 }
 0x7fe   : > { %v13479_v23 = vpop.f32.mrf.mxu0 }
 0x7ff   : > { %14485 = vst [vmem:[#allocation75_spill] sm:$0xff] %v13479_v23 }
 0x808   : > { %v11186_v24 = vpop.f32.mrf.mxu0 }
 0x809   : > { %v13482_v32 = vadd.f32 %v11186_v24, %v13357_v41 }
 0x80a   : > { %v4260_v12 = vpop.f32.mrf.mxu0 }
 0x80b   : > { %v13485_v16 = vadd.f32 %v4260_v12, %v13360_v40 }
 0x80c   : > { %v11187_v5 = vpop.f32.mrf.mxu0 }
 0x80d   : > { %v13488_v55 = vadd.f32 %v11187_v5, %v13363_v63 }
 0x80e   : > { %v13490_v52 = vpop.f32.mrf.mxu0 }
 0x80f   : > { %14486 = vst [vmem:[#allocation76_spill] sm:$0xff] %v13490_v52 }
 0x810   : > { %v10178_v61 = vpop.f32.mrf.mxu0 }
 0x812   : > { %v10179_v48 = vpop.f32.mrf.mxu0 }
 0x813   : > { %v10180_v21 = vadd.f32 %v10179_v48, %v10178_v61 }
 0x814   : > { %v10181_v18 = vpop.f32.mrf.mxu0 }
 0x816   : > { %v10182_v29 = vpop.f32.mrf.mxu0 }
 0x817   : > { %v10183_v11 = vadd.f32 %v10182_v29, %v10181_v18 }
 0x818   : > { %v10184_v46 = vpop.f32.mrf.mxu0 }
 0x819   : > { %v4663_v34 = vpack.c.bf16 %v10183_v11, %v10180_v21 }
 0x81a   : > { %v10185_v41 = vpop.f32.mrf.mxu0 }
 0x81b   : > { %11190 = vmatprep.mubr.msk.bf16.mxu1 %vm1417_vm1, %v4663_v34  ;;  %v10186_v12 = vadd.f32 %v10185_v41, %v10184_v46 }
 0x81c   : > { %v10187_v24 = vpop.f32.mrf.mxu0 }
 0x81e   : > { %v10188_v40 = vpop.f32.mrf.mxu0 }
 0x81f   : > { %v10189_v9 = vadd.f32 %v10188_v40, %v10187_v24 }
 0x820   : > { %v10190_v22 = vpop.f32.mrf.mxu0 }
 0x821   : > { %v4664_v63 = vpack.c.bf16 %v10189_v9, %v10186_v12 }
 0x822   : > { %v10191_v5 = vpop.f32.mrf.mxu0 }
 0x823   : > { %11191 = vmatmul.mubr.msk.bf16.vlgmr.msra.gmra.mxu1 %vm1417_vm1, %v4664_v63  ;;  %v10192_v48 = vadd.f32 %v10191_v5, %v10190_v22 }
 0x824   : > { %v10193_v57 = vpop.f32.mrf.mxu0  ;;  %10292 = vmatpush3.bf16.msra.mxu1 %v12760_v7 }
 0x825   : > { %10293 = vmatprep.subr.bf16.mxu1 %v12762_v8 }
 0x826   : > { %v10194_v61 = vpop.f32.mrf.mxu0 }
 0x827   : > { %v10195_v18 = vadd.f32 %v10194_v61, %v10193_v57 }
 0x828   : > { %v10196_v29 = vpop.f32.mrf.mxu0  ;;  %10294 = vmatpush3.bf16.msra.mxu1 %v12772_v13 }
 0x829   : > { %v4665_v34 = vpack.c.bf16 %v10195_v18, %v10192_v48  ;;  %10295 = vmatprep.subr.bf16.mxu1 %v12776_v14 }
 0x82a   : > { %v10197_v46 = vpop.f32.mrf.mxu0 }
 0x82b   : > { %11194 = vmatprep.mubr.msk.bf16.mxu1 %vm1417_vm1, %v4665_v34  ;;  %v10198_v11 = vadd.f32 %v10197_v46, %v10196_v29 }
 0x82c   : > { %v10199_v9 = vpop.f32.mrf.mxu0  ;;  %10296 = vmatpush3.bf16.msra.mxu1 %v12784_v19 }
 0x82d   : > { %10297 = vmatprep.subr.bf16.mxu1 %v12788_v20 }
 0x82e   : > { %v10200_v21 = vpop.f32.mrf.mxu0 }
 0x82f   : > { %v10201_v41 = vadd.f32 %v10200_v21, %v10199_v9 }
 0x830   : > { %v10202_v24 = vpop.f32.mrf.mxu0  ;;  %10298 = vmatpush3.bf16.msra.mxu1 %v12798_v28 }
 0x831   : > { %v4666_v57 = vpack.c.bf16 %v10201_v41, %v10198_v11  ;;  %10299 = vmatprep.subr.bf16.mxu1 %v12803_v30 }
 0x832   : > { %v10203_v22 = vpop.f32.mrf.mxu0 }
 0x833   : > { %11195 = vmatmul.mubr.msk.bf16.gmra.mxu1 %vm1417_vm1, %v4666_v57  ;;  %v10204_v63 = vadd.f32 %v10203_v22, %v10202_v24 }
 0x834   : > { %v10205_v40 = vpop.f32.mrf.mxu0  ;;  %10300 = vmatpush3.bf16.msra.mxu1 %v12808_v33 }
 0x835   : > { %10301 = vmatprep.subr.bf16.mxu1 %v12813_v35 }
 0x836   : > { %v10206_v12 = vpop.f32.mrf.mxu0 }
 0x837   : > { %v10207_v5 = vadd.f32 %v10206_v12, %v10205_v40 }
 0x838   : > { %v10208_v61 = vpop.f32.mrf.mxu0  ;;  %10302 = vmatpush3.bf16.msra.mxu1 %v12820_v39 }
 0x839   : > { %v4667_v48 = vpack.c.bf16 %v10207_v5, %v10204_v63  ;;  %10303 = vmatprep.subr.bf16.mxu1 %v12826_v42 }
 0x83a   : > { %v10209_v18 = vpop.f32.mrf.mxu0 }
 0x83b   : > { %11198 = vmatprep.mubr.msk.bf16.mxu1 %vm1417_vm1, %v4667_v48  ;;  %v10210_v46 = vadd.f32 %v10209_v18, %v10208_v61 }
 0x83c   : > { %v10211_v29 = vpop.f32.mrf.mxu0  ;;  %10304 = vmatpush3.bf16.msra.mxu1 %v12832_v45 }
 0x83d   : > { %10305 = vmatprep.subr.bf16.mxu1 %v12837_v47 }
 0x83e   : > { %v10212_v34 = vpop.f32.mrf.mxu0 }
 0x83f   : > { %v10213_v9 = vadd.f32 %v10212_v34, %v10211_v29 }
 0x840   : > { %v10214_v21 = vpop.f32.mrf.mxu0  ;;  %10306 = vmatpush3.bf16.msra.mxu1 %v12842_v49 }
 0x841   : > { %v4668_v11 = vpack.c.bf16 %v10213_v9, %v10210_v46 }
 0x842   : > { %v10215_v41 = vpop.f32.mrf.mxu0 }
 0x843   : > { %11199 = vmatmul.mubr.msk.bf16.gmra.mxu1 %vm1417_vm1, %v4668_v11  ;;  %v10216_v22 = vadd.f32 %v10215_v41, %v10214_v21 }
 0x844   : > { %v10217_v24 = vpop.f32.mrf.mxu0 }
 0x846   : > { %v10218_v57 = vpop.f32.mrf.mxu0 }
 0x847   : > { %v10219_v40 = vadd.f32 %v10218_v57, %v10217_v24 }
 0x848   : > { %v10220_v12 = vpop.f32.mrf.mxu0 }
 0x849   : > { %v4669_v63 = vpack.c.bf16 %v10219_v40, %v10216_v22 }
 0x84a   : > { %v10221_v5 = vpop.f32.mrf.mxu0 }
 0x84b   : > { %11202 = vmatprep.mubr.msk.bf16.mxu1 %vm1417_vm1, %v4669_v63  ;;  %v10222_v61 = vadd.f32 %v10221_v5, %v10220_v12 }
 0x84c   : > { %v10223_v48 = vpop.f32.mrf.mxu0 }
 0x84e   : > { %v10224_v23 = vpop.f32.mrf.mxu0 }
 0x84f   : > { %v10225_v18 = vadd.f32 %v10224_v23, %v10223_v48 }
 0x850   : > { %v10226_v29 = vpop.f32.mrf.mxu0 }
 0x851   : > { %v4670_v34 = vpack.c.bf16 %v10225_v18, %v10222_v61 }
 0x852   : > { %v10227_v52 = vpop.f32.mrf.mxu0 }
 0x853   : > { %11203 = vmatmul.mubr.msk.bf16.gmra.mxu1 %vm1417_vm1, %v4670_v34  ;;  %v10228_v11 = vadd.f32 %v10227_v52, %v10226_v29 }
 0x854   : > { %v10229_v46 = vpop.f32.mrf.mxu0 }
 0x856   : > { %v10230_v9 = vpop.f32.mrf.mxu0 }
 0x857   : > { %v10231_v31 = vadd.f32 %v10230_v9, %v10229_v46 }
 0x858   : > { %v10232_v21 = vpop.f32.mrf.mxu0 }
 0x859   : > { %v4671_v41 = vpack.c.bf16 %v10231_v31, %v10228_v11 }
 0x85a   : > { %v10233_v24 = vpop.f32.mrf.mxu0 }
 0x85b   : > { %11206 = vmatprep.mubr.msk.bf16.mxu1 %vm1417_vm1, %v4671_v41  ;;  %v10234_v40 = vadd.f32 %v10233_v24, %v10232_v21 }
 0x85c   : > { %v10235_v57 = vpop.f32.mrf.mxu0 }
 0x85e   : > { %v10236_v22 = vpop.f32.mrf.mxu0 }
 0x85f   : > { %v10237_v63 = vadd.f32 %v10236_v22, %v10235_v57 }
 0x860   : > { %v10238_v12 = vpop.f32.mrf.mxu0 }
 0x861   : > { %v4672_v23 = vpack.c.bf16 %v10237_v63, %v10234_v40 }
 0x862   : > { %v10239_v5 = vpop.f32.mrf.mxu0 }
 0x863   : > { %11207 = vmatmul.mubr.msk.bf16.gmra.mxu1 %vm1417_vm1, %v4672_v23  ;;  %v10240_v18 = vadd.f32 %v10239_v5, %v10238_v12 }
 0x864   : > { %v10241_v48 = vpop.f32.mrf.mxu0 }
 0x866   : > { %v10242_v61 = vpop.f32.mrf.mxu0 }
 0x867   : > { %v10243_v34 = vadd.f32 %v10242_v61, %v10241_v48 }
 0x868   : > { %v10244_v52 = vpop.f32.mrf.mxu0 }
 0x869   : > { %v4673_v29 = vpack.c.bf16 %v10243_v34, %v10240_v18 }
 0x86a   : > { %v10245_v46 = vpop.f32.mrf.mxu0 }
 0x86b   : > { %11210 = vmatprep.mubr.msk.bf16.mxu1 %vm1417_vm1, %v4673_v29  ;;  %v10246_v11 = vadd.f32 %v10245_v46, %v10244_v52 }
 0x86c   : > { %v10247_v31 = vpop.f32.mrf.mxu0 }
 0x86e   : > { %v10248_v9 = vpop.f32.mrf.mxu0 }
 0x86f   : > { %v10249_v41 = vadd.f32 %v10248_v9, %v10247_v31 }
 0x870   : > { %v10250_v21 = vpop.f32.mrf.mxu0 }
 0x871   : > { %v4674_v24 = vpack.c.bf16 %v10249_v41, %v10246_v11 }
 0x872   : > { %v10251_v57 = vpop.f32.mrf.mxu0 }
 0x873   : > { %11211 = vmatmul.mubr.msk.bf16.gmra.mxu1 %vm1417_vm1, %v4674_v24  ;;  %v10252_v63 = vadd.f32 %v10251_v57, %v10250_v21 }
 0x874   : > { %v10253_v22 = vpop.f32.mrf.mxu0 }
 0x876   : > { %v10254_v40 = vpop.f32.mrf.mxu0 }
 0x877   : > { %v10255_v23 = vadd.f32 %v10254_v40, %v10253_v22 }
 0x878   : > { %v10256_v12 = vpop.f32.mrf.mxu0 }
 0x879   : > { %v4675_v5 = vpack.c.bf16 %v10255_v23, %v10252_v63 }
 0x87a   : > { %v10257_v48 = vpop.f32.mrf.mxu0 }
 0x87b   : > { %11214 = vmatprep.mubr.msk.bf16.mxu1 %vm1417_vm1, %v4675_v5  ;;  %v10258_v34 = vadd.f32 %v10257_v48, %v10256_v12  ;;  %v11903_v12 = vld [vmem:[#allocation2 + $0x704] ss:$8 sps:$4 sm:$0xff]  }
 0x87c   : > { %v10259_v61 = vpop.f32.mrf.mxu0 }
 0x87e   : > { %v10260_v18 = vpop.f32.mrf.mxu0 }
 0x87f   : > { %v10261_v29 = vadd.f32 %v10260_v18, %v10259_v61  ;;  %v11901_v61 = vld [vmem:[#allocation2 + $0x700] ss:$8 sps:$4 sm:$0xff]   ;;  %v11906_v18 = vld [vmem:[#allocation2 + $0x714] ss:$8 sps:$4 sm:$0xff]  }
 0x880   : > { %v10262_v52 = vpop.f32.mrf.mxu0 }
 0x881   : > { %v4676_v46 = vpack.c.bf16 %v10261_v29, %v10258_v34  ;;  %v11904_v34 = vld [vmem:[#allocation2 + $0x710] ss:$8 sps:$4 sm:$0xff]   ;;  %v11909_v29 = vld [vmem:[#allocation2 + $0x724] ss:$8 sps:$4 sm:$0xff]  }
 0x882   : > { %v10263_v31 = vpop.f32.mrf.mxu0 }
 0x883   : > { %11215 = vmatmul.mubr.msk.bf16.gmra.mxu1 %vm1417_vm1, %v4676_v46  ;;  %v10264_v41 = vadd.f32 %v10263_v31, %v10262_v52  ;;  %v11907_v52 = vld [vmem:[#allocation2 + $0x720] ss:$8 sps:$4 sm:$0xff]   ;;  %v11912_v46 = vld [vmem:[#allocation2 + $0x734] ss:$8 sps:$4 sm:$0xff]   ;;  %v11910_v31 = vld [vmem:[#allocation2 + $0x730] ss:$8 sps:$4 sm:$0xff]  }
 0x884   : > { %v10265_v9 = vpop.f32.mrf.mxu0 }
 0x886   : > { %v10266_v11 = vpop.f32.mrf.mxu0 }
 0x887   : > { %v10267_v24 = vadd.f32 %v10266_v11, %v10265_v9  ;;  %v11915_v9 = vld [vmem:[#allocation2 + $0x744] ss:$8 sps:$4 sm:$0xff]   ;;  %v11913_v11 = vld [vmem:[#allocation2 + $0x740] ss:$8 sps:$4 sm:$0xff]  }
 0x888   : > { %v10268_v21 = vpop.f32.mrf.mxu0 }
 0x889   : > { %v4677_v57 = vpack.c.bf16 %v10267_v24, %v10264_v41  ;;  %v11918_v41 = vld [vmem:[#allocation2 + $0x754] ss:$8 sps:$4 sm:$0xff]   ;;  %v11916_v24 = vld [vmem:[#allocation2 + $0x750] ss:$8 sps:$4 sm:$0xff]  }
 0x88a   : > { %v10269_v22 = vpop.f32.mrf.mxu0 }
 0x88b   : > { %11218 = vmatprep.mubr.msk.bf16.mxu1 %vm1417_vm1, %v4677_v57  ;;  %v10270_v23 = vadd.f32 %v10269_v22, %v10268_v21  ;;  %v11921_v21 = vld [vmem:[#allocation2 + $0x764] ss:$8 sps:$4 sm:$0xff]   ;;  %v11919_v22 = vld [vmem:[#allocation2 + $0x760] ss:$8 sps:$4 sm:$0xff]  }
 0x88c   : > { %v10271_v40 = vpop.f32.mrf.mxu0  ;;  %v9169_v57 = vld [vmem:[%s14385_s2 + $0xe] sm:$0x3] }
 0x88d   : > { %11407 = vmatprep.subr.msk.bf16.mxu0 %vm1466_vm0, %v9169_v57 }
 0x88e   : > { %v10272_v63 = vpop.f32.mrf.mxu0 }
 0x88f   : > { %v10273_v5 = vadd.f32 %v10272_v63, %v10271_v40  ;;  %v11924_v40 = vld [vmem:[#allocation2 + $0x774] ss:$8 sps:$4 sm:$0xff]   ;;  %v5344_v63 = vsel %vm1466_vm0, %v9169_v57, 0 }
 0x890   : > { %11223 = vmatpush3.bf16.msra.mxu0 %v5344_v63 }
 0x891   : > { %v4678_v48 = vpack.c.bf16 %v10273_v5, %v10270_v23  ;;  %10420 = vmatprep.subr.bf16.mxu0 %v12755_v3  ;;  %v11922_v23 = vld [vmem:[#allocation2 + $0x770] ss:$8 sps:$4 sm:$0xff]   ;;  %v11927_v5 = vld [vmem:[#allocation2 + $0x784] ss:$8 sps:$4 sm:$0xff]  }
 0x893   : > { %11219 = vmatmul.mubr.msk.bf16.gmra.mxu1 %vm1417_vm1, %v4678_v48  ;;  %v11930_v48 = vld [vmem:[#allocation2 + $0x794] ss:$8 sps:$4 sm:$0xff]  }
 0x894   : > { %5148 = vmatprep.mubr.bf16.mxu1 %v11903_v12  ;;  %v11925_v12 = vld [vmem:[#allocation2 + $0x780] ss:$8 sps:$4 sm:$0xff]  }
 0x89b   : > { %5149 = vmatmul.mubr.bf16.vlgmr.msra.gmra.mxu1 %v11901_v61  ;;  %v11928_v61 = vld [vmem:[#allocation2 + $0x790] ss:$8 sps:$4 sm:$0xff]  }
 0x89c   : > { %5156 = vmatprep.mubr.bf16.mxu1 %v11906_v18  ;;  %v11933_v18 = vld [vmem:[#allocation2 + $0x7a4] ss:$8 sps:$4 sm:$0xff]  }
 0x8a3   : > { %5157 = vmatmul.mubr.bf16.gmra.mxu1 %v11904_v34 }
 0x8a4   : > { %5164 = vmatprep.mubr.bf16.mxu1 %v11909_v29 }
 0x8ab   : > { %5165 = vmatmul.mubr.bf16.gmra.mxu1 %v11907_v52 }
 0x8ac   : > { %5172 = vmatprep.mubr.bf16.mxu1 %v11912_v46 }
 0x8b3   : > { %5173 = vmatmul.mubr.bf16.gmra.mxu1 %v11910_v31  ;;  %v11931_v31 = vld [vmem:[#allocation2 + $0x7a0] ss:$8 sps:$4 sm:$0xff]  }
 0x8b4   : > { %5180 = vmatprep.mubr.bf16.mxu1 %v11915_v9 }
 0x8bb   : > { %5181 = vmatmul.mubr.bf16.gmra.mxu1 %v11913_v11  ;;  %v11936_v11 = vld [vmem:[#allocation2 + $0x7b4] ss:$8 sps:$4 sm:$0xff]  }
 0x8bc   : > { %5188 = vmatprep.mubr.bf16.mxu1 %v11918_v41  ;;  %v11934_v41 = vld [vmem:[#allocation2 + $0x7b0] ss:$8 sps:$4 sm:$0xff]  }
 0x8c3   : > { %5189 = vmatmul.mubr.bf16.gmra.mxu1 %v11916_v24  ;;  %v11939_v24 = vld [vmem:[#allocation2 + $0x7c4] ss:$8 sps:$4 sm:$0xff]  }
 0x8c4   : > { %5196 = vmatprep.mubr.bf16.mxu1 %v11921_v21 }
 0x8cb   : > { %5197 = vmatmul.mubr.bf16.gmra.mxu1 %v11919_v22 }
 0x8cc   : > { %5204 = vmatprep.mubr.bf16.mxu1 %v11924_v40 }
 0x8d3   : > { %5205 = vmatmul.mubr.bf16.gmra.mxu1 %v11922_v23  ;;  %v11942_v23 = vld [vmem:[#allocation2 + $0x7d4] ss:$8 sps:$4 sm:$0xff]  }
 0x8d4   : > { %5212 = vmatprep.mubr.bf16.mxu1 %v11927_v5  ;;  %v11940_v5 = vld [vmem:[#allocation2 + $0x7d0] ss:$8 sps:$4 sm:$0xff]  }
 0x8db   : > { %5213 = vmatmul.mubr.bf16.gmra.mxu1 %v11925_v12  ;;  %v11945_v12 = vld [vmem:[#allocation2 + $0x7e4] ss:$8 sps:$4 sm:$0xff]  }
 0x8dc   : > { %5220 = vmatprep.mubr.bf16.mxu1 %v11930_v48 }
 0x8e3   : > { %v11192_v34 = vpop.f32.mrf.mxu1  ;;  %5221 = vmatmul.mubr.bf16.gmra.mxu1 %v11928_v61 }
 0x8e4   : > { %v13530_v29 = vadd.f32 %v11192_v34, %v13405_v1  ;;  %5228 = vmatprep.mubr.bf16.mxu1 %v11933_v18 }
 0x8e5   : > { %v4764_v52 = vpop.f32.mrf.mxu1 }
 0x8e6   : > { %v13533_v3 = vadd.f32 %v4764_v52, %v13408_v36 }
 0x8e7   : > { %v11193_v46 = vpop.f32.mrf.mxu1 }
 0x8e8   : > { %v13536_v9 = vadd.f32 %v11193_v46, %v13411_v25  ;;  %v11937_v25 = vld [vmem:[#allocation2 + $0x7c0] ss:$8 sps:$4 sm:$0xff]   ;;  %v11948_v46 = vld [vmem:[#allocation2 + $0x7f4] ss:$8 sps:$4 sm:$0xff]  }
 0x8e9   : > { %v13538_v21 = vpop.f32.mrf.mxu1 }
 0x8ea   : > { %14487 = vst [vmem:[#allocation77_spill] sm:$0xff] %v13538_v21 }
 0x8eb   : > { %5229 = vmatmul.mubr.bf16.gmra.mxu1 %v11931_v31  ;;  %v11946_v31 = vld [vmem:[#allocation2 + $0x7f0] ss:$8 sps:$4 sm:$0xff]  }
 0x8ec   : > { %5236 = vmatprep.mubr.bf16.mxu1 %v11936_v11 }
 0x8f3   : > { %v11196_v57 = vpop.f32.mrf.mxu1  ;;  %5237 = vmatmul.mubr.bf16.gmra.mxu1 %v11934_v41 }
 0x8f4   : > { %v13541_v1 = vadd.f32 %v11196_v57, %v13416_v54  ;;  %5244 = vmatprep.mubr.bf16.mxu1 %v11939_v24 }
 0x8f5   : > { %v4780_v36 = vpop.f32.mrf.mxu1 }
 0x8f6   : > { %v13544_v22 = vadd.f32 %v4780_v36, %v13419_v59 }
 0x8f7   : > { %v11197_v40 = vpop.f32.mrf.mxu1 }
 0x8f8   : > { %v13547_v63 = vadd.f32 %v11197_v40, %v13422_v10  ;;  %v11943_v10 = vld [vmem:[#allocation2 + $0x7e0] ss:$8 sps:$4 sm:$0xff]  }
 0x8f9   : > { %v13549_v48 = vpop.f32.mrf.mxu1 }
 0x8fa   : > { %14488 = vst [vmem:[#allocation78_spill] sm:$0xff] %v13549_v48 }
 0x8fb   : > { %5245 = vmatmul.mubr.bf16.gmra.mxu1 %v11937_v25 }
 0x8fc   : > { %5252 = vmatprep.mubr.bf16.mxu1 %v11942_v23 }
 0x903   : > { %v11200_v61 = vpop.f32.mrf.mxu1  ;;  %5253 = vmatmul.mubr.bf16.gmra.mxu1 %v11940_v5 }
 0x904   : > { %v13552_v54 = vadd.f32 %v11200_v61, %v13427_v37  ;;  %5260 = vmatprep.mubr.bf16.mxu1 %v11945_v12 }
 0x905   : > { %v4796_v59 = vpop.f32.mrf.mxu1 }
 0x906   : > { %v13555_v18 = vadd.f32 %v4796_v59, %v13430_v50 }
 0x907   : > { %v11201_v34 = vpop.f32.mrf.mxu1 }
 0x908   : > { %v13558_v52 = vadd.f32 %v11201_v34, %v13433_v56 }
 0x909   : > { %v13560_v11 = vpop.f32.mrf.mxu1 }
 0x90b   : > { %5261 = vmatmul.mubr.bf16.gmra.mxu1 %v11943_v10 }
 0x90c   : > { %5268 = vmatprep.mubr.bf16.mxu1 %v11948_v46 }
 0x913   : > { %v11204_v41 = vpop.f32.mrf.mxu1  ;;  %5269 = vmatmul.mubr.bf16.gmra.mxu1 %v11946_v31 }
 0x914   : > { %v13563_v37 = vadd.f32 %v11204_v41, %v13438_v6 }
 0x915   : > { %v4812_v24 = vpop.f32.mrf.mxu1 }
 0x916   : > { %v13566_v50 = vadd.f32 %v4812_v24, %v13441_v62 }
 0x917   : > { %v11205_v57 = vpop.f32.mrf.mxu1 }
 0x918   : > { %v13569_v36 = vadd.f32 %v11205_v57, %v13444_v0 }
 0x919   : > { %v13571_v56 = vpop.f32.mrf.mxu1 }
 0x923   : > { %v11208_v40 = vpop.f32.mrf.mxu1 }
 0x924   : > { %v13574_v25 = vadd.f32 %v11208_v40, %v13449_v44 }
 0x925   : > { %v4828_v23 = vpop.f32.mrf.mxu1 }
 0x926   : > { %v13577_v5 = vadd.f32 %v4828_v23, %v13452_v15 }
 0x927   : > { %v11209_v6 = vpop.f32.mrf.mxu1 }
 0x928   : > { %v13580_v12 = vadd.f32 %v11209_v6, %v13455_v43 }
 0x929   : > { %v13582_v62 = vpop.f32.mrf.mxu1 }
 0x92a   : > { %14489 = vst [vmem:[#allocation79_spill] sm:$0xff] %v13582_v62 }
 0x933   : > { %v11212_v61 = vpop.f32.mrf.mxu1 }
 0x934   : > { %v13585_v0 = vadd.f32 %v11212_v61, %v13460_v51 }
 0x935   : > { %v4844_v59 = vpop.f32.mrf.mxu1 }
 0x936   : > { %v13588_v34 = vadd.f32 %v4844_v59, %v13463_v53 }
 0x937   : > { %v11213_v44 = vpop.f32.mrf.mxu1 }
 0x938   : > { %v13591_v10 = vadd.f32 %v11213_v44, %v13466_v38 }
 0x939   : > { %v13593_v15 = vpop.f32.mrf.mxu1 }
 0x93a   : > { %14490 = vst [vmem:[#allocation80_spill] sm:$0xff] %v13593_v15 }
 0x943   : > { %v11216_v46 = vpop.f32.mrf.mxu1 }
 0x944   : > { %v13596_v43 = vadd.f32 %v11216_v46, %v13471_v60 }
 0x945   : > { %v4860_v31 = vpop.f32.mrf.mxu1 }
 0x946   : > { %v13599_v41 = vadd.f32 %v4860_v31, %v13474_v58 }
 0x947   : > { %v11217_v51 = vpop.f32.mrf.mxu1 }
 0x948   : > { %v13602_v24 = vadd.f32 %v11217_v51, %v13477_v4 }
 0x949   : > { %v13604_v53 = vpop.f32.mrf.mxu1 }
 0x953   : > { %v11220_v57 = vpop.f32.mrf.mxu1 }
 0x954   : > { %v13607_v38 = vadd.f32 %v11220_v57, %v13482_v32 }
 0x955   : > { %v4876_v40 = vpop.f32.mrf.mxu1 }
 0x956   : > { %v13610_v23 = vadd.f32 %v4876_v40, %v13485_v16 }
 0x957   : > { %v11221_v60 = vpop.f32.mrf.mxu1 }
 0x958   : > { %v13613_v6 = vadd.f32 %v11221_v60, %v13488_v55 }
 0x959   : > { %v13615_v58 = vpop.f32.mrf.mxu1 }
 0x95b   : > { %v10307_v61 = vpop.f32.mrf.mxu1 }
 0x95d   : > { %v10308_v59 = vpop.f32.mrf.mxu1 }
 0x95e   : > { %v10309_v46 = vadd.f32 %v10308_v59, %v10307_v61 }
 0x95f   : > { %v10310_v4 = vpop.f32.mrf.mxu1 }
 0x961   : > { %v10311_v44 = vpop.f32.mrf.mxu1 }
 0x962   : > { %v10312_v31 = vadd.f32 %v10311_v44, %v10310_v4 }
 0x963   : > { %v10313_v51 = vpop.f32.mrf.mxu1 }
 0x964   : > { %v5279_v21 = vpack.c.bf16 %v10312_v31, %v10309_v46 }
 0x965   : > { %v10314_v32 = vpop.f32.mrf.mxu1 }
 0x966   : > { %11224 = vmatprep.mubr.msk.bf16.mxu0 %vm1417_vm1, %v5279_v21  ;;  %v10315_v40 = vadd.f32 %v10314_v32, %v10313_v51 }
 0x967   : > { %v10316_v57 = vpop.f32.mrf.mxu1 }
 0x969   : > { %v10317_v16 = vpop.f32.mrf.mxu1 }
 0x96a   : > { %v10318_v62 = vadd.f32 %v10317_v16, %v10316_v57 }
 0x96b   : > { %v10319_v48 = vpop.f32.mrf.mxu1 }
 0x96c   : > { %v5280_v55 = vpack.c.bf16 %v10318_v62, %v10315_v40 }
 0x96d   : > { %v10320_v60 = vpop.f32.mrf.mxu1 }
 0x96e   : > { %11225 = vmatmul.mubr.msk.bf16.vlgmr.msra.gmra.mxu0 %vm1417_vm1, %v5280_v55  ;;  %v10321_v59 = vadd.f32 %v10320_v60, %v10319_v48 }
 0x96f   : > { %v10322_v15 = vpop.f32.mrf.mxu1  ;;  %10421 = vmatpush3.bf16.msra.mxu0 %v12760_v7 }
 0x970   : > { %10422 = vmatprep.subr.bf16.mxu0 %v12762_v8 }
 0x971   : > { %v10323_v61 = vpop.f32.mrf.mxu1 }
 0x972   : > { %v10324_v4 = vadd.f32 %v10323_v61, %v10322_v15 }
 0x973   : > { %v10325_v44 = vpop.f32.mrf.mxu1  ;;  %10423 = vmatpush3.bf16.msra.mxu0 %v12772_v13 }
 0x974   : > { %v5281_v21 = vpack.c.bf16 %v10324_v4, %v10321_v59  ;;  %10424 = vmatprep.subr.bf16.mxu0 %v12776_v14 }
 0x975   : > { %v10326_v46 = vpop.f32.mrf.mxu1 }
 0x976   : > { %11228 = vmatprep.mubr.msk.bf16.mxu0 %vm1417_vm1, %v5281_v21  ;;  %v10327_v31 = vadd.f32 %v10326_v46, %v10325_v44 }
 0x977   : > { %v10328_v62 = vpop.f32.mrf.mxu1  ;;  %10425 = vmatpush3.bf16.msra.mxu0 %v12784_v19 }
 0x978   : > { %10426 = vmatprep.subr.bf16.mxu0 %v12788_v20 }
 0x979   : > { %v10329_v7 = vpop.f32.mrf.mxu1 }
 0x97a   : > { %v10330_v8 = vadd.f32 %v10329_v7, %v10328_v62 }
 0x97b   : > { %v10331_v51 = vpop.f32.mrf.mxu1  ;;  %10427 = vmatpush3.bf16.msra.mxu0 %v12798_v28 }
 0x97c   : > { %v5282_v48 = vpack.c.bf16 %v10330_v8, %v10327_v31  ;;  %10428 = vmatprep.subr.bf16.mxu0 %v12803_v30 }
 0x97d   : > { %v10332_v13 = vpop.f32.mrf.mxu1 }
 0x97e   : > { %11229 = vmatmul.mubr.msk.bf16.gmra.mxu0 %vm1417_vm1, %v5282_v48  ;;  %v10333_v15 = vadd.f32 %v10332_v13, %v10331_v51 }
 0x97f   : > { %v10334_v14 = vpop.f32.mrf.mxu1  ;;  %10429 = vmatpush3.bf16.msra.mxu0 %v12808_v33 }
 0x980   : > { %10430 = vmatprep.subr.bf16.mxu0 %v12813_v35 }
 0x981   : > { %v10335_v19 = vpop.f32.mrf.mxu1 }
 0x982   : > { %v10336_v20 = vadd.f32 %v10335_v19, %v10334_v14 }
 0x983   : > { %v10337_v32 = vpop.f32.mrf.mxu1  ;;  %10431 = vmatpush3.bf16.msra.mxu0 %v12820_v39 }
 0x984   : > { %v5283_v57 = vpack.c.bf16 %v10336_v20, %v10333_v15  ;;  %10432 = vmatprep.subr.bf16.mxu0 %v12826_v42 }
 0x985   : > { %v10338_v28 = vpop.f32.mrf.mxu1 }
 0x986   : > { %11232 = vmatprep.mubr.msk.bf16.mxu0 %vm1417_vm1, %v5283_v57  ;;  %v10339_v16 = vadd.f32 %v10338_v28, %v10337_v32 }
 0x987   : > { %v10340_v30 = vpop.f32.mrf.mxu1  ;;  %10433 = vmatpush3.bf16.msra.mxu0 %v12832_v45 }
 0x988   : > { %10434 = vmatprep.subr.bf16.mxu0 %v12837_v47 }
 0x989   : > { %v10341_v33 = vpop.f32.mrf.mxu1 }
 0x98a   : > { %v10342_v35 = vadd.f32 %v10341_v33, %v10340_v30 }
 0x98b   : > { %v10343_v40 = vpop.f32.mrf.mxu1  ;;  %10435 = vmatpush3.bf16.msra.mxu0 %v12842_v49 }
 0x98c   : > { %v5284_v55 = vpack.c.bf16 %v10342_v35, %v10339_v16 }
 0x98d   : > { %v10344_v60 = vpop.f32.mrf.mxu1 }
 0x98e   : > { %11233 = vmatmul.mubr.msk.bf16.gmra.mxu0 %vm1417_vm1, %v5284_v55  ;;  %v10345_v61 = vadd.f32 %v10344_v60, %v10343_v40 }
 0x98f   : > { %v10346_v39 = vpop.f32.mrf.mxu1 }
 0x991   : > { %v10347_v42 = vpop.f32.mrf.mxu1 }
 0x992   : > { %v10348_v59 = vadd.f32 %v10347_v42, %v10346_v39 }
 0x993   : > { %v10349_v4 = vpop.f32.mrf.mxu1 }
 0x994   : > { %v5285_v44 = vpack.c.bf16 %v10348_v59, %v10345_v61 }
 0x995   : > { %v10350_v21 = vpop.f32.mrf.mxu1 }
 0x996   : > { %11236 = vmatprep.mubr.msk.bf16.mxu0 %vm1417_vm1, %v5285_v44  ;;  %v10351_v46 = vadd.f32 %v10350_v21, %v10349_v4 }
 0x997   : > { %v10352_v45 = vpop.f32.mrf.mxu1 }
 0x999   : > { %v10353_v47 = vpop.f32.mrf.mxu1 }
 0x99a   : > { %v10354_v62 = vadd.f32 %v10353_v47, %v10352_v45 }
 0x99b   : > { %v10355_v7 = vpop.f32.mrf.mxu1 }
 0x99c   : > { %v5286_v31 = vpack.c.bf16 %v10354_v62, %v10351_v46 }
 0x99d   : > { %v10356_v49 = vpop.f32.mrf.mxu1 }
 0x99e   : > { %11237 = vmatmul.mubr.msk.bf16.gmra.mxu0 %vm1417_vm1, %v5286_v31  ;;  %v10357_v48 = vadd.f32 %v10356_v49, %v10355_v7 }
 0x99f   : > { %v10358_v8 = vpop.f32.mrf.mxu1 }
 0x9a1   : > { %v10359_v51 = vpop.f32.mrf.mxu1 }
 0x9a2   : > { %v10360_v13 = vadd.f32 %v10359_v51, %v10358_v8 }
 0x9a3   : > { %v10361_v14 = vpop.f32.mrf.mxu1 }
 0x9a4   : > { %v5287_v19 = vpack.c.bf16 %v10360_v13, %v10357_v48 }
 0x9a5   : > { %v10362_v15 = vpop.f32.mrf.mxu1 }
 0x9a6   : > { %11240 = vmatprep.mubr.msk.bf16.mxu0 %vm1417_vm1, %v5287_v19  ;;  %v10363_v57 = vadd.f32 %v10362_v15, %v10361_v14 }
 0x9a7   : > { %v10364_v20 = vpop.f32.mrf.mxu1 }
 0x9a9   : > { %v10365_v32 = vpop.f32.mrf.mxu1 }
 0x9aa   : > { %v10366_v28 = vadd.f32 %v10365_v32, %v10364_v20 }
 0x9ab   : > { %v10367_v30 = vpop.f32.mrf.mxu1 }
 0x9ac   : > { %v5288_v33 = vpack.c.bf16 %v10366_v28, %v10363_v57 }
 0x9ad   : > { %v10368_v16 = vpop.f32.mrf.mxu1 }
 0x9ae   : > { %11241 = vmatmul.mubr.msk.bf16.gmra.mxu0 %vm1417_vm1, %v5288_v33  ;;  %v10369_v55 = vadd.f32 %v10368_v16, %v10367_v30 }
 0x9af   : > { %v10370_v35 = vpop.f32.mrf.mxu1 }
 0x9b1   : > { %v10371_v40 = vpop.f32.mrf.mxu1 }
 0x9b2   : > { %v10372_v60 = vadd.f32 %v10371_v40, %v10370_v35 }
 0x9b3   : > { %v10373_v39 = vpop.f32.mrf.mxu1 }
 0x9b4   : > { %v5289_v42 = vpack.c.bf16 %v10372_v60, %v10369_v55 }
 0x9b5   : > { %v10374_v61 = vpop.f32.mrf.mxu1 }
 0x9b6   : > { %11244 = vmatprep.mubr.msk.bf16.mxu0 %vm1417_vm1, %v5289_v42  ;;  %v10375_v44 = vadd.f32 %v10374_v61, %v10373_v39 }
 0x9b7   : > { %v10376_v59 = vpop.f32.mrf.mxu1 }
 0x9b9   : > { %v10377_v4 = vpop.f32.mrf.mxu1 }
 0x9ba   : > { %v10378_v21 = vadd.f32 %v10377_v4, %v10376_v59  ;;  %v11951_v59 = vld [vmem:[#allocation2 + $0x804] ss:$8 sps:$4 sm:$0xff]  }
 0x9bb   : > { %v10379_v45 = vpop.f32.mrf.mxu1 }
 0x9bc   : > { %v5290_v47 = vpack.c.bf16 %v10378_v21, %v10375_v44  ;;  %v11949_v44 = vld [vmem:[#allocation2 + $0x800] ss:$8 sps:$4 sm:$0xff]   ;;  %v11954_v21 = vld [vmem:[#allocation2 + $0x814] ss:$8 sps:$4 sm:$0xff]  }
 0x9bd   : > { %v10380_v46 = vpop.f32.mrf.mxu1 }
 0x9be   : > { %11245 = vmatmul.mubr.msk.bf16.gmra.mxu0 %vm1417_vm1, %v5290_v47  ;;  %v10381_v31 = vadd.f32 %v10380_v46, %v10379_v45  ;;  %v11952_v45 = vld [vmem:[#allocation2 + $0x810] ss:$8 sps:$4 sm:$0xff]   ;;  %v11957_v47 = vld [vmem:[#allocation2 + $0x824] ss:$8 sps:$4 sm:$0xff]   ;;  %v11955_v46 = vld [vmem:[#allocation2 + $0x820] ss:$8 sps:$4 sm:$0xff]  }
 0x9bf   : > { %v10382_v62 = vpop.f32.mrf.mxu1 }
 0x9c1   : > { %v10383_v7 = vpop.f32.mrf.mxu1 }
 0x9c2   : > { %v10384_v49 = vadd.f32 %v10383_v7, %v10382_v62  ;;  %v11960_v62 = vld [vmem:[#allocation2 + $0x834] ss:$8 sps:$4 sm:$0xff]   ;;  %v11958_v7 = vld [vmem:[#allocation2 + $0x830] ss:$8 sps:$4 sm:$0xff]  }
 0x9c3   : > { %v10385_v8 = vpop.f32.mrf.mxu1 }
 0x9c4   : > { %v5291_v51 = vpack.c.bf16 %v10384_v49, %v10381_v31  ;;  %v11963_v31 = vld [vmem:[#allocation2 + $0x844] ss:$8 sps:$4 sm:$0xff]   ;;  %v11961_v49 = vld [vmem:[#allocation2 + $0x840] ss:$8 sps:$4 sm:$0xff]  }
 0x9c5   : > { %v10386_v48 = vpop.f32.mrf.mxu1 }
 0x9c6   : > { %11248 = vmatprep.mubr.msk.bf16.mxu0 %vm1417_vm1, %v5291_v51  ;;  %v10387_v19 = vadd.f32 %v10386_v48, %v10385_v8  ;;  %v11966_v8 = vld [vmem:[#allocation2 + $0x854] ss:$8 sps:$4 sm:$0xff]   ;;  %v11964_v51 = vld [vmem:[#allocation2 + $0x850] ss:$8 sps:$4 sm:$0xff]   ;;  %v11969_v48 = vld [vmem:[#allocation2 + $0x864] ss:$8 sps:$4 sm:$0xff]  }
 0x9c7   : > { %v10388_v13 = vpop.f32.mrf.mxu1 }
 0x9c9   : > { %v10389_v14 = vpop.f32.mrf.mxu1 }
 0x9ca   : > { %v10390_v15 = vadd.f32 %v10389_v14, %v10388_v13  ;;  %v9218_v13 = vld [vmem:[%s14385_s2 + $0x10] sm:$0x3]  ;;  %v11967_v14 = vld [vmem:[#allocation2 + $0x860] ss:$8 sps:$4 sm:$0xff]  }
 0x9cb   : > { %v10391_v20 = vpop.f32.mrf.mxu1  ;;  %11408 = vmatprep.subr.msk.bf16.mxu1 %vm1466_vm0, %v9218_v13 }
 0x9cc   : > { %v5292_v32 = vpack.c.bf16 %v10390_v15, %v10387_v19  ;;  %v11972_v19 = vld [vmem:[#allocation2 + $0x874] ss:$8 sps:$4 sm:$0xff]   ;;  %v5960_v15 = vsel %vm1466_vm0, %v9218_v13, 0 }
 0x9cd   : > { %v10392_v57 = vpop.f32.mrf.mxu1  ;;  %11257 = vmatpush3.bf16.msra.mxu1 %v5960_v15 }
 0x9ce   : > { %11249 = vmatmul.mubr.msk.bf16.gmra.mxu0 %vm1417_vm1, %v5292_v32  ;;  %v10393_v33 = vadd.f32 %v10392_v57, %v10391_v20  ;;  %v11970_v20 = vld [vmem:[#allocation2 + $0x870] ss:$8 sps:$4 sm:$0xff]   ;;  %v11975_v32 = vld [vmem:[#allocation2 + $0x884] ss:$8 sps:$4 sm:$0xff]   ;;  %v11973_v57 = vld [vmem:[#allocation2 + $0x880] ss:$8 sps:$4 sm:$0xff]  }
 0x9cf   : > { %v10394_v28 = vpop.f32.mrf.mxu1 }
 0x9d1   : > { %v10395_v30 = vpop.f32.mrf.mxu1 }
 0x9d2   : > { %v10396_v16 = vadd.f32 %v10395_v30, %v10394_v28  ;;  %v11978_v28 = vld [vmem:[#allocation2 + $0x894] ss:$8 sps:$4 sm:$0xff]   ;;  %v11976_v30 = vld [vmem:[#allocation2 + $0x890] ss:$8 sps:$4 sm:$0xff]  }
 0x9d3   : > { %v10397_v35 = vpop.f32.mrf.mxu1 }
 0x9d4   : > { %v5293_v40 = vpack.c.bf16 %v10396_v16, %v10393_v33  ;;  %v11981_v33 = vld [vmem:[#allocation2 + $0x8a4] ss:$8 sps:$4 sm:$0xff]  }
 0x9d5   : > { %v10398_v55 = vpop.f32.mrf.mxu1 }
 0x9d6   : > { %11252 = vmatprep.mubr.msk.bf16.mxu0 %vm1417_vm1, %v5293_v40  ;;  %v10399_v42 = vadd.f32 %v10398_v55, %v10397_v35 }
 0x9d7   : > { %v10400_v60 = vpop.f32.mrf.mxu1 }
 0x9d9   : > { %v10401_v39 = vpop.f32.mrf.mxu1 }
 0x9da   : > { %v10402_v61 = vadd.f32 %v10401_v39, %v10400_v60  ;;  %v11979_v39 = vld [vmem:[#allocation2 + $0x8a0] ss:$8 sps:$4 sm:$0xff]  }
 0x9dc   : > { %v5294_v4 = vpack.c.bf16 %v10402_v61, %v10399_v42  ;;  %v11984_v61 = vld [vmem:[#allocation2 + $0x8b4] ss:$8 sps:$4 sm:$0xff]  }
 0x9de   : > { %11253 = vmatmul.mubr.msk.bf16.gmra.mxu0 %vm1417_vm1, %v5294_v4  ;;  %v11987_v4 = vld [vmem:[#allocation2 + $0x8c4] ss:$8 sps:$4 sm:$0xff]  }
 0x9df   : > { %5764 = vmatprep.mubr.bf16.mxu0 %v11951_v59  ;;  %v11982_v59 = vld [vmem:[#allocation2 + $0x8b0] ss:$8 sps:$4 sm:$0xff]  }
 0x9e6   : > { %5765 = vmatmul.mubr.bf16.vlgmr.msra.gmra.mxu0 %v11949_v44 }
 0x9e7   : > { %5772 = vmatprep.mubr.bf16.mxu0 %v11954_v21 }
 0x9ee   : > { %5773 = vmatmul.mubr.bf16.gmra.mxu0 %v11952_v45 }
 0x9ef   : > { %5780 = vmatprep.mubr.bf16.mxu0 %v11957_v47 }
 0x9f6   : > { %5781 = vmatmul.mubr.bf16.gmra.mxu0 %v11955_v46 }
 0x9f7   : > { %5788 = vmatprep.mubr.bf16.mxu0 %v11960_v62  ;;  %v11990_v62 = vld [vmem:[#allocation2 + $0x8d4] ss:$8 sps:$4 sm:$0xff]  }
 0x9fe   : > { %5789 = vmatmul.mubr.bf16.gmra.mxu0 %v11958_v7  ;;  %v11988_v7 = vld [vmem:[#allocation2 + $0x8d0] ss:$8 sps:$4 sm:$0xff]  }
 0x9ff   : > { %5796 = vmatprep.mubr.bf16.mxu0 %v11963_v31  ;;  %v11993_v31 = vld [vmem:[#allocation2 + $0x8e4] ss:$8 sps:$4 sm:$0xff]  }
 0xa06   : > { %5797 = vmatmul.mubr.bf16.gmra.mxu0 %v11961_v49 }
 0xa07   : > { %5804 = vmatprep.mubr.bf16.mxu0 %v11966_v8 }
 0xa0e   : > { %5805 = vmatmul.mubr.bf16.gmra.mxu0 %v11964_v51 }
 0xa0f   : > { %5812 = vmatprep.mubr.bf16.mxu0 %v11969_v48 }
 0xa16   : > { %5813 = vmatmul.mubr.bf16.gmra.mxu0 %v11967_v14  ;;  %v11996_v14 = vld [vmem:[#allocation2 + $0x8f4] ss:$8 sps:$4 sm:$0xff]  }
 0xa17   : > { %5820 = vmatprep.mubr.bf16.mxu0 %v11972_v19  ;;  %v11994_v19 = vld [vmem:[#allocation2 + $0x8f0] ss:$8 sps:$4 sm:$0xff]  }
 0xa1e   : > { %5821 = vmatmul.mubr.bf16.gmra.mxu0 %v11970_v20 }
 0xa1f   : > { %5828 = vmatprep.mubr.bf16.mxu0 %v11975_v32 }
 0xa26   : > { %5829 = vmatmul.mubr.bf16.gmra.mxu0 %v11973_v57 }
 0xa27   : > { %5836 = vmatprep.mubr.bf16.mxu0 %v11978_v28 }
 0xa2e   : > { %v11226_v16 = vpop.f32.mrf.mxu0  ;;  %5837 = vmatmul.mubr.bf16.gmra.mxu0 %v11976_v30 }
 0xa2f   : > { %v13654_v35 = vadd.f32 %v11226_v16, %v13530_v29  ;;  %5844 = vmatprep.mubr.bf16.mxu0 %v11981_v33 }
 0xa30   : > { %v5380_v40 = vpop.f32.mrf.mxu0 }
 0xa31   : > { %v13657_v55 = vadd.f32 %v5380_v40, %v13533_v3 }
 0xa32   : > { %v11227_v60 = vpop.f32.mrf.mxu0 }
 0xa33   : > { %v13660_v42 = vadd.f32 %v11227_v60, %v13536_v9  ;;  %v11985_v9 = vld [vmem:[#allocation2 + $0x8c0] ss:$8 sps:$4 sm:$0xff]  }
 0xa34   : > { %v13662_v44 = vpop.f32.mrf.mxu0 }
 0xa36   : > { %5845 = vmatmul.mubr.bf16.gmra.mxu0 %v11979_v39 }
 0xa37   : > { %5852 = vmatprep.mubr.bf16.mxu0 %v11984_v61 }
 0xa3e   : > { %v11230_v21 = vpop.f32.mrf.mxu0  ;;  %5853 = vmatmul.mubr.bf16.gmra.mxu0 %v11982_v59 }
 0xa3f   : > { %v13665_v29 = vadd.f32 %v11230_v21, %v13541_v1  ;;  %5860 = vmatprep.mubr.bf16.mxu0 %v11987_v4 }
 0xa40   : > { %v5396_v3 = vpop.f32.mrf.mxu0 }
 0xa41   : > { %v13668_v45 = vadd.f32 %v5396_v3, %v13544_v22 }
 0xa42   : > { %v11231_v47 = vpop.f32.mrf.mxu0 }
 0xa43   : > { %v13671_v46 = vadd.f32 %v11231_v47, %v13547_v63  ;;  %v11991_v63 = vld [vmem:[#allocation2 + $0x8e0] ss:$8 sps:$4 sm:$0xff]  }
 0xa44   : > { %v13673_v49 = vpop.f32.mrf.mxu0 }
 0xa46   : > { %5861 = vmatmul.mubr.bf16.gmra.mxu0 %v11985_v9 }
 0xa47   : > { %5868 = vmatprep.mubr.bf16.mxu0 %v11990_v62 }
 0xa4e   : > { %v11234_v8 = vpop.f32.mrf.mxu0  ;;  %5869 = vmatmul.mubr.bf16.gmra.mxu0 %v11988_v7 }
 0xa4f   : > { %v13676_v1 = vadd.f32 %v11234_v8, %v13552_v54  ;;  %5876 = vmatprep.mubr.bf16.mxu0 %v11993_v31 }
 0xa50   : > { %v5412_v22 = vpop.f32.mrf.mxu0 }
 0xa51   : > { %v13679_v51 = vadd.f32 %v5412_v22, %v13555_v18 }
 0xa52   : > { %v11235_v48 = vpop.f32.mrf.mxu0 }
 0xa53   : > { %v13682_v13 = vadd.f32 %v11235_v48, %v13558_v52 }
 0xa54   : > { %v13684_v15 = vpop.f32.mrf.mxu0 }
 0xa56   : > { %5877 = vmatmul.mubr.bf16.gmra.mxu0 %v11991_v63 }
 0xa57   : > { %5884 = vmatprep.mubr.bf16.mxu0 %v11996_v14 }
 0xa5e   : > { %v11238_v20 = vpop.f32.mrf.mxu0  ;;  %5885 = vmatmul.mubr.bf16.gmra.mxu0 %v11994_v19 }
 0xa5f   : > { %v13687_v54 = vadd.f32 %v11238_v20, %v13563_v37 }
 0xa60   : > { %v5428_v32 = vpop.f32.mrf.mxu0 }
 0xa61   : > { %v13690_v18 = vadd.f32 %v5428_v32, %v13566_v50 }
 0xa62   : > { %v11239_v57 = vpop.f32.mrf.mxu0 }
 0xa63   : > { %v13693_v28 = vadd.f32 %v11239_v57, %v13569_v36 }
 0xa64   : > { %v13695_v52 = vpop.f32.mrf.mxu0 }
 0xa6e   : > { %v11242_v30 = vpop.f32.mrf.mxu0 }
 0xa6f   : > { %v13698_v33 = vadd.f32 %v11242_v30, %v13574_v25 }
 0xa70   : > { %v5444_v16 = vpop.f32.mrf.mxu0 }
 0xa71   : > { %v13701_v40 = vadd.f32 %v5444_v16, %v13577_v5 }
 0xa72   : > { %v11243_v37 = vpop.f32.mrf.mxu0 }
 0xa73   : > { %v13704_v60 = vadd.f32 %v11243_v37, %v13580_v12 }
 0xa74   : > { %v13706_v50 = vpop.f32.mrf.mxu0 }
 0xa7e   : > { %v11246_v39 = vpop.f32.mrf.mxu0 }
 0xa7f   : > { %v13709_v36 = vadd.f32 %v11246_v39, %v13585_v0 }
 0xa80   : > { %v5460_v61 = vpop.f32.mrf.mxu0 }
 0xa81   : > { %v13712_v59 = vadd.f32 %v5460_v61, %v13588_v34 }
 0xa82   : > { %v11247_v25 = vpop.f32.mrf.mxu0 }
 0xa83   : > { %v13715_v4 = vadd.f32 %v11247_v25, %v13591_v10 }
 0xa84   : > { %v13717_v5 = vpop.f32.mrf.mxu0 }
 0xa8e   : > { %v11250_v21 = vpop.f32.mrf.mxu0 }
 0xa8f   : > { %v13720_v12 = vadd.f32 %v11250_v21, %v13596_v43 }
 0xa90   : > { %v5476_v3 = vpop.f32.mrf.mxu0 }
 0xa91   : > { %v13723_v47 = vadd.f32 %v5476_v3, %v13599_v41 }
 0xa92   : > { %v11251_v0 = vpop.f32.mrf.mxu0 }
 0xa93   : > { %v13726_v9 = vadd.f32 %v11251_v0, %v13602_v24 }
 0xa94   : > { %v13728_v34 = vpop.f32.mrf.mxu0 }
 0xa9e   : > { %v11254_v62 = vpop.f32.mrf.mxu0 }
 0xa9f   : > { %v13731_v10 = vadd.f32 %v11254_v62, %v13607_v38 }
 0xaa0   : > { %v5492_v7 = vpop.f32.mrf.mxu0 }
 0xaa1   : > { %v13734_v31 = vadd.f32 %v5492_v7, %v13610_v23 }
 0xaa2   : > { %v11255_v43 = vpop.f32.mrf.mxu0 }
 0xaa3   : > { %v13737_v8 = vadd.f32 %v11255_v43, %v13613_v6 }
 0xaa4   : > { %v13739_v41 = vpop.f32.mrf.mxu0 }
 0xaa6   : > { %v10436_v22 = vpop.f32.mrf.mxu0 }
 0xaa8   : > { %v10437_v48 = vpop.f32.mrf.mxu0 }
 0xaa9   : > { %v10438_v14 = vadd.f32 %v10437_v48, %v10436_v22 }
 0xaaa   : > { %v10439_v24 = vpop.f32.mrf.mxu0 }
 0xaac   : > { %v10440_v63 = vpop.f32.mrf.mxu0 }
 0xaad   : > { %v10441_v19 = vadd.f32 %v10440_v63, %v10439_v24 }
 0xaae   : > { %v10442_v20 = vpop.f32.mrf.mxu0 }
 0xaaf   : > { %v5895_v32 = vpack.c.bf16 %v10441_v19, %v10438_v14 }
 0xab0   : > { %v10443_v38 = vpop.f32.mrf.mxu0 }
 0xab1   : > { %11258 = vmatprep.mubr.msk.bf16.mxu1 %vm1417_vm1, %v5895_v32  ;;  %v10444_v30 = vadd.f32 %v10443_v38, %v10442_v20 }
 0xab2   : > { %v10445_v57 = vpop.f32.mrf.mxu0 }
 0xab4   : > { %v10446_v23 = vpop.f32.mrf.mxu0 }
 0xab5   : > { %v10447_v16 = vadd.f32 %v10446_v23, %v10445_v57 }
 0xab6   : > { %v10448_v37 = vpop.f32.mrf.mxu0 }
 0xab7   : > { %v5896_v6 = vpack.c.bf16 %v10447_v16, %v10444_v30 }
 0xab8   : > { %v10449_v39 = vpop.f32.mrf.mxu0 }
 0xab9   : > { %11259 = vmatmul.mubr.msk.bf16.vlgmr.msra.gmra.mxu1 %vm1417_vm1, %v5896_v6  ;;  %v10450_v21 = vadd.f32 %v10449_v39, %v10448_v37 }
 0xaba   : > { %v10451_v61 = vpop.f32.mrf.mxu0 }
 0xabc   : > { %v10452_v25 = vpop.f32.mrf.mxu0 }
 0xabd   : > { %v10453_v3 = vadd.f32 %v10452_v25, %v10451_v61 }
 0xabe   : > { %v10454_v0 = vpop.f32.mrf.mxu0 }
 0xabf   : > { %v5897_v62 = vpack.c.bf16 %v10453_v3, %v10450_v21 }
 0xac0   : > { %v10455_v7 = vpop.f32.mrf.mxu0 }
 0xac1   : > { %11262 = vmatprep.mubr.msk.bf16.mxu1 %vm1417_vm1, %v5897_v62  ;;  %v10456_v48 = vadd.f32 %v10455_v7, %v10454_v0 }
 0xac2   : > { %v10457_v43 = vpop.f32.mrf.mxu0 }
 0xac4   : > { %v10458_v22 = vpop.f32.mrf.mxu0 }
 0xac5   : > { %v10459_v24 = vadd.f32 %v10458_v22, %v10457_v43 }
 0xac6   : > { %v10460_v63 = vpop.f32.mrf.mxu0 }
 0xac7   : > { %v5898_v14 = vpack.c.bf16 %v10459_v24, %v10456_v48 }
 0xac8   : > { %v10461_v19 = vpop.f32.mrf.mxu0 }
 0xac9   : > { %11263 = vmatmul.mubr.msk.bf16.gmra.mxu1 %vm1417_vm1, %v5898_v14  ;;  %v10462_v38 = vadd.f32 %v10461_v19, %v10460_v63 }
 0xaca   : > { %v10463_v20 = vpop.f32.mrf.mxu0 }
 0xacc   : > { %v10464_v32 = vpop.f32.mrf.mxu0 }
 0xacd   : > { %v10465_v57 = vadd.f32 %v10464_v32, %v10463_v20 }
 0xace   : > { %v10466_v23 = vpop.f32.mrf.mxu0 }
 0xacf   : > { %v5899_v30 = vpack.c.bf16 %v10465_v57, %v10462_v38 }
 0xad0   : > { %v10467_v16 = vpop.f32.mrf.mxu0 }
 0xad1   : > { %11266 = vmatprep.mubr.msk.bf16.mxu1 %vm1417_vm1, %v5899_v30  ;;  %v10468_v39 = vadd.f32 %v10467_v16, %v10466_v23 }
 0xad2   : > { %v10469_v37 = vpop.f32.mrf.mxu0 }
 0xad4   : > { %v10470_v6 = vpop.f32.mrf.mxu0 }
 0xad5   : > { %v10471_v61 = vadd.f32 %v10470_v6, %v10469_v37 }
 0xad6   : > { %v10472_v25 = vpop.f32.mrf.mxu0 }
 0xad7   : > { %v5900_v21 = vpack.c.bf16 %v10471_v61, %v10468_v39 }
 0xad8   : > { %v10473_v3 = vpop.f32.mrf.mxu0 }
 0xad9   : > { %11267 = vmatmul.mubr.msk.bf16.gmra.mxu1 %vm1417_vm1, %v5900_v21  ;;  %v10474_v7 = vadd.f32 %v10473_v3, %v10472_v25 }
 0xada   : > { %v10475_v0 = vpop.f32.mrf.mxu0 }
 0xadc   : > { %v10476_v62 = vpop.f32.mrf.mxu0 }
 0xadd   : > { %v10477_v43 = vadd.f32 %v10476_v62, %v10475_v0 }
 0xade   : > { %v10478_v22 = vpop.f32.mrf.mxu0 }
 0xadf   : > { %v5901_v48 = vpack.c.bf16 %v10477_v43, %v10474_v7 }
 0xae0   : > { %v10479_v24 = vpop.f32.mrf.mxu0 }
 0xae1   : > { %11270 = vmatprep.mubr.msk.bf16.mxu1 %vm1417_vm1, %v5901_v48  ;;  %v10480_v19 = vadd.f32 %v10479_v24, %v10478_v22 }
 0xae2   : > { %v10481_v63 = vpop.f32.mrf.mxu0 }
 0xae4   : > { %v10482_v14 = vpop.f32.mrf.mxu0 }
 0xae5   : > { %v10483_v20 = vadd.f32 %v10482_v14, %v10481_v63 }
 0xae6   : > { %v10484_v32 = vpop.f32.mrf.mxu0 }
 0xae7   : > { %v5902_v38 = vpack.c.bf16 %v10483_v20, %v10480_v19 }
 0xae8   : > { %v10485_v57 = vpop.f32.mrf.mxu0 }
 0xae9   : > { %11271 = vmatmul.mubr.msk.bf16.gmra.mxu1 %vm1417_vm1, %v5902_v38  ;;  %v10486_v16 = vadd.f32 %v10485_v57, %v10484_v32 }
 0xaea   : > { %v10487_v23 = vpop.f32.mrf.mxu0 }
 0xaec   : > { %v10488_v30 = vpop.f32.mrf.mxu0 }
 0xaed   : > { %v10489_v37 = vadd.f32 %v10488_v30, %v10487_v23 }
 0xaee   : > { %v10490_v6 = vpop.f32.mrf.mxu0 }
 0xaef   : > { %v5903_v39 = vpack.c.bf16 %v10489_v37, %v10486_v16 }
 0xaf0   : > { %v10491_v61 = vpop.f32.mrf.mxu0 }
 0xaf1   : > { %11274 = vmatprep.mubr.msk.bf16.mxu1 %vm1417_vm1, %v5903_v39  ;;  %v10492_v3 = vadd.f32 %v10491_v61, %v10490_v6 }
 0xaf2   : > { %v10493_v25 = vpop.f32.mrf.mxu0 }
 0xaf4   : > { %v10494_v21 = vpop.f32.mrf.mxu0 }
 0xaf5   : > { %v10495_v0 = vadd.f32 %v10494_v21, %v10493_v25 }
 0xaf6   : > { %v10496_v62 = vpop.f32.mrf.mxu0 }
 0xaf7   : > { %v5904_v7 = vpack.c.bf16 %v10495_v0, %v10492_v3 }
 0xaf8   : > { %v10497_v43 = vpop.f32.mrf.mxu0 }
 0xaf9   : > { %11275 = vmatmul.mubr.msk.bf16.gmra.mxu1 %vm1417_vm1, %v5904_v7  ;;  %v10498_v24 = vadd.f32 %v10497_v43, %v10496_v62 }
 0xafa   : > { %v10499_v22 = vpop.f32.mrf.mxu0 }
 0xafc   : > { %v10500_v48 = vpop.f32.mrf.mxu0 }
 0xafd   : > { %v10501_v63 = vadd.f32 %v10500_v48, %v10499_v22 }
 0xafe   : > { %v10502_v14 = vpop.f32.mrf.mxu0 }
 0xaff   : > { %v5905_v19 = vpack.c.bf16 %v10501_v63, %v10498_v24 }
 0xb00   : > { %v10503_v20 = vpop.f32.mrf.mxu0 }
 0xb01   : > { %11278 = vmatprep.mubr.msk.bf16.mxu1 %vm1417_vm1, %v5905_v19  ;;  %v10504_v57 = vadd.f32 %v10503_v20, %v10502_v14 }
 0xb02   : > { %v10505_v32 = vpop.f32.mrf.mxu0 }
 0xb04   : > { %v10506_v38 = vpop.f32.mrf.mxu0 }
 0xb05   : > { %v10507_v23 = vadd.f32 %v10506_v38, %v10505_v32 }
 0xb06   : > { %v10508_v30 = vpop.f32.mrf.mxu0 }
 0xb07   : > { %v5906_v16 = vpack.c.bf16 %v10507_v23, %v10504_v57 }
 0xb08   : > { %v10509_v37 = vpop.f32.mrf.mxu0 }
 0xb09   : > { %11279 = vmatmul.mubr.msk.bf16.gmra.mxu1 %vm1417_vm1, %v5906_v16  ;;  %v10510_v61 = vadd.f32 %v10509_v37, %v10508_v30 }
 0xb0a   : > { %v10511_v6 = vpop.f32.mrf.mxu0 }
 0xb0c   : > { %v10512_v39 = vpop.f32.mrf.mxu0 }
 0xb0d   : > { %v10513_v25 = vadd.f32 %v10512_v39, %v10511_v6 }
 0xb0e   : > { %v10514_v21 = vpop.f32.mrf.mxu0 }
 0xb0f   : > { %v5907_v3 = vpack.c.bf16 %v10513_v25, %v10510_v61  ;;  %v9252_v61 = vld [vmem:[%s14388_s5 + $0x4] sm:$0xf] }
 0xb10   : > { %v10515_v0 = vpop.f32.mrf.mxu0  ;;  %11409 = vmatprep.subr.msk.bf16.mxu0 %vm6493_vm2, %v9252_v61  ;;  %v6495_v25 = vsel %vm6493_vm2, %v9252_v61, 0 }
 0xb11   : > { %11282 = vmatprep.mubr.msk.bf16.mxu1 %vm1417_vm1, %v5907_v3  ;;  %v10516_v43 = vadd.f32 %v10515_v0, %v10514_v21  ;;  %11291 = vmatpush3.bf16.msra.mxu0 %v6495_v25  ;;  %v13763_v0 = vld [vmem:[#allocation5] ss:$0 sm:$0xff] }
 0xb12   : > { %v10517_v62 = vpop.f32.mrf.mxu0 }
 0xb14   : > { %v10518_v7 = vpop.f32.mrf.mxu0 }
 0xb15   : > { %v10519_v22 = vadd.f32 %v10518_v7, %v10517_v62 }
 0xb16   : > { %v10520_v48 = vpop.f32.mrf.mxu0 }
 0xb17   : > { %v5908_v24 = vpack.c.bf16 %v10519_v22, %v10516_v43 }
 0xb18   : > { %v10521_v63 = vpop.f32.mrf.mxu0 }
 0xb19   : > { %11283 = vmatmul.mubr.msk.bf16.gmra.mxu1 %vm1417_vm1, %v5908_v24  ;;  %v10522_v20 = vadd.f32 %v10521_v63, %v10520_v48 }
 0xb1a   : > { %v10523_v14 = vpop.f32.mrf.mxu0 }
 0xb1c   : > { %v10524_v19 = vpop.f32.mrf.mxu0 }
 0xb1d   : > { %v10525_v32 = vadd.f32 %v10524_v19, %v10523_v14 }
 0xb1e   : > { %v10526_v38 = vpop.f32.mrf.mxu0 }
 0xb1f   : > { %v5909_v57 = vpack.c.bf16 %v10525_v32, %v10522_v20 }
 0xb20   : > { %v10527_v23 = vpop.f32.mrf.mxu0 }
 0xb21   : > { %11286 = vmatprep.mubr.msk.bf16.mxu1 %vm1417_vm1, %v5909_v57  ;;  %v10528_v37 = vadd.f32 %v10527_v23, %v10526_v38 }
 0xb22   : > { %v10529_v30 = vpop.f32.mrf.mxu0 }
 0xb24   : > { %v10530_v16 = vpop.f32.mrf.mxu0 }
 0xb25   : > { %v10531_v6 = vadd.f32 %v10530_v16, %v10529_v30 }
 0xb27   : > { %v5910_v39 = vpack.c.bf16 %v10531_v6, %v10528_v37  ;;  %v11999_v6 = vld [vmem:[#allocation7 + $0x4] ss:$8 sps:$4 sm:$0xff]  }
 0xb29   : > { %11287 = vmatmul.mubr.msk.bf16.gmra.mxu1 %vm1417_vm1, %v5910_v39 }
 0xb2a   : > { %6322 = vmatprep.mubr.bf16.mxu1 %v11999_v6 }
 0xb79   : > { %v11260_v21 = vpop.f32.mrf.mxu1 }
 0xb7a   : > { %v6125_v3 = vadd.f32 %v11260_v21, %v13654_v35 }
 0xb7b   : > { %v5996_v62 = vpop.f32.mrf.mxu1 }
 0xb7c   : > { %v13766_v7 = vadd.f32 %v5996_v62, %v13657_v55  ;;  %v6164_v22 = vadd.f32 %v13763_v0, %v6125_v3 }
 0xb7d   : > { %v11261_v43 = vpop.f32.mrf.mxu1 }
 0xb7e   : > { %v6126_v48 = vadd.f32 %v11261_v43, %v13660_v42  ;;  %v6196_v63 = vmax.f32 %v6164_v22, 0.0 }
 0xb7f   : > { %v13773_v20 = vpop.f32.mrf.mxu1 }
 0xb80   : > { %v6165_v24 = vadd.f32 %v13763_v0, %v6126_v48 }
 0xb82   : > { %v6197_v14 = vmax.f32 %v6165_v24, 0.0 }
 0xb84   : > { %v13771_v19 = vpack.c.bf16 %v6197_v14, %v6196_v63 }
 0xb86   : > { %14491 = vst [vmem:[#allocation81_spill] sm:$0xff] %v13771_v19  ;;  %v14504_v19 = vld [vmem:[#allocation68_spill] sm:$0xff] }
 0xb89   : > { %v11264_v35 = vpop.f32.mrf.mxu1 }
 0xb8a   : > { %v6129_v32 = vadd.f32 %v11264_v35, %v13665_v29 }
 0xb8b   : > { %v6012_v38 = vpop.f32.mrf.mxu1 }
 0xb8c   : > { %v13777_v55 = vadd.f32 %v6012_v38, %v13668_v45  ;;  %v6168_v23 = vadd.f32 %v13763_v0, %v6129_v32 }
 0xb8d   : > { %v11265_v57 = vpop.f32.mrf.mxu1 }
 0xb8e   : > { %v6130_v42 = vadd.f32 %v11265_v57, %v13671_v46  ;;  %v6200_v16 = vmax.f32 %v6168_v23, 0.0 }
 0xb8f   : > { %v13784_v61 = vpop.f32.mrf.mxu1 }
 0xb90   : > { %v6169_v30 = vadd.f32 %v13763_v0, %v6130_v42 }
 0xb92   : > { %v6201_v37 = vmax.f32 %v6169_v30, 0.0 }
 0xb94   : > { %v13782_v39 = vpack.c.bf16 %v6201_v37, %v6200_v16 }
 0xb99   : > { %v11268_v29 = vpop.f32.mrf.mxu1 }
 0xb9a   : > { %v6133_v25 = vadd.f32 %v11268_v29, %v13676_v1 }
 0xb9b   : > { %v13787_v45 = vpop.f32.mrf.mxu1 }
 0xb9c   : > { %v6172_v3 = vadd.f32 %v13763_v0, %v6133_v25 }
 0xb9d   : > { %v11269_v21 = vpop.f32.mrf.mxu1 }
 0xb9e   : > { %v6134_v46 = vadd.f32 %v11269_v21, %v13682_v13  ;;  %v6204_v43 = vmax.f32 %v6172_v3, 0.0 }
 0xb9f   : > { %v13794_v24 = vpop.f32.mrf.mxu1 }
 0xba0   : > { %v6173_v62 = vadd.f32 %v13763_v0, %v6134_v46 }
 0xba2   : > { %v6205_v22 = vmax.f32 %v6173_v62, 0.0 }
 0xba4   : > { %v13792_v48 = vpack.c.bf16 %v6205_v22, %v6204_v43 }
 0xba9   : > { %v11272_v63 = vpop.f32.mrf.mxu1 }
 0xbaa   : > { %v6137_v14 = vadd.f32 %v11272_v63, %v13687_v54 }
 0xbab   : > { %v13797_v35 = vpop.f32.mrf.mxu1 }
 0xbac   : > { %v6176_v32 = vadd.f32 %v13763_v0, %v6137_v14 }
 0xbad   : > { %v11273_v1 = vpop.f32.mrf.mxu1 }
 0xbae   : > { %v6138_v38 = vadd.f32 %v11273_v1, %v13693_v28  ;;  %v6208_v57 = vmax.f32 %v6176_v32, 0.0 }
 0xbaf   : > { %v13804_v30 = vpop.f32.mrf.mxu1 }
 0xbb0   : > { %v6177_v13 = vadd.f32 %v13763_v0, %v6138_v38 }
 0xbb2   : > { %v6209_v23 = vmax.f32 %v6177_v13, 0.0 }
 0xbb4   : > { %v13802_v42 = vpack.c.bf16 %v6209_v23, %v6208_v57 }
 0xbb9   : > { %v11276_v16 = vpop.f32.mrf.mxu1 }
 0xbba   : > { %v6141_v37 = vadd.f32 %v11276_v16, %v13698_v33 }
 0xbbb   : > { %v13807_v6 = vpop.f32.mrf.mxu1 }
 0xbbc   : > { %v6180_v29 = vadd.f32 %v13763_v0, %v6141_v37 }
 0xbbd   : > { %v11277_v54 = vpop.f32.mrf.mxu1 }
 0xbbe   : > { %v6142_v25 = vadd.f32 %v11277_v54, %v13704_v60  ;;  %v6212_v21 = vmax.f32 %v6180_v29, 0.0 }
 0xbbf   : > { %v13814_v62 = vpop.f32.mrf.mxu1 }
 0xbc0   : > { %v6181_v28 = vadd.f32 %v13763_v0, %v6142_v25 }
 0xbc2   : > { %v6213_v3 = vmax.f32 %v6181_v28, 0.0 }
 0xbc4   : > { %v13812_v46 = vpack.c.bf16 %v6213_v3, %v6212_v21  ;;  %v14492_v21 = vld [vmem:[#allocation45_spill] sm:$0xff] }
 0xbc5   : > { %v1832_v3 = vadd.f32 %v14492_v21, %v12988_v17 }
 0xbc9   : > { %v11280_v43 = vpop.f32.mrf.mxu1 }
 0xbca   : > { %v6145_v22 = vadd.f32 %v11280_v43, %v13709_v36 }
 0xbcb   : > { %v13817_v63 = vpop.f32.mrf.mxu1 }
 0xbcc   : > { %v6184_v14 = vadd.f32 %v13763_v0, %v6145_v22 }
 0xbcd   : > { %v11281_v33 = vpop.f32.mrf.mxu1 }
 0xbce   : > { %v6146_v1 = vadd.f32 %v11281_v33, %v13715_v4  ;;  %v6216_v32 = vmax.f32 %v6184_v14, 0.0  ;;  %v1768_v4 = vadd.f32 %v12950_v27, %v12948_v26  ;;  %v14494_v14 = vld [vmem:[#allocation43_spill] sm:$0xff] }
 0xbcf   : > { %v13824_v57 = vpop.f32.mrf.mxu1  ;;  %v14498_v27 = vld [vmem:[#allocation51_spill] sm:$0xff] }
 0xbd0   : > { %v6185_v60 = vadd.f32 %v13763_v0, %v6146_v1  ;;  %v2440_v28 = vadd.f32 %v13071_v2, %v1768_v4  ;;  %v14495_v1 = vld [vmem:[#allocation44_spill] sm:$0xff]  ;;  %v14501_v4 = vld [vmem:[#allocation38_spill] sm:$0xff] }
 0xbd2   : > { %v6217_v38 = vmax.f32 %v6185_v60, 0.0  ;;  %v1816_v60 = vadd.f32 %v14495_v1, %v14494_v14  ;;  %v14505_v1 = vld [vmem:[#allocation48_spill] sm:$0xff] }
 0xbd4   : > { %v13822_v13 = vpack.c.bf16 %v6217_v38, %v6216_v32  ;;  %v14496_v32 = vld [vmem:[#allocation52_spill] sm:$0xff] }
 0xbd5   : > { %v2456_v38 = vadd.f32 %v14496_v32, %v1832_v3 }
 0xbd9   : > { %v11284_v23 = vpop.f32.mrf.mxu1 }
 0xbda   : > { %v6149_v16 = vadd.f32 %v11284_v23, %v13720_v12  ;;  %v14493_v12 = vld [vmem:[#allocation56_spill] sm:$0xff] }
 0xbdb   : > { %v13827_v37 = vpop.f32.mrf.mxu1  ;;  %v3056_v33 = vadd.f32 %v14493_v12, %v2440_v28  ;;  %v14497_v23 = vld [vmem:[#allocation64_spill] sm:$0xff]  ;;  %v14503_v28 = vld [vmem:[#allocation59_spill] sm:$0xff] }
 0xbdc   : > { %v6188_v54 = vadd.f32 %v13763_v0, %v6149_v16  ;;  %v2452_v16 = vadd.f32 %v14498_v27, %v1816_v60  ;;  %v14507_v60 = vld [vmem:[#allocation76_spill] sm:$0xff]  ;;  %v14508_v27 = vld [vmem:[#allocation41_spill] sm:$0xff] }
 0xbdd   : > { %v11285_v36 = vpop.f32.mrf.mxu1  ;;  %v3672_v26 = vadd.f32 %v14497_v23, %v3056_v33  ;;  %v14506_v33 = vld [vmem:[#allocation67_spill] sm:$0xff] }
 0xbde   : > { %v6150_v29 = vadd.f32 %v11285_v36, %v13726_v9  ;;  %v6220_v43 = vmax.f32 %v6188_v54, 0.0  ;;  %v14499_v36 = vld [vmem:[#allocation60_spill] sm:$0xff]  ;;  %v3068_v12 = vadd.f32 %v14503_v28, %v2452_v16 }
 0xbdf   : > { %v3072_v2 = vadd.f32 %v14499_v36, %v2456_v38  ;;  %v14502_v54 = vld [vmem:[#allocation72_spill] sm:$0xff]  ;;  %v6095_v21 = vpop.f32.mrf.mxu1  ;;  %v14509_v36 = vld [vmem:[#allocation42_spill] sm:$0xff] }
 0xbe0   : > { %v6189_v25 = vadd.f32 %v13763_v0, %v6150_v29  ;;  %v14500_v29 = vld [vmem:[#allocation37_spill] sm:$0xff]  ;;  %v3684_v32 = vadd.f32 %v14506_v33, %v3068_v12  ;;  %v14513_v28 = vld [vmem:[#allocation36_spill] sm:$0xff] }
 0xbe1   : > { %v1752_v17 = vadd.f32 %v14501_v4, %v14500_v29  ;;  %v3688_v14 = vadd.f32 %v14504_v19, %v3072_v2  ;;  %v1800_v29 = vadd.f32 %v14509_v36, %v14508_v27  ;;  %v14511_v19 = vld [vmem:[#allocation75_spill] sm:$0xff]  ;;  %v14518_v27 = vld [vmem:[#allocation58_spill] sm:$0xff] }
 0xbe2   : > { %v6221_v22 = vmax.f32 %v6189_v25, 0.0  ;;  %v4288_v25 = vadd.f32 %v14502_v54, %v3672_v26  ;;  %v14510_v26 = vld [vmem:[#allocation55_spill] sm:$0xff]  ;;  %v4300_v2 = vadd.f32 %v14511_v19, %v3684_v32  ;;  %v14521_v19 = vld [vmem:[#allocation66_spill] sm:$0xff] }
 0xbe3   : > { %v2436_v3 = vadd.f32 %v14505_v1, %v1752_v17  ;;  %v4304_v23 = vadd.f32 %v14507_v60, %v3688_v14  ;;  %v14514_v14 = vld [vmem:[#allocation50_spill] sm:$0xff]  ;;  %v14516_v32 = vld [vmem:[#allocation39_spill] sm:$0xff] }
 0xbe4   : > { %v13841_v9 = vpack.c.bf16 %v6221_v22, %v6220_v43  ;;  %v4904_v43 = vadd.f32 %v13571_v56, %v4288_v25  ;;  %v14512_v25 = vld [vmem:[#allocation35_spill] sm:$0xff]  ;;  %v2448_v1 = vadd.f32 %v14514_v14, %v1800_v29 }
 0xbe5   : > { %v3052_v4 = vadd.f32 %v14510_v26, %v2436_v3  ;;  %v4920_v17 = vadd.f32 %v13615_v58, %v4304_v23  ;;  %v1736_v12 = vadd.f32 %v14513_v28, %v14512_v25  ;;  %v4916_v3 = vadd.f32 %v13604_v53, %v4300_v2  ;;  %v14519_v26 = vld [vmem:[#allocation71_spill] sm:$0xff] }
 0xbe6   : > { %v5520_v16 = vadd.f32 %v13695_v52, %v4904_v43  ;;  %v3064_v36 = vadd.f32 %v14518_v27, %v2448_v1  ;;  %v14526_v27 = vld [vmem:[#allocation80_spill] sm:$0xff] }
 0xbe7   : > { %v5536_v52 = vadd.f32 %v13739_v41, %v4920_v17 }
 0xbe8   : > { %v6136_v33 = vadd.f32 %v13804_v30, %v5520_v16  ;;  %v5532_v16 = vadd.f32 %v13728_v34, %v4916_v3  ;;  %v3680_v2 = vadd.f32 %v14521_v19, %v3064_v36  ;;  %v14532_v19 = vld [vmem:[#allocation78_spill] sm:$0xff] }
 0xbe9   : > { %v11288_v22 = vpop.f32.mrf.mxu1 }
 0xbea   : > { %v6153_v38 = vadd.f32 %v11288_v22, %v13731_v10  ;;  %v14515_v10 = vld [vmem:[#allocation63_spill] sm:$0xff]  ;;  %v6175_v25 = vadd.f32 %v13763_v0, %v6136_v33  ;;  %v6148_v28 = vadd.f32 %v6095_v21, %v5532_v16  ;;  %v14524_v21 = vld [vmem:[#allocation49_spill] sm:$0xff] }
 0xbeb   : > { %v6108_v54 = vpop.f32.mrf.mxu1  ;;  %v3668_v22 = vadd.f32 %v14515_v10, %v3052_v4  ;;  %v6135_v4 = vadd.f32 %v13797_v35, %v13690_v18  ;;  %v14522_v35 = vld [vmem:[#allocation54_spill] sm:$0xff]  ;;  %v14530_v16 = vld [vmem:[#allocation57_spill] sm:$0xff] }
 0xbec   : > { %v6151_v56 = vadd.f32 %v6108_v54, %v13734_v31  ;;  %v6192_v43 = vadd.f32 %v13763_v0, %v6153_v38  ;;  %v14517_v31 = vld [vmem:[#allocation40_spill] sm:$0xff]  ;;  %v14520_v54 = vld [vmem:[#allocation47_spill] sm:$0xff]  ;;  %v14523_v10 = vld [vmem:[#allocation74_spill] sm:$0xff] }
 0xbed   : > { %v11289_v60 = vpop.f32.mrf.mxu1  ;;  %v1784_v23 = vadd.f32 %v14517_v31, %v14516_v32  ;;  %v4284_v29 = vadd.f32 %v14519_v26, %v3668_v22  ;;  %v6207_v31 = vmax.f32 %v6175_v25, 0.0 }
 0xbee   : > { %v6154_v58 = vadd.f32 %v11289_v60, %v13737_v8  ;;  %v6190_v53 = vadd.f32 %v13763_v0, %v6151_v56  ;;  %v2432_v8 = vadd.f32 %v14520_v54, %v1736_v12  ;;  %v6224_v14 = vmax.f32 %v6192_v43, 0.0  ;;  %v14525_v43 = vld [vmem:[#allocation62_spill] sm:$0xff] }
 0xbef   : > { %v6111_v30 = vpop.f32.mrf.mxu1  ;;  %v4900_v17 = vadd.f32 %v13560_v11, %v4284_v29  ;;  %v4296_v56 = vadd.f32 %v14523_v10, %v3680_v2  ;;  %v6174_v60 = vadd.f32 %v13763_v0, %v6135_v4  ;;  %v6147_v12 = vadd.f32 %v13827_v37, %v13723_v47  ;;  %v14527_v47 = vld [vmem:[#allocation33_spill] sm:$0xff]  ;;  %v14528_v37 = vld [vmem:[#allocation34_spill] sm:$0xff] }
 0xbf0   : > { %v6193_v41 = vadd.f32 %v13763_v0, %v6154_v58  ;;  %v6152_v38 = vadd.f32 %v6111_v30, %v5536_v52  ;;  %v3048_v34 = vadd.f32 %v14522_v35, %v2432_v8  ;;  %v6222_v3 = vmax.f32 %v6190_v53, 0.0  ;;  %v14529_v4 = vld [vmem:[#allocation70_spill] sm:$0xff] }
 0xbf1   : > { %v5516_v22 = vadd.f32 %v13684_v15, %v4900_v17  ;;  %v2444_v52 = vadd.f32 %v14524_v21, %v1784_v23  ;;  %v4912_v36 = vadd.f32 %v14526_v27, %v4296_v56  ;;  %v6187_v15 = vadd.f32 %v13763_v0, %v6148_v28  ;;  %v14531_v54 = vld [vmem:[#allocation46_spill] sm:$0xff] }
 0xbf2   : > { %v6225_v1 = vmax.f32 %v6193_v41, 0.0  ;;  %v6191_v18 = vadd.f32 %v13763_v0, %v6152_v38  ;;  %v3664_v58 = vadd.f32 %v14525_v43, %v3048_v34  ;;  %v1720_v29 = vadd.f32 %v14528_v37, %v14527_v47  ;;  %v14535_v34 = vld [vmem:[#allocation73_spill] sm:$0xff] }
 0xbf3   : > { %v6132_v32 = vadd.f32 %v13794_v24, %v5516_v22  ;;  %v6131_v30 = vadd.f32 %v13787_v45, %v13679_v51  ;;  %v6206_v24 = vmax.f32 %v6174_v60, 0.0  ;;  %v3060_v53 = vadd.f32 %v14530_v16, %v2444_v52  ;;  %v14533_v51 = vld [vmem:[#allocation65_spill] sm:$0xff] }
 0xbf4   : > { %v13892_v11 = vpack.c.bf16 %v6225_v1, %v6224_v14  ;;  %v6223_v33 = vmax.f32 %v6191_v18, 0.0  ;;  %v4280_v23 = vadd.f32 %v14529_v4, %v3664_v58  ;;  %v5528_v41 = vadd.f32 %v13717_v5, %v4912_v36  ;;  %v14534_v1 = vld [vmem:[#allocation53_spill] sm:$0xff] }
 0xbf5   : > { %v6186_v38 = vadd.f32 %v13763_v0, %v6147_v12  ;;  %v2428_v8 = vadd.f32 %v14531_v54, %v1720_v29  ;;  %v6171_v17 = vadd.f32 %v13763_v0, %v6132_v32  ;;  %v13916_v25 = vpack.c.bf16 %v6207_v31, %v6206_v24  ;;  %v14536_v60 = vld [vmem:[#allocation61_spill] sm:$0xff] }
 0xbf6   : > { %v13899_v26 = vpack.c.bf16 %v6223_v33, %v6222_v3  ;;  %10549 = vmatprep.subr.bf16.mxu1 %v13892_v11  ;;  %10639 = vmatprep.subr.bf16.mxu0 %v13892_v11  ;;  %v4896_v2 = vadd.f32 %v14532_v19, %v4280_v23  ;;  %v3676_v45 = vadd.f32 %v14533_v51, %v3060_v53  ;;  %v6219_v14 = vmax.f32 %v6187_v15, 0.0  ;;  %v14537_v33 = vld [vmem:[#allocation79_spill] sm:$0xff]  ;;  %v14538_v43 = vld [vmem:[#allocation69_spill] sm:$0xff] }
 0xbf7   : > { %10550 = vmatpush3.bf16.msra.mxu1 %v13802_v42  ;;  %v6144_v28 = vadd.f32 %v13824_v57, %v5528_v41  ;;  %v3044_v18 = vadd.f32 %v14534_v1, %v2428_v8  ;;  %v6170_v35 = vadd.f32 %v13763_v0, %v6131_v30  ;;  %v6143_v56 = vadd.f32 %v13817_v63, %v13712_v59  ;;  %v14539_v31 = vld [vmem:[#allocation77_spill] sm:$0xff] }
 0xbf8   : > { %10551 = vmatprep.subr.bf16.mxu1 %v13899_v26  ;;  %v5512_v5 = vadd.f32 %v13673_v49, %v4896_v2  ;;  %v4292_v10 = vadd.f32 %v14535_v34, %v3676_v45  ;;  %v6218_v22 = vmax.f32 %v6186_v38, 0.0  ;;  %v6203_v3 = vmax.f32 %v6171_v17, 0.0  ;;  %v14540_v8 = vld [vmem:[#allocation81_spill] sm:$0xff]  ;;  %v12002_v17 = vld [vmem:[#allocation7 + $0x14] ss:$8 sps:$4 sm:$0xff]  }
 0xbf9   : > { %v3660_v12 = vadd.f32 %v14536_v60, %v3044_v18  ;;  %v6183_v49 = vadd.f32 %v13763_v0, %v6144_v28  ;;  %v6202_v32 = vmax.f32 %v6170_v35, 0.0  ;;  %v6182_v63 = vadd.f32 %v13763_v0, %v6143_v56  ;;  %v11997_v2 = vld [vmem:[#allocation7] ss:$8 sps:$4 sm:$0xff]   ;;  %v12008_v45 = vld [vmem:[#allocation7 + $0x34] ss:$8 sps:$4 sm:$0xff]  }
 0xbfa   : > { %v6128_v57 = vadd.f32 %v13784_v61, %v5512_v5  ;;  %v4908_v21 = vadd.f32 %v14537_v33, %v4292_v10  ;;  %v13932_v52 = vpack.c.bf16 %v6219_v14, %v6218_v22  ;;  %v6166_v29 = vadd.f32 %v13763_v0, %v13777_v55  ;;  %v12003_v51 = vld [vmem:[#allocation7 + $0x20] ss:$8 sps:$4 sm:$0xff]   ;;  %v12006_v28 = vld [vmem:[#allocation7 + $0x30] ss:$8 sps:$4 sm:$0xff]   ;;  %v12011_v14 = vld [vmem:[#allocation7 + $0x44] ss:$8 sps:$4 sm:$0xff]  }
 0xbfb   : > { %10552 = vmatpush3.bf16.msra.mxu1 %v13916_v25  ;;  %v4276_v58 = vadd.f32 %v14538_v43, %v3660_v12  ;;  %v13941_v36 = vpack.c.bf16 %v6203_v3, %v6202_v32  ;;  %v6215_v47 = vmax.f32 %v6183_v49, 0.0  ;;  %v6214_v4 = vmax.f32 %v6182_v63, 0.0  ;;  %v12009_v1 = vld [vmem:[#allocation7 + $0x40] ss:$8 sps:$4 sm:$0xff]   ;;  %v12014_v18 = vld [vmem:[#allocation7 + $0x54] ss:$8 sps:$4 sm:$0xff]  }
 0xbfc   : > { %10553 = vmatprep.subr.bf16.mxu1 %v13841_v9  ;;  %v5524_v59 = vadd.f32 %v13706_v50, %v4908_v21  ;;  %v6167_v27 = vadd.f32 %v13763_v0, %v6128_v57  ;;  %v6139_v50 = vadd.f32 %v13807_v6, %v13701_v40  ;;  %v6198_v16 = vmax.f32 %v6166_v29, 0.0  ;;  %v12012_v5 = vld [vmem:[#allocation7 + $0x50] ss:$8 sps:$4 sm:$0xff]   ;;  %v12017_v35 = vld [vmem:[#allocation7 + $0x64] ss:$8 sps:$4 sm:$0xff]  }
 0xbfd   : > { %v4892_v61 = vadd.f32 %v14539_v31, %v4276_v58  ;;  %v12015_v34 = vld [vmem:[#allocation7 + $0x60] ss:$8 sps:$4 sm:$0xff]   ;;  %v12020_v10 = vld [vmem:[#allocation7 + $0x74] ss:$8 sps:$4 sm:$0xff]   ;;  %v12018_v56 = vld [vmem:[#allocation7 + $0x70] ss:$8 sps:$4 sm:$0xff]  }
 0xbfe   : > { %v6140_v15 = vadd.f32 %v13814_v62, %v5524_v59  ;;  %v6199_v30 = vmax.f32 %v6167_v27, 0.0  ;;  %v13953_v62 = vpack.c.bf16 %v6215_v47, %v6214_v4  ;;  %v6355_v22 = vld [vmem:[%s14388_s5] sm:$0xf]  ;;  %v9269_v12 = vld [vmem:[%s14388_s5 + $0x8] sm:$0xf] }
 0xbff   : > { %10554 = vmatpush3.bf16.msra.mxu1 %v13792_v48  ;;  %v5508_v37 = vadd.f32 %v13662_v44, %v4892_v61  ;;  %v6178_v44 = vadd.f32 %v13763_v0, %v6139_v50  ;;  %v6575_v60 = vsel %vm6493_vm2, %v6355_v22, 0 }
 0xc00   : > { %10555 = vmatprep.subr.bf16.mxu1 %v13932_v52  ;;  %v6179_v24 = vadd.f32 %v13763_v0, %v6140_v15  ;;  %v13959_v40 = vpack.c.bf16 %v6199_v30, %v6198_v16 }
 0xc01   : > { %v6124_v23 = vadd.f32 %v13773_v20, %v5508_v37  ;;  %v6162_v20 = vadd.f32 %v13763_v0, %v13766_v7  ;;  %v6210_v53 = vmax.f32 %v6178_v44, 0.0  ;;  %v12005_v7 = vld [vmem:[#allocation7 + $0x24] ss:$8 sps:$4 sm:$0xff]   ;;  %v6775_v37 = vsel %vm6493_vm2, %v9269_v12, 0 }
 0xc02   : > { %v6211_v6 = vmax.f32 %v6179_v24, 0.0 }
 0xc03   : > { %10556 = vmatpush3.bf16.msra.mxu1 %v13941_v36  ;;  %v6163_v55 = vadd.f32 %v13763_v0, %v6124_v23  ;;  %v6194_v54 = vmax.f32 %v6162_v20, 0.0  ;;  %v12000_v0 = vld [vmem:[#allocation7 + $0x10] ss:$8 sps:$4 sm:$0xff]  }
 0xc04   : > { %10557 = vmatprep.subr.bf16.mxu1 %v13822_v13  ;;  %v13965_v38 = vpack.c.bf16 %v6211_v6, %v6210_v53 }
 0xc05   : > { %v6195_v41 = vmax.f32 %v6163_v55, 0.0 }
 0xc07   : > { %10558 = vmatpush3.bf16.msra.mxu1 %v13782_v39  ;;  %v13969_v19 = vpack.c.bf16 %v6195_v41, %v6194_v54 }
 0xc08   : > { %10559 = vmatprep.subr.bf16.mxu1 %v13953_v62 }
 0xc0b   : > { %10560 = vmatpush3.bf16.msra.mxu1 %v13959_v40 }
 0xc0c   : > { %10561 = vmatprep.subr.bf16.mxu1 %v13812_v46 }
 0xc0f   : > { %10562 = vmatpush3.bf16.msra.mxu1 %v14540_v8 }
 0xc10   : > { %10563 = vmatprep.subr.bf16.mxu1 %v13965_v38 }
 0xc13   : > { %10564 = vmatpush3.bf16.msra.mxu1 %v13969_v19 }
 0xc14   : > { %10589 = vmatprep.subr.bf16.mxu1 %v13892_v11 }
 0xc16   : > { %6323 = vmatmul.mubr.bf16.vlgmr.msra.gmra.mxu1 %v11997_v2 }
 0xc17   : > { %10590 = vmatpush3.bf16.msra.mxu1 %v13802_v42  ;;  %6330 = vmatprep.mubr.bf16.mxu1 %v12002_v17 }
 0xc18   : > { %10591 = vmatprep.subr.bf16.mxu1 %v13899_v26 }
 0xc1b   : > { %10592 = vmatpush3.bf16.msra.mxu1 %v13916_v25 }
 0xc1c   : > { %10593 = vmatprep.subr.bf16.mxu1 %v13841_v9 }
 0xc1e   : > { %6331 = vmatmul.mubr.bf16.gmra.mxu1 %v12000_v0 }
 0xc1f   : > { %10594 = vmatpush3.bf16.msra.mxu1 %v13792_v48  ;;  %6338 = vmatprep.mubr.bf16.mxu1 %v12005_v7 }
 0xc20   : > { %10595 = vmatprep.subr.bf16.mxu1 %v13932_v52 }
 0xc23   : > { %10596 = vmatpush3.bf16.msra.mxu1 %v13941_v36 }
 0xc24   : > { %10597 = vmatprep.subr.bf16.mxu1 %v13822_v13 }
 0xc26   : > { %6339 = vmatmul.mubr.bf16.gmra.mxu1 %v12003_v51 }
 0xc27   : > { %10598 = vmatpush3.bf16.msra.mxu1 %v13782_v39  ;;  %6346 = vmatprep.mubr.bf16.mxu1 %v12008_v45 }
 0xc28   : > { %10599 = vmatprep.subr.bf16.mxu1 %v13953_v62 }
 0xc2b   : > { %10600 = vmatpush3.bf16.msra.mxu1 %v13959_v40 }
 0xc2c   : > { %10601 = vmatprep.subr.bf16.mxu1 %v13812_v46 }
 0xc2e   : > { %6347 = vmatmul.mubr.bf16.gmra.mxu1 %v12006_v28 }
 0xc2f   : > { %10602 = vmatpush3.bf16.msra.mxu1 %v14540_v8  ;;  %6441 = vmatprep.mubr.bf16.mxu1 %v12011_v14 }
 0xc30   : > { %10603 = vmatprep.subr.bf16.mxu1 %v13965_v38 }
 0xc33   : > { %10604 = vmatpush3.bf16.msra.mxu1 %v13969_v19 }
 0xc34   : > { %11410 = vmatprep.subr.msk.bf16.mxu1 %vm6493_vm2, %v6355_v22 }
 0xc36   : > { %6442 = vmatmul.mubr.bf16.vlgmr.msra.gmra.mxu1 %v12009_v1 }
 0xc37   : > { %6449 = vmatprep.mubr.bf16.mxu1 %v12014_v18  ;;  %11301 = vmatpush3.bf16.msra.mxu1 %v6575_v60 }
 0xc38   : > { %11411 = vmatprep.subr.msk.bf16.mxu1 %vm6493_vm2, %v9269_v12 }
 0xc3e   : > { %6450 = vmatmul.mubr.bf16.gmra.mxu1 %v12012_v5 }
 0xc3f   : > { %6457 = vmatprep.mubr.bf16.mxu1 %v12017_v35 }
 0xc46   : > { %6458 = vmatmul.mubr.bf16.gmra.mxu1 %v12015_v34 }
 0xc47   : > { %6465 = vmatprep.mubr.bf16.mxu1 %v12020_v10 }
 0xc4e   : > { %6466 = vmatmul.mubr.bf16.gmra.mxu1 %v12018_v56 }
 0xcd6   : > { %v10565_v57 = vpop.f32.mrf.mxu1 }
 0xcd8   : > { %v10566_v3 = vpop.f32.mrf.mxu1 }
 0xcd9   : > { %v10567_v49 = vadd.f32 %v10566_v3, %v10565_v57 }
 0xcda   : > { %v10568_v33 = vpop.f32.mrf.mxu1 }
 0xcdc   : > { %v10569_v21 = vpop.f32.mrf.mxu1 }
 0xcdd   : > { %v10570_v43 = vadd.f32 %v10569_v21, %v10568_v33 }
 0xcde   : > { %v10571_v58 = vpop.f32.mrf.mxu1 }
 0xcdf   : > { %v6356_v32 = vpack.c.bf16 %v10570_v43, %v10567_v49 }
 0xce0   : > { %v10572_v59 = vpop.f32.mrf.mxu1 }
 0xce1   : > { %11302 = vmatprep.mubr.msk.bf16.mxu1 %vm6480_vm3, %v6356_v32  ;;  %v10573_v61 = vadd.f32 %v10572_v59, %v10571_v58  ;;  %v12023_v59 = vld [vmem:[#allocation7 + $0x84] ss:$8 sps:$4 sm:$0xff]  }
 0xce2   : > { %v10574_v63 = vpop.f32.mrf.mxu1 }
 0xce4   : > { %v10575_v31 = vpop.f32.mrf.mxu1 }
 0xce5   : > { %v10576_v27 = vadd.f32 %v10575_v31, %v10574_v63  ;;  %v12021_v31 = vld [vmem:[#allocation7 + $0x80] ss:$8 sps:$4 sm:$0xff]  }
 0xce6   : > { %v10577_v15 = vpop.f32.mrf.mxu1 }
 0xce7   : > { %v6357_v47 = vpack.c.bf16 %v10576_v27, %v10573_v61  ;;  %v12026_v61 = vld [vmem:[#allocation7 + $0x94] ss:$8 sps:$4 sm:$0xff]   ;;  %v12024_v27 = vld [vmem:[#allocation7 + $0x90] ss:$8 sps:$4 sm:$0xff]  }
 0xce8   : > { %v10578_v29 = vpop.f32.mrf.mxu1 }
 0xce9   : > { %11303 = vmatmul.mubr.msk.bf16.vlgmr.msra.gmra.mxu1 %vm6480_vm3, %v6357_v47  ;;  %v10579_v23 = vadd.f32 %v10578_v29, %v10577_v15  ;;  %v12029_v15 = vld [vmem:[#allocation7 + $0xa4] ss:$8 sps:$4 sm:$0xff]   ;;  %v12027_v47 = vld [vmem:[#allocation7 + $0xa0] ss:$8 sps:$4 sm:$0xff]   ;;  %v12030_v29 = vld [vmem:[#allocation7 + $0xb0] ss:$8 sps:$4 sm:$0xff]  }
 0xcea   : > { %11311 = vmatpush3.bf16.msra.mxu1 %v6775_v37  ;;  %v10580_v50 = vpop.f32.mrf.mxu1  ;;  %v12032_v37 = vld [vmem:[#allocation7 + $0xb4] ss:$8 sps:$4 sm:$0xff]  }
 0xceb   : > { %10684 = vmatprep.subr.bf16.mxu1 %v13892_v11 }
 0xcec   : > { %v10581_v4 = vpop.f32.mrf.mxu1 }
 0xced   : > { %v10582_v30 = vadd.f32 %v10581_v4, %v10580_v50 }
 0xcee   : > { %v10583_v24 = vpop.f32.mrf.mxu1 }
 0xcef   : > { %v6358_v16 = vpack.c.bf16 %v10582_v30, %v10579_v23 }
 0xcf0   : > { %v10584_v44 = vpop.f32.mrf.mxu1 }
 0xcf1   : > { %11306 = vmatprep.mubr.msk.bf16.mxu1 %vm6480_vm3, %v6358_v16  ;;  %v10585_v20 = vadd.f32 %v10584_v44, %v10583_v24 }
 0xcf2   : > { %v10586_v55 = vpop.f32.mrf.mxu1 }
 0xcf4   : > { %v10587_v6 = vpop.f32.mrf.mxu1 }
 0xcf5   : > { %v10588_v53 = vadd.f32 %v10587_v6, %v10586_v55 }
 0xcf6   : > { %v10605_v41 = vpop.f32.mrf.mxu1 }
 0xcf7   : > { %v6359_v54 = vpack.c.bf16 %v10588_v53, %v10585_v20 }
 0xcf8   : > { %v10606_v2 = vpop.f32.mrf.mxu1 }
 0xcf9   : > { %11307 = vmatmul.mubr.msk.bf16.gmra.mxu1 %vm6480_vm3, %v6359_v54  ;;  %v10607_v7 = vadd.f32 %v10606_v2, %v10605_v41 }
 0xcfa   : > { %v10608_v17 = vpop.f32.mrf.mxu1 }
 0xcfc   : > { %v10609_v0 = vpop.f32.mrf.mxu1 }
 0xcfd   : > { %v10610_v51 = vadd.f32 %v10609_v0, %v10608_v17 }
 0xcfe   : > { %v10611_v45 = vpop.f32.mrf.mxu1 }
 0xcff   : > { %v6476_v28 = vpack.c.bf16 %v10610_v51, %v10607_v7 }
 0xd00   : > { %v10612_v14 = vpop.f32.mrf.mxu1 }
 0xd01   : > { %11292 = vmatprep.mubr.msk.bf16.mxu0 %vm6480_vm3, %v6476_v28  ;;  %v10613_v5 = vadd.f32 %v10612_v14, %v10611_v45 }
 0xd02   : > { %v10614_v1 = vpop.f32.mrf.mxu1 }
 0xd04   : > { %v10615_v18 = vpop.f32.mrf.mxu1 }
 0xd05   : > { %v10616_v35 = vadd.f32 %v10615_v18, %v10614_v1 }
 0xd06   : > { %v10617_v34 = vpop.f32.mrf.mxu1 }
 0xd07   : > { %v6477_v10 = vpack.c.bf16 %v10616_v35, %v10613_v5 }
 0xd08   : > { %v10618_v56 = vpop.f32.mrf.mxu1 }
 0xd09   : > { %11293 = vmatmul.mubr.msk.bf16.vlgmr.msra.gmra.mxu0 %vm6480_vm3, %v6477_v10  ;;  %v10619_v60 = vadd.f32 %v10618_v56, %v10617_v34 }
 0xd0a   : > { %10640 = vmatpush3.bf16.msra.mxu0 %v13802_v42  ;;  %v10620_v22 = vpop.f32.mrf.mxu1 }
 0xd0b   : > { %10641 = vmatprep.subr.bf16.mxu0 %v13899_v26 }
 0xd0c   : > { %v10621_v12 = vpop.f32.mrf.mxu1 }
 0xd0d   : > { %v10622_v57 = vadd.f32 %v10621_v12, %v10620_v22 }
 0xd0e   : > { %10642 = vmatpush3.bf16.msra.mxu0 %v13916_v25  ;;  %v10623_v3 = vpop.f32.mrf.mxu1 }
 0xd0f   : > { %v6478_v33 = vpack.c.bf16 %v10622_v57, %v10619_v60  ;;  %10643 = vmatprep.subr.bf16.mxu0 %v13841_v9 }
 0xd10   : > { %v10624_v21 = vpop.f32.mrf.mxu1 }
 0xd11   : > { %11296 = vmatprep.mubr.msk.bf16.mxu0 %vm6480_vm3, %v6478_v33  ;;  %v10625_v43 = vadd.f32 %v10624_v21, %v10623_v3 }
 0xd12   : > { %10644 = vmatpush3.bf16.msra.mxu0 %v13792_v48  ;;  %v10626_v49 = vpop.f32.mrf.mxu1 }
 0xd13   : > { %10645 = vmatprep.subr.bf16.mxu0 %v13932_v52 }
 0xd14   : > { %v10627_v58 = vpop.f32.mrf.mxu1 }
 0xd15   : > { %v10628_v32 = vadd.f32 %v10627_v58, %v10626_v49 }
 0xd16   : > { %10646 = vmatpush3.bf16.msra.mxu0 %v13941_v36 }
 0xd17   : > { %v6479_v63 = vpack.c.bf16 %v10628_v32, %v10625_v43  ;;  %10647 = vmatprep.subr.bf16.mxu0 %v13822_v13 }
 0xd19   : > { %11297 = vmatmul.mubr.msk.bf16.gmra.mxu0 %vm6480_vm3, %v6479_v63 }
 0xd1a   : > { %10648 = vmatpush3.bf16.msra.mxu0 %v13782_v39  ;;  %6723 = vmatprep.mubr.bf16.mxu0 %v12023_v59 }
 0xd1b   : > { %10649 = vmatprep.subr.bf16.mxu0 %v13953_v62 }
 0xd1e   : > { %10650 = vmatpush3.bf16.msra.mxu0 %v13959_v40 }
 0xd1f   : > { %10651 = vmatprep.subr.bf16.mxu0 %v13812_v46 }
 0xd22   : > { %10652 = vmatpush3.bf16.msra.mxu0 %v14540_v8 }
 0xd23   : > { %10653 = vmatprep.subr.bf16.mxu0 %v13965_v38 }
 0xd26   : > { %10654 = vmatpush3.bf16.msra.mxu0 %v13969_v19 }
 0xd29   : > { %6724 = vmatmul.mubr.bf16.vlgmr.msra.gmra.mxu0 %v12021_v31 }
 0xd2a   : > { %6731 = vmatprep.mubr.bf16.mxu0 %v12026_v61 }
 0xd31   : > { %6732 = vmatmul.mubr.bf16.gmra.mxu0 %v12024_v27 }
 0xd32   : > { %6739 = vmatprep.mubr.bf16.mxu0 %v12029_v15 }
 0xd39   : > { %6740 = vmatmul.mubr.bf16.gmra.mxu0 %v12027_v47 }
 0xd3a   : > { %6747 = vmatprep.mubr.bf16.mxu0 %v12032_v37 }
 0xd41   : > { %6748 = vmatmul.mubr.bf16.gmra.mxu0 %v12030_v29 }
 0xda9   : > { %v11304_v50 = vpop.f32.mrf.mxu1 }
 0xdab   : > { %v6611_v4 = vpop.f32.mrf.mxu1 }
 0xdad   : > { %v11305_v24 = vpop.f32.mrf.mxu1 }
 0xdaf   : > { %v6614_v20 = vpop.f32.mrf.mxu1 }
 0xdb9   : > { %v11308_v54 = vpop.f32.mrf.mxu1 }
 0xdbb   : > { %v6627_v2 = vpop.f32.mrf.mxu1 }
 0xdbd   : > { %v11309_v45 = vpop.f32.mrf.mxu1 }
 0xdc9   : > { %v11294_v23 = vpop.f32.mrf.mxu0 }
 0xdca   : > { %v14022_v30 = vadd.f32 %v11304_v50, %v11294_v23 }
 0xdcb   : > { %v6531_v16 = vpop.f32.mrf.mxu0 }
 0xdcc   : > { %v14024_v44 = vadd.f32 %v6611_v4, %v6531_v16  ;;  %v12035_v4 = vld [vmem:[#allocation7 + $0xc4] ss:$8 sps:$4 sm:$0xff]   ;;  %v12038_v16 = vld [vmem:[#allocation7 + $0xd4] ss:$8 sps:$4 sm:$0xff]  }
 0xdcd   : > { %v11295_v55 = vpop.f32.mrf.mxu0 }
 0xdce   : > { %v14026_v6 = vadd.f32 %v11305_v24, %v11295_v55  ;;  %v12033_v24 = vld [vmem:[#allocation7 + $0xc0] ss:$8 sps:$4 sm:$0xff]   ;;  %v12036_v55 = vld [vmem:[#allocation7 + $0xd0] ss:$8 sps:$4 sm:$0xff]  }
 0xdcf   : > { %v6534_v53 = vpop.f32.mrf.mxu0 }
 0xdd0   : > { %v14028_v41 = vadd.f32 %v6614_v20, %v6534_v53  ;;  %v12041_v20 = vld [vmem:[#allocation7 + $0xe4] ss:$8 sps:$4 sm:$0xff]   ;;  %v12039_v53 = vld [vmem:[#allocation7 + $0xe0] ss:$8 sps:$4 sm:$0xff]  }
 0xdd9   : > { %v11298_v17 = vpop.f32.mrf.mxu0 }
 0xdda   : > { %v14030_v0 = vadd.f32 %v11308_v54, %v11298_v17  ;;  %v12044_v54 = vld [vmem:[#allocation7 + $0xf4] ss:$8 sps:$4 sm:$0xff]   ;;  %v12047_v17 = vld [vmem:[#allocation7 + $0x104] ss:$8 sps:$4 sm:$0xff]  }
 0xddb   : > { %v6547_v7 = vpop.f32.mrf.mxu0 }
 0xddc   : > { %v14032_v51 = vadd.f32 %v6627_v2, %v6547_v7  ;;  %v12042_v2 = vld [vmem:[#allocation7 + $0xf0] ss:$8 sps:$4 sm:$0xff]   ;;  %v12045_v7 = vld [vmem:[#allocation7 + $0x100] ss:$8 sps:$4 sm:$0xff]  }
 0xddd   : > { %v11299_v28 = vpop.f32.mrf.mxu0 }
 0xdde   : > { %v14034_v14 = vadd.f32 %v11309_v45, %v11299_v28  ;;  %v12050_v45 = vld [vmem:[#allocation7 + $0x114] ss:$8 sps:$4 sm:$0xff]   ;;  %v12048_v28 = vld [vmem:[#allocation7 + $0x110] ss:$8 sps:$4 sm:$0xff]  }
 0xddf   : > { %v14036_v1 = vpop.f32.mrf.mxu0 }
 0xde9   : > { %v10655_v18 = vpop.f32.mrf.mxu0 }
 0xdeb   : > { %v10656_v5 = vpop.f32.mrf.mxu0 }
 0xdec   : > { %v10657_v10 = vadd.f32 %v10656_v5, %v10655_v18  ;;  %v12053_v18 = vld [vmem:[#allocation7 + $0x124] ss:$8 sps:$4 sm:$0xff]   ;;  %v12051_v5 = vld [vmem:[#allocation7 + $0x120] ss:$8 sps:$4 sm:$0xff]  }
 0xded   : > { %v10658_v35 = vpop.f32.mrf.mxu0 }
 0xdef   : > { %v10659_v34 = vpop.f32.mrf.mxu0 }
 0xdf0   : > { %v10660_v56 = vadd.f32 %v10659_v34, %v10658_v35  ;;  %v12056_v35 = vld [vmem:[#allocation7 + $0x134] ss:$8 sps:$4 sm:$0xff]   ;;  %v12054_v34 = vld [vmem:[#allocation7 + $0x130] ss:$8 sps:$4 sm:$0xff]  }
 0xdf1   : > { %v10661_v22 = vpop.f32.mrf.mxu0 }
 0xdf2   : > { %v6758_v60 = vpack.c.bf16 %v10660_v56, %v10657_v10  ;;  %v9282_v10 = vld [vmem:[%s14388_s5 + $0xc] sm:$0xf] }
 0xdf3   : > { %v10662_v12 = vpop.f32.mrf.mxu0  ;;  %11412 = vmatprep.subr.msk.bf16.mxu0 %vm6493_vm2, %v9282_v10  ;;  %v6983_v56 = vsel %vm6493_vm2, %v9282_v10, 0 }
 0xdf4   : > { %11312 = vmatprep.mubr.msk.bf16.mxu1 %vm6480_vm3, %v6758_v60  ;;  %v10663_v33 = vadd.f32 %v10662_v12, %v10661_v22  ;;  %11321 = vmatpush3.bf16.msra.mxu0 %v6983_v56  ;;  %v9295_v22 = vld [vmem:[%s14388_s5 + $0x10] sm:$0xf]  ;;  %v6630_v60 = vpop.f32.mrf.mxu1 }
 0xdf5   : > { %v10664_v57 = vpop.f32.mrf.mxu0  ;;  %11413 = vmatprep.subr.msk.bf16.mxu0 %vm6493_vm2, %v9295_v22 }
 0xdf7   : > { %v10665_v3 = vpop.f32.mrf.mxu0 }
 0xdf8   : > { %v10666_v21 = vadd.f32 %v10665_v3, %v10664_v57 }
 0xdf9   : > { %v10667_v49 = vpop.f32.mrf.mxu0 }
 0xdfa   : > { %v6759_v43 = vpack.c.bf16 %v10666_v21, %v10663_v33 }
 0xdfb   : > { %v10668_v58 = vpop.f32.mrf.mxu0 }
 0xdfc   : > { %11313 = vmatmul.mubr.msk.bf16.vlgmr.msra.gmra.mxu1 %vm6480_vm3, %v6759_v43  ;;  %v10669_v59 = vadd.f32 %v10668_v58, %v10667_v49 }
 0xdfd   : > { %10685 = vmatpush3.bf16.msra.mxu1 %v13802_v42  ;;  %v10670_v32 = vpop.f32.mrf.mxu0 }
 0xdfe   : > { %10686 = vmatprep.subr.bf16.mxu1 %v13899_v26 }
 0xdff   : > { %v10671_v63 = vpop.f32.mrf.mxu0 }
 0xe00   : > { %v10672_v31 = vadd.f32 %v10671_v63, %v10670_v32 }
 0xe01   : > { %10687 = vmatpush3.bf16.msra.mxu1 %v13916_v25  ;;  %v10673_v61 = vpop.f32.mrf.mxu0 }
 0xe02   : > { %v6760_v27 = vpack.c.bf16 %v10672_v31, %v10669_v59  ;;  %10688 = vmatprep.subr.bf16.mxu1 %v13841_v9 }
 0xe03   : > { %v10674_v15 = vpop.f32.mrf.mxu0 }
 0xe04   : > { %11316 = vmatprep.mubr.msk.bf16.mxu1 %vm6480_vm3, %v6760_v27  ;;  %v10675_v37 = vadd.f32 %v10674_v15, %v10673_v61 }
 0xe05   : > { %10689 = vmatpush3.bf16.msra.mxu1 %v13792_v48  ;;  %v10676_v47 = vpop.f32.mrf.mxu0 }
 0xe06   : > { %10690 = vmatprep.subr.bf16.mxu1 %v13932_v52 }
 0xe07   : > { %v10677_v29 = vpop.f32.mrf.mxu0 }
 0xe08   : > { %v10678_v50 = vadd.f32 %v10677_v29, %v10676_v47 }
 0xe09   : > { %10691 = vmatpush3.bf16.msra.mxu1 %v13941_v36 }
 0xe0a   : > { %v6761_v23 = vpack.c.bf16 %v10678_v50, %v10675_v37  ;;  %10692 = vmatprep.subr.bf16.mxu1 %v13822_v13 }
 0xe0c   : > { %11317 = vmatmul.mubr.msk.bf16.gmra.mxu1 %vm6480_vm3, %v6761_v23 }
 0xe0d   : > { %10693 = vmatpush3.bf16.msra.mxu1 %v13782_v39  ;;  %6931 = vmatprep.mubr.bf16.mxu1 %v12035_v4 }
 0xe0e   : > { %10694 = vmatprep.subr.bf16.mxu1 %v13953_v62 }
 0xe11   : > { %10695 = vmatpush3.bf16.msra.mxu1 %v13959_v40 }
 0xe12   : > { %10696 = vmatprep.subr.bf16.mxu1 %v13812_v46 }
 0xe15   : > { %10697 = vmatpush3.bf16.msra.mxu1 %v14540_v8 }
 0xe16   : > { %10698 = vmatprep.subr.bf16.mxu1 %v13965_v38 }
 0xe19   : > { %10699 = vmatpush3.bf16.msra.mxu1 %v13969_v19 }
 0xe1a   : > { %10729 = vmatprep.subr.bf16.mxu1 %v13892_v11 }
 0xe1c   : > { %6932 = vmatmul.mubr.bf16.vlgmr.msra.gmra.mxu1 %v12033_v24 }
 0xe1d   : > { %10730 = vmatpush3.bf16.msra.mxu1 %v13802_v42  ;;  %6939 = vmatprep.mubr.bf16.mxu1 %v12038_v16 }
 0xe1e   : > { %10731 = vmatprep.subr.bf16.mxu1 %v13899_v26 }
 0xe21   : > { %10732 = vmatpush3.bf16.msra.mxu1 %v13916_v25 }
 0xe22   : > { %10733 = vmatprep.subr.bf16.mxu1 %v13841_v9 }
 0xe24   : > { %6940 = vmatmul.mubr.bf16.gmra.mxu1 %v12036_v55 }
 0xe25   : > { %10734 = vmatpush3.bf16.msra.mxu1 %v13792_v48  ;;  %6947 = vmatprep.mubr.bf16.mxu1 %v12041_v20  ;;  %v7191_v20 = vsel %vm6493_vm2, %v9295_v22, 0 }
 0xe26   : > { %10735 = vmatprep.subr.bf16.mxu1 %v13932_v52 }
 0xe29   : > { %10736 = vmatpush3.bf16.msra.mxu1 %v13941_v36 }
 0xe2a   : > { %10737 = vmatprep.subr.bf16.mxu1 %v13822_v13 }
 0xe2c   : > { %6948 = vmatmul.mubr.bf16.gmra.mxu1 %v12039_v53 }
 0xe2d   : > { %10738 = vmatpush3.bf16.msra.mxu1 %v13782_v39  ;;  %6955 = vmatprep.mubr.bf16.mxu1 %v12044_v54 }
 0xe2e   : > { %10739 = vmatprep.subr.bf16.mxu1 %v13953_v62 }
 0xe31   : > { %10740 = vmatpush3.bf16.msra.mxu1 %v13959_v40 }
 0xe32   : > { %10741 = vmatprep.subr.bf16.mxu1 %v13812_v46 }
 0xe34   : > { %6956 = vmatmul.mubr.bf16.gmra.mxu1 %v12042_v2 }
 0xe35   : > { %10742 = vmatpush3.bf16.msra.mxu1 %v14540_v8  ;;  %7139 = vmatprep.mubr.bf16.mxu1 %v12047_v17 }
 0xe36   : > { %10743 = vmatprep.subr.bf16.mxu1 %v13965_v38 }
 0xe39   : > { %10744 = vmatpush3.bf16.msra.mxu1 %v13969_v19 }
 0xe3c   : > { %7140 = vmatmul.mubr.bf16.vlgmr.msra.gmra.mxu1 %v12045_v7 }
 0xe3d   : > { %7147 = vmatprep.mubr.bf16.mxu1 %v12050_v45 }
 0xe44   : > { %7148 = vmatmul.mubr.bf16.gmra.mxu1 %v12048_v28 }
 0xe45   : > { %7155 = vmatprep.mubr.bf16.mxu1 %v12053_v18 }
 0xe4c   : > { %7156 = vmatmul.mubr.bf16.gmra.mxu1 %v12051_v5 }
 0xe4d   : > { %7163 = vmatprep.mubr.bf16.mxu1 %v12056_v35 }
 0xe54   : > { %7164 = vmatmul.mubr.bf16.gmra.mxu1 %v12054_v34 }
 0xebc   : > { %v11314_v12 = vpop.f32.mrf.mxu1 }
 0xebd   : > { %v14083_v57 = vadd.f32 %v11314_v12, %v14022_v30 }
 0xebe   : > { %v6811_v3 = vpop.f32.mrf.mxu1 }
 0xebf   : > { %v14086_v33 = vadd.f32 %v6811_v3, %v14024_v44  ;;  %v6631_v44 = vadd.f32 %v6630_v60, %v14036_v1 }
 0xec0   : > { %v11315_v21 = vpop.f32.mrf.mxu1 }
 0xec1   : > { %v14089_v49 = vadd.f32 %v11315_v21, %v14026_v6 }
 0xec2   : > { %v6814_v43 = vpop.f32.mrf.mxu1 }
 0xec3   : > { %v14092_v58 = vadd.f32 %v6814_v43, %v14028_v41 }
 0xecc   : > { %v11318_v32 = vpop.f32.mrf.mxu1 }
 0xecd   : > { %v14095_v59 = vadd.f32 %v11318_v32, %v14030_v0 }
 0xece   : > { %v6827_v63 = vpop.f32.mrf.mxu1 }
 0xecf   : > { %v14098_v30 = vadd.f32 %v6827_v63, %v14032_v51 }
 0xed0   : > { %v11319_v31 = vpop.f32.mrf.mxu1 }
 0xed1   : > { %v14102_v61 = vadd.f32 %v11319_v31, %v14034_v14 }
 0xed2   : > { %v6830_v6 = vpop.f32.mrf.mxu1 }
 0xed3   : > { %v14104_v27 = vadd.f32 %v6830_v6, %v6631_v44 }
 0xedc   : > { %v10700_v15 = vpop.f32.mrf.mxu1 }
 0xede   : > { %v10701_v41 = vpop.f32.mrf.mxu1 }
 0xedf   : > { %v10702_v29 = vadd.f32 %v10701_v41, %v10700_v15 }
 0xee0   : > { %v10703_v47 = vpop.f32.mrf.mxu1 }
 0xee2   : > { %v10704_v37 = vpop.f32.mrf.mxu1 }
 0xee3   : > { %v10705_v0 = vadd.f32 %v10704_v37, %v10703_v47 }
 0xee4   : > { %v10706_v50 = vpop.f32.mrf.mxu1 }
 0xee5   : > { %v6966_v4 = vpack.c.bf16 %v10705_v0, %v10702_v29 }
 0xee6   : > { %v10707_v23 = vpop.f32.mrf.mxu1 }
 0xee7   : > { %11322 = vmatprep.mubr.msk.bf16.mxu0 %vm6480_vm3, %v6966_v4  ;;  %v10708_v1 = vadd.f32 %v10707_v23, %v10706_v50 }
 0xee8   : > { %v10709_v51 = vpop.f32.mrf.mxu1 }
 0xeea   : > { %v10710_v24 = vpop.f32.mrf.mxu1 }
 0xeeb   : > { %v10711_v16 = vadd.f32 %v10710_v24, %v10709_v51 }
 0xeec   : > { %v10712_v14 = vpop.f32.mrf.mxu1 }
 0xeed   : > { %v6967_v55 = vpack.c.bf16 %v10711_v16, %v10708_v1 }
 0xeee   : > { %v10713_v53 = vpop.f32.mrf.mxu1 }
 0xeef   : > { %11323 = vmatmul.mubr.msk.bf16.vlgmr.msra.gmra.mxu0 %vm6480_vm3, %v6967_v55  ;;  %v10714_v17 = vadd.f32 %v10713_v53, %v10712_v14  ;;  %v12059_v53 = vld [vmem:[#allocation7 + $0x144] ss:$8 sps:$4 sm:$0xff]  }
 0xef0   : > { %11331 = vmatpush3.bf16.msra.mxu0 %v7191_v20  ;;  %v10715_v54 = vpop.f32.mrf.mxu1 }
 0xef1   : > { %10774 = vmatprep.subr.bf16.mxu0 %v13892_v11 }
 0xef2   : > { %v10716_v2 = vpop.f32.mrf.mxu1 }
 0xef3   : > { %v10717_v7 = vadd.f32 %v10716_v2, %v10715_v54  ;;  %v12057_v2 = vld [vmem:[#allocation7 + $0x140] ss:$8 sps:$4 sm:$0xff]  }
 0xef4   : > { %v10718_v45 = vpop.f32.mrf.mxu1 }
 0xef5   : > { %v6968_v28 = vpack.c.bf16 %v10717_v7, %v10714_v17  ;;  %v12062_v17 = vld [vmem:[#allocation7 + $0x154] ss:$8 sps:$4 sm:$0xff]   ;;  %v12060_v7 = vld [vmem:[#allocation7 + $0x150] ss:$8 sps:$4 sm:$0xff]  }
 0xef6   : > { %v10719_v18 = vpop.f32.mrf.mxu1 }
 0xef7   : > { %11326 = vmatprep.mubr.msk.bf16.mxu0 %vm6480_vm3, %v6968_v28  ;;  %v10720_v34 = vadd.f32 %v10719_v18, %v10718_v45  ;;  %v12065_v45 = vld [vmem:[#allocation7 + $0x164] ss:$8 sps:$4 sm:$0xff]   ;;  %v12063_v28 = vld [vmem:[#allocation7 + $0x160] ss:$8 sps:$4 sm:$0xff]   ;;  %v12068_v18 = vld [vmem:[#allocation7 + $0x174] ss:$8 sps:$4 sm:$0xff]  }
 0xef8   : > { %v10721_v5 = vpop.f32.mrf.mxu1 }
 0xefa   : > { %v10722_v35 = vpop.f32.mrf.mxu1 }
 0xefb   : > { %v10723_v10 = vadd.f32 %v10722_v35, %v10721_v5  ;;  %v12066_v5 = vld [vmem:[#allocation7 + $0x170] ss:$8 sps:$4 sm:$0xff]   ;;  %v12071_v35 = vld [vmem:[#allocation7 + $0x184] ss:$8 sps:$4 sm:$0xff]  }
 0xefc   : > { %v10745_v56 = vpop.f32.mrf.mxu1 }
 0xefd   : > { %v6969_v22 = vpack.c.bf16 %v10723_v10, %v10720_v34  ;;  %v12069_v34 = vld [vmem:[#allocation7 + $0x180] ss:$8 sps:$4 sm:$0xff]   ;;  %v12074_v10 = vld [vmem:[#allocation7 + $0x194] ss:$8 sps:$4 sm:$0xff]  }
 0xefe   : > { %v10746_v60 = vpop.f32.mrf.mxu1 }
 0xeff   : > { %11327 = vmatmul.mubr.msk.bf16.gmra.mxu0 %vm6480_vm3, %v6969_v22  ;;  %v10747_v21 = vadd.f32 %v10746_v60, %v10745_v56  ;;  %v12072_v56 = vld [vmem:[#allocation7 + $0x190] ss:$8 sps:$4 sm:$0xff]   ;;  %v12077_v22 = vld [vmem:[#allocation7 + $0x1a4] ss:$8 sps:$4 sm:$0xff]   ;;  %v12075_v60 = vld [vmem:[#allocation7 + $0x1a0] ss:$8 sps:$4 sm:$0xff]  }
 0xf00   : > { %v10748_v12 = vpop.f32.mrf.mxu1 }
 0xf02   : > { %v10749_v3 = vpop.f32.mrf.mxu1 }
 0xf03   : > { %v10750_v43 = vadd.f32 %v10749_v3, %v10748_v12  ;;  %v12080_v12 = vld [vmem:[#allocation7 + $0x1b4] ss:$8 sps:$4 sm:$0xff]   ;;  %v12078_v3 = vld [vmem:[#allocation7 + $0x1b0] ss:$8 sps:$4 sm:$0xff]  }
 0xf04   : > { %v10751_v32 = vpop.f32.mrf.mxu1 }
 0xf05   : > { %v7174_v63 = vpack.c.bf16 %v10750_v43, %v10747_v21  ;;  %v9308_v21 = vld [vmem:[%s14388_s5 + $0x14] sm:$0xf] }
 0xf06   : > { %v10752_v31 = vpop.f32.mrf.mxu1  ;;  %11414 = vmatprep.subr.msk.bf16.mxu1 %vm6493_vm2, %v9308_v21  ;;  %v7399_v43 = vsel %vm6493_vm2, %v9308_v21, 0 }
 0xf07   : > { %11332 = vmatprep.mubr.msk.bf16.mxu0 %vm6480_vm3, %v7174_v63  ;;  %v10753_v15 = vadd.f32 %v10752_v31, %v10751_v32  ;;  %11341 = vmatpush3.bf16.msra.mxu1 %v7399_v43  ;;  %v9321_v32 = vld [vmem:[%s14388_s5 + $0x18] sm:$0xf] }
 0xf08   : > { %v10754_v44 = vpop.f32.mrf.mxu1  ;;  %11415 = vmatprep.subr.msk.bf16.mxu1 %vm6493_vm2, %v9321_v32 }
 0xf0a   : > { %v10755_v6 = vpop.f32.mrf.mxu1 }
 0xf0b   : > { %v10756_v41 = vadd.f32 %v10755_v6, %v10754_v44 }
 0xf0c   : > { %v10757_v47 = vpop.f32.mrf.mxu1 }
 0xf0d   : > { %v7175_v37 = vpack.c.bf16 %v10756_v41, %v10753_v15 }
 0xf0e   : > { %v10758_v29 = vpop.f32.mrf.mxu1 }
 0xf0f   : > { %11333 = vmatmul.mubr.msk.bf16.vlgmr.msra.gmra.mxu0 %vm6480_vm3, %v7175_v37  ;;  %v10759_v50 = vadd.f32 %v10758_v29, %v10757_v47 }
 0xf10   : > { %10775 = vmatpush3.bf16.msra.mxu0 %v13802_v42  ;;  %v10760_v0 = vpop.f32.mrf.mxu1 }
 0xf11   : > { %10776 = vmatprep.subr.bf16.mxu0 %v13899_v26 }
 0xf12   : > { %v10761_v4 = vpop.f32.mrf.mxu1 }
 0xf13   : > { %v10762_v23 = vadd.f32 %v10761_v4, %v10760_v0 }
 0xf14   : > { %10777 = vmatpush3.bf16.msra.mxu0 %v13916_v25  ;;  %v10763_v51 = vpop.f32.mrf.mxu1 }
 0xf15   : > { %v7176_v24 = vpack.c.bf16 %v10762_v23, %v10759_v50  ;;  %10778 = vmatprep.subr.bf16.mxu0 %v13841_v9 }
 0xf16   : > { %v10764_v1 = vpop.f32.mrf.mxu1 }
 0xf17   : > { %11336 = vmatprep.mubr.msk.bf16.mxu0 %vm6480_vm3, %v7176_v24  ;;  %v10765_v14 = vadd.f32 %v10764_v1, %v10763_v51 }
 0xf18   : > { %10779 = vmatpush3.bf16.msra.mxu0 %v13792_v48  ;;  %v10766_v16 = vpop.f32.mrf.mxu1 }
 0xf19   : > { %10780 = vmatprep.subr.bf16.mxu0 %v13932_v52 }
 0xf1a   : > { %v10767_v55 = vpop.f32.mrf.mxu1 }
 0xf1b   : > { %v10768_v20 = vadd.f32 %v10767_v55, %v10766_v16 }
 0xf1c   : > { %10781 = vmatpush3.bf16.msra.mxu0 %v13941_v36 }
 0xf1d   : > { %v7177_v54 = vpack.c.bf16 %v10768_v20, %v10765_v14  ;;  %10782 = vmatprep.subr.bf16.mxu0 %v13822_v13 }
 0xf1f   : > { %11337 = vmatmul.mubr.msk.bf16.gmra.mxu0 %vm6480_vm3, %v7177_v54 }
 0xf20   : > { %10783 = vmatpush3.bf16.msra.mxu0 %v13782_v39  ;;  %7347 = vmatprep.mubr.bf16.mxu0 %v12059_v53 }
 0xf21   : > { %10784 = vmatprep.subr.bf16.mxu0 %v13953_v62 }
 0xf24   : > { %10785 = vmatpush3.bf16.msra.mxu0 %v13959_v40 }
 0xf25   : > { %10786 = vmatprep.subr.bf16.mxu0 %v13812_v46 }
 0xf28   : > { %10787 = vmatpush3.bf16.msra.mxu0 %v14540_v8 }
 0xf29   : > { %10788 = vmatprep.subr.bf16.mxu0 %v13965_v38 }
 0xf2c   : > { %10789 = vmatpush3.bf16.msra.mxu0 %v13969_v19 }
 0xf2d   : > { %10819 = vmatprep.subr.bf16.mxu0 %v13892_v11 }
 0xf2f   : > { %7348 = vmatmul.mubr.bf16.vlgmr.msra.gmra.mxu0 %v12057_v2 }
 0xf30   : > { %10820 = vmatpush3.bf16.msra.mxu0 %v13802_v42  ;;  %7355 = vmatprep.mubr.bf16.mxu0 %v12062_v17 }
 0xf31   : > { %10821 = vmatprep.subr.bf16.mxu0 %v13899_v26 }
 0xf34   : > { %10822 = vmatpush3.bf16.msra.mxu0 %v13916_v25 }
 0xf35   : > { %10823 = vmatprep.subr.bf16.mxu0 %v13841_v9 }
 0xf37   : > { %7356 = vmatmul.mubr.bf16.gmra.mxu0 %v12060_v7 }
 0xf38   : > { %10824 = vmatpush3.bf16.msra.mxu0 %v13792_v48  ;;  %7363 = vmatprep.mubr.bf16.mxu0 %v12065_v45 }
 0xf39   : > { %10825 = vmatprep.subr.bf16.mxu0 %v13932_v52 }
 0xf3c   : > { %10826 = vmatpush3.bf16.msra.mxu0 %v13941_v36 }
 0xf3d   : > { %10827 = vmatprep.subr.bf16.mxu0 %v13822_v13 }
 0xf3f   : > { %7364 = vmatmul.mubr.bf16.gmra.mxu0 %v12063_v28 }
 0xf40   : > { %10828 = vmatpush3.bf16.msra.mxu0 %v13782_v39  ;;  %7371 = vmatprep.mubr.bf16.mxu0 %v12068_v18 }
 0xf41   : > { %10829 = vmatprep.subr.bf16.mxu0 %v13953_v62 }
 0xf44   : > { %10830 = vmatpush3.bf16.msra.mxu0 %v13959_v40 }
 0xf45   : > { %10831 = vmatprep.subr.bf16.mxu0 %v13812_v46 }
 0xf47   : > { %7372 = vmatmul.mubr.bf16.gmra.mxu0 %v12066_v5 }
 0xf48   : > { %10832 = vmatpush3.bf16.msra.mxu0 %v14540_v8  ;;  %7555 = vmatprep.mubr.bf16.mxu0 %v12071_v35 }
 0xf49   : > { %10833 = vmatprep.subr.bf16.mxu0 %v13965_v38 }
 0xf4c   : > { %10834 = vmatpush3.bf16.msra.mxu0 %v13969_v19 }
 0xf4f   : > { %7556 = vmatmul.mubr.bf16.vlgmr.msra.gmra.mxu0 %v12069_v34 }
 0xf50   : > { %7563 = vmatprep.mubr.bf16.mxu0 %v12074_v10 }
 0xf57   : > { %7564 = vmatmul.mubr.bf16.gmra.mxu0 %v12072_v56 }
 0xf58   : > { %7571 = vmatprep.mubr.bf16.mxu0 %v12077_v22 }
 0xf5f   : > { %7572 = vmatmul.mubr.bf16.gmra.mxu0 %v12075_v60 }
 0xf60   : > { %7579 = vmatprep.mubr.bf16.mxu0 %v12080_v12 }
 0xf67   : > { %7580 = vmatmul.mubr.bf16.gmra.mxu0 %v12078_v3 }
 0xfaf   : > { %v11324_v63 = vpop.f32.mrf.mxu0 }
 0xfb0   : > { %v7052_v31 = vadd.f32 %v11324_v63, %v14083_v57  ;;  %v7607_v63 = vsel %vm6493_vm2, %v9321_v32, 0 }
 0xfb1   : > { %v7019_v44 = vpop.f32.mrf.mxu0 }
 0xfb2   : > { %v7050_v6 = vadd.f32 %v7019_v44, %v14086_v33 }
 0xfb3   : > { %v11325_v15 = vpop.f32.mrf.mxu0 }
 0xfb4   : > { %v7053_v41 = vadd.f32 %v11325_v15, %v14089_v49 }
 0xfb5   : > { %v7022_v47 = vpop.f32.mrf.mxu0 }
 0xfb6   : > { %v7051_v37 = vadd.f32 %v7022_v47, %v14092_v58 }
 0xfbf   : > { %v11328_v29 = vpop.f32.mrf.mxu0 }
 0xfc0   : > { %v7056_v0 = vadd.f32 %v11328_v29, %v14095_v59 }
 0xfc1   : > { %v7035_v50 = vpop.f32.mrf.mxu0 }
 0xfc2   : > { %v7054_v4 = vadd.f32 %v7035_v50, %v14098_v30 }
 0xfc3   : > { %v11329_v23 = vpop.f32.mrf.mxu0 }
 0xfc4   : > { %v7057_v51 = vadd.f32 %v11329_v23, %v14102_v61 }
 0xfc5   : > { %v7038_v24 = vpop.f32.mrf.mxu0 }
 0xfc6   : > { %v7055_v57 = vadd.f32 %v7038_v24, %v14104_v27 }
 0xfcf   : > { %v11334_v1 = vpop.f32.mrf.mxu0 }
 0xfd0   : > { %v14164_v33 = vadd.f32 %v11334_v1, %v7052_v31 }
 0xfd1   : > { %v7227_v16 = vpop.f32.mrf.mxu0 }
 0xfd2   : > { %v14166_v49 = vadd.f32 %v7227_v16, %v7050_v6 }
 0xfd3   : > { %v11335_v14 = vpop.f32.mrf.mxu0 }
 0xfd4   : > { %v14168_v58 = vadd.f32 %v11335_v14, %v7053_v41 }
 0xfd5   : > { %v7230_v55 = vpop.f32.mrf.mxu0 }
 0xfd6   : > { %v14170_v59 = vadd.f32 %v7230_v55, %v7051_v37 }
 0xfdf   : > { %v11338_v20 = vpop.f32.mrf.mxu0 }
 0xfe0   : > { %v14172_v30 = vadd.f32 %v11338_v20, %v7056_v0 }
 0xfe1   : > { %v7243_v53 = vpop.f32.mrf.mxu0 }
 0xfe2   : > { %v14174_v61 = vadd.f32 %v7243_v53, %v7054_v4 }
 0xfe3   : > { %v11339_v54 = vpop.f32.mrf.mxu0 }
 0xfe4   : > { %v14176_v27 = vadd.f32 %v11339_v54, %v7057_v51 }
 0xfe5   : > { %v7246_v2 = vpop.f32.mrf.mxu0 }
 0xfe6   : > { %v14178_v17 = vadd.f32 %v7246_v2, %v7055_v57 }
 0xfef   : > { %v10790_v7 = vpop.f32.mrf.mxu0 }
 0xff1   : > { %v10791_v45 = vpop.f32.mrf.mxu0 }
 0xff2   : > { %v10792_v5 = vadd.f32 %v10791_v45, %v10790_v7 }
 0xff3   : > { %v10793_v28 = vpop.f32.mrf.mxu0 }
 0xff5   : > { %v10794_v18 = vpop.f32.mrf.mxu0 }
 0xff6   : > { %v10795_v35 = vadd.f32 %v10794_v18, %v10793_v28 }
 0xff7   : > { %v10796_v34 = vpop.f32.mrf.mxu0 }
 0xff8   : > { %v7382_v10 = vpack.c.bf16 %v10795_v35, %v10792_v5 }
 0xff9   : > { %v10797_v56 = vpop.f32.mrf.mxu0 }
 0xffa   : > { %11342 = vmatprep.mubr.msk.bf16.mxu1 %vm6480_vm3, %v7382_v10  ;;  %v10798_v12 = vadd.f32 %v10797_v56, %v10796_v34 }
 0xffb   : > { %v10799_v22 = vpop.f32.mrf.mxu0 }
 0xffd   : > { %v10800_v60 = vpop.f32.mrf.mxu0 }
 0xffe   : > { %v10801_v3 = vadd.f32 %v10800_v60, %v10799_v22 }
 0xfff   : > { %v10802_v21 = vpop.f32.mrf.mxu0 }
0x1000   : > { %v7383_v43 = vpack.c.bf16 %v10801_v3, %v10798_v12 }
0x1001   : > { %v10803_v31 = vpop.f32.mrf.mxu0 }
0x1002   : > { %11343 = vmatmul.mubr.msk.bf16.vlgmr.msra.gmra.mxu1 %vm6480_vm3, %v7383_v43  ;;  %v10804_v15 = vadd.f32 %v10803_v31, %v10802_v21  ;;  %v12083_v31 = vld [vmem:[#allocation7 + $0x1c4] ss:$8 sps:$4 sm:$0xff]  }
0x1003   : > { %11351 = vmatpush3.bf16.msra.mxu1 %v7607_v63  ;;  %v10805_v44 = vpop.f32.mrf.mxu0 }
0x1004   : > { %10864 = vmatprep.subr.bf16.mxu1 %v13892_v11 }
0x1005   : > { %v10806_v6 = vpop.f32.mrf.mxu0 }
0x1006   : > { %v10807_v41 = vadd.f32 %v10806_v6, %v10805_v44  ;;  %v12081_v6 = vld [vmem:[#allocation7 + $0x1c0] ss:$8 sps:$4 sm:$0xff]  }
0x1007   : > { %v10808_v47 = vpop.f32.mrf.mxu0 }
0x1008   : > { %v7384_v37 = vpack.c.bf16 %v10807_v41, %v10804_v15  ;;  %v12086_v15 = vld [vmem:[#allocation7 + $0x1d4] ss:$8 sps:$4 sm:$0xff]   ;;  %v12084_v41 = vld [vmem:[#allocation7 + $0x1d0] ss:$8 sps:$4 sm:$0xff]  }
0x1009   : > { %v10809_v29 = vpop.f32.mrf.mxu0 }
0x100a   : > { %11346 = vmatprep.mubr.msk.bf16.mxu1 %vm6480_vm3, %v7384_v37  ;;  %v10810_v4 = vadd.f32 %v10809_v29, %v10808_v47  ;;  %v12089_v47 = vld [vmem:[#allocation7 + $0x1e4] ss:$8 sps:$4 sm:$0xff]   ;;  %v12087_v37 = vld [vmem:[#allocation7 + $0x1e0] ss:$8 sps:$4 sm:$0xff]  }
0x100b   : > { %v10811_v0 = vpop.f32.mrf.mxu0 }
0x100d   : > { %v10812_v50 = vpop.f32.mrf.mxu0 }
0x100e   : > { %v10813_v23 = vadd.f32 %v10812_v50, %v10811_v0 }
0x100f   : > { %v10835_v32 = vpop.f32.mrf.mxu0 }
0x1010   : > { %v7385_v51 = vpack.c.bf16 %v10813_v23, %v10810_v4 }
0x1011   : > { %v10836_v24 = vpop.f32.mrf.mxu0 }
0x1012   : > { %11347 = vmatmul.mubr.msk.bf16.gmra.mxu1 %vm6480_vm3, %v7385_v51  ;;  %v10837_v16 = vadd.f32 %v10836_v24, %v10835_v32 }
0x1013   : > { %v10838_v57 = vpop.f32.mrf.mxu0 }
0x1015   : > { %v10839_v1 = vpop.f32.mrf.mxu0 }
0x1016   : > { %v10840_v14 = vadd.f32 %v10839_v1, %v10838_v57 }
0x1017   : > { %v10841_v55 = vpop.f32.mrf.mxu0 }
0x1018   : > { %v7590_v20 = vpack.c.bf16 %v10840_v14, %v10837_v16 }
0x1019   : > { %v10842_v53 = vpop.f32.mrf.mxu0 }
0x101a   : > { %11352 = vmatprep.mubr.msk.bf16.mxu1 %vm6480_vm3, %v7590_v20  ;;  %v10843_v7 = vadd.f32 %v10842_v53, %v10841_v55 }
0x101b   : > { %v10844_v54 = vpop.f32.mrf.mxu0 }
0x101d   : > { %v10845_v2 = vpop.f32.mrf.mxu0 }
0x101e   : > { %v10846_v45 = vadd.f32 %v10845_v2, %v10844_v54 }
0x101f   : > { %v10847_v28 = vpop.f32.mrf.mxu0 }
0x1020   : > { %v7591_v18 = vpack.c.bf16 %v10846_v45, %v10843_v7 }
0x1021   : > { %v10848_v5 = vpop.f32.mrf.mxu0 }
0x1022   : > { %11353 = vmatmul.mubr.msk.bf16.vlgmr.msra.gmra.mxu1 %vm6480_vm3, %v7591_v18  ;;  %v10849_v34 = vadd.f32 %v10848_v5, %v10847_v28 }
0x1023   : > { %10865 = vmatpush3.bf16.msra.mxu1 %v13802_v42  ;;  %v10850_v35 = vpop.f32.mrf.mxu0 }
0x1024   : > { %10866 = vmatprep.subr.bf16.mxu1 %v13899_v26 }
0x1025   : > { %v10851_v10 = vpop.f32.mrf.mxu0 }
0x1026   : > { %v10852_v56 = vadd.f32 %v10851_v10, %v10850_v35 }
0x1027   : > { %10867 = vmatpush3.bf16.msra.mxu1 %v13916_v25  ;;  %v10853_v22 = vpop.f32.mrf.mxu0 }
0x1028   : > { %v7592_v60 = vpack.c.bf16 %v10852_v56, %v10849_v34  ;;  %10868 = vmatprep.subr.bf16.mxu1 %v13841_v9 }
0x1029   : > { %v10854_v12 = vpop.f32.mrf.mxu0 }
0x102a   : > { %11356 = vmatprep.mubr.msk.bf16.mxu1 %vm6480_vm3, %v7592_v60  ;;  %v10855_v21 = vadd.f32 %v10854_v12, %v10853_v22 }
0x102b   : > { %10869 = vmatpush3.bf16.msra.mxu1 %v13792_v48  ;;  %v10856_v3 = vpop.f32.mrf.mxu0 }
0x102c   : > { %10870 = vmatprep.subr.bf16.mxu1 %v13932_v52 }
0x102d   : > { %v10857_v43 = vpop.f32.mrf.mxu0 }
0x102e   : > { %v10858_v63 = vadd.f32 %v10857_v43, %v10856_v3 }
0x102f   : > { %10871 = vmatpush3.bf16.msra.mxu1 %v13941_v36 }
0x1030   : > { %v7593_v44 = vpack.c.bf16 %v10858_v63, %v10855_v21  ;;  %10872 = vmatprep.subr.bf16.mxu1 %v13822_v13 }
0x1032   : > { %11357 = vmatmul.mubr.msk.bf16.gmra.mxu1 %vm6480_vm3, %v7593_v44 }
0x1033   : > { %10873 = vmatpush3.bf16.msra.mxu1 %v13782_v39  ;;  %7763 = vmatprep.mubr.bf16.mxu1 %v12083_v31 }
0x1034   : > { %10874 = vmatprep.subr.bf16.mxu1 %v13953_v62 }
0x1037   : > { %10875 = vmatpush3.bf16.msra.mxu1 %v13959_v40 }
0x1038   : > { %10876 = vmatprep.subr.bf16.mxu1 %v13812_v46 }
0x103b   : > { %10877 = vmatpush3.bf16.msra.mxu1 %v14540_v8 }
0x103c   : > { %10878 = vmatprep.subr.bf16.mxu1 %v13965_v38 }
0x103f   : > { %10879 = vmatpush3.bf16.msra.mxu1 %v13969_v19 }
0x1040   : > { %10909 = vmatprep.subr.bf16.mxu1 %v13892_v11  ;;  %v12092_v11 = vld [vmem:[#allocation7 + $0x1f4] ss:$8 sps:$4 sm:$0xff]  }
0x1042   : > { %7764 = vmatmul.mubr.bf16.vlgmr.msra.gmra.mxu1 %v12081_v6 }
0x1043   : > { %10910 = vmatpush3.bf16.msra.mxu1 %v13802_v42  ;;  %7771 = vmatprep.mubr.bf16.mxu1 %v12086_v15  ;;  %v12090_v42 = vld [vmem:[#allocation7 + $0x1f0] ss:$8 sps:$4 sm:$0xff]  }
0x1044   : > { %10911 = vmatprep.subr.bf16.mxu1 %v13899_v26  ;;  %v12101_v26 = vld [vmem:[#allocation7 + $0x224] ss:$8 sps:$4 sm:$0xff]  }
0x1047   : > { %10912 = vmatpush3.bf16.msra.mxu1 %v13916_v25  ;;  %v12099_v25 = vld [vmem:[#allocation7 + $0x220] ss:$8 sps:$4 sm:$0xff]  }
0x1048   : > { %10913 = vmatprep.subr.bf16.mxu1 %v13841_v9  ;;  %v12095_v9 = vld [vmem:[#allocation7 + $0x204] ss:$8 sps:$4 sm:$0xff]  }
0x104a   : > { %7772 = vmatmul.mubr.bf16.gmra.mxu1 %v12084_v41 }
0x104b   : > { %10914 = vmatpush3.bf16.msra.mxu1 %v13792_v48  ;;  %7779 = vmatprep.mubr.bf16.mxu1 %v12089_v47  ;;  %v12093_v48 = vld [vmem:[#allocation7 + $0x200] ss:$8 sps:$4 sm:$0xff]  }
0x104c   : > { %10915 = vmatprep.subr.bf16.mxu1 %v13932_v52  ;;  %v12104_v52 = vld [vmem:[#allocation7 + $0x234] ss:$8 sps:$4 sm:$0xff]  }
0x104f   : > { %10916 = vmatpush3.bf16.msra.mxu1 %v13941_v36  ;;  %v9334_v36 = vld [vmem:[%s14388_s5 + $0x1c] sm:$0xf] }
0x1050   : > { %10917 = vmatprep.subr.bf16.mxu1 %v13822_v13  ;;  %v12098_v13 = vld [vmem:[#allocation7 + $0x214] ss:$8 sps:$4 sm:$0xff]   ;;  %11416 = vmatprep.subr.msk.bf16.mxu0 %vm6493_vm2, %v9334_v36 }
0x1052   : > { %7780 = vmatmul.mubr.bf16.gmra.mxu1 %v12087_v37 }
0x1053   : > { %10918 = vmatpush3.bf16.msra.mxu1 %v13782_v39  ;;  %7787 = vmatprep.mubr.bf16.mxu1 %v12092_v11  ;;  %v12096_v39 = vld [vmem:[#allocation7 + $0x210] ss:$8 sps:$4 sm:$0xff]  }
0x1054   : > { %10919 = vmatprep.subr.bf16.mxu1 %v13953_v62  ;;  %v7815_v62 = vsel %vm6493_vm2, %v9334_v36, 0 }
0x1055   : > { %11361 = vmatpush3.bf16.msra.mxu0 %v7815_v62 }
0x1057   : > { %10920 = vmatpush3.bf16.msra.mxu1 %v13959_v40  ;;  %v9347_v40 = vld [vmem:[%s14388_s5 + $0x20] sm:$0xf] }
0x1058   : > { %10921 = vmatprep.subr.bf16.mxu1 %v13812_v46  ;;  %v12102_v46 = vld [vmem:[#allocation7 + $0x230] ss:$8 sps:$4 sm:$0xff]   ;;  %11417 = vmatprep.subr.msk.bf16.mxu0 %vm6493_vm2, %v9347_v40  ;;  %v8023_v15 = vsel %vm6493_vm2, %v9347_v40, 0 }
0x105a   : > { %7788 = vmatmul.mubr.bf16.gmra.mxu1 %v12090_v42 }
0x105b   : > { %10922 = vmatpush3.bf16.msra.mxu1 %v14540_v8  ;;  %7971 = vmatprep.mubr.bf16.mxu1 %v12095_v9 }
0x105c   : > { %10923 = vmatprep.subr.bf16.mxu1 %v13965_v38 }
0x105f   : > { %10924 = vmatpush3.bf16.msra.mxu1 %v13969_v19 }
0x1062   : > { %7972 = vmatmul.mubr.bf16.vlgmr.msra.gmra.mxu1 %v12093_v48 }
0x1063   : > { %7979 = vmatprep.mubr.bf16.mxu1 %v12098_v13 }
0x106a   : > { %7980 = vmatmul.mubr.bf16.gmra.mxu1 %v12096_v39 }
0x106b   : > { %7987 = vmatprep.mubr.bf16.mxu1 %v12101_v26 }
0x1072   : > { %7988 = vmatmul.mubr.bf16.gmra.mxu1 %v12099_v25 }
0x1073   : > { %7995 = vmatprep.mubr.bf16.mxu1 %v12104_v52 }
0x107a   : > { %7996 = vmatmul.mubr.bf16.gmra.mxu1 %v12102_v46 }
0x10c2   : > { %v11344_v38 = vpop.f32.mrf.mxu1 }
0x10c3   : > { %v7468_v8 = vadd.f32 %v11344_v38, %v14164_v33 }
0x10c4   : > { %v7435_v19 = vpop.f32.mrf.mxu1 }
0x10c5   : > { %v7466_v29 = vadd.f32 %v7435_v19, %v14166_v49 }
0x10c6   : > { %v11345_v0 = vpop.f32.mrf.mxu1 }
0x10c7   : > { %v7469_v50 = vadd.f32 %v11345_v0, %v14168_v58 }
0x10c8   : > { %v7438_v4 = vpop.f32.mrf.mxu1 }
0x10c9   : > { %v7467_v23 = vadd.f32 %v7438_v4, %v14170_v59 }
0x10d2   : > { %v11348_v32 = vpop.f32.mrf.mxu1 }
0x10d3   : > { %v7472_v51 = vadd.f32 %v11348_v32, %v14172_v30 }
0x10d4   : > { %v7451_v24 = vpop.f32.mrf.mxu1 }
0x10d5   : > { %v7470_v57 = vadd.f32 %v7451_v24, %v14174_v61 }
0x10d6   : > { %v11349_v1 = vpop.f32.mrf.mxu1 }
0x10d7   : > { %v7473_v16 = vadd.f32 %v11349_v1, %v14176_v27 }
0x10d8   : > { %v7454_v14 = vpop.f32.mrf.mxu1 }
0x10d9   : > { %v7471_v33 = vadd.f32 %v7454_v14, %v14178_v17 }
0x10e2   : > { %v11354_v55 = vpop.f32.mrf.mxu1 }
0x10e3   : > { %v14238_v49 = vadd.f32 %v11354_v55, %v7468_v8 }
0x10e4   : > { %v7643_v20 = vpop.f32.mrf.mxu1 }
0x10e5   : > { %v14240_v58 = vadd.f32 %v7643_v20, %v7466_v29 }
0x10e6   : > { %v11355_v53 = vpop.f32.mrf.mxu1 }
0x10e7   : > { %v14242_v59 = vadd.f32 %v11355_v53, %v7469_v50 }
0x10e8   : > { %v7646_v54 = vpop.f32.mrf.mxu1 }
0x10e9   : > { %v14244_v30 = vadd.f32 %v7646_v54, %v7467_v23 }
0x10f2   : > { %v11358_v2 = vpop.f32.mrf.mxu1 }
0x10f3   : > { %v14246_v61 = vadd.f32 %v11358_v2, %v7472_v51 }
0x10f4   : > { %v7659_v7 = vpop.f32.mrf.mxu1 }
0x10f5   : > { %v14248_v27 = vadd.f32 %v7659_v7, %v7470_v57 }
0x10f6   : > { %v11359_v45 = vpop.f32.mrf.mxu1 }
0x10f7   : > { %v14250_v17 = vadd.f32 %v11359_v45, %v7473_v16 }
0x10f8   : > { %v7662_v28 = vpop.f32.mrf.mxu1 }
0x10f9   : > { %v14252_v18 = vadd.f32 %v7662_v28, %v7471_v33 }
0x1102   : > { %v10880_v5 = vpop.f32.mrf.mxu1 }
0x1104   : > { %v10881_v35 = vpop.f32.mrf.mxu1 }
0x1105   : > { %v10882_v56 = vadd.f32 %v10881_v35, %v10880_v5  ;;  %v8121_v35 = vld [vmem:[#allocation10] sm:$0xff] }
0x1106   : > { %v10883_v34 = vpop.f32.mrf.mxu1 }
0x1108   : > { %v10884_v10 = vpop.f32.mrf.mxu1 }
0x1109   : > { %v10885_v22 = vadd.f32 %v10884_v10, %v10883_v34  ;;  %v9354_v34 = vcombine.high %v8121_v35, %v8121_v35  ;;  %v9353_v10 = vcombine.low %v8121_v35, %v8121_v35  ;;  %v12113_v35 = vld [vmem:[%s14392_s9 + $0x60] sm:$0xff]  }
0x110a   : > { %v10886_v60 = vpop.f32.mrf.mxu1 }
0x110b   : > { %v7798_v12 = vpack.c.bf16 %v10885_v22, %v10882_v56  ;;  %v8144_v56 = vsel %vm6493_vm2, %v9353_v10, 0  ;;  %v12489_v22 = vmov 0   ;;  %v12115_v10 = vld [vmem:[%s14392_s9 + $0x58] sm:$0xff]  }
0x110c   : > { %v10887_v3 = vpop.f32.mrf.mxu1 }
0x110d   : > { %11362 = vmatprep.mubr.msk.bf16.mxu0 %vm6480_vm3, %v7798_v12  ;;  %v10888_v63 = vadd.f32 %v10887_v3, %v10886_v60 }
0x110e   : > { %v10889_v21 = vpop.f32.mrf.mxu1 }
0x1110   : > { %v10890_v43 = vpop.f32.mrf.mxu1 }
0x1111   : > { %v10891_v31 = vadd.f32 %v10890_v43, %v10889_v21 }
0x1112   : > { %v10892_v44 = vpop.f32.mrf.mxu1 }
0x1113   : > { %v7799_v6 = vpack.c.bf16 %v10891_v31, %v10888_v63 }
0x1114   : > { %v10893_v41 = vpop.f32.mrf.mxu1 }
0x1115   : > { %11363 = vmatmul.mubr.msk.bf16.vlgmr.msra.gmra.mxu0 %vm6480_vm3, %v7799_v6  ;;  %v10894_v11 = vadd.f32 %v10893_v41, %v10892_v44 }
0x1116   : > { %v10895_v47 = vpop.f32.mrf.mxu1  ;;  %11371 = vmatpush3.bf16.msra.mxu0 %v8023_v15 }
0x1117   : > { %9355 = vmatprep.subr.msk.bf16.mxu0 %vm6493_vm2, %v9354_v34  ;;  %v12114_v34 = vld [vmem:[%s14392_s9 + $0x20] sm:$0xff]  }
0x1118   : > { %v10896_v37 = vpop.f32.mrf.mxu1 }
0x1119   : > { %v10897_v42 = vadd.f32 %v10896_v37, %v10895_v47  ;;  %v9352_v37 = vld [vmem:[#allocation8] ss:$0 sm:$0xff] }
0x111a   : > { %v10898_v9 = vpop.f32.mrf.mxu1 }
0x111b   : > { %v7800_v48 = vpack.c.bf16 %v10897_v42, %v10894_v11 }
0x111c   : > { %v10899_v13 = vpop.f32.mrf.mxu1 }
0x111d   : > { %11366 = vmatprep.mubr.msk.bf16.mxu0 %vm6480_vm3, %v7800_v48  ;;  %v10900_v25 = vadd.f32 %v10899_v13, %v10898_v9 }
0x111e   : > { %v10901_v39 = vpop.f32.mrf.mxu1 }
0x1120   : > { %v10902_v26 = vpop.f32.mrf.mxu1 }
0x1121   : > { %v10903_v52 = vadd.f32 %v10902_v26, %v10901_v39 }
0x1122   : > { %v10925_v46 = vpop.f32.mrf.mxu1 }
0x1123   : > { %v7801_v36 = vpack.c.bf16 %v10903_v52, %v10900_v25 }
0x1124   : > { %v10926_v62 = vpop.f32.mrf.mxu1 }
0x1125   : > { %11367 = vmatmul.mubr.msk.bf16.gmra.mxu0 %vm6480_vm3, %v7801_v36  ;;  %v10927_v8 = vadd.f32 %v10926_v62, %v10925_v46 }
0x1126   : > { %v10928_v40 = vpop.f32.mrf.mxu1 }
0x1128   : > { %v10929_v38 = vpop.f32.mrf.mxu1 }
0x1129   : > { %v10930_v19 = vadd.f32 %v10929_v38, %v10928_v40 }
0x112a   : > { %v10931_v29 = vpop.f32.mrf.mxu1 }
0x112b   : > { %v8006_v0 = vpack.c.bf16 %v10930_v19, %v10927_v8 }
0x112c   : > { %v10932_v50 = vpop.f32.mrf.mxu1 }
0x112d   : > { %11372 = vmatprep.mubr.msk.bf16.mxu0 %vm6480_vm3, %v8006_v0  ;;  %v10933_v32 = vadd.f32 %v10932_v50, %v10931_v29 }
0x112e   : > { %v10934_v4 = vpop.f32.mrf.mxu1 }
0x1130   : > { %v10935_v23 = vpop.f32.mrf.mxu1 }
0x1131   : > { %v10936_v51 = vadd.f32 %v10935_v23, %v10934_v4 }
0x1132   : > { %v10937_v24 = vpop.f32.mrf.mxu1 }
0x1133   : > { %v8007_v57 = vpack.c.bf16 %v10936_v51, %v10933_v32 }
0x1134   : > { %v10938_v1 = vpop.f32.mrf.mxu1 }
0x1135   : > { %11373 = vmatmul.mubr.msk.bf16.vlgmr.msra.gmra.mxu0 %vm6480_vm3, %v8007_v57  ;;  %v10939_v33 = vadd.f32 %v10938_v1, %v10937_v24 }
0x1136   : > { %v10940_v16 = vpop.f32.mrf.mxu1  ;;  %8164 = vmatpush1.bf16.msra.mxu0 %v8144_v56  ;;  %v12116_v56 = vld [vmem:[%s14392_s9 + $0x18] sm:$0xff]  }
0x1138   : > { %v10941_v14 = vpop.f32.mrf.mxu1 }
0x1139   : > { %v10942_v55 = vadd.f32 %v10941_v14, %v10940_v16 }
0x113a   : > { %v10943_v20 = vpop.f32.mrf.mxu1 }
0x113b   : > { %v8008_v53 = vpack.c.bf16 %v10942_v55, %v10939_v33 }
0x113c   : > { %v10944_v54 = vpop.f32.mrf.mxu1 }
0x113d   : > { %11376 = vmatprep.mubr.msk.bf16.mxu0 %vm6480_vm3, %v8008_v53  ;;  %v10945_v45 = vadd.f32 %v10944_v54, %v10943_v20 }
0x113e   : > { %v10946_v2 = vpop.f32.mrf.mxu1 }
0x1140   : > { %v10947_v7 = vpop.f32.mrf.mxu1 }
0x1141   : > { %v10948_v28 = vadd.f32 %v10947_v7, %v10946_v2  ;;  %v12108_v2 = vld [vmem:[%s14392_s9 + $0x38] sm:$0xff]   ;;  %v12109_v7 = vld [vmem:[%s14392_s9 + $0x70] sm:$0xff]  }
0x1143   : > { %v8009_v5 = vpack.c.bf16 %v10948_v28, %v10945_v45  ;;  %v12110_v45 = vld [vmem:[%s14392_s9 + $0x30] sm:$0xff]   ;;  %v12111_v28 = vld [vmem:[%s14392_s9 + $0x68] sm:$0xff]  }
0x1145   : > { %11377 = vmatmul.mubr.msk.bf16.gmra.mxu0 %vm6480_vm3, %v8009_v5  ;;  %v12112_v5 = vld [vmem:[%s14392_s9 + $0x28] sm:$0xff]  }
0x1146   : > { %8181 = vmatprep.mubr.bf16.mxu0 %v12489_v22 }
0x11d5   : > { %v11364_v60 = vpop.f32.mrf.mxu0 }
0x11d6   : > { %v7884_v6 = vadd.f32 %v11364_v60, %v14238_v49  ;;  %v12118_v60 = vld [vmem:[%s14392_s9 + $0x10] sm:$0xff]  }
0x11d7   : > { %v7851_v12 = vpop.f32.mrf.mxu0 }
0x11d8   : > { %v7882_v41 = vadd.f32 %v7851_v12, %v14240_v58  ;;  %v12119_v12 = vld [vmem:[%s14392_s9 + $0x48] sm:$0xff]  }
0x11d9   : > { %v11365_v3 = vpop.f32.mrf.mxu0 }
0x11da   : > { %v7885_v42 = vadd.f32 %v11365_v3, %v14242_v59  ;;  %v12120_v3 = vld [vmem:[%s14392_s9 + $0x8] sm:$0xff]  }
0x11db   : > { %v7854_v21 = vpop.f32.mrf.mxu0 }
0x11dc   : > { %v7883_v13 = vadd.f32 %v7854_v21, %v14244_v30  ;;  %v12121_v21 = vld [vmem:[%s14392_s9 + $0x40] sm:$0xff]  }
0x11e5   : > { %v11368_v43 = vpop.f32.mrf.mxu0 }
0x11e6   : > { %v7888_v29 = vadd.f32 %v11368_v43, %v14246_v61  ;;  %v12122_v43 = vld [vmem:[%s14392_s9] sm:$0xff]  }
0x11e7   : > { %v7867_v63 = vpop.f32.mrf.mxu0 }
0x11e8   : > { %v7886_v30 = vadd.f32 %v7867_v63, %v14248_v27 }
0x11e9   : > { %v11369_v31 = vpop.f32.mrf.mxu0 }
0x11ea   : > { %v7889_v4 = vadd.f32 %v11369_v31, %v14250_v17 }
0x11eb   : > { %v7870_v44 = vpop.f32.mrf.mxu0 }
0x11ec   : > { %v7887_v51 = vadd.f32 %v7870_v44, %v14252_v18  ;;  %v12107_v18 = vld [vmem:[%s14392_s9 + $0x78] sm:$0xff]  }
0x11ed   : > { %10954 = vmatprep.subr.bf16.mxu1 %v12107_v18 }
0x11ee   : > { %10955 = vmatpush3.bf16.msra.mxu1 %v12108_v2 }
0x11ef   : > { %10956 = vmatprep.subr.bf16.mxu1 %v12109_v7 }
0x11f2   : > { %10957 = vmatpush3.bf16.msra.mxu1 %v12110_v45 }
0x11f3   : > { %10958 = vmatprep.subr.bf16.mxu1 %v12111_v28 }
0x11f5   : > { %v11374_v15 = vpop.f32.mrf.mxu0 }
0x11f6   : > { %v8092_v47 = vadd.f32 %v11374_v15, %v7884_v6  ;;  %10959 = vmatpush3.bf16.msra.mxu1 %v12112_v5  ;;  %v8223_v15 = vld [vmem:[#allocation11 + $0x8] sm:$0xff] }
0x11f7   : > { %v8059_v11 = vpop.f32.mrf.mxu0  ;;  %10960 = vmatprep.subr.bf16.mxu1 %v12113_v35 }
0x11f8   : > { %v8090_v9 = vadd.f32 %v8059_v11, %v7882_v41  ;;  %v8107_v39 = vadd.f32 %v9352_v37, %v8092_v47  ;;  %v8222_v47 = vld [vmem:[#allocation11] sm:$0xff] }
0x11f9   : > { %v11375_v48 = vpop.f32.mrf.mxu0 }
0x11fa   : > { %v8093_v26 = vadd.f32 %v11375_v48, %v7885_v42  ;;  %v8105_v52 = vadd.f32 %v9352_v37, %v8090_v9  ;;  %v8115_v62 = vmax.f32 %v8107_v39, 0.0  ;;  %10961 = vmatpush3.bf16.msra.mxu1 %v12114_v34  ;;  %v8232_v42 = vunpack.c.l.bf16 %v8223_v15  ;;  %v8225_v48 = vld [vmem:[#allocation11 + $0x18] sm:$0xff] }
0x11fb   : > { %v8062_v25 = vpop.f32.mrf.mxu0  ;;  %10962 = vmatprep.subr.bf16.mxu1 %v12115_v10  ;;  %v8233_v39 = vunpack.c.h.bf16 %v8223_v15 }
0x11fc   : > { %v8108_v46 = vadd.f32 %v9352_v37, %v8093_v26  ;;  %v8091_v36 = vadd.f32 %v8062_v25, %v7883_v13  ;;  %v8113_v38 = vmax.f32 %v8105_v52, 0.0  ;;  %v8230_v13 = vunpack.c.l.bf16 %v8222_v47  ;;  %v8226_v52 = vld [vmem:[#allocation11 + $0x20] sm:$0xff] }
0x11fe   : > { %v8116_v49 = vmax.f32 %v8108_v46, 0.0  ;;  %v8106_v40 = vadd.f32 %v9352_v37, %v8091_v36  ;;  %10963 = vmatpush3.bf16.msra.mxu1 %v12116_v56  ;;  %v8231_v46 = vunpack.c.h.bf16 %v8222_v47 }
0x1200   : > { %v8123_v58 = vpack.c.bf16 %v8116_v49, %v8115_v62  ;;  %v8114_v8 = vmax.f32 %v8106_v40, 0.0  ;;  %v8236_v49 = vunpack.c.l.bf16 %v8225_v48  ;;  %v8227_v40 = vld [vmem:[#allocation11 + $0x28] sm:$0xff] }
0x1202   : > { %v8122_v19 = vpack.c.bf16 %v8114_v8, %v8113_v38  ;;  %v8237_v38 = vunpack.c.h.bf16 %v8225_v48 }
0x1204   : > { %9356 = vmatmul.mubr.msk.bf16.vlgmr.msra.gmra.mxu0 %vm6480_vm3, %v8122_v19 }
0x1205   : > { %v11378_v59 = vpop.f32.mrf.mxu0  ;;  %8191 = vmatprep.mubr.bf16.mxu0 %v12489_v22 }
0x1206   : > { %v8096_v0 = vadd.f32 %v11378_v59, %v7888_v29  ;;  %v8238_v59 = vunpack.c.l.bf16 %v8226_v52 }
0x1207   : > { %v8075_v50 = vpop.f32.mrf.mxu0 }
0x1208   : > { %v8094_v23 = vadd.f32 %v8075_v50, %v7886_v30  ;;  %v8111_v24 = vadd.f32 %v9352_v37, %v8096_v0  ;;  %v8228_v30 = vld [vmem:[#allocation11 + $0x30] sm:$0xff]  ;;  %v8239_v50 = vunpack.c.h.bf16 %v8226_v52 }
0x1209   : > { %v11379_v32 = vpop.f32.mrf.mxu0 }
0x120a   : > { %v8097_v57 = vadd.f32 %v11379_v32, %v7889_v4  ;;  %v8109_v16 = vadd.f32 %v9352_v37, %v8094_v23  ;;  %v8119_v33 = vmax.f32 %v8111_v24, 0.0  ;;  %v8240_v4 = vunpack.c.l.bf16 %v8227_v40 }
0x120b   : > { %v8078_v1 = vpop.f32.mrf.mxu0 }
0x120c   : > { %v8112_v14 = vadd.f32 %v9352_v37, %v8097_v57  ;;  %v8095_v61 = vadd.f32 %v8078_v1, %v7887_v51  ;;  %9357 = vmatmul.mubr.msk.bf16.gmra.mxu0 %vm6480_vm3, %v8123_v58  ;;  %v8117_v20 = vmax.f32 %v8109_v16, 0.0  ;;  %v8241_v1 = vunpack.c.h.bf16 %v8227_v40 }
0x120d   : > { %8201 = vmatprep.mubr.bf16.mxu0 %v12489_v22  ;;  %v8242_v16 = vunpack.c.l.bf16 %v8228_v30  ;;  %v12490_v40 = vmov 0.0  }
0x120e   : > { %v8120_v55 = vmax.f32 %v8112_v14, 0.0  ;;  %v8110_v27 = vadd.f32 %v9352_v37, %v8095_v61  ;;  %v8224_v37 = vld [vmem:[#allocation11 + $0x10] sm:$0xff]  ;;  %11388 = vmatprep.subr.bf16.mxu0 %v12490_v40 }
0x120f   : > { %v8234_v26 = vunpack.c.l.bf16 %v8224_v37  ;;  %v8235_v62 = vunpack.c.h.bf16 %v8224_v37 }
0x1210   : > { %v8125_v53 = vpack.c.bf16 %v8120_v55, %v8119_v33  ;;  %v8118_v54 = vmax.f32 %v8110_v27, 0.0  ;;  %v8229_v27 = vld [vmem:[#allocation11 + $0x38] sm:$0xff] }
0x1211   : > { %v8244_v45 = vunpack.c.l.bf16 %v8229_v27 }
0x1212   : > { %v8124_v17 = vpack.c.bf16 %v8118_v54, %v8117_v20 }
0x1214   : > { %9358 = vmatmul.mubr.msk.bf16.gmra.mxu0 %vm6480_vm3, %v8124_v17 }
0x1215   : > { %8211 = vmatprep.mubr.bf16.mxu0 %v12489_v22  ;;  %v12117_v22 = vld [vmem:[%s14392_s9 + $0x50] sm:$0xff]  }
0x1216   : > { %10964 = vmatprep.subr.bf16.mxu1 %v12117_v22 }
0x1217   : > { %10965 = vmatpush3.bf16.msra.mxu1 %v12118_v60 }
0x1218   : > { %10966 = vmatprep.subr.bf16.mxu1 %v12119_v12  ;;  %v8245_v12 = vunpack.c.h.bf16 %v8229_v27 }
0x121b   : > { %10967 = vmatpush3.bf16.msra.mxu1 %v12120_v3 }
0x121c   : > { %9359 = vmatmul.mubr.msk.bf16.gmra.mxu0 %vm6480_vm3, %v8125_v53  ;;  %10968 = vmatprep.subr.bf16.mxu1 %v12121_v21  ;;  %v8243_v53 = vunpack.c.h.bf16 %v8228_v30 }
0x121d   : > { %11396 = vmatprep.mubr.msk.bf16.mxu0 %vm12491_vm4, %v12490_v40 }
0x121f   : > { %10969 = vmatpush3.bf16.msra.mxu1 %v12122_v43 }
0x1220   : > { %11380 = vmatprep.subr.bf16.mxu1 %v12490_v40 }
0x12c4   : > { %v8183_v63 = vpop.f32.mrf.mxu0 }
0x12c5   : > { %v8246_v8 = vmul.f32 %v8230_v13, %v8183_v63 }
0x12c6   : > { %v8185_v31 = vpop.f32.mrf.mxu0 }
0x12c7   : > { %v8247_v23 = vmul.f32 %v8231_v46, %v8185_v31 }
0x12c8   : > { %v8187_v44 = vpop.f32.mrf.mxu0 }
0x12c9   : > { %v8248_v36 = vmul.f32 %v8232_v42, %v8187_v44 }
0x12ca   : > { %v8189_v6 = vpop.f32.mrf.mxu0 }
0x12cb   : > { %v8249_v19 = vmul.f32 %v8233_v39, %v8189_v6  ;;  %v8262_v32 = vadd.f32 %v8248_v36, %v8246_v8  ;;  %v12126_v8 = vld [vmem:[%s14396_s13 + $0x10] sm:$0xff]  }
0x12cc   : > { %v8193_v41 = vpop.f32.mrf.mxu0 }
0x12cd   : > { %v8250_v29 = vmul.f32 %v8234_v26, %v8193_v41  ;;  %v8275_v14 = vadd.f32 %v8249_v19, %v8247_v23 }
0x12ce   : > { %v8195_v11 = vpop.f32.mrf.mxu0 }
0x12cf   : > { %v8251_v51 = vmul.f32 %v8235_v62, %v8195_v11  ;;  %v8263_v61 = vadd.f32 %v8262_v32, %v8250_v29  ;;  %v8322_v29 = vld [vmem:[#allocation13] sm:$0x1] }
0x12d0   : > { %v8197_v9 = vpop.f32.mrf.mxu0 }
0x12d1   : > { %v8252_v24 = vmul.f32 %v8236_v49, %v8197_v9  ;;  %v8276_v54 = vadd.f32 %v8275_v14, %v8251_v51  ;;  %v12123_v49 = vld [vmem:[#allocation14 + $0x8] sm:$0xff]   ;;  %v12127_v51 = vld [vmem:[%s14396_s13 + $0x8] sm:$0xff]  }
0x12d2   : > { %v8199_v25 = vpop.f32.mrf.mxu0 }
0x12d3   : > { %v8253_v33 = vmul.f32 %v8237_v38, %v8199_v25  ;;  %v8264_v17 = vadd.f32 %v8263_v61, %v8252_v24  ;;  %v12124_v38 = vld [vmem:[#allocation14] sm:$0xff]   ;;  %v12128_v24 = vld [vmem:[%s14396_s13] sm:$0xff]  }
0x12d4   : > { %v8203_v58 = vpop.f32.mrf.mxu0 }
0x12d5   : > { %v8254_v55 = vmul.f32 %v8238_v59, %v8203_v58  ;;  %v8277_v28 = vadd.f32 %v8276_v54, %v8253_v33  ;;  %v12125_v58 = vld [vmem:[%s14396_s13 + $0x18] sm:$0xff]  }
0x12d6   : > { %v8205_v0 = vpop.f32.mrf.mxu0  ;;  %11389 = vmatpush3.bf16.msra.mxu0 %v12125_v58 }
0x12d7   : > { %v8255_v18 = vmul.f32 %v8239_v50, %v8205_v0  ;;  %v8265_v5 = vadd.f32 %v8264_v17, %v8254_v55  ;;  %11390 = vmatprep.subr.bf16.mxu0 %v12490_v40 }
0x12d8   : > { %v8207_v57 = vpop.f32.mrf.mxu0 }
0x12d9   : > { %v8256_v2 = vmul.f32 %v8240_v4, %v8207_v57  ;;  %v8278_v56 = vadd.f32 %v8277_v28, %v8255_v18  ;;  %v8465_v57 = vld [vmem:[#allocation16] sm:$0x1] }
0x12da   : > { %v8209_v20 = vpop.f32.mrf.mxu0  ;;  %11391 = vmatpush3.bf16.msra.mxu0 %v12126_v8 }
0x12db   : > { %v8257_v35 = vmul.f32 %v8241_v1, %v8209_v20  ;;  %v8266_v22 = vadd.f32 %v8265_v5, %v8256_v2  ;;  %11392 = vmatprep.subr.bf16.mxu0 %v12490_v40  ;;  %v8532_v20 = vld [vmem:[#allocation17] sm:$0x1] }
0x12dc   : > { %v8213_v7 = vpop.f32.mrf.mxu0 }
0x12dd   : > { %v8258_v34 = vmul.f32 %v8242_v16, %v8213_v7  ;;  %v8279_v21 = vadd.f32 %v8278_v56, %v8257_v35 }
0x12de   : > { %v8215_v10 = vpop.f32.mrf.mxu0  ;;  %11393 = vmatpush3.bf16.msra.mxu0 %v12127_v51 }
0x12df   : > { %v8259_v60 = vmul.f32 %v8243_v53, %v8215_v10  ;;  %v8267_v43 = vadd.f32 %v8266_v22, %v8258_v34  ;;  %11394 = vmatprep.subr.bf16.mxu0 %v12490_v40 }
0x12e0   : > { %v8217_v3 = vpop.f32.mrf.mxu0 }
0x12e1   : > { %v8260_v63 = vmul.f32 %v8244_v45, %v8217_v3  ;;  %v8280_v44 = vadd.f32 %v8279_v21, %v8259_v60 }
0x12e2   : > { %v8219_v31 = vpop.f32.mrf.mxu0  ;;  %11395 = vmatpush3.bf16.msra.mxu0 %v12128_v24 }
0x12e3   : > { %v8268_v6 = vadd.f32 %v8267_v43, %v8260_v63  ;;  %v8261_v15 = vmul.f32 %v8245_v12, %v8219_v31 }
0x12e5   : > { %v8269_v41 = vrot.slane %v8268_v6, 4  ;;  %v8281_v47 = vadd.f32 %v8280_v44, %v8261_v15 }
0x12e7   : > { %v8270_v37 = vadd.f32 %v8269_v41, %v8268_v6  ;;  %v8282_v11 = vrot.slane %v8281_v47, 4 }
0x12e9   : > { %v8271_v42 = vrot.slane %v8270_v37, 2  ;;  %v8283_v9 = vadd.f32 %v8282_v11, %v8281_v47 }
0x12eb   : > { %v8272_v48 = vadd.f32 %v8271_v42, %v8270_v37  ;;  %v8284_v13 = vrot.slane %v8283_v9, 2 }
0x12ed   : > { %v8273_v39 = vrot.slane %v8272_v48, 1  ;;  %v8285_v26 = vadd.f32 %v8284_v13, %v8283_v9 }
0x12ef   : > { %v8286_v25 = vrot.slane %v8285_v26, 1  ;;  %v8274_v52 = vadd.f32 %v8273_v39, %v8272_v48 }
0x12f1   : > { %v8287_v46 = vadd.f32 %v8286_v25, %v8285_v26  ;;  %v8320_v62 = vpack.c.bf16 %v8274_v52, %v8274_v52 }
0x12f3   : > { %v8321_v36 = vpack.c.bf16 %v8287_v46, %v8287_v46 }
0x12f5   : > { %8451 = vmatprep.mubr.bf16.mxu1 %v8321_v36 }
0x12f6   : > { %8452 = vmatmul.mubr.bf16.vlgmr.msra.gmra.mxu1 %v8320_v62 }
0x12f7   : > { %11381 = vmatpush3.bf16.msra.mxu1 %v12123_v49  ;;  %11384 = vmatprep.mubr.msk.bf16.mxu1 %vm12491_vm4, %v12490_v40 }
0x12f8   : > { %11382 = vmatprep.subr.bf16.mxu1 %v12490_v40 }
0x12fb   : > { %11383 = vmatpush3.bf16.msra.mxu1 %v12124_v38 }
0x13b6   : > { %v10970_v19 = vpop.f32.mrf.mxu1 }
0x13b8   : > { %v10971_v59 = vpop.f32.mrf.mxu1 }
0x13b9   : > { %v10972_v30 = vadd.f32 %v10971_v59, %v10970_v19 }
0x13ba   : > { %v10973_v0 = vpop.f32.mrf.mxu1 }
0x13bb   : > { %v8454_v50 = vadd.f32 %v10972_v30, %v8322_v29 }
0x13bc   : > { %v10974_v4 = vpop.f32.mrf.mxu1 }
0x13bd   : > { %v8459_v23 = vmax.f32 %v8454_v50, 0.0 }
0x13bf   : > { %v8464_v32 = vpack.c.bf16 %v8459_v23, %v8459_v23 }
0x13c1   : > { %11385 = vmatmul.mubr.msk.bf16.vlgmr.msra.gmra.mxu1 %vm8478_vm5, %v8464_v32 }
0x1481   : > { %v8516_v1 = vpop.f32.mrf.mxu1 }
0x1482   : > { %v8517_v16 = vadd.f32 %v8516_v1, %v8465_v57 }
0x1483   : > { %v11386_v14 = vpop.f32.mrf.mxu1 }
0x1484   : > { %v8522_v61 = vmax.f32 %v8517_v16, 0.0 }
0x1485   : > { %v8519_v33 = vpop.f32.mrf.mxu1 }
0x1486   : > { %v8531_v55 = vpack.c.bf16 %v8522_v61, %v8522_v61 }
0x1487   : > { %v11387_v27 = vpop.f32.mrf.mxu1 }
0x1488   : > { %11397 = vmatmul.mubr.msk.bf16.vlgmr.msra.gmra.mxu0 %vm8557_vm6, %v8531_v55 }
0x1548   : > { %v8595_v53 = vpop.f32.mrf.mxu0 }
0x1549   : > { %v8596_v54 = vadd.f32 %v8595_v53, %v8532_v20 }
0x154a   : > { %v11398_v17 = vpop.f32.mrf.mxu0 }
0x154b   : > { %8602 = vst.msk [vmem:[%s620_s20] sm:$0x1] %vm8601_vm7, %v8596_v54 }
0x154c   : > { %v8598_v18 = vpop.f32.mrf.mxu0 }
0x154d   : > { %12402 = shalt.err (!%p12399_p3)
}
0x154e   : > { %s12403_s16 = scalar_lea.hbm %s14342_s25, 16  ;;  %s12407_s6 = scalar_lea.hbm %s14398_s15, 32 }
0x154f   : > { %p12404_p4 = scmp.ne.s32.totalorder %s14342_s25, %s12403_s16  ;;  %p12408_p8 = scmp.lt.s32.totalorder %s14342_s25, %s14398_s15 }
0x1550   : > { %p12409_p11 = scmp.lt.s32.totalorder %s12407_s6, %s12403_s16 }
0x1551   : > { %p12405_p9 = pnand %p12404_p4, %p14541_p10 }
0x1552   : > { %p12410_p5 = por %p12409_p11, %p12408_p8 }
0x1553   : > { %p12406_p7 = pneg %p12405_p9 }
0x1555   : > { %p12411_p6 = pnand %p12410_p5, %p12406_p7 }
0x1557   : > { %12414 = shalt.err (!%p12411_p6)
}
0x1558   : > { %11458 = dma.vmem_to_hbm [thread:$0]  (%p14541_p10), %s14344_s24, 16, %s14342_s25, %s8604_s27   ;;  %v11399_v2 = vpop.f32.mrf.mxu0 }
0x1559 PF: > { %s14542_s30 = sld [smem:[#allocation29_spill]] }
0x155a   : > { %s14543_s26 = sld [smem:[#allocation27_spill]] }
0x155b   : > { %s14544_s22 = sld [smem:[#allocation32_spill]] }
0x155f   : > { %p11515_p13 = scmp.ge.s32.totalorder %s14542_s30, 2 }
0x1560   : > { %s8628_s29 = sand.u32 1, %s14543_s26  }
0x1561   : > { %p14545_p0 = scmp.ne.s32.totalorder %s14544_s22, 0  ;;  %s8629_s18 = scalar_lea.sflag [#allocation4], %s8628_s29 }
0x1563   : > { %p11492_p1 = pnand %p11515_p13, %p14545_p0 }
0x1565   : > { %p11493_p2 = pneg %p11492_p1 }
0x1567   : > { %12456 = dma.done.wait (%p11493_p2), %s8629_s18, 16  }
0x1568   : > { %12458 = vsyncadd (%p11493_p2), %s8629_s18, 4294967280  ;;  %s14546_s21 = sld [smem:[#allocation30_spill]]  ;;  %s14549_s18 = smov %s12465_s19 }
0x1569   : > { %s14547_s16 = sld [smem:[#allocation28_spill]] }
0x156a   : > { %s14548_s20 = sld [smem:[#allocation31_spill]] }
0x156e   : > { %p31_p12 = scmp.ge.s32.totalorder %s14546_s21, 4  }
0x156f   : > { %s14550_s19 = smov %s14547_s16 }
0x1570   :  { %33 = sbr.rel (!%p31_p12) target bundleno = 12 (0xc), region = 188 }
0x1575   :  { %8633 = vsyncpa [#allocation3], 1 }
0x1576   :  { %8635 = vsyncpa [#allocation3 + $0x1], 1 }
0x1577   :  { %8636 = vsyncpa [#allocation6], 1 }
0x1578   :  { %8637 = vsyncpa [#allocation9], 1 }
0x1579   :  { %8638 = vsyncpa [#allocation12], 1 }
0x157a   :  { %8639 = vsyncpa [#allocation15], 1 }
0x157b   :  { %8640 = vsyncpa [#allocation18], 1 }
0x157c   :  { %8641 = vsyncpa [#allocation4], 1 }
0x157d   :  { %8643 = vsyncpa [#allocation4 + $0x1], 1 }

</bundles_post_ra>
